<compile_context>
chip_gen: v6e
topology: v6e:2x2x1
jax: 0.10.0
libtpu: 0.0.40
codegen_flags: <defaults>
</compile_context>

<pallas_src>
import jax
import jax.numpy as jnp
from jax.experimental import pallas as pl
from jax.experimental.pallas import tpu as pltpu

NT = 128  # number of entries in the synthesized CDF lookup table


# ---------------------------------------------------------------------------
# In-kernel CDF activation math (single pass)
# ---------------------------------------------------------------------------
def _cdf_fast(x, table_lo, pmf_hi, pmf0):
    """cdf[clamp(searchsorted(table, round(x*100)/100, right=True), 0, NT-1)]
    computed as pmf[0] + sum_k pmf[k+1] * (table[k] <= r)   (table sorted)."""
    r = jnp.round(x * 100.0) / 100.0
    mask = r[..., None] >= table_lo                       # (..., NT-1), lane-dense
    return pmf0 + jnp.sum(jnp.where(mask, pmf_hi, 0.0), axis=-1)


# ---------------------------------------------------------------------------
# Pallas kernels
# ---------------------------------------------------------------------------
def conv_pool_act_kernel(p_ref, w_ref, b_ref, tlo_ref, phi_ref, scal_ref, o_ref):
    # p_ref: (4*M, K) im2col patches; the 4 positions of each 2x2 pool window
    # live in 4 contiguous row blocks of M rows.  w_ref: (K, C).  o_ref: (M, C).
    y = jnp.dot(p_ref[...], w_ref[...],
                preferred_element_type=jnp.float32) + b_ref[...]
    m = o_ref.shape[0]
    y0, y1, y2, y3 = y[0:m], y[m:2 * m], y[2 * m:3 * m], y[3 * m:4 * m]
    pmax = jnp.maximum(jnp.maximum(y0, y1), jnp.maximum(y2, y3))
    pmin = jnp.minimum(jnp.minimum(y0, y1), jnp.minimum(y2, y3))
    scale = scal_ref[0]
    pmf0 = scal_ref[1]
    # act = scale * (monotone non-decreasing map)  =>  pool-before-act is exact:
    # max over window if scale >= 0, min over window if scale < 0.
    pooled = jnp.where(scale >= 0.0, pmax, pmin)
    o_ref[...] = scale * _cdf_fast(pooled, tlo_ref[...], phi_ref[...], pmf0)


def fc_head_kernel(a_ref, w1_ref, b1_ref, w2_ref, b2_ref,
                   tlo_ref, phi_ref, scal_ref, o_ref):
    h = jnp.dot(a_ref[...], w1_ref[...],
                preferred_element_type=jnp.float32) + b1_ref[...]
    scale = scal_ref[0]
    pmf0 = scal_ref[1]
    hact = scale * _cdf_fast(h, tlo_ref[...], phi_ref[...], pmf0)
    o_ref[...] = jnp.dot(hact, w2_ref[...],
                         preferred_element_type=jnp.float32) + b2_ref[...]


# ---------------------------------------------------------------------------
# pallas_call wrappers
# ---------------------------------------------------------------------------
def _vmem_spec(shape):
    return pl.BlockSpec(shape, lambda i: (0,) * len(shape))


_SMEM_SPEC = pl.BlockSpec(memory_space=pltpu.MemorySpace.SMEM)


def conv_pool_act(patches, w, b, table_lo, pmf_hi, scalars):
    m4, k = patches.shape
    _, c = w.shape
    m = m4 // 4
    return pl.pallas_call(
        conv_pool_act_kernel,
        out_shape=jax.ShapeDtypeStruct((m, c), jnp.float32),
        grid=(1,),
        in_specs=[_vmem_spec((m4, k)),
                  _vmem_spec((k, c)),
                  _vmem_spec((1, c)),
                  _vmem_spec((1, NT - 1)),
                  _vmem_spec((1, NT - 1)),
                  _SMEM_SPEC],
        out_specs=_vmem_spec((m, c)),
    )(patches, w, b.reshape(1, c), table_lo, pmf_hi, scalars)


def fc_head(a, w1, b1, w2, b2, table_lo, pmf_hi, scalars):
    bsz, f = a.shape
    _, h = w1.shape
    _, ncls = w2.shape
    return pl.pallas_call(
        fc_head_kernel,
        out_shape=jax.ShapeDtypeStruct((bsz, ncls), jnp.float32),
        grid=(1,),
        in_specs=[_vmem_spec((bsz, f)),
                  _vmem_spec((f, h)),
                  _vmem_spec((1, h)),
                  _vmem_spec((h, ncls)),
                  _vmem_spec((1, ncls)),
                  _vmem_spec((1, NT - 1)),
                  _vmem_spec((1, NT - 1)),
                  _SMEM_SPEC],
        out_specs=_vmem_spec((bsz, ncls)),
    )(a, w1, b1.reshape(1, h), w2, b2.reshape(1, ncls), table_lo, pmf_hi, scalars)


# ---------------------------------------------------------------------------
# Host/XLA glue (tiny layout plumbing only)
# ---------------------------------------------------------------------------
def _pool_ordered_patches(x_nhwc):
    """3x3 / pad=1 im2col patches whose rows are ordered (pool_a, pool_b, n, ho, wo):
    the 4 positions of every 2x2 pool window form 4 contiguous row blocks."""
    n, h, w, c = x_nhwc.shape
    xp = jnp.pad(x_nhwc, ((0, 0), (1, 1), (1, 1), (0, 0)))
    cols = [xp[:, dh:dh + h, dw:dw + w, :] for dh in range(3) for dw in range(3)]
    patches = jnp.stack(cols, axis=3).reshape(n, h, w, 9 * c)   # (kh,kw,cin) order
    ho, wo = h // 2, w // 2
    patches = patches.reshape(n, ho, 2, wo, 2, 9 * c)
    patches = patches.transpose(2, 4, 0, 1, 3, 5)               # (a, b, n, ho, wo, K)
    return patches.reshape(4 * n * ho * wo, 9 * c)


def prepare_params(params, table, pmf, scale):
    """One-time host-side weight/table prep (layout only, no math changes)."""
    c_in = params["conv1_w"].shape[1]
    c1 = params["conv1_w"].shape[0]
    c2 = params["conv2_w"].shape[0]
    w1 = jnp.transpose(params["conv1_w"], (2, 3, 1, 0)).reshape(9 * c_in, c1)
    w2 = jnp.transpose(params["conv2_w"], (2, 3, 1, 0)).reshape(9 * c1, c2)
    # fc1 consumes the conv trunk's (ho, wo, c) flatten order; fold PyTorch's
    # NCHW (c, ho, wo) flatten order into the weight matrix instead.
    f_in = params["fc1_w"].shape[1]
    side = int(round((f_in // c2) ** 0.5))
    fc1_w = (params["fc1_w"].reshape(-1, c2, side, side)
             .transpose(2, 3, 1, 0).reshape(f_in, -1))
    fc2_w = params["fc2_w"].T
    scalars = jnp.stack([scale.astype(jnp.float32),
                         pmf[0].astype(jnp.float32)])
    return {
        "w1": w1, "b1": params["conv1_b"],
        "w2": w2, "b2": params["conv2_b"],
        "fc1_w": fc1_w, "fc1_b": params["fc1_b"],
        "fc2_w": fc2_w, "fc2_b": params["fc2_b"],
        "table_lo": table[:-1].reshape(1, NT - 1).astype(jnp.float32),
        "pmf_hi": pmf[1:].reshape(1, NT - 1).astype(jnp.float32),
        "scalars": scalars,
    }


def modified_cnn_forward(x_nchw, prepped):
    n, _, hh, ww = x_nchw.shape
    tlo, phi, scal = prepped["table_lo"], prepped["pmf_hi"], prepped["scalars"]
    x = jnp.transpose(x_nchw, (0, 2, 3, 1))                         # NCHW -> NHWC

    # stage 1: conv1 + 2x2 pool + CDF act (one fused kernel)
    p1 = _pool_ordered_patches(x)
    a1 = conv_pool_act(p1, prepped["w1"], prepped["b1"], tlo, phi, scal)
    a1 = a1.reshape(n, hh // 2, ww // 2, prepped["w1"].shape[1])    # (N, 8, 8, 16)

    # stage 2: conv2 + 2x2 pool + CDF act (one fused kernel)
    p2 = _pool_ordered_patches(a1)
    a2 = conv_pool_act(p2, prepped["w2"], prepped["b2"], tlo, phi, scal)
    # rows are (n, ho, wo); flatten per sample in (ho, wo, c) order — fc1
    # weights were pre-permuted to consume this order (no NCHW transpose).
    a2 = a2.reshape(n, -1)                                          # (N, 512)

    # stage 3: fc1 + CDF act + fc2 (one fused kernel)
    return fc_head(a2, prepped["fc1_w"], prepped["fc1_b"],
                   prepped["fc2_w"], prepped["fc2_b"], tlo, phi, scal)


if __name__ == "__main__":
    B, C_IN, H, W = 2, 3, 16, 16
    NUM_CLASSES = 10
    FC1_IN = 32 * (H // 4) * (W // 4)   # = 512 for 16x16 input

    keys = jax.random.split(jax.random.PRNGKey(0), 9)
    params = {
        # PyTorch parameter layouts: Conv2d (Cout, Cin, kH, kW), Linear (out, in)
        "conv1_w": jax.random.normal(keys[0], (16, C_IN, 3, 3), jnp.float32) * 0.2,
        "conv1_b": jax.random.normal(keys[1], (16,), jnp.float32) * 0.05,
        "conv2_w": jax.random.normal(keys[2], (32, 16, 3, 3), jnp.float32) * 0.1,
        "conv2_b": jax.random.normal(keys[3], (32,), jnp.float32) * 0.05,
        "fc1_w": jax.random.normal(keys[4], (120, FC1_IN), jnp.float32) * 0.05,
        "fc1_b": jax.random.normal(keys[5], (120,), jnp.float32) * 0.05,
        "fc2_w": jax.random.normal(keys[6], (NUM_CLASSES, 120), jnp.float32) * 0.1,
        "fc2_b": jax.random.normal(keys[7], (NUM_CLASSES,), jnp.float32) * 0.05,
    }

    # Synthesized CDF lookup table (stands in for the training-time histogram;
    # bin values rounded to 2 decimals like the PyTorch code does).  Sorted,
    # pmf >= 0 -> the CDF map is monotone non-decreasing (pool-before-act exact).
    grid_vals = jnp.round(jnp.linspace(-2.0, 2.0, NT) * 100.0) / 100.0
    freqs = jnp.exp(-0.5 * grid_vals ** 2) + 0.05
    pmf = (freqs / jnp.sum(freqs)).astype(jnp.float32)      # cdf = cumsum(pmf)
    table = grid_vals.astype(jnp.float32)
    scale = jnp.array(1.0, jnp.float32)                     # nn.Parameter init = 1.0

    x = jax.random.normal(keys[8], (B, C_IN, H, W), jnp.float32)

    prepped = prepare_params(params, table, pmf, scale)
    fwd = jax.jit(modified_cnn_forward)
    out = jax.block_until_ready(fwd(x, prepped))

    assert out.shape == (B, NUM_CLASSES)
    assert bool(jnp.all(jnp.isfinite(out)))
    print("KERNEL_OK")
</pallas_src>

<mosaic_0001>
module attributes {stable_mosaic.version = 11 : i64} {
  func.func @conv_pool_act_kernel(%arg0: i32, %arg1: memref<512x27xf32, #tpu.memory_space<vmem>>, %arg2: memref<27x16xf32, #tpu.memory_space<vmem>>, %arg3: memref<1x16xf32, #tpu.memory_space<vmem>>, %arg4: memref<1x127xf32, #tpu.memory_space<vmem>>, %arg5: memref<1x127xf32, #tpu.memory_space<vmem>>, %arg6: memref<2xf32, #tpu.memory_space<smem>>, %arg7: memref<128x16xf32, #tpu.memory_space<vmem>>) attributes {dimension_semantics = [#tpu.dimension_semantics<arbitrary>], iteration_bounds = array<i64: 1>, scalar_prefetch = 0 : i64, scratch_operands = 0 : i64, tpu.core_type = #tpu.core_type<tc>, window_params = [{pipeline_mode = #tpu.pipeline_mode<synchronous>, transform_indices = @transform_0, window_bounds = array<i64: 512, 27>}, {pipeline_mode = #tpu.pipeline_mode<synchronous>, transform_indices = @transform_1, window_bounds = array<i64: 27, 16>}, {pipeline_mode = #tpu.pipeline_mode<synchronous>, transform_indices = @transform_2, window_bounds = array<i64: 1, 16>}, {pipeline_mode = #tpu.pipeline_mode<synchronous>, transform_indices = @transform_3, window_bounds = array<i64: 1, 127>}, {pipeline_mode = #tpu.pipeline_mode<synchronous>, transform_indices = @transform_4, window_bounds = array<i64: 1, 127>}, {transform_indices = @transform_5, window_bounds = array<i64: 2>}, {pipeline_mode = #tpu.pipeline_mode<synchronous>, transform_indices = @transform_6, window_bounds = array<i64: 128, 16>}]} {
    %c0 = arith.constant 0 : index
    %c0_0 = arith.constant 0 : index
    %0 = vector.load %arg1[%c0, %c0_0] : memref<512x27xf32, #tpu.memory_space<vmem>>, vector<512x27xf32>
    %c0_1 = arith.constant 0 : index
    %c0_2 = arith.constant 0 : index
    %1 = vector.load %arg2[%c0_1, %c0_2] : memref<27x16xf32, #tpu.memory_space<vmem>>, vector<27x16xf32>
    %cst = arith.constant dense<0.000000e+00> : vector<512x16xf32>
    %2 = tpu.matmul %0, %1, %cst {dimension_numbers = #tpu.dot_dimension_numbers<[1], [0], [0], [1], [0, 0, 1, 1], [], []>} : vector<512x27xf32>, vector<27x16xf32>, vector<512x16xf32> -> vector<512x16xf32>
    %c0_3 = arith.constant 0 : index
    %c0_4 = arith.constant 0 : index
    %3 = vector.load %arg3[%c0_3, %c0_4] : memref<1x16xf32, #tpu.memory_space<vmem>>, vector<1x16xf32>
    %4 = vector.broadcast %3 : vector<1x16xf32> to vector<512x16xf32>
    %5 = arith.addf %2, %4 : vector<512x16xf32>
    %6 = vector.extract_strided_slice %5 {offsets = [0, 0], sizes = [128, 16], strides = [1, 1]} : vector<512x16xf32> to vector<128x16xf32>
    %7 = vector.extract_strided_slice %5 {offsets = [128, 0], sizes = [128, 16], strides = [1, 1]} : vector<512x16xf32> to vector<128x16xf32>
    %8 = vector.extract_strided_slice %5 {offsets = [256, 0], sizes = [128, 16], strides = [1, 1]} : vector<512x16xf32> to vector<128x16xf32>
    %9 = vector.extract_strided_slice %5 {offsets = [384, 0], sizes = [128, 16], strides = [1, 1]} : vector<512x16xf32> to vector<128x16xf32>
    %10 = arith.maximumf %6, %7 : vector<128x16xf32>
    %11 = arith.maximumf %8, %9 : vector<128x16xf32>
    %12 = arith.maximumf %10, %11 : vector<128x16xf32>
    %13 = arith.minimumf %6, %7 : vector<128x16xf32>
    %14 = arith.minimumf %8, %9 : vector<128x16xf32>
    %15 = arith.minimumf %13, %14 : vector<128x16xf32>
    %c0_5 = arith.constant 0 : index
    %16 = memref.load %arg6[%c0_5] : memref<2xf32, #tpu.memory_space<smem>>
    %c1 = arith.constant 1 : index
    %17 = memref.load %arg6[%c1] : memref<2xf32, #tpu.memory_space<smem>>
    %cst_6 = arith.constant 0.000000e+00 : f32
    %18 = arith.cmpf oge, %16, %cst_6 : f32
    %19 = arith.select %18, %12, %15 : vector<128x16xf32>
    %c0_7 = arith.constant 0 : index
    %c0_8 = arith.constant 0 : index
    %20 = vector.load %arg4[%c0_7, %c0_8] : memref<1x127xf32, #tpu.memory_space<vmem>>, vector<1x127xf32>
    %c0_9 = arith.constant 0 : index
    %c0_10 = arith.constant 0 : index
    %21 = vector.load %arg5[%c0_9, %c0_10] : memref<1x127xf32, #tpu.memory_space<vmem>>, vector<1x127xf32>
    %cst_11 = arith.constant 1.000000e+02 : f32
    %22 = vector.broadcast %cst_11 : f32 to vector<128x16xf32>
    %23 = arith.mulf %19, %22 : vector<128x16xf32>
    %24 = math.roundeven %23 : vector<128x16xf32>
    %cst_12 = arith.constant 1.000000e+02 : f32
    %25 = vector.broadcast %cst_12 : f32 to vector<128x16xf32>
    %26 = arith.divf %24, %25 : vector<128x16xf32>
    %27 = vector.shape_cast %26 : vector<128x16xf32> to vector<128x16x1xf32>
    %28 = vector.shape_cast %20 : vector<1x127xf32> to vector<1x1x127xf32>
    %29 = vector.broadcast %27 : vector<128x16x1xf32> to vector<128x16x127xf32>
    %30 = vector.broadcast %28 : vector<1x1x127xf32> to vector<128x16x127xf32>
    %31 = arith.cmpf oge, %29, %30 : vector<128x16x127xf32>
    %cst_13 = arith.constant 0.000000e+00 : f32
    %32 = vector.shape_cast %21 : vector<1x127xf32> to vector<1x1x127xf32>
    %33 = vector.broadcast %32 : vector<1x1x127xf32> to vector<128x16x127xf32>
    %34 = vector.broadcast %cst_13 : f32 to vector<128x16x127xf32>
    %35 = arith.select %31, %33, %34 : vector<128x16x127xi1>, vector<128x16x127xf32>
    %cst_14 = arith.constant dense<0.000000e+00> : vector<128x16xf32>
    %36 = vector.multi_reduction <add>, %35, %cst_14 [2] : vector<128x16x127xf32> to vector<128x16xf32>
    %37 = vector.broadcast %17 : f32 to vector<128x16xf32>
    %38 = arith.addf %37, %36 : vector<128x16xf32>
    %39 = vector.broadcast %16 : f32 to vector<128x16xf32>
    %40 = arith.mulf %39, %38 : vector<128x16xf32>
    %c0_15 = arith.constant 0 : index
    %c0_16 = arith.constant 0 : index
    %41 = vector.load %arg7[%c0_15, %c0_16] : memref<128x16xf32, #tpu.memory_space<vmem>>, vector<128x16xf32>
    tpu.vector_store %arg7[%c0_15, %c0_16], %40 {strides = array<i32>} : memref<128x16xf32, #tpu.memory_space<vmem>>, vector<128x16xf32>,
    return
  }
  func.func @transform_0(%arg0: i32) -> (i32, i32) {
    %c0_i32 = arith.constant 0 : i32
    %c0_i32_0 = arith.constant 0 : i32
    %c0_i32_1 = arith.constant 0 : i32
    return %c0_i32, %c0_i32_0 : i32, i32
  }
  func.func @transform_1(%arg0: i32) -> (i32, i32) {
    %c0_i32 = arith.constant 0 : i32
    %c0_i32_0 = arith.constant 0 : i32
    %c0_i32_1 = arith.constant 0 : i32
    return %c0_i32, %c0_i32_0 : i32, i32
  }
  func.func @transform_2(%arg0: i32) -> (i32, i32) {
    %c0_i32 = arith.constant 0 : i32
    %c0_i32_0 = arith.constant 0 : i32
    %c0_i32_1 = arith.constant 0 : i32
    return %c0_i32, %c0_i32_0 : i32, i32
  }
  func.func @transform_3(%arg0: i32) -> (i32, i32) {
    %c0_i32 = arith.constant 0 : i32
    %c0_i32_0 = arith.constant 0 : i32
    %c0_i32_1 = arith.constant 0 : i32
    return %c0_i32, %c0_i32_0 : i32, i32
  }
  func.func @transform_4(%arg0: i32) -> (i32, i32) {
    %c0_i32 = arith.constant 0 : i32
    %c0_i32_0 = arith.constant 0 : i32
    %c0_i32_1 = arith.constant 0 : i32
    return %c0_i32, %c0_i32_0 : i32, i32
  }
  func.func @transform_5(%arg0: i32) -> i32 {
    %c0_i32 = arith.constant 0 : i32
    %c0_i32_0 = arith.constant 0 : i32
    return %c0_i32 : i32
  }
  func.func @transform_6(%arg0: i32) -> (i32, i32) {
    %c0_i32 = arith.constant 0 : i32
    %c0_i32_0 = arith.constant 0 : i32
    %c0_i32_1 = arith.constant 0 : i32
    return %c0_i32, %c0_i32_0 : i32, i32
  }
}

module attributes {stable_mosaic.version = 11 : i64} {
  func.func @conv_pool_act_kernel(%arg0: i32, %arg1: memref<128x144xf32, #tpu.memory_space<vmem>>, %arg2: memref<144x32xf32, #tpu.memory_space<vmem>>, %arg3: memref<1x32xf32, #tpu.memory_space<vmem>>, %arg4: memref<1x127xf32, #tpu.memory_space<vmem>>, %arg5: memref<1x127xf32, #tpu.memory_space<vmem>>, %arg6: memref<2xf32, #tpu.memory_space<smem>>, %arg7: memref<32x32xf32, #tpu.memory_space<vmem>>) attributes {dimension_semantics = [#tpu.dimension_semantics<arbitrary>], iteration_bounds = array<i64: 1>, scalar_prefetch = 0 : i64, scratch_operands = 0 : i64, tpu.core_type = #tpu.core_type<tc>, window_params = [{pipeline_mode = #tpu.pipeline_mode<synchronous>, transform_indices = @transform_0, window_bounds = array<i64: 128, 144>}, {pipeline_mode = #tpu.pipeline_mode<synchronous>, transform_indices = @transform_1, window_bounds = array<i64: 144, 32>}, {pipeline_mode = #tpu.pipeline_mode<synchronous>, transform_indices = @transform_2, window_bounds = array<i64: 1, 32>}, {pipeline_mode = #tpu.pipeline_mode<synchronous>, transform_indices = @transform_3, window_bounds = array<i64: 1, 127>}, {pipeline_mode = #tpu.pipeline_mode<synchronous>, transform_indices = @transform_4, window_bounds = array<i64: 1, 127>}, {transform_indices = @transform_5, window_bounds = array<i64: 2>}, {pipeline_mode = #tpu.pipeline_mode<synchronous>, transform_indices = @transform_6, window_bounds = array<i64: 32, 32>}]} {
    %c0 = arith.constant 0 : index
    %c0_0 = arith.constant 0 : index
    %0 = vector.load %arg1[%c0, %c0_0] : memref<128x144xf32, #tpu.memory_space<vmem>>, vector<128x144xf32>
    %c0_1 = arith.constant 0 : index
    %c0_2 = arith.constant 0 : index
    %1 = vector.load %arg2[%c0_1, %c0_2] : memref<144x32xf32, #tpu.memory_space<vmem>>, vector<144x32xf32>
    %cst = arith.constant dense<0.000000e+00> : vector<128x32xf32>
    %2 = tpu.matmul %0, %1, %cst {dimension_numbers = #tpu.dot_dimension_numbers<[1], [0], [0], [1], [0, 0, 1, 1], [], []>} : vector<128x144xf32>, vector<144x32xf32>, vector<128x32xf32> -> vector<128x32xf32>
    %c0_3 = arith.constant 0 : index
    %c0_4 = arith.constant 0 : index
    %3 = vector.load %arg3[%c0_3, %c0_4] : memref<1x32xf32, #tpu.memory_space<vmem>>, vector<1x32xf32>
    %4 = vector.broadcast %3 : vector<1x32xf32> to vector<128x32xf32>
    %5 = arith.addf %2, %4 : vector<128x32xf32>
    %6 = vector.extract_strided_slice %5 {offsets = [0, 0], sizes = [32, 32], strides = [1, 1]} : vector<128x32xf32> to vector<32x32xf32>
    %7 = vector.extract_strided_slice %5 {offsets = [32, 0], sizes = [32, 32], strides = [1, 1]} : vector<128x32xf32> to vector<32x32xf32>
    %8 = vector.extract_strided_slice %5 {offsets = [64, 0], sizes = [32, 32], strides = [1, 1]} : vector<128x32xf32> to vector<32x32xf32>
    %9 = vector.extract_strided_slice %5 {offsets = [96, 0], sizes = [32, 32], strides = [1, 1]} : vector<128x32xf32> to vector<32x32xf32>
    %10 = arith.maximumf %6, %7 : vector<32x32xf32>
    %11 = arith.maximumf %8, %9 : vector<32x32xf32>
    %12 = arith.maximumf %10, %11 : vector<32x32xf32>
    %13 = arith.minimumf %6, %7 : vector<32x32xf32>
    %14 = arith.minimumf %8, %9 : vector<32x32xf32>
    %15 = arith.minimumf %13, %14 : vector<32x32xf32>
    %c0_5 = arith.constant 0 : index
    %16 = memref.load %arg6[%c0_5] : memref<2xf32, #tpu.memory_space<smem>>
    %c1 = arith.constant 1 : index
    %17 = memref.load %arg6[%c1] : memref<2xf32, #tpu.memory_space<smem>>
    %cst_6 = arith.constant 0.000000e+00 : f32
    %18 = arith.cmpf oge, %16, %cst_6 : f32
    %19 = arith.select %18, %12, %15 : vector<32x32xf32>
    %c0_7 = arith.constant 0 : index
    %c0_8 = arith.constant 0 : index
    %20 = vector.load %arg4[%c0_7, %c0_8] : memref<1x127xf32, #tpu.memory_space<vmem>>, vector<1x127xf32>
    %c0_9 = arith.constant 0 : index
    %c0_10 = arith.constant 0 : index
    %21 = vector.load %arg5[%c0_9, %c0_10] : memref<1x127xf32, #tpu.memory_space<vmem>>, vector<1x127xf32>
    %cst_11 = arith.constant 1.000000e+02 : f32
    %22 = vector.broadcast %cst_11 : f32 to vector<32x32xf32>
    %23 = arith.mulf %19, %22 : vector<32x32xf32>
    %24 = math.roundeven %23 : vector<32x32xf32>
    %cst_12 = arith.constant 1.000000e+02 : f32
    %25 = vector.broadcast %cst_12 : f32 to vector<32x32xf32>
    %26 = arith.divf %24, %25 : vector<32x32xf32>
    %27 = vector.shape_cast %26 : vector<32x32xf32> to vector<32x32x1xf32>
    %28 = vector.shape_cast %20 : vector<1x127xf32> to vector<1x1x127xf32>
    %29 = vector.broadcast %27 : vector<32x32x1xf32> to vector<32x32x127xf32>
    %30 = vector.broadcast %28 : vector<1x1x127xf32> to vector<32x32x127xf32>
    %31 = arith.cmpf oge, %29, %30 : vector<32x32x127xf32>
    %cst_13 = arith.constant 0.000000e+00 : f32
    %32 = vector.shape_cast %21 : vector<1x127xf32> to vector<1x1x127xf32>
    %33 = vector.broadcast %32 : vector<1x1x127xf32> to vector<32x32x127xf32>
    %34 = vector.broadcast %cst_13 : f32 to vector<32x32x127xf32>
    %35 = arith.select %31, %33, %34 : vector<32x32x127xi1>, vector<32x32x127xf32>
    %cst_14 = arith.constant dense<0.000000e+00> : vector<32x32xf32>
    %36 = vector.multi_reduction <add>, %35, %cst_14 [2] : vector<32x32x127xf32> to vector<32x32xf32>
    %37 = vector.broadcast %17 : f32 to vector<32x32xf32>
    %38 = arith.addf %37, %36 : vector<32x32xf32>
    %39 = vector.broadcast %16 : f32 to vector<32x32xf32>
    %40 = arith.mulf %39, %38 : vector<32x32xf32>
    %c0_15 = arith.constant 0 : index
    %c0_16 = arith.constant 0 : index
    %41 = vector.load %arg7[%c0_15, %c0_16] : memref<32x32xf32, #tpu.memory_space<vmem>>, vector<32x32xf32>
    tpu.vector_store %arg7[%c0_15, %c0_16], %40 {strides = array<i32>} : memref<32x32xf32, #tpu.memory_space<vmem>>, vector<32x32xf32>,
    return
  }
  func.func @transform_0(%arg0: i32) -> (i32, i32) {
    %c0_i32 = arith.constant 0 : i32
    %c0_i32_0 = arith.constant 0 : i32
    %c0_i32_1 = arith.constant 0 : i32
    return %c0_i32, %c0_i32_0 : i32, i32
  }
  func.func @transform_1(%arg0: i32) -> (i32, i32) {
    %c0_i32 = arith.constant 0 : i32
    %c0_i32_0 = arith.constant 0 : i32
    %c0_i32_1 = arith.constant 0 : i32
    return %c0_i32, %c0_i32_0 : i32, i32
  }
  func.func @transform_2(%arg0: i32) -> (i32, i32) {
    %c0_i32 = arith.constant 0 : i32
    %c0_i32_0 = arith.constant 0 : i32
    %c0_i32_1 = arith.constant 0 : i32
    return %c0_i32, %c0_i32_0 : i32, i32
  }
  func.func @transform_3(%arg0: i32) -> (i32, i32) {
    %c0_i32 = arith.constant 0 : i32
    %c0_i32_0 = arith.constant 0 : i32
    %c0_i32_1 = arith.constant 0 : i32
    return %c0_i32, %c0_i32_0 : i32, i32
  }
  func.func @transform_4(%arg0: i32) -> (i32, i32) {
    %c0_i32 = arith.constant 0 : i32
    %c0_i32_0 = arith.constant 0 : i32
    %c0_i32_1 = arith.constant 0 : i32
    return %c0_i32, %c0_i32_0 : i32, i32
  }
  func.func @transform_5(%arg0: i32) -> i32 {
    %c0_i32 = arith.constant 0 : i32
    %c0_i32_0 = arith.constant 0 : i32
    return %c0_i32 : i32
  }
  func.func @transform_6(%arg0: i32) -> (i32, i32) {
    %c0_i32 = arith.constant 0 : i32
    %c0_i32_0 = arith.constant 0 : i32
    %c0_i32_1 = arith.constant 0 : i32
    return %c0_i32, %c0_i32_0 : i32, i32
  }
}

module attributes {stable_mosaic.version = 11 : i64} {
  func.func @fc_head_kernel(%arg0: i32, %arg1: memref<2x512xf32, #tpu.memory_space<vmem>>, %arg2: memref<512x120xf32, #tpu.memory_space<vmem>>, %arg3: memref<1x120xf32, #tpu.memory_space<vmem>>, %arg4: memref<120x10xf32, #tpu.memory_space<vmem>>, %arg5: memref<1x10xf32, #tpu.memory_space<vmem>>, %arg6: memref<1x127xf32, #tpu.memory_space<vmem>>, %arg7: memref<1x127xf32, #tpu.memory_space<vmem>>, %arg8: memref<2xf32, #tpu.memory_space<smem>>, %arg9: memref<2x10xf32, #tpu.memory_space<vmem>>) attributes {dimension_semantics = [#tpu.dimension_semantics<arbitrary>], iteration_bounds = array<i64: 1>, scalar_prefetch = 0 : i64, scratch_operands = 0 : i64, tpu.core_type = #tpu.core_type<tc>, window_params = [{pipeline_mode = #tpu.pipeline_mode<synchronous>, transform_indices = @transform_0, window_bounds = array<i64: 2, 512>}, {pipeline_mode = #tpu.pipeline_mode<synchronous>, transform_indices = @transform_1, window_bounds = array<i64: 512, 120>}, {pipeline_mode = #tpu.pipeline_mode<synchronous>, transform_indices = @transform_2, window_bounds = array<i64: 1, 120>}, {pipeline_mode = #tpu.pipeline_mode<synchronous>, transform_indices = @transform_3, window_bounds = array<i64: 120, 10>}, {pipeline_mode = #tpu.pipeline_mode<synchronous>, transform_indices = @transform_4, window_bounds = array<i64: 1, 10>}, {pipeline_mode = #tpu.pipeline_mode<synchronous>, transform_indices = @transform_5, window_bounds = array<i64: 1, 127>}, {pipeline_mode = #tpu.pipeline_mode<synchronous>, transform_indices = @transform_6, window_bounds = array<i64: 1, 127>}, {transform_indices = @transform_7, window_bounds = array<i64: 2>}, {pipeline_mode = #tpu.pipeline_mode<synchronous>, transform_indices = @transform_8, window_bounds = array<i64: 2, 10>}]} {
    %c0 = arith.constant 0 : index
    %c0_0 = arith.constant 0 : index
    %0 = vector.load %arg1[%c0, %c0_0] : memref<2x512xf32, #tpu.memory_space<vmem>>, vector<2x512xf32>
    %c0_1 = arith.constant 0 : index
    %c0_2 = arith.constant 0 : index
    %1 = vector.load %arg2[%c0_1, %c0_2] : memref<512x120xf32, #tpu.memory_space<vmem>>, vector<512x120xf32>
    %cst = arith.constant dense<0.000000e+00> : vector<2x120xf32>
    %2 = tpu.matmul %0, %1, %cst {dimension_numbers = #tpu.dot_dimension_numbers<[1], [0], [0], [1], [0, 0, 1, 1], [], []>} : vector<2x512xf32>, vector<512x120xf32>, vector<2x120xf32> -> vector<2x120xf32>
    %c0_3 = arith.constant 0 : index
    %c0_4 = arith.constant 0 : index
    %3 = vector.load %arg3[%c0_3, %c0_4] : memref<1x120xf32, #tpu.memory_space<vmem>>, vector<1x120xf32>
    %4 = vector.broadcast %3 : vector<1x120xf32> to vector<2x120xf32>
    %5 = arith.addf %2, %4 : vector<2x120xf32>
    %c0_5 = arith.constant 0 : index
    %6 = memref.load %arg8[%c0_5] : memref<2xf32, #tpu.memory_space<smem>>
    %c1 = arith.constant 1 : index
    %7 = memref.load %arg8[%c1] : memref<2xf32, #tpu.memory_space<smem>>
    %c0_6 = arith.constant 0 : index
    %c0_7 = arith.constant 0 : index
    %8 = vector.load %arg6[%c0_6, %c0_7] : memref<1x127xf32, #tpu.memory_space<vmem>>, vector<1x127xf32>
    %c0_8 = arith.constant 0 : index
    %c0_9 = arith.constant 0 : index
    %9 = vector.load %arg7[%c0_8, %c0_9] : memref<1x127xf32, #tpu.memory_space<vmem>>, vector<1x127xf32>
    %cst_10 = arith.constant 1.000000e+02 : f32
    %10 = vector.broadcast %cst_10 : f32 to vector<2x120xf32>
    %11 = arith.mulf %5, %10 : vector<2x120xf32>
    %12 = math.roundeven %11 : vector<2x120xf32>
    %cst_11 = arith.constant 1.000000e+02 : f32
    %13 = vector.broadcast %cst_11 : f32 to vector<2x120xf32>
    %14 = arith.divf %12, %13 : vector<2x120xf32>
    %15 = vector.shape_cast %14 : vector<2x120xf32> to vector<2x120x1xf32>
    %16 = vector.shape_cast %8 : vector<1x127xf32> to vector<1x1x127xf32>
    %17 = vector.broadcast %15 : vector<2x120x1xf32> to vector<2x120x127xf32>
    %18 = vector.broadcast %16 : vector<1x1x127xf32> to vector<2x120x127xf32>
    %19 = arith.cmpf oge, %17, %18 : vector<2x120x127xf32>
    %cst_12 = arith.constant 0.000000e+00 : f32
    %20 = vector.shape_cast %9 : vector<1x127xf32> to vector<1x1x127xf32>
    %21 = vector.broadcast %20 : vector<1x1x127xf32> to vector<2x120x127xf32>
    %22 = vector.broadcast %cst_12 : f32 to vector<2x120x127xf32>
    %23 = arith.select %19, %21, %22 : vector<2x120x127xi1>, vector<2x120x127xf32>
    %cst_13 = arith.constant dense<0.000000e+00> : vector<2x120xf32>
    %24 = vector.multi_reduction <add>, %23, %cst_13 [2] : vector<2x120x127xf32> to vector<2x120xf32>
    %25 = vector.broadcast %7 : f32 to vector<2x120xf32>
    %26 = arith.addf %25, %24 : vector<2x120xf32>
    %27 = vector.broadcast %6 : f32 to vector<2x120xf32>
    %28 = arith.mulf %27, %26 : vector<2x120xf32>
    %c0_14 = arith.constant 0 : index
    %c0_15 = arith.constant 0 : index
    %29 = vector.load %arg4[%c0_14, %c0_15] : memref<120x10xf32, #tpu.memory_space<vmem>>, vector<120x10xf32>
    %cst_16 = arith.constant dense<0.000000e+00> : vector<2x10xf32>
    %30 = tpu.matmul %28, %29, %cst_16 {dimension_numbers = #tpu.dot_dimension_numbers<[1], [0], [0], [1], [0, 0, 1, 1], [], []>} : vector<2x120xf32>, vector<120x10xf32>, vector<2x10xf32> -> vector<2x10xf32>
    %c0_17 = arith.constant 0 : index
    %c0_18 = arith.constant 0 : index
    %31 = vector.load %arg5[%c0_17, %c0_18] : memref<1x10xf32, #tpu.memory_space<vmem>>, vector<1x10xf32>
    %32 = vector.broadcast %31 : vector<1x10xf32> to vector<2x10xf32>
    %33 = arith.addf %30, %32 : vector<2x10xf32>
    %c0_19 = arith.constant 0 : index
    %c0_20 = arith.constant 0 : index
    %34 = vector.load %arg9[%c0_19, %c0_20] : memref<2x10xf32, #tpu.memory_space<vmem>>, vector<2x10xf32>
    tpu.vector_store %arg9[%c0_19, %c0_20], %33 {strides = array<i32>} : memref<2x10xf32, #tpu.memory_space<vmem>>, vector<2x10xf32>,
    return
  }
  func.func @transform_0(%arg0: i32) -> (i32, i32) {
    %c0_i32 = arith.constant 0 : i32
    %c0_i32_0 = arith.constant 0 : i32
    %c0_i32_1 = arith.constant 0 : i32
    return %c0_i32, %c0_i32_0 : i32, i32
  }
  func.func @transform_1(%arg0: i32) -> (i32, i32) {
    %c0_i32 = arith.constant 0 : i32
    %c0_i32_0 = arith.constant 0 : i32
    %c0_i32_1 = arith.constant 0 : i32
    return %c0_i32, %c0_i32_0 : i32, i32
  }
  func.func @transform_2(%arg0: i32) -> (i32, i32) {
    %c0_i32 = arith.constant 0 : i32
    %c0_i32_0 = arith.constant 0 : i32
    %c0_i32_1 = arith.constant 0 : i32
    return %c0_i32, %c0_i32_0 : i32, i32
  }
  func.func @transform_3(%arg0: i32) -> (i32, i32) {
    %c0_i32 = arith.constant 0 : i32
    %c0_i32_0 = arith.constant 0 : i32
    %c0_i32_1 = arith.constant 0 : i32
    return %c0_i32, %c0_i32_0 : i32, i32
  }
  func.func @transform_4(%arg0: i32) -> (i32, i32) {
    %c0_i32 = arith.constant 0 : i32
    %c0_i32_0 = arith.constant 0 : i32
    %c0_i32_1 = arith.constant 0 : i32
    return %c0_i32, %c0_i32_0 : i32, i32
  }
  func.func @transform_5(%arg0: i32) -> (i32, i32) {
    %c0_i32 = arith.constant 0 : i32
    %c0_i32_0 = arith.constant 0 : i32
    %c0_i32_1 = arith.constant 0 : i32
    return %c0_i32, %c0_i32_0 : i32, i32
  }
  func.func @transform_6(%arg0: i32) -> (i32, i32) {
    %c0_i32 = arith.constant 0 : i32
    %c0_i32_0 = arith.constant 0 : i32
    %c0_i32_1 = arith.constant 0 : i32
    return %c0_i32, %c0_i32_0 : i32, i32
  }
  func.func @transform_7(%arg0: i32) -> i32 {
    %c0_i32 = arith.constant 0 : i32
    %c0_i32_0 = arith.constant 0 : i32
    return %c0_i32 : i32
  }
  func.func @transform_8(%arg0: i32) -> (i32, i32) {
    %c0_i32 = arith.constant 0 : i32
    %c0_i32_0 = arith.constant 0 : i32
    %c0_i32_1 = arith.constant 0 : i32
    return %c0_i32, %c0_i32_0 : i32, i32
  }
}

</mosaic_0001>

<bundles_post_ra>
// kernel: modified_cnn_forward.3
= control target key start
LH: loop header
LB: loop body
LE: loop exit
PB: predicated region body
PF: predicated region fallthrough
CT: control target
= control target key end

     0   :  { %11 = vsyncpa [#allocation3], 0  ;;  %s10632_s0 = inlined_call_operand.vmem [shape: f32[512,27], index: 0, kind: input, shape index: {}]   ;;  %s10633_s1 = inlined_call_operand.vmem [shape: f32[27,16], index: 1, kind: input, shape index: {}]   ;;  %s10634_s2 = inlined_call_operand.vmem [shape: f32[1,16], index: 2, kind: input, shape index: {}]   ;;  %s10635_s3 = inlined_call_operand.vmem [shape: f32[1,127], index: 3, kind: input, shape index: {}]   ;;  %s10636_s4 = inlined_call_operand.vmem [shape: f32[1,127], index: 4, kind: input, shape index: {}]   ;;  %s10637_s5 = inlined_call_operand.vmem [shape: f32[2], index: 5, kind: input, shape index: {}]   ;;  %s10638_s6 = inlined_call_operand.vmem [shape: f32[128,16], index: 6, kind: output, shape index: {}]  }
   0x1   :  { %s28_s23 = sshll.u32 %s10637_s5, 4  ;;  %s29_s23 = int_to_ptr.vmem [resolvable:$true] %s28_s23 }
   0x2   :  { %s6030_s24 = scalar_lea.vmem %s29_s23, 16  ;;  %p6035_p1 = scmp.lt.s32.totalorder %s29_s23, %s29_s23 }
   0x3   :  { %p6031_p0 = scmp.ne.s32.totalorder %s29_s23, %s6030_s24  ;;  %p6036_p2 = scmp.lt.s32.totalorder %s6030_s24, %s6030_s24 }
   0x5   :  { %p6037_p3 = por %p6036_p2, %p6035_p1 }
   0x7   :  { %p6038_p4 = pnand %p6037_p3, %p6031_p0 }
   0x9   :  { %6041 = shalt.err (!%p6038_p4)
}
   0xa   :  { %s6044_s25 = smov [#allocation2]  }
   0xb   :  { %31 = dma.vmem_to_smem %s29_s23, 16, %s6044_s25, [#allocation3]  }
   0xc   :  { %6042 = dma.done.wait [#allocation3], 16  }
   0xd   :  { %6043 = vsyncadd [#allocation3], 4294967280 }
   0xe   :  { %35 = sfence }
   0xf   :  { %v103_v0 = vld [vmem:[%s10633_s1 + $0x18] sm:$0x7]  ;;  %vm304_vm0 = vcmask 1042432   ;;  %v102_v1 = vld [vmem:[%s10633_s1 + $0x10] sm:$0xff]  ;;  %v101_v2 = vld [vmem:[%s10633_s1 + $0x8] sm:$0xff]  ;;  %vm111_vm1 = vcmask 220160  }
  0x10   :  { %5783 = vmatprep.subr.msk.mxu0 %vm304_vm0, %v103_v0  ;;  %5887 = vmatprep.subr.msk.mxu1 %vm304_vm0, %v103_v0  ;;  %v100_v3 = vld [vmem:[%s10633_s1] sm:$0xff]  ;;  %v37_v6 = vld [vmem:[%s10632_s0 + $0x8] sm:$0xff]  ;;  %v38_v8 = vld [vmem:[%s10632_s0 + $0x10] sm:$0xff]  ;;  %s6351_s7 = sld [smem:[#allocation2]] }
  0x11   :  { %5784 = vmatpush3.msk.msra.mxu0 %vm304_vm0, %v103_v0  ;;  %5891 = vmatpush3.msk.msra.mxu1 %vm304_vm0, %v103_v0  ;;  %v36_v4 = vld [vmem:[%s10632_s0] sm:$0xff]  ;;  %v69_v7 = vld [vmem:[%s10632_s0 + $0x108] sm:$0xff]  ;;  %v70_v9 = vld [vmem:[%s10632_s0 + $0x110] sm:$0xff]  ;;  %s8404_s13 = sld [smem:[#allocation2 + $0x1]] }
  0x12   :  { %5785 = vmatprep.subr.mxu0 %v102_v1  ;;  %5888 = vmatprep.subr.mxu1 %v102_v1  ;;  %v68_v5 = vld [vmem:[%s10632_s0 + $0x100] sm:$0xff]  ;;  %v39_v10 = vld [vmem:[%s10632_s0 + $0x18] sm:$0xff]  ;;  %v41_v14 = vld [vmem:[%s10632_s0 + $0x28] sm:$0xff] }
  0x13   :  { %5786 = vmatpush3.msra.mxu0 %v102_v1  ;;  %5892 = vmatpush3.msra.mxu1 %v102_v1  ;;  %v71_v11 = vld [vmem:[%s10632_s0 + $0x118] sm:$0xff]  ;;  %v40_v12 = vld [vmem:[%s10632_s0 + $0x20] sm:$0xff]  ;;  %v73_v15 = vld [vmem:[%s10632_s0 + $0x128] sm:$0xff] }
  0x14   :  { %5787 = vmatprep.subr.mxu0 %v101_v2  ;;  %5889 = vmatprep.subr.mxu1 %v101_v2  ;;  %v72_v13 = vld [vmem:[%s10632_s0 + $0x120] sm:$0xff]  ;;  %v42_v16 = vld [vmem:[%s10632_s0 + $0x30] sm:$0xff]  ;;  %v43_v18 = vld [vmem:[%s10632_s0 + $0x38] sm:$0xff] }
  0x15   :  { %5788 = vmatpush3.msra.mxu0 %v101_v2  ;;  %5893 = vmatpush3.msra.mxu1 %v101_v2  ;;  %v74_v17 = vld [vmem:[%s10632_s0 + $0x130] sm:$0xff]  ;;  %v75_v19 = vld [vmem:[%s10632_s0 + $0x138] sm:$0xff]  ;;  %v44_v20 = vld [vmem:[%s10632_s0 + $0x40] sm:$0xff] }
  0x16   :  { %5789 = vmatprep.subr.mxu0 %v100_v3  ;;  %5890 = vmatprep.subr.mxu1 %v100_v3  ;;  %v76_v21 = vld [vmem:[%s10632_s0 + $0x140] sm:$0xff]  ;;  %v45_v22 = vld [vmem:[%s10632_s0 + $0x48] sm:$0xff]  ;;  %v46_v24 = vld [vmem:[%s10632_s0 + $0x50] sm:$0xff]  ;;  %p791_p5 = scmp.ge.f32.partialorder %s6351_s7, 0.0 }
  0x17   :  { %5790 = vmatpush3.msra.mxu0 %v100_v3  ;;  %5894 = vmatpush3.msra.mxu1 %v100_v3  ;;  %v77_v23 = vld [vmem:[%s10632_s0 + $0x148] sm:$0xff]  ;;  %v78_v25 = vld [vmem:[%s10632_s0 + $0x150] sm:$0xff]  ;;  %v47_v26 = vld [vmem:[%s10632_s0 + $0x58] sm:$0xff] }
  0x18   :  { %5791 = vmatprep.mubr.msk.f32.mxu0 %vm111_vm1, %v36_v4  ;;  %5839 = vmatprep.mubr.msk.f32.mxu1 %vm111_vm1, %v68_v5  ;;  %v79_v27 = vld [vmem:[%s10632_s0 + $0x158] sm:$0xff]  ;;  %v48_v28 = vld [vmem:[%s10632_s0 + $0x60] sm:$0xff]  ;;  %v49_v30 = vld [vmem:[%s10632_s0 + $0x68] sm:$0xff] }
  0x19   :  { %5792 = vmatmul.mubr.msk.f32.vlgmr.msra.gmra.mxu0 %vm111_vm1, %v37_v6  ;;  %5840 = vmatmul.mubr.msk.f32.vlgmr.msra.gmra.mxu1 %vm111_vm1, %v69_v7  ;;  %v80_v29 = vld [vmem:[%s10632_s0 + $0x160] sm:$0xff]  ;;  %v81_v31 = vld [vmem:[%s10632_s0 + $0x168] sm:$0xff]  ;;  %v50_v32 = vld [vmem:[%s10632_s0 + $0x70] sm:$0xff] }
  0x1a   :  { %5794 = vmatprep.mubr.msk.f32.mxu0 %vm111_vm1, %v38_v8  ;;  %5842 = vmatprep.mubr.msk.f32.mxu1 %vm111_vm1, %v70_v9  ;;  %v82_v33 = vld [vmem:[%s10632_s0 + $0x170] sm:$0xff]  ;;  %v51_v34 = vld [vmem:[%s10632_s0 + $0x78] sm:$0xff]  ;;  %v52_v36 = vld [vmem:[%s10632_s0 + $0x80] sm:$0xff] }
  0x1b   :  { %v83_v35 = vld [vmem:[%s10632_s0 + $0x178] sm:$0xff]  ;;  %v84_v37 = vld [vmem:[%s10632_s0 + $0x180] sm:$0xff]  ;;  %v53_v38 = vld [vmem:[%s10632_s0 + $0x88] sm:$0xff] }
  0x1c   :  { %v85_v39 = vld [vmem:[%s10632_s0 + $0x188] sm:$0xff]  ;;  %v54_v40 = vld [vmem:[%s10632_s0 + $0x90] sm:$0xff]  ;;  %v55_v42 = vld [vmem:[%s10632_s0 + $0x98] sm:$0xff] }
  0x1d   :  { %5795 = vmatmul.mubr.msk.f32.gmra.mxu0 %vm111_vm1, %v39_v10  ;;  %5843 = vmatmul.mubr.msk.f32.gmra.mxu1 %vm111_vm1, %v71_v11  ;;  %v86_v41 = vld [vmem:[%s10632_s0 + $0x190] sm:$0xff]  ;;  %v87_v43 = vld [vmem:[%s10632_s0 + $0x198] sm:$0xff]  ;;  %v56_v44 = vld [vmem:[%s10632_s0 + $0xa0] sm:$0xff] }
  0x1e   :  { %5797 = vmatprep.mubr.msk.f32.mxu0 %vm111_vm1, %v40_v12  ;;  %5845 = vmatprep.mubr.msk.f32.mxu1 %vm111_vm1, %v72_v13  ;;  %v88_v45 = vld [vmem:[%s10632_s0 + $0x1a0] sm:$0xff]  ;;  %v57_v46 = vld [vmem:[%s10632_s0 + $0xa8] sm:$0xff]  ;;  %v58_v48 = vld [vmem:[%s10632_s0 + $0xb0] sm:$0xff] }
  0x1f   :  { %v89_v47 = vld [vmem:[%s10632_s0 + $0x1a8] sm:$0xff]  ;;  %v90_v49 = vld [vmem:[%s10632_s0 + $0x1b0] sm:$0xff]  ;;  %v59_v50 = vld [vmem:[%s10632_s0 + $0xb8] sm:$0xff] }
  0x20   :  { %v91_v51 = vld [vmem:[%s10632_s0 + $0x1b8] sm:$0xff]  ;;  %v60_v52 = vld [vmem:[%s10632_s0 + $0xc0] sm:$0xff]  ;;  %v61_v54 = vld [vmem:[%s10632_s0 + $0xc8] sm:$0xff] }
  0x21   :  { %5798 = vmatmul.mubr.msk.f32.gmra.mxu0 %vm111_vm1, %v41_v14  ;;  %5846 = vmatmul.mubr.msk.f32.gmra.mxu1 %vm111_vm1, %v73_v15  ;;  %v92_v53 = vld [vmem:[%s10632_s0 + $0x1c0] sm:$0xff]  ;;  %v93_v55 = vld [vmem:[%s10632_s0 + $0x1c8] sm:$0xff]  ;;  %v62_v56 = vld [vmem:[%s10632_s0 + $0xd0] sm:$0xff] }
  0x22   :  { %5800 = vmatprep.mubr.msk.f32.mxu0 %vm111_vm1, %v42_v16  ;;  %5848 = vmatprep.mubr.msk.f32.mxu1 %vm111_vm1, %v74_v17  ;;  %v94_v57 = vld [vmem:[%s10632_s0 + $0x1d0] sm:$0xff]  ;;  %v63_v58 = vld [vmem:[%s10632_s0 + $0xd8] sm:$0xff]  ;;  %v64_v60 = vld [vmem:[%s10632_s0 + $0xe0] sm:$0xff] }
  0x23   :  { %v95_v59 = vld [vmem:[%s10632_s0 + $0x1d8] sm:$0xff]  ;;  %v96_v61 = vld [vmem:[%s10632_s0 + $0x1e0] sm:$0xff]  ;;  %v65_v62 = vld [vmem:[%s10632_s0 + $0xe8] sm:$0xff] }
  0x24   :  { %v97_v63 = vld [vmem:[%s10632_s0 + $0x1e8] sm:$0xff]  ;;  %v66_v0 = vld [vmem:[%s10632_s0 + $0xf0] sm:$0xff]  ;;  %v67_v2 = vld [vmem:[%s10632_s0 + $0xf8] sm:$0xff] }
  0x25   :  { %5801 = vmatmul.mubr.msk.f32.gmra.mxu0 %vm111_vm1, %v43_v18  ;;  %5849 = vmatmul.mubr.msk.f32.gmra.mxu1 %vm111_vm1, %v75_v19  ;;  %v98_v1 = vld [vmem:[%s10632_s0 + $0x1f0] sm:$0xff]  ;;  %v99_v3 = vld [vmem:[%s10632_s0 + $0x1f8] sm:$0xff]  ;;  %s792_s0 = scalar_select %p791_p5, 1, 0 }
  0x26   :  { %5803 = vmatprep.mubr.msk.f32.mxu0 %vm111_vm1, %v44_v20  ;;  %5851 = vmatprep.mubr.msk.f32.mxu1 %vm111_vm1, %v76_v21 }
  0x29   :  { %5804 = vmatmul.mubr.msk.f32.gmra.mxu0 %vm111_vm1, %v45_v22  ;;  %5852 = vmatmul.mubr.msk.f32.gmra.mxu1 %vm111_vm1, %v77_v23 }
  0x2a   :  { %5806 = vmatprep.mubr.msk.f32.mxu0 %vm111_vm1, %v46_v24  ;;  %5854 = vmatprep.mubr.msk.f32.mxu1 %vm111_vm1, %v78_v25  ;;  %v10639_v24 = vlaneseq }
  0x2d   :  { %5807 = vmatmul.mubr.msk.f32.gmra.mxu0 %vm111_vm1, %v47_v26  ;;  %5855 = vmatmul.mubr.msk.f32.gmra.mxu1 %vm111_vm1, %v79_v27 }
  0x2e   :  { %5809 = vmatprep.mubr.msk.f32.mxu0 %vm111_vm1, %v48_v28  ;;  %5857 = vmatprep.mubr.msk.f32.mxu1 %vm111_vm1, %v80_v29  ;;  %v6359_v29 = vshrl.u32 %v10639_v24, 7 }
  0x30   :  { %10782 = vst [vmem:[#allocation5_spill] sm:$0xff] %v6359_v29 }
  0x31   :  { %5810 = vmatmul.mubr.msk.f32.gmra.mxu0 %vm111_vm1, %v49_v30  ;;  %5858 = vmatmul.mubr.msk.f32.gmra.mxu1 %vm111_vm1, %v81_v31 }
  0x32   :  { %5812 = vmatprep.mubr.msk.f32.mxu0 %vm111_vm1, %v50_v32  ;;  %5860 = vmatprep.mubr.msk.f32.mxu1 %vm111_vm1, %v82_v33  ;;  %v793_v32 = vstv %s792_s0  ;;  %v6368_v33 = vld [vmem:[%s10634_s2] ss:$0 sm:$0xff] }
  0x33   :  { %vm6384_vm2 = vcmp.eq.s32.totalorder %v793_v32, 1 }
  0x35   :  { %5813 = vmatmul.mubr.msk.f32.gmra.mxu0 %vm111_vm1, %v51_v34  ;;  %5861 = vmatmul.mubr.msk.f32.gmra.mxu1 %vm111_vm1, %v83_v35 }
  0x36   :  { %5815 = vmatprep.mubr.msk.f32.mxu0 %vm111_vm1, %v52_v36  ;;  %5863 = vmatprep.mubr.msk.f32.mxu1 %vm111_vm1, %v84_v37  ;;  %v6375_v36 = vsub.s32 0, %v6359_v29  ;;  %v6378_v37 = vsub.s32 1, %v6359_v29 }
  0x39   :  { %5816 = vmatmul.mubr.msk.f32.gmra.mxu0 %vm111_vm1, %v53_v38  ;;  %5864 = vmatmul.mubr.msk.f32.gmra.mxu1 %vm111_vm1, %v85_v39 }
  0x3a   :  { %5818 = vmatprep.mubr.msk.f32.mxu0 %vm111_vm1, %v54_v40  ;;  %5866 = vmatprep.mubr.msk.f32.mxu1 %vm111_vm1, %v86_v41  ;;  %v6389_v41 = vsub.s32 2, %v6359_v29 }
  0x3d   :  { %5819 = vmatmul.mubr.msk.f32.gmra.mxu0 %vm111_vm1, %v55_v42  ;;  %5867 = vmatmul.mubr.msk.f32.gmra.mxu1 %vm111_vm1, %v87_v43  ;;  %v6392_v42 = vsub.s32 3, %v6359_v29  ;;  %v6395_v43 = vsub.s32 4, %v6359_v29 }
  0x3e   :  { %5821 = vmatprep.mubr.msk.f32.mxu0 %vm111_vm1, %v56_v44  ;;  %5869 = vmatprep.mubr.msk.f32.mxu1 %vm111_vm1, %v88_v45  ;;  %v6398_v44 = vsub.s32 5, %v6359_v29 }
  0x41   :  { %5822 = vmatmul.mubr.msk.f32.gmra.mxu0 %vm111_vm1, %v57_v46  ;;  %5870 = vmatmul.mubr.msk.f32.gmra.mxu1 %vm111_vm1, %v89_v47  ;;  %v6403_v47 = vsub.s32 6, %v6359_v29 }
  0x42   :  { %5824 = vmatprep.mubr.msk.f32.mxu0 %vm111_vm1, %v58_v48  ;;  %5872 = vmatprep.mubr.msk.f32.mxu1 %vm111_vm1, %v90_v49  ;;  %v6406_v48 = vsub.s32 7, %v6359_v29 }
  0x45   :  { %5825 = vmatmul.mubr.msk.f32.gmra.mxu0 %vm111_vm1, %v59_v50  ;;  %5873 = vmatmul.mubr.msk.f32.gmra.mxu1 %vm111_vm1, %v91_v51 }
  0x46   :  { %5827 = vmatprep.mubr.msk.f32.mxu0 %vm111_vm1, %v60_v52  ;;  %5875 = vmatprep.mubr.msk.f32.mxu1 %vm111_vm1, %v92_v53 }
  0x49   :  { %5828 = vmatmul.mubr.msk.f32.gmra.mxu0 %vm111_vm1, %v61_v54  ;;  %5876 = vmatmul.mubr.msk.f32.gmra.mxu1 %vm111_vm1, %v93_v55 }
  0x4a   :  { %5830 = vmatprep.mubr.msk.f32.mxu0 %vm111_vm1, %v62_v56  ;;  %5878 = vmatprep.mubr.msk.f32.mxu1 %vm111_vm1, %v94_v57 }
  0x4d   :  { %5831 = vmatmul.mubr.msk.f32.gmra.mxu0 %vm111_vm1, %v63_v58  ;;  %5879 = vmatmul.mubr.msk.f32.gmra.mxu1 %vm111_vm1, %v95_v59 }
  0x4e   :  { %5833 = vmatprep.mubr.msk.f32.mxu0 %vm111_vm1, %v64_v60  ;;  %5881 = vmatprep.mubr.msk.f32.mxu1 %vm111_vm1, %v96_v61 }
  0x51   :  { %5834 = vmatmul.mubr.msk.f32.gmra.mxu0 %vm111_vm1, %v65_v62  ;;  %5882 = vmatmul.mubr.msk.f32.gmra.mxu1 %vm111_vm1, %v97_v63 }
  0x52   :  { %5836 = vmatprep.mubr.msk.f32.mxu0 %vm111_vm1, %v66_v0  ;;  %5884 = vmatprep.mubr.msk.f32.mxu1 %vm111_vm1, %v98_v1 }
  0x55   :  { %5837 = vmatmul.mubr.msk.f32.gmra.mxu0 %vm111_vm1, %v67_v2  ;;  %5885 = vmatmul.mubr.msk.f32.gmra.mxu1 %vm111_vm1, %v99_v3 }
  0xd9   :  { %v5793_v4 = vpop.f32.mrf.mxu0  ;;  %v5841_v5 = vpop.f32.mrf.mxu1 }
  0xda   :  { %v380_v45 = vadd.f32 %v5793_v4, %v6368_v33  ;;  %v540_v46 = vadd.f32 %v5841_v5, %v6368_v33 }
  0xdb   :  { %v374_v6 = vpop.f32.mrf.mxu0  ;;  %v534_v7 = vpop.f32.mrf.mxu1 }
  0xdc   :  { %v375_v49 = vadd.f32 %v6368_v33, %v374_v6  ;;  %v535_v50 = vadd.f32 %v6368_v33, %v534_v7 }
  0xdd   :  { %v5796_v8 = vpop.f32.mrf.mxu0  ;;  %v5844_v9 = vpop.f32.mrf.mxu1 }
  0xde   :  { %v6411_v51 = vadd.f32 %v5796_v8, %v6368_v33  ;;  %v550_v52 = vadd.f32 %v5844_v9, %v6368_v33 }
  0xdf   :  { %v384_v10 = vpop.f32.mrf.mxu0  ;;  %v544_v11 = vpop.f32.mrf.mxu1 }
  0xe0   :  { %v6419_v55 = vadd.f32 %v6368_v33, %v384_v10  ;;  %v6422_v56 = vadd.f32 %v6368_v33, %v544_v11 }
  0xe1   :  { %v5799_v12 = vpop.f32.mrf.mxu0  ;;  %v5847_v13 = vpop.f32.mrf.mxu1 }
  0xe2   :  { %v6425_v57 = vadd.f32 %v5799_v12, %v6368_v33  ;;  %v6428_v58 = vadd.f32 %v5847_v13, %v6368_v33 }
  0xe3   :  { %v394_v14 = vpop.f32.mrf.mxu0  ;;  %v554_v15 = vpop.f32.mrf.mxu1 }
  0xe4   :  { %v6431_v59 = vadd.f32 %v6368_v33, %v394_v14  ;;  %v6434_v60 = vadd.f32 %v6368_v33, %v554_v15 }
  0xe5   :  { %v5802_v16 = vpop.f32.mrf.mxu0  ;;  %v5850_v17 = vpop.f32.mrf.mxu1 }
  0xe6   :  { %v6437_v61 = vadd.f32 %v5802_v16, %v6368_v33  ;;  %v6440_v62 = vadd.f32 %v5850_v17, %v6368_v33 }
  0xe7   :  { %v404_v18 = vpop.f32.mrf.mxu0  ;;  %v564_v19 = vpop.f32.mrf.mxu1 }
  0xe8   :  { %v6443_v1 = vadd.f32 %v6368_v33, %v404_v18  ;;  %v6446_v2 = vadd.f32 %v6368_v33, %v564_v19 }
  0xe9   :  { %v5805_v20 = vpop.f32.mrf.mxu0  ;;  %v5853_v21 = vpop.f32.mrf.mxu1 }
  0xea   :  { %v6451_v5 = vadd.f32 %v5805_v20, %v6368_v33  ;;  %v6454_v6 = vadd.f32 %v5853_v21, %v6368_v33 }
  0xeb   :  { %v414_v22 = vpop.f32.mrf.mxu0  ;;  %v574_v23 = vpop.f32.mrf.mxu1 }
  0xec   :  { %v6457_v7 = vadd.f32 %v6368_v33, %v414_v22  ;;  %v6460_v8 = vadd.f32 %v6368_v33, %v574_v23 }
  0xed   :  { %v5808_v25 = vpop.f32.mrf.mxu0  ;;  %v5856_v26 = vpop.f32.mrf.mxu1 }
  0xee   :  { %v6463_v15 = vadd.f32 %v5808_v25, %v6368_v33  ;;  %v6466_v16 = vadd.f32 %v5856_v26, %v6368_v33 }
  0xef   :  { %v6354_v27 = vpop.f32.mrf.mxu0  ;;  %v6356_v28 = vpop.f32.mrf.mxu1 }
  0xf1   :  { %v6361_v30 = vpop.f32.mrf.mxu0  ;;  %v6363_v31 = vpop.f32.mrf.mxu1 }
  0xf3   :  { %v6370_v34 = vpop.f32.mrf.mxu0  ;;  %v6372_v35 = vpop.f32.mrf.mxu1 }
  0xf5   :  { %v6380_v38 = vpop.f32.mrf.mxu0  ;;  %v6382_v39 = vpop.f32.mrf.mxu1 }
  0xf7   :  { %v6414_v53 = vpop.f32.mrf.mxu0  ;;  %v6416_v54 = vpop.f32.mrf.mxu1 }
  0xf9   :  { %v5817_v63 = vpop.f32.mrf.mxu0  ;;  %v5865_v0 = vpop.f32.mrf.mxu1 }
  0xfa   :  { %v460_v3 = vadd.f32 %v5817_v63, %v6368_v33  ;;  %v620_v4 = vadd.f32 %v5865_v0, %v6368_v33 }
  0xfb   :  { %v454_v9 = vpop.f32.mrf.mxu0  ;;  %v614_v10 = vpop.f32.mrf.mxu1 }
  0xfc   :  { %v694_v11 = vmax.f32 %v380_v45, %v460_v3  ;;  %v742_v12 = vmin.f32 %v380_v45, %v460_v3  ;;  %v710_v13 = vmax.f32 %v540_v46, %v620_v4  ;;  %v758_v14 = vmin.f32 %v540_v46, %v620_v4 }
  0xfd   :  { %v455_v17 = vadd.f32 %v6368_v33, %v454_v9  ;;  %v615_v18 = vadd.f32 %v6368_v33, %v614_v10  ;;  %v5820_v19 = vpop.f32.mrf.mxu0  ;;  %v5868_v20 = vpop.f32.mrf.mxu1 }
  0xfe   :  { %v726_v21 = vmax.f32 %v694_v11, %v710_v13  ;;  %v774_v22 = vmin.f32 %v742_v12, %v758_v14  ;;  %v470_v23 = vadd.f32 %v5820_v19, %v6368_v33  ;;  %v630_v32 = vadd.f32 %v5868_v20, %v6368_v33 }
  0xff   :  { %v693_v45 = vmax.f32 %v375_v49, %v455_v17  ;;  %v741_v46 = vmin.f32 %v375_v49, %v455_v17  ;;  %v709_v63 = vmax.f32 %v535_v50, %v615_v18  ;;  %v757_v25 = vmin.f32 %v535_v50, %v615_v18  ;;  %v464_v0 = vpop.f32.mrf.mxu0  ;;  %v624_v3 = vpop.f32.mrf.mxu1 }
 0x100   :  { %v796_v26 = vsel %vm6384_vm2, %v726_v21, %v774_v22  ;;  %v696_v4 = vmax.f32 %v6411_v51, %v470_v23  ;;  %v744_v9 = vmin.f32 %v6411_v51, %v470_v23  ;;  %v712_v10 = vmax.f32 %v550_v52, %v630_v32 }
 0x101   :  { %v6476_v11 = vmul.f32 100.0, %v796_v26  ;;  %v725_v12 = vmax.f32 %v693_v45, %v709_v63  ;;  %v773_v13 = vmin.f32 %v741_v46, %v757_v25  ;;  %v760_v14 = vmin.f32 %v550_v52, %v630_v32 }
 0x102   :  { %v6480_v49 = vadd.f32 %v6368_v33, %v6354_v27  ;;  %v728_v50 = vmax.f32 %v696_v4, %v712_v10  ;;  %v465_v17 = vadd.f32 %v6368_v33, %v464_v0  ;;  %v625_v18 = vadd.f32 %v6368_v33, %v624_v3  ;;  %v5823_v27 = vpop.f32.mrf.mxu0  ;;  %v5871_v3 = vpop.f32.mrf.mxu1 }
 0x103   :  { %v6486_v19 = vadd.f32 %v6368_v33, %v6356_v28  ;;  %v6490_v51 = vadd.f32 %v6361_v30, %v6368_v33  ;;  %v5905_v20 = vcvt.f32.s32 %v6476_v11  ;;  %v795_v52 = vsel %vm6384_vm2, %v725_v12, %v773_v13 }
 0x104   :  { %v6495_v21 = vmul.f32 100.0, %v795_v52  ;;  %v776_v22 = vmin.f32 %v744_v9, %v760_v14  ;;  %v695_v23 = vmax.f32 %v6419_v55, %v465_v17  ;;  %v743_v32 = vmin.f32 %v6419_v55, %v465_v17  ;;  %v474_v13 = vpop.f32.mrf.mxu0  ;;  %v634_v52 = vpop.f32.mrf.mxu1 }
 0x105   :  { %v6501_v28 = vadd.f32 %v6363_v31, %v6368_v33  ;;  %v5906_v45 = vcvt.s32.f32 %v5905_v20  ;;  %v711_v30 = vmax.f32 %v6422_v56, %v625_v18  ;;  %v759_v46 = vmin.f32 %v6422_v56, %v625_v18 }
 0x106   :  { %v6507_v63 = vadd.f32 %v6368_v33, %v6370_v34  ;;  %v5897_v25 = vcvt.f32.s32 %v6495_v21  ;;  %v798_v0 = vsel %vm6384_vm2, %v728_v50, %v776_v22  ;;  %v480_v55 = vadd.f32 %v5823_v27, %v6368_v33 }
 0x107   :  { %v5907_v26 = vand.u32 2147483647, %v5906_v45  ;;  %v6513_v31 = vmul.f32 100.0, %v798_v0  ;;  %v727_v4 = vmax.f32 %v695_v23, %v711_v30  ;;  %v775_v9 = vmin.f32 %v743_v32, %v759_v46 }
 0x108   :  { %v6517_v56 = vadd.f32 %v6368_v33, %v6372_v35  ;;  %v6521_v34 = vadd.f32 %v6380_v38, %v6368_v33  ;;  %v6525_v10 = vadd.f32 %v6382_v39, %v6368_v33  ;;  %v5898_v12 = vcvt.s32.f32 %v5897_v25 }
 0x109   :  { %v5903_v14 = vand.u32 2147483647, %v6476_v11  ;;  %v5908_v50 = vand.u32 2147483648, %v6476_v11  ;;  %v5895_v17 = vand.u32 2147483647, %v6495_v21  ;;  %v5921_v18 = vcvt.f32.s32 %v6513_v31 }
 0x10a   :  { %v797_v35 = vsel %vm6384_vm2, %v727_v4, %v775_v9  ;;  %v698_v38 = vmax.f32 %v6425_v57, %v480_v55  ;;  %v746_v20 = vmin.f32 %v6425_v57, %v480_v55  ;;  %v640_v39 = vadd.f32 %v5871_v3, %v6368_v33 }
 0x10b   :  { %v5909_v27 = vor.u32 %v5908_v50, %v5907_v26  ;;  %v5899_v22 = vand.u32 2147483647, %v5898_v12  ;;  %v6536_v23 = vmul.f32 100.0, %v797_v35  ;;  %v475_v32 = vadd.f32 %v6368_v33, %v474_v13  ;;  %v5826_v26 = vpop.f32.mrf.mxu0  ;;  %v5874_v12 = vpop.f32.mrf.mxu1 }
 0x10c   :  { %v6541_v45 = vadd.f32 %v6368_v33, %v6414_v53  ;;  %v6545_v30 = vadd.f32 %v6368_v33, %v6416_v54  ;;  %v714_v46 = vmax.f32 %v6428_v58, %v640_v39  ;;  %v762_v57 = vmin.f32 %v6428_v58, %v640_v39 }
 0x10d   :  { %vm6549_vm3 = vcmp.lt.f32.partialorder %v5903_v14, 8388608.0  ;;  %v5900_v0 = vand.u32 2147483648, %v6495_v21  ;;  %v5922_v55 = vcvt.s32.f32 %v5921_v18  ;;  %v5913_v3 = vcvt.f32.s32 %v6536_v23 }
 0x10e   :  { %vm6555_vm4 = vcmp.lt.f32.partialorder %v5895_v17, 8388608.0  ;;  %v5919_v54 = vand.u32 2147483647, %v6513_v31  ;;  %v730_v4 = vmax.f32 %v698_v38, %v714_v46  ;;  %v778_v9 = vmin.f32 %v746_v20, %v762_v57 }
 0x10f   :  { %v5910_v58 = vsel %vm6549_vm3, %v5909_v27, %v6476_v11  ;;  %v5901_v13 = vor.u32 %v5900_v0, %v5899_v22  ;;  %v5924_v14 = vand.u32 2147483648, %v6513_v31  ;;  %v697_v50 = vmax.f32 %v6431_v59, %v475_v32  ;;  %v484_v27 = vpop.f32.mrf.mxu0 }
 0x110   :  { %v800_v17 = vsel %vm6384_vm2, %v730_v4, %v778_v9  ;;  %v745_v18 = vmin.f32 %v6431_v59, %v475_v32  ;;  %v635_v35 = vadd.f32 %v6368_v33, %v634_v52  ;;  %v490_v38 = vadd.f32 %v5826_v26, %v6368_v33 }
 0x111   :  { %v5923_v20 = vand.u32 2147483647, %v5922_v55  ;;  %v5914_v39 = vcvt.s32.f32 %v5913_v3  ;;  %v6570_v46 = vmul.f32 100.0, %v800_v17  ;;  %v650_v11 = vadd.f32 %v5874_v12, %v6368_v33  ;;  %v644_v3 = vpop.f32.mrf.mxu1 }
 0x112   :  { %vm6573_vm5 = vcmp.lt.f32.partialorder %v5919_v54, 8388608.0  ;;  %v713_v57 = vmax.f32 %v6434_v60, %v635_v35  ;;  %v761_v25 = vmin.f32 %v6434_v60, %v635_v35  ;;  %v700_v59 = vmax.f32 %v6437_v61, %v490_v38  ;;  %v5829_v35 = vpop.f32.mrf.mxu0 }
 0x113   :  { %v6580_v52 = vmul.f32 0.01, %v5910_v58  ;;  %v5902_v32 = vsel %vm6555_vm4, %v5901_v13, %v6495_v21  ;;  %v5911_v0 = vand.u32 2147483647, %v6536_v23  ;;  %v5937_v55 = vcvt.f32.s32 %v6570_v46 }
 0x114   :  { %v729_v26 = vmax.f32 %v697_v50, %v713_v57  ;;  %v777_v54 = vmin.f32 %v745_v18, %v761_v25  ;;  %v748_v4 = vmin.f32 %v6437_v61, %v490_v38  ;;  %v716_v9 = vmax.f32 %v6440_v62, %v650_v11  ;;  %v5877_v38 = vpop.f32.mrf.mxu1 }
 0x115   :  { %v5925_v60 = vor.u32 %v5924_v14, %v5923_v20  ;;  %v5915_v12 = vand.u32 2147483647, %v5914_v39  ;;  %v5938_v17 = vcvt.s32.f32 %v5937_v55  ;;  %v764_v58 = vmin.f32 %v6440_v62, %v650_v11 }
 0x116   :  { %v5916_v53 = vand.u32 2147483648, %v6536_v23  ;;  %v799_v21 = vsel %vm6384_vm2, %v729_v26, %v777_v54  ;;  %v732_v13 = vmax.f32 %v700_v59, %v716_v9  ;;  %v485_v24 = vadd.f32 %v6368_v33, %v484_v27 }
 0x117   :  { %v6594_v50 = vmul.f32 0.01, %v5902_v32  ;;  %v6596_v18 = vmul.f32 100.0, %v799_v21  ;;  %v780_v61 = vmin.f32 %v748_v4, %v764_v58  ;;  %v645_v14 = vadd.f32 %v6368_v33, %v644_v3 }
 0x118   :  { %vm6599_vm6 = vcmp.lt.f32.partialorder %v5911_v0, 8388608.0  ;;  %v699_v62 = vmax.f32 %v6443_v1, %v485_v24  ;;  %v747_v39 = vmin.f32 %v6443_v1, %v485_v24  ;;  %v500_v11 = vadd.f32 %v5829_v35, %v6368_v33  ;;  %v654_v35 = vpop.f32.mrf.mxu1 }
 0x119   :  { %v5926_v27 = vsel %vm6573_vm5, %v5925_v60, %v6513_v31  ;;  %v5917_v57 = vor.u32 %v5916_v53, %v5915_v12  ;;  %v5939_v25 = vand.u32 2147483647, %v5938_v17  ;;  %v5929_v59 = vcvt.f32.s32 %v6596_v18  ;;  %v494_v31 = vpop.f32.mrf.mxu0 }
 0x11a   :  { %v802_v32 = vsel %vm6384_vm2, %v732_v13, %v780_v61  ;;  %v715_v0 = vmax.f32 %v6446_v2, %v645_v14  ;;  %v763_v55 = vmin.f32 %v6446_v2, %v645_v14  ;;  %v660_v3 = vadd.f32 %v5877_v38, %v6368_v33 }
 0x11b   :  { %v5935_v24 = vand.u32 2147483647, %v6570_v46  ;;  %v5940_v1 = vand.u32 2147483648, %v6570_v46  ;;  %v5930_v26 = vcvt.s32.f32 %v5929_v59  ;;  %v6617_v22 = vmul.f32 100.0, %v802_v32  ;;  %v5832_v32 = vpop.f32.mrf.mxu0 }
 0x11c   :  { %v731_v54 = vmax.f32 %v699_v62, %v715_v0  ;;  %v779_v4 = vmin.f32 %v747_v39, %v763_v55  ;;  %v702_v9 = vmax.f32 %v6451_v5, %v500_v11  ;;  %v750_v60 = vmin.f32 %v6451_v5, %v500_v11  ;;  %v5880_v0 = vpop.f32.mrf.mxu1 }
 0x11d   :  { %v5918_v2 = vsel %vm6599_vm6, %v5917_v57, %v6536_v23  ;;  %v5941_v12 = vor.u32 %v5940_v1, %v5939_v25  ;;  %v5931_v17 = vand.u32 2147483647, %v5930_v26  ;;  %v5953_v58 = vcvt.f32.s32 %v6617_v22 }
 0x11e   :  { %v801_v53 = vsel %vm6384_vm2, %v731_v54, %v779_v4  ;;  %v718_v21 = vmax.f32 %v6454_v6, %v660_v3  ;;  %v766_v13 = vmin.f32 %v6454_v6, %v660_v3  ;;  %v495_v61 = vadd.f32 %v6368_v33, %v494_v31 }
 0x11f   :  { %v5927_v5 = vand.u32 2147483647, %v6596_v18  ;;  %v5932_v14 = vand.u32 2147483648, %v6596_v18  ;;  %v5954_v38 = vcvt.s32.f32 %v5953_v58  ;;  %v6632_v23 = vmul.f32 100.0, %v801_v53 }
 0x120   :  { %v6634_v20 = vmul.f32 0.01, %v5926_v27  ;;  %vm6636_vm7 = vcmp.lt.f32.partialorder %v5935_v24, 8388608.0  ;;  %v734_v39 = vmax.f32 %v702_v9, %v718_v21  ;;  %v782_v11 = vmin.f32 %v750_v60, %v766_v13 }
 0x121   :  { %v6640_v57 = vmul.f32 0.01, %v5918_v2  ;;  %v5942_v6 = vsel %vm6636_vm7, %v5941_v12, %v6570_v46  ;;  %v5933_v25 = vor.u32 %v5932_v14, %v5931_v17  ;;  %v5945_v59 = vcvt.f32.s32 %v6632_v23 }
 0x122   :  { %v804_v27 = vsel %vm6384_vm2, %v734_v39, %v782_v11  ;;  %v701_v55 = vmax.f32 %v6457_v7, %v495_v61  ;;  %v749_v3 = vmin.f32 %v6457_v7, %v495_v61  ;;  %v655_v24 = vadd.f32 %v6368_v33, %v654_v35 }
 0x123   :  { %vm6651_vm8 = vcmp.lt.f32.partialorder %v5927_v5, 8388608.0  ;;  %v5955_v26 = vand.u32 2147483647, %v5954_v38  ;;  %v5946_v46 = vcvt.s32.f32 %v5945_v59  ;;  %v6655_v31 = vmul.f32 100.0, %v804_v27  ;;  %v664_v38 = vpop.f32.mrf.mxu1 }
 0x124   :  { %v717_v54 = vmax.f32 %v6460_v8, %v655_v24  ;;  %v765_v4 = vmin.f32 %v6460_v8, %v655_v24  ;;  %v510_v9 = vadd.f32 %v5832_v32, %v6368_v33  ;;  %v670_v60 = vadd.f32 %v5880_v0, %v6368_v33  ;;  %v504_v8 = vpop.f32.mrf.mxu0 }
 0x125   :  { %v6661_v2 = vmul.f32 0.01, %v5942_v6  ;;  %v5951_v7 = vand.u32 2147483647, %v6617_v22  ;;  %v5956_v12 = vand.u32 2147483648, %v6617_v22  ;;  %v5969_v17 = vcvt.f32.s32 %v6655_v31 }
 0x126   :  { %v5934_v58 = vsel %vm6651_vm8, %v5933_v25, %v6596_v18  ;;  %v5947_v35 = vand.u32 2147483647, %v5946_v46  ;;  %v733_v53 = vmax.f32 %v701_v55, %v717_v54  ;;  %v781_v21 = vmin.f32 %v749_v3, %v765_v4 }
 0x127   :  { %v5957_v13 = vor.u32 %v5956_v12, %v5955_v26  ;;  %v5948_v61 = vand.u32 2147483648, %v6632_v23  ;;  %v5970_v5 = vcvt.s32.f32 %v5969_v17  ;;  %v704_v14 = vmax.f32 %v6463_v15, %v510_v9 }
 0x128   :  { %v803_v62 = vsel %vm6384_vm2, %v733_v53, %v781_v21  ;;  %v752_v39 = vmin.f32 %v6463_v15, %v510_v9  ;;  %v720_v11 = vmax.f32 %v6466_v16, %v670_v60  ;;  %v768_v18 = vmin.f32 %v6466_v16, %v670_v60  ;;  %v5835_v15 = vpop.f32.mrf.mxu0  ;;  %v5883_v60 = vpop.f32.mrf.mxu1 }
 0x129   :  { %vm6676_vm9 = vcmp.lt.f32.partialorder %v5951_v7, 8388608.0  ;;  %v5943_v25 = vand.u32 2147483647, %v6632_v23  ;;  %v6681_v59 = vmul.f32 100.0, %v803_v62  ;;  %v505_v32 = vadd.f32 %v6368_v33, %v504_v8 }
 0x12a   :  { %v5949_v0 = vor.u32 %v5948_v61, %v5947_v35  ;;  %v736_v27 = vmax.f32 %v704_v14, %v720_v11  ;;  %v784_v55 = vmin.f32 %v752_v39, %v768_v18  ;;  %v665_v3 = vadd.f32 %v6368_v33, %v664_v38  ;;  %v514_v21 = vpop.f32.mrf.mxu0  ;;  %v674_v62 = vpop.f32.mrf.mxu1 }
 0x12b   :  { %v6685_v24 = vmul.f32 0.01, %v5934_v58  ;;  %v5958_v16 = vsel %vm6676_vm9, %v5957_v13, %v6617_v22  ;;  %v5971_v1 = vand.u32 2147483647, %v5970_v5  ;;  %v5961_v26 = vcvt.f32.s32 %v6681_v59 }
 0x12c   :  { %v806_v46 = vsel %vm6384_vm2, %v736_v27, %v784_v55  ;;  %v703_v54 = vmax.f32 %v6480_v49, %v505_v32  ;;  %v751_v4 = vmin.f32 %v6480_v49, %v505_v32  ;;  %v719_v9 = vmax.f32 %v6486_v19, %v665_v3 }
 0x12d   :  { %vm6696_vm10 = vcmp.lt.f32.partialorder %v5943_v25, 8388608.0  ;;  %v5967_v12 = vand.u32 2147483647, %v6655_v31  ;;  %v5972_v22 = vand.u32 2147483648, %v6655_v31  ;;  %v6702_v17 = vmul.f32 100.0, %v806_v46 }
 0x12e   :  { %v5950_v58 = vsel %vm6696_vm10, %v5949_v0, %v6632_v23  ;;  %v735_v35 = vmax.f32 %v703_v54, %v719_v9  ;;  %v767_v49 = vmin.f32 %v6486_v19, %v665_v3  ;;  %v953_v53 = vrot.slane %v6580_v52, %v6375_v36 }
 0x12f   :  { %v6710_v8 = vmul.f32 0.01, %v5958_v16  ;;  %v6712_v13 = vor.u32 %v5972_v22, %v5971_v1  ;;  %v5962_v61 = vcvt.s32.f32 %v5961_v26  ;;  %v5985_v5 = vcvt.f32.s32 %v6702_v17  ;;  %v5838_v1 = vpop.f32.mrf.mxu0 }
 0x130   :  { %v5959_v14 = vand.u32 2147483647, %v6681_v59  ;;  %v783_v38 = vmin.f32 %v751_v4, %v767_v49  ;;  %959 = vbcast.lane.b32.xlu1 %v953_v53, 264  ;;  %955 = vbcast.lane.b32.xlu0 %v953_v53, 256  ;;  %v520_v23 = vadd.f32 %v5835_v15, %v6368_v33  ;;  %v680_v19 = vadd.f32 %v5883_v60, %v6368_v33  ;;  %v5886_v4 = vpop.f32.mrf.mxu1 }
 0x131   :  { %v6718_v39 = vmul.f32 0.01, %v5950_v58  ;;  %vm6720_vm11 = vcmp.lt.f32.partialorder %v5967_v12, 8388608.0  ;;  %v5986_v18 = vcvt.s32.f32 %v5985_v5  ;;  %v515_v6 = vadd.f32 %v6368_v33, %v514_v21 }
 0x132   :  { %v805_v25 = vsel %vm6384_vm2, %v735_v35, %v783_v38  ;;  %v706_v32 = vmax.f32 %v6490_v51, %v520_v23  ;;  %v754_v0 = vmin.f32 %v6490_v51, %v520_v23  ;;  %v722_v27 = vmax.f32 %v6501_v28, %v680_v19 }
 0x133   :  { %v5963_v55 = vand.u32 2147483647, %v5962_v61  ;;  %v5987_v3 = vand.u32 2147483647, %v5986_v18  ;;  %v6730_v15 = vmul.f32 100.0, %v805_v25  ;;  %v770_v16 = vmin.f32 %v6501_v28, %v680_v19 }
 0x134   :  { %v5974_v26 = vsel %vm6720_vm11, %v6712_v13, %v6655_v31  ;;  %vm6737_vm12 = vcmp.lt.f32.partialorder %v5959_v14, 8388608.0  ;;  %v5964_v51 = vand.u32 2147483648, %v6681_v59  ;;  %v738_v54 = vmax.f32 %v706_v32, %v722_v27 }
 0x135   :  { %v5988_v9 = vand.u32 2147483648, %v6702_v17  ;;  %v5977_v60 = vcvt.f32.s32 %v6730_v15  ;;  %v705_v28 = vmax.f32 %v6507_v63, %v515_v6  ;;  %v753_v7 = vmin.f32 %v6507_v63, %v515_v6 }
 0x136   :  { %v786_v12 = vmin.f32 %v754_v0, %v770_v16  ;;  %v675_v22 = vadd.f32 %v6368_v33, %v674_v62  ;;  %v964_v31 = vrot.slane %v6580_v52, %v6378_v37  ;;  %v530_v58 = vadd.f32 %v5838_v1, %v6368_v33  ;;  %v524_v62 = vpop.f32.mrf.mxu0 }
 0x137   :  { %v5965_v35 = vor.u32 %v5964_v51, %v5963_v55  ;;  %v5989_v49 = vor.u32 %v5988_v9, %v5987_v3  ;;  %v5978_v53 = vcvt.s32.f32 %v5977_v60  ;;  %v690_v21 = vadd.f32 %v5886_v4, %v6368_v33  ;;  %v684_v51 = vpop.f32.mrf.mxu1 }
 0x138   :  { %v5983_v13 = vand.u32 2147483647, %v6702_v17  ;;  %v808_v61 = vsel %vm6384_vm2, %v738_v54, %v786_v12  ;;  %v721_v63 = vmax.f32 %v6517_v56, %v675_v22  ;;  %v769_v5 = vmin.f32 %v6517_v56, %v675_v22  ;;  %970 = vbcast.lane.b32.xlu1 %v964_v31, 264  ;;  %966 = vbcast.lane.b32.xlu0 %v964_v31, 256 }
 0x139   :  { %v5979_v14 = vand.u32 2147483647, %v5978_v53  ;;  %v6756_v38 = vmul.f32 100.0, %v808_v61  ;;  %v708_v23 = vmax.f32 %v6521_v34, %v530_v58  ;;  %v756_v19 = vmin.f32 %v6521_v34, %v530_v58 }
 0x13a   :  { %v737_v11 = vmax.f32 %v705_v28, %v721_v63  ;;  %v785_v18 = vmin.f32 %v753_v7, %v769_v5  ;;  %v724_v6 = vmax.f32 %v6525_v10, %v690_v21  ;;  %v772_v25 = vmin.f32 %v6525_v10, %v690_v21 }
 0x13b   :  { %v5966_v56 = vsel %vm6737_vm12, %v5965_v35, %v6681_v59  ;;  %v5975_v32 = vand.u32 2147483647, %v6730_v15  ;;  %v5980_v0 = vand.u32 2147483648, %v6730_v15  ;;  %v6001_v27 = vcvt.f32.s32 %v6756_v38 }
 0x13c   :  { %v807_v34 = vsel %vm6384_vm2, %v737_v11, %v785_v18  ;;  %v740_v55 = vmax.f32 %v708_v23, %v724_v6  ;;  %v788_v3 = vmin.f32 %v756_v19, %v772_v25  ;;  %v525_v16 = vadd.f32 %v6368_v33, %v524_v62 }
 0x13d   :  { %v6771_v1 = vmul.f32 0.01, %v5974_v26  ;;  %vm6773_vm13 = vcmp.lt.f32.partialorder %v5983_v13, 8388608.0  ;;  %v6002_v59 = vcvt.s32.f32 %v6001_v27  ;;  %v6777_v46 = vmul.f32 100.0, %v807_v34 }
 0x13e   :  { %v6779_v54 = vmul.f32 0.01, %v5966_v56  ;;  %v5990_v4 = vsel %vm6773_vm13, %v5989_v49, %v6702_v17  ;;  %v5981_v9 = vor.u32 %v5980_v0, %v5979_v14  ;;  %v810_v60 = vsel %vm6384_vm2, %v740_v55, %v788_v3 }
 0x13f   :  { %vm6786_vm14 = vcmp.lt.f32.partialorder %v5975_v32, 8388608.0  ;;  %v5999_v28 = vand.u32 2147483647, %v6756_v38  ;;  %v6003_v7 = vand.u32 2147483647, %v6002_v59  ;;  %v5993_v12 = vcvt.f32.s32 %v6777_v46 }
 0x140   :  { %v6792_v22 = vmul.f32 100.0, %v810_v60  ;;  %v707_v31 = vmax.f32 %v6541_v45, %v525_v16  ;;  %v685_v58 = vadd.f32 %v6368_v33, %v684_v51  ;;  %v975_v17 = vrot.slane %v6580_v52, %v6389_v41 }
 0x141   :  { %v6798_v35 = vmul.f32 0.01, %v5990_v4  ;;  %v6004_v49 = vand.u32 2147483648, %v6756_v38  ;;  %v5994_v53 = vcvt.s32.f32 %v5993_v12  ;;  %v755_v21 = vmin.f32 %v6541_v45, %v525_v16 }
 0x142   :  { %v5982_v13 = vsel %vm6786_vm14, %v5981_v9, %v6730_v15  ;;  %v5991_v61 = vand.u32 2147483647, %v6777_v46  ;;  %v6017_v63 = vcvt.f32.s32 %v6792_v22  ;;  %v723_v33 = vmax.f32 %v6545_v30, %v685_v58  ;;  %981 = vbcast.lane.b32.xlu1 %v975_v17, 264  ;;  %977 = vbcast.lane.b32.xlu0 %v975_v17, 256 }
 0x143   :  { %v6808_v5 = vor.u32 %v6004_v49, %v6003_v7  ;;  %v5995_v14 = vand.u32 2147483647, %v5994_v53  ;;  %v5996_v23 = vand.u32 2147483648, %v6777_v46  ;;  %v771_v19 = vmin.f32 %v6545_v30, %v685_v58 }
 0x144   :  { %vm6812_vm15 = vcmp.lt.f32.partialorder %v5999_v28, 8388608.0  ;;  %v6018_v15 = vcvt.s32.f32 %v6017_v63  ;;  %v739_v62 = vmax.f32 %v707_v31, %v723_v33  ;;  %v986_v11 = vrot.slane %v6580_v52, %v6392_v42 }
 0x145   :  { %v6818_v18 = vmul.f32 0.01, %v5982_v13  ;;  %v6820_v6 = vor.u32 %v5996_v23, %v5995_v14  ;;  %v6015_v25 = vand.u32 2147483647, %v6792_v22  ;;  %v787_v56 = vmin.f32 %v755_v21, %v771_v19 }
 0x146   :  { %vm6823_vm0 = vcmp.lt.f32.partialorder %v5991_v61, 8388608.0  ;;  %v6019_v30 = vand.u32 2147483647, %v6018_v15  ;;  %v6020_v0 = vand.u32 2147483648, %v6792_v22  ;;  %992 = vbcast.lane.b32.xlu1 %v986_v11, 264  ;;  %988 = vbcast.lane.b32.xlu0 %v986_v11, 256  ;;  %v997_v27 = vrot.slane %v6580_v52, %v6395_v43 }
 0x147   :  { %v809_v55 = vsel %vm6384_vm2, %v739_v62, %v787_v56  ;;  %v1008_v3 = vrot.slane %v6580_v52, %v6398_v44  ;;  %v1019_v16 = vrot.slane %v6580_v52, %v6403_v47  ;;  %v6844_v59 = vrot.slane %v6580_v52, %v6406_v48 }
 0x148   :  { %v6840_v10 = vmul.f32 100.0, %v809_v55  ;;  %v6848_v51 = vrot.slane %v6594_v50, %v6378_v37  ;;  %v6852_v40 = vrot.slane %v6594_v50, %v6375_v36  ;;  %vm6858_vm1 = vcmp.lt.f32.partialorder %v6015_v25, 8388608.0 }
 0x149   :  { %v6864_v52 = vrot.slane %v6594_v50, %v6389_v41  ;;  %v6868_v60 = vrot.slane %v6634_v20, %v6375_v36  ;;  %v6872_v26 = vrot.slane %v6634_v20, %v6378_v37  ;;  %v6874_v28 = vor.u32 %v6020_v0, %v6019_v30 }
 0x14a   :  { %v6009_v7 = vcvt.f32.s32 %v6840_v10  ;;  %1003 = vbcast.lane.b32.xlu1 %v997_v27, 264  ;;  %999 = vbcast.lane.b32.xlu0 %v997_v27, 256  ;;  %v6879_v12 = vrot.slane %v6594_v50, %v6392_v42  ;;  %v6883_v31 = vrot.slane %v6594_v50, %v6395_v43  ;;  %v6007_v58 = vand.u32 2147483647, %v6840_v10 }
 0x14b   :  { %v6888_v17 = vrot.slane %v6634_v20, %v6389_v41  ;;  %v6892_v49 = vrot.slane %v6634_v20, %v6392_v42  ;;  %v6896_v53 = vrot.slane %v6634_v20, %v6395_v43  ;;  %v6012_v13 = vand.u32 2147483648, %v6840_v10 }
 0x14c   :  { %v6010_v21 = vcvt.s32.f32 %v6009_v7  ;;  %v6901_v61 = vrot.slane %v6634_v20, %v6398_v44  ;;  %v6905_v63 = vrot.slane %v6634_v20, %v6403_v47  ;;  %v6909_v33 = vrot.slane %v6634_v20, %v6406_v48 }
 0x14d   :  { %v6913_v14 = vrot.slane %v6640_v57, %v6375_v36  ;;  %v6917_v23 = vrot.slane %v6640_v57, %v6378_v37  ;;  %v6921_v19 = vrot.slane %v6640_v57, %v6389_v41  ;;  %v6925_v62 = vrot.slane %v6640_v57, %v6392_v42 }
 0x14e   :  { %v6011_v15 = vand.u32 2147483647, %v6010_v21  ;;  %1014 = vbcast.lane.b32.xlu1 %v1008_v3, 264  ;;  %1010 = vbcast.lane.b32.xlu0 %v1008_v3, 256  ;;  %v6929_v20 = vrot.slane %v6640_v57, %v6395_v43  ;;  %v6933_v11 = vrot.slane %v6640_v57, %v6398_v44  ;;  %v6937_v25 = vrot.slane %v6640_v57, %v6403_v47 }
 0x14f   :  { %v6941_v56 = vrot.slane %v6640_v57, %v6406_v48  ;;  %v6945_v30 = vrot.slane %v6661_v2, %v6375_v36  ;;  %v6949_v0 = vrot.slane %v6661_v2, %v6378_v37  ;;  %v6953_v55 = vrot.slane %v6661_v2, %v6389_v41 }
 0x150   :  { %v6013_v27 = vor.u32 %v6012_v13, %v6011_v15  ;;  %v6957_v3 = vrot.slane %v6661_v2, %v6392_v42  ;;  %v6961_v57 = vrot.slane %v6661_v2, %v6395_v43  ;;  %v6965_v7 = vrot.slane %v6661_v2, %v6398_v44 }
 0x151   :  { %v6969_v21 = vrot.slane %v6661_v2, %v6403_v47  ;;  %v6973_v13 = vrot.slane %v6661_v2, %v6406_v48  ;;  %v6977_v15 = vrot.slane %v6685_v24, %v6375_v36  ;;  %vm6983_vm2 = vcmp.lt.f32.partialorder %v6007_v58, 8388608.0 }
 0x152   :  { %1025 = vbcast.lane.b32.xlu1 %v1019_v16, 264  ;;  %1021 = vbcast.lane.b32.xlu0 %v1019_v16, 256  ;;  %v6989_v29 = vrot.slane %v6685_v24, %v6378_v37  ;;  %v6993_v2 = vrot.slane %v6685_v24, %v6389_v41  ;;  %v7000_v58 = vrot.slane %v6685_v24, %v6392_v42  ;;  %vm2794_vm6 = vcmask 1039360  }
 0x153   :  { %10815 = vst [vmem:[#allocation6_spill] sm:$0xff] %v6977_v15  ;;  %v6014_v15 = vsel %vm6983_vm2, %v6013_v27, %v6840_v10  ;;  %v7004_v4 = vrot.slane %v6685_v24, %v6395_v43  ;;  %v7008_v16 = vrot.slane %v6685_v24, %v6398_v44  ;;  %v7016_v34 = vrot.slane %v6685_v24, %v6406_v48 }
 0x154   :  { %10818 = vst [vmem:[#allocation7_spill] sm:$0xff] %v6989_v29  ;;  %v7012_v29 = vrot.slane %v6685_v24, %v6403_v47  ;;  %v7020_v10 = vrot.slane %v6710_v8, %v6375_v36  ;;  %v7024_v27 = vrot.slane %v6710_v8, %v6378_v37  ;;  %v7036_v24 = vrot.slane %v6710_v8, %v6395_v43 }
 0x155   :  { %10819 = vst [vmem:[#allocation8_spill] sm:$0xff] %v7004_v4  ;;  %10820 = vst [vmem:[#allocation9_spill] sm:$0xff] %v7008_v16  ;;  %v7028_v4 = vrot.slane %v6710_v8, %v6389_v41  ;;  %v7032_v16 = vrot.slane %v6710_v8, %v6392_v42  ;;  %v7061_v45 = vrot.slane %v6718_v39, %v6375_v36 }
 0x156   :  { %10821 = vst [vmem:[#allocation10_spill] sm:$0xff] %v7016_v34  ;;  %10822 = vst [vmem:[#allocation11_spill] sm:$0xff] %v7020_v10  ;;  %v7040_v34 = vrot.slane %v6710_v8, %v6398_v44  ;;  %1036 = vbcast.lane.b32.xlu1 %v6844_v59, 264  ;;  %1032 = vbcast.lane.b32.xlu0 %v6844_v59, 256  ;;  %v7073_v59 = vrot.slane %v6718_v39, %v6392_v42 }
 0x157   :  { %10823 = vst [vmem:[#allocation12_spill] sm:$0xff] %v7024_v27  ;;  %10824 = vst [vmem:[#allocation13_spill] sm:$0xff] %v7032_v16  ;;  %v10826_v27 = vsel %vm6812_vm15, %v6808_v5, %v6756_v38  ;;  %v7053_v16 = vrot.slane %v6710_v8, %v6403_v47  ;;  %v7065_v38 = vrot.slane %v6718_v39, %v6378_v37 }
 0x158   :  { %10825 = vst [vmem:[#allocation14_spill] sm:$0xff] %v7036_v24  ;;  %v7047_v10 = vmul.f32 0.01, %v10826_v27  ;;  %v7057_v24 = vrot.slane %v6710_v8, %v6406_v48  ;;  %10827 = vst [vmem:[#allocation15_spill] sm:$0xff] %v7061_v45  ;;  %v7069_v5 = vrot.slane %v6718_v39, %v6389_v41  ;;  %v7077_v8 = vrot.slane %v6718_v39, %v6395_v43 }
 0x159   :  { %10828 = vst [vmem:[#allocation16_spill] sm:$0xff] %v7065_v38  ;;  %10830 = vst [vmem:[#allocation18_spill] sm:$0xff] %v7073_v59  ;;  %v7081_v27 = vrot.slane %v6718_v39, %v6398_v44  ;;  %v7085_v45 = vrot.slane %v6718_v39, %v6403_v47  ;;  %v7089_v38 = vrot.slane %v6718_v39, %v6406_v48 }
 0x15a   :  { %10829 = vst [vmem:[#allocation17_spill] sm:$0xff] %v7069_v5  ;;  %10831 = vst [vmem:[#allocation19_spill] sm:$0xff] %v7077_v8  ;;  %v7093_v5 = vrot.slane %v6779_v54, %v6375_v36  ;;  %v7097_v59 = vrot.slane %v6779_v54, %v6378_v37  ;;  %v7101_v8 = vrot.slane %v6779_v54, %v6389_v41  ;;  %878 = vbcast.lane.b32.xlu1 %v6848_v51, 256 }
 0x15b   :  { %10832 = vst [vmem:[#allocation20_spill] sm:$0xff] %v7081_v27  ;;  %10833 = vst [vmem:[#allocation21_spill] sm:$0xff] %v7089_v38  ;;  %v7105_v27 = vrot.slane %v6779_v54, %v6392_v42  ;;  %v7109_v39 = vrot.slane %v6779_v54, %v6395_v43  ;;  %867 = vbcast.lane.b32.xlu0 %v6852_v40, 256  ;;  %v7140_v32 = vrot.slane %v6771_v1, %v6389_v41 }
 0x15c   :  { %10834 = vst [vmem:[#allocation22_spill] sm:$0xff] %v7093_v5  ;;  %10835 = vst [vmem:[#allocation23_spill] sm:$0xff] %v7101_v8  ;;  %v10838_v5 = vsel %vm6823_vm0, %v6820_v6, %v6777_v46  ;;  %v7120_v8 = vrot.slane %v6779_v54, %v6398_v44  ;;  %v7132_v46 = vrot.slane %v6771_v1, %v6375_v36 }
 0x15d   :  { %10836 = vst [vmem:[#allocation24_spill] sm:$0xff] %v7105_v27  ;;  %10837 = vst [vmem:[#allocation25_spill] sm:$0xff] %v7109_v39  ;;  %v858_v38 = vmul.f32 0.01, %v10838_v5  ;;  %v7124_v27 = vrot.slane %v6779_v54, %v6403_v47  ;;  %v7128_v39 = vrot.slane %v6779_v54, %v6406_v48  ;;  %v7136_v6 = vrot.slane %v6771_v1, %v6378_v37 }
 0x15e   :  { %10840 = vst [vmem:[#allocation27_spill] sm:$0xff] %v7132_v46  ;;  %10842 = vst [vmem:[#allocation29_spill] sm:$0xff] %v7140_v32  ;;  %v7144_v5 = vrot.slane %v6771_v1, %v6392_v42  ;;  %v7148_v54 = vrot.slane %v6771_v1, %v6395_v43  ;;  %v7156_v46 = vrot.slane %v6771_v1, %v6403_v47  ;;  %882 = vbcast.lane.b32.xlu1 %v6848_v51, 264 }
 0x15f   :  { %10839 = vst [vmem:[#allocation26_spill] sm:$0xff] %v7128_v39  ;;  %10841 = vst [vmem:[#allocation28_spill] sm:$0xff] %v7136_v6  ;;  %v7152_v39 = vrot.slane %v6771_v1, %v6398_v44  ;;  %v7160_v6 = vrot.slane %v6771_v1, %v6406_v48  ;;  %v7164_v32 = vrot.slane %v6818_v18, %v6375_v36  ;;  %871 = vbcast.lane.b32.xlu0 %v6852_v40, 264 }
 0x160   :  { %10843 = vst [vmem:[#allocation30_spill] sm:$0xff] %v7144_v5  ;;  %10844 = vst [vmem:[#allocation31_spill] sm:$0xff] %v7148_v54  ;;  %v7168_v5 = vrot.slane %v6818_v18, %v6378_v37  ;;  %v7172_v54 = vrot.slane %v6818_v18, %v6389_v41  ;;  %v7182_v1 = vrot.slane %v6818_v18, %v6395_v43 }
 0x161   :  { %10845 = vst [vmem:[#allocation32_spill] sm:$0xff] %v7152_v39  ;;  %10846 = vst [vmem:[#allocation33_spill] sm:$0xff] %v7156_v46  ;;  %v7176_v39 = vrot.slane %v6818_v18, %v6392_v42  ;;  %v860_v46 = vmul.f32 0.01, %v6014_v15  ;;  %v7198_v51 = vrot.slane %v6798_v35, %v6375_v36  ;;  %v7202_v40 = vrot.slane %v6798_v35, %v6378_v37 }
 0x162   :  { %10847 = vst [vmem:[#allocation34_spill] sm:$0xff] %v7168_v5  ;;  %10848 = vst [vmem:[#allocation35_spill] sm:$0xff] %v7172_v54  ;;  %v7186_v5 = vrot.slane %v6818_v18, %v6398_v44  ;;  %v7190_v54 = vrot.slane %v6818_v18, %v6403_v47  ;;  %v7206_v15 = vrot.slane %v6798_v35, %v6389_v41  ;;  %893 = vbcast.lane.b32.xlu1 %v6864_v52, 264 }
 0x163   :  { %10849 = vst [vmem:[#allocation36_spill] sm:$0xff] %v7176_v39  ;;  %v7194_v39 = vrot.slane %v6818_v18, %v6406_v48  ;;  %10853 = vst [vmem:[#allocation40_spill] sm:$0xff] %v7198_v51  ;;  %v7214_v18 = vrot.slane %v6798_v35, %v6395_v43  ;;  %v7222_v51 = vrot.slane %v6798_v35, %v6403_v47  ;;  %889 = vbcast.lane.b32.xlu0 %v6864_v52, 256 }
 0x164   :  { %10850 = vst [vmem:[#allocation37_spill] sm:$0xff] %v7186_v5  ;;  %10851 = vst [vmem:[#allocation38_spill] sm:$0xff] %v7190_v54  ;;  %v7210_v5 = vrot.slane %v6798_v35, %v6392_v42  ;;  %v7257_v9 = vrot.slane %v858_v38, %v6406_v48  ;;  %v7265_v52 = vrot.slane %v7047_v10, %v6378_v37 }
 0x165   :  { %10852 = vst [vmem:[#allocation39_spill] sm:$0xff] %v7194_v39  ;;  %10854 = vst [vmem:[#allocation41_spill] sm:$0xff] %v7202_v40  ;;  %v7218_v39 = vrot.slane %v6798_v35, %v6398_v44  ;;  %v7226_v40 = vrot.slane %v6798_v35, %v6406_v48  ;;  %v7245_v35 = vrot.slane %v858_v38, %v6392_v42 }
 0x166   :  { %10855 = vst [vmem:[#allocation42_spill] sm:$0xff] %v7206_v15  ;;  %10856 = vst [vmem:[#allocation43_spill] sm:$0xff] %v7210_v5  ;;  %v7229_v15 = vrot.slane %v858_v38, %v6375_v36  ;;  %v7232_v5 = vrot.slane %v858_v38, %v6378_v37  ;;  %904 = vbcast.lane.b32.xlu1 %v6879_v12, 264 }
 0x167   :  { %10857 = vst [vmem:[#allocation44_spill] sm:$0xff] %v7214_v18  ;;  %10858 = vst [vmem:[#allocation45_spill] sm:$0xff] %v7218_v39  ;;  %v7235_v18 = vrot.slane %v858_v38, %v6389_v41  ;;  %v10862_v39 = vsel %vm6858_vm1, %v6874_v28, %v6792_v22  ;;  %v7261_v22 = vrot.slane %v7047_v10, %v6375_v36  ;;  %900 = vbcast.lane.b32.xlu0 %v6879_v12, 256 }
 0x168   :  { %10859 = vst [vmem:[#allocation46_spill] sm:$0xff] %v7229_v15  ;;  %10860 = vst [vmem:[#allocation47_spill] sm:$0xff] %v7232_v5  ;;  %v861_v54 = vmul.f32 0.01, %v10862_v39  ;;  %v7248_v15 = vrot.slane %v858_v38, %v6395_v43  ;;  %v7251_v5 = vrot.slane %v858_v38, %v6398_v44  ;;  %v7269_v28 = vrot.slane %v7047_v10, %v6389_v41 }
 0x169   :  { %10861 = vst [vmem:[#allocation48_spill] sm:$0xff] %v7235_v18  ;;  %v7254_v18 = vrot.slane %v858_v38, %v6403_v47  ;;  %10863 = vst [vmem:[#allocation49_spill] sm:$0xff] %v7257_v9  ;;  %v7273_v39 = vrot.slane %v7047_v10, %v6392_v42  ;;  %v7277_v38 = vrot.slane %v7047_v10, %v6395_v43 }
 0x16a   :  { %10864 = vst [vmem:[#allocation50_spill] sm:$0xff] %v7261_v22  ;;  %10865 = vst [vmem:[#allocation51_spill] sm:$0xff] %v7265_v52  ;;  %v7281_v9 = vrot.slane %v7047_v10, %v6398_v44  ;;  %v7285_v22 = vrot.slane %v7047_v10, %v6403_v47  ;;  %v7289_v52 = vrot.slane %v7047_v10, %v6406_v48  ;;  %915 = vbcast.lane.b32.xlu1 %v6883_v31, 264 }
 0x16b   :  { %10866 = vst [vmem:[#allocation52_spill] sm:$0xff] %v7269_v28  ;;  %10867 = vst [vmem:[#allocation53_spill] sm:$0xff] %v7273_v39  ;;  %v7292_v28 = vrot.slane %v860_v46, %v6375_v36  ;;  %v7295_v39 = vrot.slane %v860_v46, %v6378_v37  ;;  %v7309_v10 = vrot.slane %v860_v46, %v6398_v44  ;;  %911 = vbcast.lane.b32.xlu0 %v6883_v31, 256 }
 0x16c   :  { %10868 = vst [vmem:[#allocation54_spill] sm:$0xff] %v7277_v38  ;;  %10869 = vst [vmem:[#allocation55_spill] sm:$0xff] %v7281_v9  ;;  %v7300_v9 = vrot.slane %v860_v46, %v6389_v41  ;;  %v7303_v38 = vrot.slane %v860_v46, %v6392_v42  ;;  %v7318_v12 = vrot.slane %v861_v54, %v6375_v36 }
 0x16d   :  { %10870 = vst [vmem:[#allocation56_spill] sm:$0xff] %v7285_v22  ;;  %10871 = vst [vmem:[#allocation57_spill] sm:$0xff] %v7292_v28  ;;  %v7306_v22 = vrot.slane %v860_v46, %v6395_v43  ;;  %v7312_v28 = vrot.slane %v860_v46, %v6403_v47  ;;  %v7339_v36 = vrot.slane %v861_v54, %v6406_v48 }
 0x16e   :  { %10872 = vst [vmem:[#allocation58_spill] sm:$0xff] %v7295_v39  ;;  %10873 = vst [vmem:[#allocation59_spill] sm:$0xff] %v7300_v9  ;;  %v7315_v39 = vrot.slane %v860_v46, %v6406_v48  ;;  %v7321_v9 = vrot.slane %v861_v54, %v6378_v37  ;;  %v7336_v46 = vrot.slane %v861_v54, %v6403_v47 }
 0x16f   :  { %10874 = vst [vmem:[#allocation60_spill] sm:$0xff] %v7303_v38  ;;  %10875 = vst [vmem:[#allocation61_spill] sm:$0xff] %v7306_v22  ;;  %v7324_v38 = vrot.slane %v861_v54, %v6389_v41  ;;  %v7327_v22 = vrot.slane %v861_v54, %v6392_v42  ;;  %v920_v37 = vrot.slane %v6594_v50, %v6398_v44 }
 0x170   :  { %10876 = vst [vmem:[#allocation62_spill] sm:$0xff] %v7309_v10  ;;  %10877 = vst [vmem:[#allocation63_spill] sm:$0xff] %v7312_v28  ;;  %v7330_v10 = vrot.slane %v861_v54, %v6395_v43  ;;  %v7333_v28 = vrot.slane %v861_v54, %v6398_v44  ;;  %v931_v41 = vrot.slane %v6594_v50, %v6403_v47 }
 0x171   :  { %926 = vbcast.lane.b32.xlu1 %v920_v37, 264  ;;  %922 = vbcast.lane.b32.xlu0 %v920_v37, 256  ;;  %v942_v42 = vrot.slane %v6594_v50, %v6406_v48 }
 0x175   :  { %937 = vbcast.lane.b32.xlu1 %v931_v41, 264  ;;  %933 = vbcast.lane.b32.xlu0 %v931_v41, 256 }
 0x179   :  { %948 = vbcast.lane.b32.xlu1 %v942_v42, 264  ;;  %944 = vbcast.lane.b32.xlu0 %v942_v42, 256 }
 0x17d   :  { %1135 = vbcast.lane.b32.xlu1 %v6868_v60, 264  ;;  %1131 = vbcast.lane.b32.xlu0 %v6868_v60, 256 }
 0x181   :  { %1146 = vbcast.lane.b32.xlu1 %v6872_v26, 264  ;;  %1142 = vbcast.lane.b32.xlu0 %v6872_v26, 256 }
 0x185   :  { %1157 = vbcast.lane.b32.xlu1 %v6888_v17, 264  ;;  %1153 = vbcast.lane.b32.xlu0 %v6888_v17, 256 }
 0x189   :  { %1168 = vbcast.lane.b32.xlu1 %v6892_v49, 264  ;;  %1164 = vbcast.lane.b32.xlu0 %v6892_v49, 256 }
 0x18d   :  { %1179 = vbcast.lane.b32.xlu1 %v6896_v53, 264  ;;  %1175 = vbcast.lane.b32.xlu0 %v6896_v53, 256 }
 0x191   :  { %1190 = vbcast.lane.b32.xlu1 %v6901_v61, 264  ;;  %1186 = vbcast.lane.b32.xlu0 %v6901_v61, 256 }
 0x195   :  { %1201 = vbcast.lane.b32.xlu1 %v6905_v63, 264  ;;  %1197 = vbcast.lane.b32.xlu0 %v6905_v63, 256 }
 0x199   :  { %1212 = vbcast.lane.b32.xlu1 %v6909_v33, 264  ;;  %1208 = vbcast.lane.b32.xlu0 %v6909_v33, 256 }
 0x19d   :  { %1047 = vbcast.lane.b32.xlu1 %v6913_v14, 264  ;;  %1043 = vbcast.lane.b32.xlu0 %v6913_v14, 256 }
 0x1a1   :  { %1058 = vbcast.lane.b32.xlu1 %v6917_v23, 264  ;;  %1054 = vbcast.lane.b32.xlu0 %v6917_v23, 256 }
 0x1a2   :  { %v7373_v43 = vpop.permute.xlu1 %959  ;;  %v7375_v44 = vpop.permute.xlu0 %955 }
 0x1a5   :  { %1069 = vbcast.lane.b32.xlu1 %v6921_v19, 264  ;;  %1065 = vbcast.lane.b32.xlu0 %v6921_v19, 256 }
 0x1a9   :  { %1080 = vbcast.lane.b32.xlu1 %v6925_v62, 264  ;;  %1076 = vbcast.lane.b32.xlu0 %v6925_v62, 256 }
 0x1aa   :  { %v7381_v47 = vpop.permute.xlu1 %970  ;;  %v7383_v48 = vpop.permute.xlu0 %966 }
 0x1ad   :  { %1091 = vbcast.lane.b32.xlu1 %v6929_v20, 264  ;;  %1087 = vbcast.lane.b32.xlu0 %v6929_v20, 256 }
 0x1b1   :  { %1102 = vbcast.lane.b32.xlu1 %v6933_v11, 264  ;;  %1098 = vbcast.lane.b32.xlu0 %v6933_v11, 256 }
 0x1b4   :  { %v7387_v50 = vpop.permute.xlu1 %981  ;;  %v7389_v60 = vpop.permute.xlu0 %977 }
 0x1b5   :  { %1113 = vbcast.lane.b32.xlu1 %v6937_v25, 264  ;;  %1109 = vbcast.lane.b32.xlu0 %v6937_v25, 256 }
 0x1b8   :  { %v7393_v26 = vpop.permute.xlu1 %992  ;;  %v7395_v31 = vpop.permute.xlu0 %988 }
 0x1b9   :  { %1124 = vbcast.lane.b32.xlu1 %v6941_v56, 264  ;;  %1120 = vbcast.lane.b32.xlu0 %v6941_v56, 256 }
 0x1bc   :  { %v7399_v17 = vpop.permute.xlu1 %1003  ;;  %v7401_v49 = vpop.permute.xlu0 %999 }
 0x1bd   :  { %1311 = vbcast.lane.b32.xlu1 %v6945_v30, 264  ;;  %1307 = vbcast.lane.b32.xlu0 %v6945_v30, 256 }
 0x1c0   :  { %v7405_v53 = vpop.permute.xlu1 %1014  ;;  %v7407_v61 = vpop.permute.xlu0 %1010 }
 0x1c1   :  { %1322 = vbcast.lane.b32.xlu1 %v6949_v0, 264  ;;  %1318 = vbcast.lane.b32.xlu0 %v6949_v0, 256 }
 0x1c4   :  { %v7411_v63 = vpop.permute.xlu1 %1025  ;;  %v7413_v33 = vpop.permute.xlu0 %1021 }
 0x1c5   :  { %1333 = vbcast.lane.b32.xlu1 %v6953_v55, 264  ;;  %1329 = vbcast.lane.b32.xlu0 %v6953_v55, 256  ;;  %10878 = vst [vmem:[#allocation64_spill] sm:$0xff] %v7411_v63  ;;  %10879 = vst [vmem:[#allocation65_spill] sm:$0xff] %v7413_v33  ;;  %v10882_v55 = vld [vmem:[#allocation6_spill] sm:$0xff] }
 0x1c8   :  { %v7417_v14 = vpop.permute.xlu1 %1036  ;;  %v7419_v23 = vpop.permute.xlu0 %1032 }
 0x1c9   :  { %1344 = vbcast.lane.b32.xlu1 %v6957_v3, 264  ;;  %1340 = vbcast.lane.b32.xlu0 %v6957_v3, 256  ;;  %10880 = vst [vmem:[#allocation66_spill] sm:$0xff] %v7417_v14  ;;  %10881 = vst [vmem:[#allocation67_spill] sm:$0xff] %v7419_v23 }
 0x1cc   :  { %v7423_v19 = vpop.permute.xlu1 %878 }
 0x1cd   :  { %1355 = vbcast.lane.b32.xlu1 %v6961_v57, 264  ;;  %1351 = vbcast.lane.b32.xlu0 %v6961_v57, 256  ;;  %v7425_v62 = vpop.permute.xlu0 %867 }
 0x1d0   :  { %v7429_v20 = vpop.permute.xlu1 %882 }
 0x1d1   :  { %1366 = vbcast.lane.b32.xlu1 %v6965_v7, 264  ;;  %1362 = vbcast.lane.b32.xlu0 %v6965_v7, 256  ;;  %v7431_v11 = vpop.permute.xlu0 %871  ;;  %v10883_v7 = vld [vmem:[#allocation7_spill] sm:$0xff] }
 0x1d4   :  { %v7435_v25 = vpop.permute.xlu1 %893 }
 0x1d5   :  { %1377 = vbcast.lane.b32.xlu1 %v6969_v21, 264  ;;  %1373 = vbcast.lane.b32.xlu0 %v6969_v21, 256  ;;  %v7437_v56 = vpop.permute.xlu0 %889 }
 0x1d8   :  { %v7441_v30 = vpop.permute.xlu1 %904 }
 0x1d9   :  { %1388 = vbcast.lane.b32.xlu1 %v6973_v13, 264  ;;  %1384 = vbcast.lane.b32.xlu0 %v6973_v13, 256  ;;  %v7443_v0 = vpop.permute.xlu0 %900 }
 0x1dc   :  { %v7447_v3 = vpop.permute.xlu1 %915 }
 0x1dd   :  { %1223 = vbcast.lane.b32.xlu1 %v10882_v55, 264  ;;  %1219 = vbcast.lane.b32.xlu0 %v10882_v55, 256  ;;  %v7449_v57 = vpop.permute.xlu0 %911  ;;  %v10884_v55 = vld [vmem:[#allocation8_spill] sm:$0xff] }
 0x1e1   :  { %1234 = vbcast.lane.b32.xlu1 %v10883_v7, 264  ;;  %1230 = vbcast.lane.b32.xlu0 %v10883_v7, 256 }
 0x1e3   :  { %v7453_v21 = vpop.permute.xlu1 %926  ;;  %v7455_v54 = vpop.permute.xlu0 %922 }
 0x1e5   :  { %1245 = vbcast.lane.b32.xlu1 %v6993_v2, 264  ;;  %1241 = vbcast.lane.b32.xlu0 %v6993_v2, 256  ;;  %v10887_v2 = vld [vmem:[#allocation9_spill] sm:$0xff] }
 0x1e7   :  { %v7459_v13 = vpop.permute.xlu1 %937  ;;  %v7461_v37 = vpop.permute.xlu0 %933 }
 0x1e9   :  { %1256 = vbcast.lane.b32.xlu1 %v7000_v58, 264  ;;  %1252 = vbcast.lane.b32.xlu0 %v7000_v58, 256 }
 0x1eb   :  { %v7465_v41 = vpop.permute.xlu1 %948  ;;  %v7467_v42 = vpop.permute.xlu0 %944 }
 0x1ed   :  { %1267 = vbcast.lane.b32.xlu1 %v10884_v55, 264  ;;  %1263 = vbcast.lane.b32.xlu0 %v10884_v55, 256  ;;  %v10892_v55 = vld [vmem:[#allocation10_spill] sm:$0xff] }
 0x1ef   :  { %v7471_v7 = vpop.permute.xlu1 %1135  ;;  %v7473_v14 = vpop.permute.xlu0 %1131 }
 0x1f0   :  { %10885 = vst [vmem:[#allocation6_spill] sm:$0xff] %v7471_v7  ;;  %10886 = vst [vmem:[#allocation7_spill] sm:$0xff] %v7473_v14 }
 0x1f1   :  { %1278 = vbcast.lane.b32.xlu1 %v10887_v2, 264  ;;  %1274 = vbcast.lane.b32.xlu0 %v10887_v2, 256  ;;  %v10895_v2 = vld [vmem:[#allocation11_spill] sm:$0xff] }
 0x1f3   :  { %v7477_v23 = vpop.permute.xlu1 %1146  ;;  %v7479_v63 = vpop.permute.xlu0 %1142 }
 0x1f4   :  { %10888 = vst [vmem:[#allocation8_spill] sm:$0xff] %v7477_v23  ;;  %10889 = vst [vmem:[#allocation9_spill] sm:$0xff] %v7479_v63 }
 0x1f5   :  { %1289 = vbcast.lane.b32.xlu1 %v7012_v29, 264  ;;  %1285 = vbcast.lane.b32.xlu0 %v7012_v29, 256  ;;  %v10898_v29 = vld [vmem:[#allocation12_spill] sm:$0xff] }
 0x1f7   :  { %v7483_v58 = vpop.permute.xlu1 %1157  ;;  %v7485_v33 = vpop.permute.xlu0 %1153 }
 0x1f8   :  { %10890 = vst [vmem:[#allocation68_spill] sm:$0xff] %v7483_v58  ;;  %10891 = vst [vmem:[#allocation69_spill] sm:$0xff] %v7485_v33 }
 0x1f9   :  { %1300 = vbcast.lane.b32.xlu1 %v10892_v55, 264  ;;  %1296 = vbcast.lane.b32.xlu0 %v10892_v55, 256 }
 0x1fb   :  { %v7489_v7 = vpop.permute.xlu1 %1168  ;;  %v7491_v14 = vpop.permute.xlu0 %1164 }
 0x1fc   :  { %10893 = vst [vmem:[#allocation10_spill] sm:$0xff] %v7489_v7  ;;  %10894 = vst [vmem:[#allocation70_spill] sm:$0xff] %v7491_v14 }
 0x1fd   :  { %1487 = vbcast.lane.b32.xlu1 %v10895_v2, 264  ;;  %1483 = vbcast.lane.b32.xlu0 %v10895_v2, 256  ;;  %v10903_v2 = vld [vmem:[#allocation13_spill] sm:$0xff] }
 0x1ff   :  { %v7495_v23 = vpop.permute.xlu1 %1179  ;;  %v7497_v63 = vpop.permute.xlu0 %1175 }
 0x200   :  { %10896 = vst [vmem:[#allocation11_spill] sm:$0xff] %v7495_v23  ;;  %10897 = vst [vmem:[#allocation71_spill] sm:$0xff] %v7497_v63 }
 0x201   :  { %1498 = vbcast.lane.b32.xlu1 %v10898_v29, 264  ;;  %1494 = vbcast.lane.b32.xlu0 %v10898_v29, 256  ;;  %v10906_v29 = vld [vmem:[#allocation14_spill] sm:$0xff] }
 0x203   :  { %v7501_v58 = vpop.permute.xlu1 %1190  ;;  %v7503_v33 = vpop.permute.xlu0 %1186 }
 0x204   :  { %10899 = vst [vmem:[#allocation12_spill] sm:$0xff] %v7501_v58  ;;  %10900 = vst [vmem:[#allocation72_spill] sm:$0xff] %v7503_v33 }
 0x205   :  { %1509 = vbcast.lane.b32.xlu1 %v7028_v4, 264  ;;  %1505 = vbcast.lane.b32.xlu0 %v7028_v4, 256 }
 0x207   :  { %v7507_v55 = vpop.permute.xlu1 %1201  ;;  %v7509_v7 = vpop.permute.xlu0 %1197 }
 0x208   :  { %10901 = vst [vmem:[#allocation73_spill] sm:$0xff] %v7507_v55  ;;  %10902 = vst [vmem:[#allocation74_spill] sm:$0xff] %v7509_v7 }
 0x209   :  { %1520 = vbcast.lane.b32.xlu1 %v10903_v2, 264  ;;  %1516 = vbcast.lane.b32.xlu0 %v10903_v2, 256 }
 0x20b   :  { %v7513_v23 = vpop.permute.xlu1 %1212  ;;  %v7515_v63 = vpop.permute.xlu0 %1208 }
 0x20c   :  { %10904 = vst [vmem:[#allocation13_spill] sm:$0xff] %v7513_v23  ;;  %10905 = vst [vmem:[#allocation75_spill] sm:$0xff] %v7515_v63 }
 0x20d   :  { %1531 = vbcast.lane.b32.xlu1 %v10906_v29, 264  ;;  %1527 = vbcast.lane.b32.xlu0 %v10906_v29, 256 }
 0x20f   :  { %v7519_v58 = vpop.permute.xlu1 %1047  ;;  %v7521_v33 = vpop.permute.xlu0 %1043 }
 0x211   :  { %1542 = vbcast.lane.b32.xlu1 %v7040_v34, 264  ;;  %1538 = vbcast.lane.b32.xlu0 %v7040_v34, 256  ;;  %v10911_v34 = vld [vmem:[#allocation15_spill] sm:$0xff] }
 0x213   :  { %v7525_v4 = vpop.permute.xlu1 %1058  ;;  %v7527_v55 = vpop.permute.xlu0 %1054 }
 0x215   :  { %1553 = vbcast.lane.b32.xlu1 %v7053_v16, 264  ;;  %1549 = vbcast.lane.b32.xlu0 %v7053_v16, 256  ;;  %v10914_v16 = vld [vmem:[#allocation16_spill] sm:$0xff] }
 0x217   :  { %v7531_v2 = vpop.permute.xlu1 %1069  ;;  %v7533_v23 = vpop.permute.xlu0 %1065 }
 0x218   :  { %10907 = vst [vmem:[#allocation14_spill] sm:$0xff] %v7531_v2  ;;  %10908 = vst [vmem:[#allocation76_spill] sm:$0xff] %v7533_v23 }
 0x219   :  { %1564 = vbcast.lane.b32.xlu1 %v7057_v24, 264  ;;  %1560 = vbcast.lane.b32.xlu0 %v7057_v24, 256  ;;  %v10917_v24 = vld [vmem:[#allocation17_spill] sm:$0xff] }
 0x21b   :  { %v7537_v29 = vpop.permute.xlu1 %1080  ;;  %v7539_v63 = vpop.permute.xlu0 %1076 }
 0x21c   :  { %10909 = vst [vmem:[#allocation77_spill] sm:$0xff] %v7537_v29  ;;  %10910 = vst [vmem:[#allocation78_spill] sm:$0xff] %v7539_v63 }
 0x21d   :  { %1399 = vbcast.lane.b32.xlu1 %v10911_v34, 264  ;;  %1395 = vbcast.lane.b32.xlu0 %v10911_v34, 256  ;;  %v10920_v34 = vld [vmem:[#allocation18_spill] sm:$0xff] }
 0x21f   :  { %v7543_v7 = vpop.permute.xlu1 %1091  ;;  %v7545_v14 = vpop.permute.xlu0 %1087 }
 0x220   :  { %10912 = vst [vmem:[#allocation15_spill] sm:$0xff] %v7543_v7  ;;  %10913 = vst [vmem:[#allocation79_spill] sm:$0xff] %v7545_v14 }
 0x221   :  { %1410 = vbcast.lane.b32.xlu1 %v10914_v16, 264  ;;  %1406 = vbcast.lane.b32.xlu0 %v10914_v16, 256  ;;  %v10922_v16 = vld [vmem:[#allocation19_spill] sm:$0xff] }
 0x223   :  { %v7549_v2 = vpop.permute.xlu1 %1102  ;;  %v7551_v23 = vpop.permute.xlu0 %1098 }
 0x224   :  { %10915 = vst [vmem:[#allocation16_spill] sm:$0xff] %v7549_v2  ;;  %10916 = vst [vmem:[#allocation80_spill] sm:$0xff] %v7551_v23 }
 0x225   :  { %1421 = vbcast.lane.b32.xlu1 %v10917_v24, 264  ;;  %1417 = vbcast.lane.b32.xlu0 %v10917_v24, 256  ;;  %v10925_v24 = vld [vmem:[#allocation20_spill] sm:$0xff] }
 0x227   :  { %v7555_v29 = vpop.permute.xlu1 %1113  ;;  %v7557_v63 = vpop.permute.xlu0 %1109 }
 0x228   :  { %10918 = vst [vmem:[#allocation17_spill] sm:$0xff] %v7555_v29  ;;  %10919 = vst [vmem:[#allocation81_spill] sm:$0xff] %v7557_v63 }
 0x229   :  { %1432 = vbcast.lane.b32.xlu1 %v10920_v34, 264  ;;  %1428 = vbcast.lane.b32.xlu0 %v10920_v34, 256 }
 0x22b   :  { %v7561_v7 = vpop.permute.xlu1 %1124  ;;  %v7563_v14 = vpop.permute.xlu0 %1120 }
 0x22c   :  { %10921 = vst [vmem:[#allocation18_spill] sm:$0xff] %v7561_v7 }
 0x22d   :  { %1443 = vbcast.lane.b32.xlu1 %v10922_v16, 264  ;;  %1439 = vbcast.lane.b32.xlu0 %v10922_v16, 256  ;;  %v10930_v16 = vld [vmem:[#allocation21_spill] sm:$0xff] }
 0x22f   :  { %v7567_v2 = vpop.permute.xlu1 %1311  ;;  %v7569_v23 = vpop.permute.xlu0 %1307 }
 0x230   :  { %10923 = vst [vmem:[#allocation19_spill] sm:$0xff] %v7567_v2  ;;  %10924 = vst [vmem:[#allocation82_spill] sm:$0xff] %v7569_v23 }
 0x231   :  { %1454 = vbcast.lane.b32.xlu1 %v10925_v24, 264  ;;  %1450 = vbcast.lane.b32.xlu0 %v10925_v24, 256  ;;  %v10933_v24 = vld [vmem:[#allocation22_spill] sm:$0xff] }
 0x233   :  { %v7573_v29 = vpop.permute.xlu1 %1322  ;;  %v7575_v63 = vpop.permute.xlu0 %1318 }
 0x234   :  { %10926 = vst [vmem:[#allocation20_spill] sm:$0xff] %v7573_v29  ;;  %10927 = vst [vmem:[#allocation83_spill] sm:$0xff] %v7575_v63 }
 0x235   :  { %1465 = vbcast.lane.b32.xlu1 %v7085_v45, 264  ;;  %1461 = vbcast.lane.b32.xlu0 %v7085_v45, 256 }
 0x237   :  { %v7579_v34 = vpop.permute.xlu1 %1333  ;;  %v7581_v7 = vpop.permute.xlu0 %1329 }
 0x238   :  { %10928 = vst [vmem:[#allocation84_spill] sm:$0xff] %v7579_v34  ;;  %10929 = vst [vmem:[#allocation85_spill] sm:$0xff] %v7581_v7 }
 0x239   :  { %1476 = vbcast.lane.b32.xlu1 %v10930_v16, 264  ;;  %1472 = vbcast.lane.b32.xlu0 %v10930_v16, 256  ;;  %v10938_v16 = vld [vmem:[#allocation23_spill] sm:$0xff] }
 0x23b   :  { %v7585_v2 = vpop.permute.xlu1 %1344  ;;  %v7587_v23 = vpop.permute.xlu0 %1340 }
 0x23c   :  { %10931 = vst [vmem:[#allocation21_spill] sm:$0xff] %v7585_v2  ;;  %10932 = vst [vmem:[#allocation86_spill] sm:$0xff] %v7587_v23 }
 0x23d   :  { %1575 = vbcast.lane.b32.xlu1 %v10933_v24, 264  ;;  %1571 = vbcast.lane.b32.xlu0 %v10933_v24, 256  ;;  %v10941_v24 = vld [vmem:[#allocation24_spill] sm:$0xff] }
 0x23f   :  { %v7591_v63 = vpop.permute.xlu1 %1355  ;;  %v7593_v29 = vpop.permute.xlu0 %1351 }
 0x240   :  { %10934 = vst [vmem:[#allocation22_spill] sm:$0xff] %v7591_v63  ;;  %10935 = vst [vmem:[#allocation87_spill] sm:$0xff] %v7593_v29 }
 0x241   :  { %1586 = vbcast.lane.b32.xlu1 %v7097_v59, 264  ;;  %1582 = vbcast.lane.b32.xlu0 %v7097_v59, 256  ;;  %v10944_v59 = vld [vmem:[#allocation25_spill] sm:$0xff] }
 0x243   :  { %v7597_v45 = vpop.permute.xlu1 %1366  ;;  %v7599_v7 = vpop.permute.xlu0 %1362 }
 0x244   :  { %10936 = vst [vmem:[#allocation88_spill] sm:$0xff] %v7597_v45  ;;  %10937 = vst [vmem:[#allocation89_spill] sm:$0xff] %v7599_v7 }
 0x245   :  { %1597 = vbcast.lane.b32.xlu1 %v10938_v16, 264  ;;  %1593 = vbcast.lane.b32.xlu0 %v10938_v16, 256 }
 0x247   :  { %v7603_v2 = vpop.permute.xlu1 %1377  ;;  %v7605_v23 = vpop.permute.xlu0 %1373 }
 0x248   :  { %10939 = vst [vmem:[#allocation23_spill] sm:$0xff] %v7603_v2  ;;  %10940 = vst [vmem:[#allocation90_spill] sm:$0xff] %v7605_v23 }
 0x249   :  { %1608 = vbcast.lane.b32.xlu1 %v10941_v24, 264  ;;  %1604 = vbcast.lane.b32.xlu0 %v10941_v24, 256 }
 0x24b   :  { %v7609_v63 = vpop.permute.xlu1 %1388  ;;  %v7611_v29 = vpop.permute.xlu0 %1384 }
 0x24c   :  { %10942 = vst [vmem:[#allocation24_spill] sm:$0xff] %v7609_v63  ;;  %10943 = vst [vmem:[#allocation91_spill] sm:$0xff] %v7611_v29 }
 0x24d   :  { %1619 = vbcast.lane.b32.xlu1 %v10944_v59, 264  ;;  %1615 = vbcast.lane.b32.xlu0 %v10944_v59, 256  ;;  %v10948_v59 = vld [vmem:[#allocation26_spill] sm:$0xff] }
 0x24f   :  { %v7615_v45 = vpop.permute.xlu1 %1223  ;;  %v7617_v7 = vpop.permute.xlu0 %1219 }
 0x251   :  { %1630 = vbcast.lane.b32.xlu1 %v7120_v8, 264  ;;  %1626 = vbcast.lane.b32.xlu0 %v7120_v8, 256  ;;  %v10951_v8 = vld [vmem:[#allocation27_spill] sm:$0xff] }
 0x253   :  { %v7621_v16 = vpop.permute.xlu1 %1234  ;;  %v7623_v2 = vpop.permute.xlu0 %1230 }
 0x254   :  { %10945 = vst [vmem:[#allocation25_spill] sm:$0xff] %v7621_v16 }
 0x255   :  { %1641 = vbcast.lane.b32.xlu1 %v7124_v27, 264  ;;  %1637 = vbcast.lane.b32.xlu0 %v7124_v27, 256  ;;  %v10954_v27 = vld [vmem:[#allocation28_spill] sm:$0xff] }
 0x257   :  { %v7627_v24 = vpop.permute.xlu1 %1245  ;;  %v7629_v63 = vpop.permute.xlu0 %1241 }
 0x258   :  { %10946 = vst [vmem:[#allocation92_spill] sm:$0xff] %v7627_v24  ;;  %10947 = vst [vmem:[#allocation93_spill] sm:$0xff] %v7629_v63 }
 0x259   :  { %1652 = vbcast.lane.b32.xlu1 %v10948_v59, 264  ;;  %1648 = vbcast.lane.b32.xlu0 %v10948_v59, 256  ;;  %v10957_v59 = vld [vmem:[#allocation29_spill] sm:$0xff] }
 0x25b   :  { %v7633_v29 = vpop.permute.xlu1 %1256  ;;  %v7635_v23 = vpop.permute.xlu0 %1252 }
 0x25c   :  { %10949 = vst [vmem:[#allocation26_spill] sm:$0xff] %v7633_v29  ;;  %10950 = vst [vmem:[#allocation94_spill] sm:$0xff] %v7635_v23 }
 0x25d   :  { %1663 = vbcast.lane.b32.xlu1 %v10951_v8, 264  ;;  %1659 = vbcast.lane.b32.xlu0 %v10951_v8, 256  ;;  %v10960_v8 = vld [vmem:[#allocation30_spill] sm:$0xff] }
 0x25f   :  { %v7639_v34 = vpop.permute.xlu1 %1267  ;;  %v7641_v16 = vpop.permute.xlu0 %1263 }
 0x260   :  { %10952 = vst [vmem:[#allocation27_spill] sm:$0xff] %v7639_v34  ;;  %10953 = vst [vmem:[#allocation95_spill] sm:$0xff] %v7641_v16 }
 0x261   :  { %1674 = vbcast.lane.b32.xlu1 %v10954_v27, 264  ;;  %1670 = vbcast.lane.b32.xlu0 %v10954_v27, 256  ;;  %v10963_v27 = vld [vmem:[#allocation31_spill] sm:$0xff] }
 0x263   :  { %v7645_v24 = vpop.permute.xlu1 %1278  ;;  %v7647_v63 = vpop.permute.xlu0 %1274 }
 0x264   :  { %10955 = vst [vmem:[#allocation28_spill] sm:$0xff] %v7645_v24  ;;  %10956 = vst [vmem:[#allocation96_spill] sm:$0xff] %v7647_v63 }
 0x265   :  { %1685 = vbcast.lane.b32.xlu1 %v10957_v59, 264  ;;  %1681 = vbcast.lane.b32.xlu0 %v10957_v59, 256  ;;  %v10966_v59 = vld [vmem:[#allocation32_spill] sm:$0xff] }
 0x267   :  { %v7651_v29 = vpop.permute.xlu1 %1289  ;;  %v7653_v23 = vpop.permute.xlu0 %1285 }
 0x268   :  { %10958 = vst [vmem:[#allocation29_spill] sm:$0xff] %v7651_v29  ;;  %10959 = vst [vmem:[#allocation97_spill] sm:$0xff] %v7653_v23 }
 0x269   :  { %1696 = vbcast.lane.b32.xlu1 %v10960_v8, 264  ;;  %1692 = vbcast.lane.b32.xlu0 %v10960_v8, 256  ;;  %v10969_v8 = vld [vmem:[#allocation33_spill] sm:$0xff] }
 0x26b   :  { %v7657_v34 = vpop.permute.xlu1 %1300  ;;  %v7659_v16 = vpop.permute.xlu0 %1296 }
 0x26c   :  { %10961 = vst [vmem:[#allocation30_spill] sm:$0xff] %v7657_v34  ;;  %10962 = vst [vmem:[#allocation98_spill] sm:$0xff] %v7659_v16 }
 0x26d   :  { %1707 = vbcast.lane.b32.xlu1 %v10963_v27, 264  ;;  %1703 = vbcast.lane.b32.xlu0 %v10963_v27, 256 }
 0x26f   :  { %v7663_v24 = vpop.permute.xlu1 %1487  ;;  %v7665_v63 = vpop.permute.xlu0 %1483 }
 0x270   :  { %10964 = vst [vmem:[#allocation31_spill] sm:$0xff] %v7663_v24  ;;  %10965 = vst [vmem:[#allocation99_spill] sm:$0xff] %v7665_v63 }
 0x271   :  { %1718 = vbcast.lane.b32.xlu1 %v10966_v59, 264  ;;  %1714 = vbcast.lane.b32.xlu0 %v10966_v59, 256 }
 0x273   :  { %v7669_v29 = vpop.permute.xlu1 %1498  ;;  %v7671_v23 = vpop.permute.xlu0 %1494 }
 0x274   :  { %10967 = vst [vmem:[#allocation32_spill] sm:$0xff] %v7669_v29  ;;  %10968 = vst [vmem:[#allocation100_spill] sm:$0xff] %v7671_v23 }
 0x275   :  { %1729 = vbcast.lane.b32.xlu1 %v10969_v8, 264  ;;  %1725 = vbcast.lane.b32.xlu0 %v10969_v8, 256  ;;  %v10976_v8 = vld [vmem:[#allocation34_spill] sm:$0xff] }
 0x277   :  { %v7675_v34 = vpop.permute.xlu1 %1509  ;;  %v7677_v16 = vpop.permute.xlu0 %1505 }
 0x278   :  { %10970 = vst [vmem:[#allocation33_spill] sm:$0xff] %v7675_v34  ;;  %10971 = vst [vmem:[#allocation101_spill] sm:$0xff] %v7677_v16 }
 0x279   :  { %1740 = vbcast.lane.b32.xlu1 %v7160_v6, 264  ;;  %1736 = vbcast.lane.b32.xlu0 %v7160_v6, 256  ;;  %v10979_v6 = vld [vmem:[#allocation35_spill] sm:$0xff] }
 0x27b   :  { %v7681_v27 = vpop.permute.xlu1 %1520  ;;  %v7683_v24 = vpop.permute.xlu0 %1516 }
 0x27c   :  { %10972 = vst [vmem:[#allocation102_spill] sm:$0xff] %v7681_v27  ;;  %10973 = vst [vmem:[#allocation103_spill] sm:$0xff] %v7683_v24 }
 0x27d   :  { %1751 = vbcast.lane.b32.xlu1 %v7164_v32, 264  ;;  %1747 = vbcast.lane.b32.xlu0 %v7164_v32, 256  ;;  %v10982_v32 = vld [vmem:[#allocation36_spill] sm:$0xff] }
 0x27f   :  { %v7687_v59 = vpop.permute.xlu1 %1531  ;;  %v7689_v23 = vpop.permute.xlu0 %1527 }
 0x280   :  { %10974 = vst [vmem:[#allocation104_spill] sm:$0xff] %v7687_v59  ;;  %10975 = vst [vmem:[#allocation105_spill] sm:$0xff] %v7689_v23 }
 0x281   :  { %1762 = vbcast.lane.b32.xlu1 %v10976_v8, 264  ;;  %1758 = vbcast.lane.b32.xlu0 %v10976_v8, 256 }
 0x283   :  { %v7693_v16 = vpop.permute.xlu1 %1542  ;;  %v7695_v34 = vpop.permute.xlu0 %1538 }
 0x284   :  { %10977 = vst [vmem:[#allocation34_spill] sm:$0xff] %v7693_v16  ;;  %10978 = vst [vmem:[#allocation106_spill] sm:$0xff] %v7695_v34 }
 0x285   :  { %1773 = vbcast.lane.b32.xlu1 %v10979_v6, 264  ;;  %1769 = vbcast.lane.b32.xlu0 %v10979_v6, 256  ;;  %v10985_v6 = vld [vmem:[#allocation37_spill] sm:$0xff] }
 0x287   :  { %v7699_v24 = vpop.permute.xlu1 %1553  ;;  %v7701_v27 = vpop.permute.xlu0 %1549 }
 0x288   :  { %10980 = vst [vmem:[#allocation35_spill] sm:$0xff] %v7699_v24  ;;  %10981 = vst [vmem:[#allocation107_spill] sm:$0xff] %v7701_v27 }
 0x289   :  { %1784 = vbcast.lane.b32.xlu1 %v10982_v32, 264  ;;  %1780 = vbcast.lane.b32.xlu0 %v10982_v32, 256  ;;  %v10987_v32 = vld [vmem:[#allocation38_spill] sm:$0xff] }
 0x28b   :  { %v7705_v59 = vpop.permute.xlu1 %1564  ;;  %v7707_v23 = vpop.permute.xlu0 %1560 }
 0x28c   :  { %10983 = vst [vmem:[#allocation36_spill] sm:$0xff] %v7705_v59  ;;  %10984 = vst [vmem:[#allocation108_spill] sm:$0xff] %v7707_v23 }
 0x28d   :  { %1795 = vbcast.lane.b32.xlu1 %v7182_v1, 264  ;;  %1791 = vbcast.lane.b32.xlu0 %v7182_v1, 256  ;;  %v10990_v1 = vld [vmem:[#allocation39_spill] sm:$0xff] }
 0x28f   :  { %v7711_v8 = vpop.permute.xlu1 %1399  ;;  %v7713_v16 = vpop.permute.xlu0 %1395 }
 0x291   :  { %1806 = vbcast.lane.b32.xlu1 %v10985_v6, 264  ;;  %1802 = vbcast.lane.b32.xlu0 %v10985_v6, 256  ;;  %v10993_v6 = vld [vmem:[#allocation40_spill] sm:$0xff] }
 0x293   :  { %v7717_v24 = vpop.permute.xlu1 %1410  ;;  %v7719_v27 = vpop.permute.xlu0 %1406 }
 0x294   :  { %10986 = vst [vmem:[#allocation37_spill] sm:$0xff] %v7717_v24 }
 0x295   :  { %1817 = vbcast.lane.b32.xlu1 %v10987_v32, 264  ;;  %1813 = vbcast.lane.b32.xlu0 %v10987_v32, 256  ;;  %v10996_v32 = vld [vmem:[#allocation41_spill] sm:$0xff] }
 0x297   :  { %v7723_v59 = vpop.permute.xlu1 %1421  ;;  %v7725_v23 = vpop.permute.xlu0 %1417 }
 0x298   :  { %10988 = vst [vmem:[#allocation38_spill] sm:$0xff] %v7723_v59  ;;  %10989 = vst [vmem:[#allocation109_spill] sm:$0xff] %v7725_v23 }
 0x299   :  { %1828 = vbcast.lane.b32.xlu1 %v10990_v1, 264  ;;  %1824 = vbcast.lane.b32.xlu0 %v10990_v1, 256  ;;  %v10999_v1 = vld [vmem:[#allocation42_spill] sm:$0xff] }
 0x29b   :  { %v7729_v34 = vpop.permute.xlu1 %1432  ;;  %v7731_v29 = vpop.permute.xlu0 %1428 }
 0x29c   :  { %10991 = vst [vmem:[#allocation39_spill] sm:$0xff] %v7729_v34  ;;  %10992 = vst [vmem:[#allocation110_spill] sm:$0xff] %v7731_v29 }
 0x29d   :  { %1839 = vbcast.lane.b32.xlu1 %v10993_v6, 264  ;;  %1835 = vbcast.lane.b32.xlu0 %v10993_v6, 256  ;;  %v11002_v6 = vld [vmem:[#allocation43_spill] sm:$0xff] }
 0x29f   :  { %v7735_v63 = vpop.permute.xlu1 %1443  ;;  %v7737_v24 = vpop.permute.xlu0 %1439 }
 0x2a0   :  { %10994 = vst [vmem:[#allocation40_spill] sm:$0xff] %v7735_v63  ;;  %10995 = vst [vmem:[#allocation111_spill] sm:$0xff] %v7737_v24 }
 0x2a1   :  { %1850 = vbcast.lane.b32.xlu1 %v10996_v32, 264  ;;  %1846 = vbcast.lane.b32.xlu0 %v10996_v32, 256  ;;  %v11004_v32 = vld [vmem:[#allocation44_spill] sm:$0xff] }
 0x2a3   :  { %v7741_v59 = vpop.permute.xlu1 %1454  ;;  %v7743_v23 = vpop.permute.xlu0 %1450 }
 0x2a4   :  { %10997 = vst [vmem:[#allocation41_spill] sm:$0xff] %v7741_v59  ;;  %10998 = vst [vmem:[#allocation112_spill] sm:$0xff] %v7743_v23 }
 0x2a5   :  { %1861 = vbcast.lane.b32.xlu1 %v10999_v1, 264  ;;  %1857 = vbcast.lane.b32.xlu0 %v10999_v1, 256  ;;  %v11006_v1 = vld [vmem:[#allocation45_spill] sm:$0xff] }
 0x2a7   :  { %v7747_v34 = vpop.permute.xlu1 %1465  ;;  %v7749_v29 = vpop.permute.xlu0 %1461 }
 0x2a8   :  { %11000 = vst [vmem:[#allocation42_spill] sm:$0xff] %v7747_v34  ;;  %11001 = vst [vmem:[#allocation113_spill] sm:$0xff] %v7749_v29 }
 0x2a9   :  { %1872 = vbcast.lane.b32.xlu1 %v11002_v6, 264  ;;  %1868 = vbcast.lane.b32.xlu0 %v11002_v6, 256 }
 0x2ab   :  { %v7753_v63 = vpop.permute.xlu1 %1476  ;;  %v7755_v24 = vpop.permute.xlu0 %1472 }
 0x2ac   :  { %11003 = vst [vmem:[#allocation43_spill] sm:$0xff] %v7753_v63 }
 0x2ad   :  { %1883 = vbcast.lane.b32.xlu1 %v11004_v32, 264  ;;  %1879 = vbcast.lane.b32.xlu0 %v11004_v32, 256 }
 0x2af   :  { %v7759_v59 = vpop.permute.xlu1 %1575  ;;  %v7761_v23 = vpop.permute.xlu0 %1571 }
 0x2b0   :  { %11005 = vst [vmem:[#allocation44_spill] sm:$0xff] %v7759_v59 }
 0x2b1   :  { %1894 = vbcast.lane.b32.xlu1 %v11006_v1, 264  ;;  %1890 = vbcast.lane.b32.xlu0 %v11006_v1, 256  ;;  %v11013_v1 = vld [vmem:[#allocation46_spill] sm:$0xff] }
 0x2b3   :  { %v7765_v34 = vpop.permute.xlu1 %1586  ;;  %v7767_v29 = vpop.permute.xlu0 %1582 }
 0x2b4   :  { %11007 = vst [vmem:[#allocation45_spill] sm:$0xff] %v7765_v34  ;;  %11008 = vst [vmem:[#allocation114_spill] sm:$0xff] %v7767_v29 }
 0x2b5   :  { %1905 = vbcast.lane.b32.xlu1 %v7222_v51, 264  ;;  %1901 = vbcast.lane.b32.xlu0 %v7222_v51, 256  ;;  %v11015_v51 = vld [vmem:[#allocation47_spill] sm:$0xff] }
 0x2b7   :  { %v7771_v6 = vpop.permute.xlu1 %1597  ;;  %v7773_v63 = vpop.permute.xlu0 %1593 }
 0x2b8   :  { %11009 = vst [vmem:[#allocation115_spill] sm:$0xff] %v7771_v6  ;;  %11010 = vst [vmem:[#allocation116_spill] sm:$0xff] %v7773_v63 }
 0x2b9   :  { %1916 = vbcast.lane.b32.xlu1 %v7226_v40, 264  ;;  %1912 = vbcast.lane.b32.xlu0 %v7226_v40, 256  ;;  %v11017_v40 = vld [vmem:[#allocation48_spill] sm:$0xff] }
 0x2bb   :  { %v7777_v32 = vpop.permute.xlu1 %1608  ;;  %v7779_v59 = vpop.permute.xlu0 %1604 }
 0x2bc   :  { %11011 = vst [vmem:[#allocation117_spill] sm:$0xff] %v7777_v32  ;;  %11012 = vst [vmem:[#allocation118_spill] sm:$0xff] %v7779_v59 }
 0x2bd   :  { %1927 = vbcast.lane.b32.xlu1 %v11013_v1, 264  ;;  %1923 = vbcast.lane.b32.xlu0 %v11013_v1, 256 }
 0x2bf   :  { %v7783_v29 = vpop.permute.xlu1 %1619  ;;  %v7785_v34 = vpop.permute.xlu0 %1615 }
 0x2c0   :  { %11014 = vst [vmem:[#allocation46_spill] sm:$0xff] %v7783_v29 }
 0x2c1   :  { %1938 = vbcast.lane.b32.xlu1 %v11015_v51, 264  ;;  %1934 = vbcast.lane.b32.xlu0 %v11015_v51, 256 }
 0x2c3   :  { %v7789_v63 = vpop.permute.xlu1 %1630  ;;  %v7791_v6 = vpop.permute.xlu0 %1626 }
 0x2c4   :  { %11016 = vst [vmem:[#allocation47_spill] sm:$0xff] %v7789_v63 }
 0x2c5   :  { %1949 = vbcast.lane.b32.xlu1 %v11017_v40, 264  ;;  %1945 = vbcast.lane.b32.xlu0 %v11017_v40, 256 }
 0x2c7   :  { %v7795_v59 = vpop.permute.xlu1 %1641  ;;  %v7797_v32 = vpop.permute.xlu0 %1637 }
 0x2c8   :  { %11018 = vst [vmem:[#allocation48_spill] sm:$0xff] %v7795_v59 }
 0x2c9   :  { %1960 = vbcast.lane.b32.xlu1 %v7245_v35, 264  ;;  %1956 = vbcast.lane.b32.xlu0 %v7245_v35, 256 }
 0x2cb   :  { %v7801_v1 = vpop.permute.xlu1 %1652  ;;  %v7803_v29 = vpop.permute.xlu0 %1648 }
 0x2cc   :  { %11019 = vst [vmem:[#allocation119_spill] sm:$0xff] %v7801_v1 }
 0x2cd   :  { %1971 = vbcast.lane.b32.xlu1 %v7248_v15, 264  ;;  %1967 = vbcast.lane.b32.xlu0 %v7248_v15, 256  ;;  %v11026_v15 = vld [vmem:[#allocation49_spill] sm:$0xff] }
 0x2cf   :  { %v7807_v51 = vpop.permute.xlu1 %1663  ;;  %v7809_v63 = vpop.permute.xlu0 %1659 }
 0x2d0   :  { %11020 = vst [vmem:[#allocation120_spill] sm:$0xff] %v7807_v51  ;;  %11021 = vst [vmem:[#allocation121_spill] sm:$0xff] %v7809_v63 }
 0x2d1   :  { %1982 = vbcast.lane.b32.xlu1 %v7251_v5, 264  ;;  %1978 = vbcast.lane.b32.xlu0 %v7251_v5, 256  ;;  %v11029_v5 = vld [vmem:[#allocation50_spill] sm:$0xff] }
 0x2d3   :  { %v7813_v40 = vpop.permute.xlu1 %1674  ;;  %v7815_v59 = vpop.permute.xlu0 %1670 }
 0x2d4   :  { %11022 = vst [vmem:[#allocation122_spill] sm:$0xff] %v7813_v40  ;;  %11023 = vst [vmem:[#allocation123_spill] sm:$0xff] %v7815_v59 }
 0x2d5   :  { %1993 = vbcast.lane.b32.xlu1 %v7254_v18, 264  ;;  %1989 = vbcast.lane.b32.xlu0 %v7254_v18, 256  ;;  %v11032_v18 = vld [vmem:[#allocation51_spill] sm:$0xff] }
 0x2d7   :  { %v7819_v35 = vpop.permute.xlu1 %1685  ;;  %v7821_v1 = vpop.permute.xlu0 %1681 }
 0x2d8   :  { %11024 = vst [vmem:[#allocation124_spill] sm:$0xff] %v7819_v35  ;;  %11025 = vst [vmem:[#allocation125_spill] sm:$0xff] %v7821_v1 }
 0x2d9   :  { %2004 = vbcast.lane.b32.xlu1 %v11026_v15, 264  ;;  %2000 = vbcast.lane.b32.xlu0 %v11026_v15, 256  ;;  %v11035_v15 = vld [vmem:[#allocation52_spill] sm:$0xff] }
 0x2db   :  { %v7825_v51 = vpop.permute.xlu1 %1696  ;;  %v7827_v63 = vpop.permute.xlu0 %1692 }
 0x2dc   :  { %11027 = vst [vmem:[#allocation49_spill] sm:$0xff] %v7825_v51  ;;  %11028 = vst [vmem:[#allocation126_spill] sm:$0xff] %v7827_v63 }
 0x2dd   :  { %2015 = vbcast.lane.b32.xlu1 %v11029_v5, 264  ;;  %2011 = vbcast.lane.b32.xlu0 %v11029_v5, 256  ;;  %v11038_v5 = vld [vmem:[#allocation53_spill] sm:$0xff] }
 0x2df   :  { %v7831_v59 = vpop.permute.xlu1 %1707  ;;  %v7833_v40 = vpop.permute.xlu0 %1703 }
 0x2e0   :  { %11030 = vst [vmem:[#allocation50_spill] sm:$0xff] %v7831_v59  ;;  %11031 = vst [vmem:[#allocation127_spill] sm:$0xff] %v7833_v40 }
 0x2e1   :  { %2026 = vbcast.lane.b32.xlu1 %v11032_v18, 264  ;;  %2022 = vbcast.lane.b32.xlu0 %v11032_v18, 256  ;;  %v11041_v18 = vld [vmem:[#allocation54_spill] sm:$0xff] }
 0x2e3   :  { %v7837_v1 = vpop.permute.xlu1 %1718  ;;  %v7839_v35 = vpop.permute.xlu0 %1714 }
 0x2e4   :  { %11033 = vst [vmem:[#allocation51_spill] sm:$0xff] %v7837_v1  ;;  %11034 = vst [vmem:[#allocation128_spill] sm:$0xff] %v7839_v35 }
 0x2e5   :  { %2037 = vbcast.lane.b32.xlu1 %v11035_v15, 264  ;;  %2033 = vbcast.lane.b32.xlu0 %v11035_v15, 256  ;;  %v11043_v15 = vld [vmem:[#allocation55_spill] sm:$0xff] }
 0x2e7   :  { %v7843_v63 = vpop.permute.xlu1 %1729  ;;  %v7845_v51 = vpop.permute.xlu0 %1725 }
 0x2e8   :  { %11036 = vst [vmem:[#allocation52_spill] sm:$0xff] %v7843_v63  ;;  %11037 = vst [vmem:[#allocation129_spill] sm:$0xff] %v7845_v51 }
 0x2e9   :  { %2048 = vbcast.lane.b32.xlu1 %v11038_v5, 264  ;;  %2044 = vbcast.lane.b32.xlu0 %v11038_v5, 256  ;;  %v11046_v5 = vld [vmem:[#allocation56_spill] sm:$0xff] }
 0x2eb   :  { %v7849_v59 = vpop.permute.xlu1 %1740  ;;  %v7851_v40 = vpop.permute.xlu0 %1736 }
 0x2ec   :  { %11039 = vst [vmem:[#allocation53_spill] sm:$0xff] %v7849_v59  ;;  %11040 = vst [vmem:[#allocation130_spill] sm:$0xff] %v7851_v40 }
 0x2ed   :  { %2059 = vbcast.lane.b32.xlu1 %v11041_v18, 264  ;;  %2055 = vbcast.lane.b32.xlu0 %v11041_v18, 256 }
 0x2ef   :  { %v7855_v1 = vpop.permute.xlu1 %1751  ;;  %v7857_v35 = vpop.permute.xlu0 %1747 }
 0x2f0   :  { %11042 = vst [vmem:[#allocation54_spill] sm:$0xff] %v7855_v1 }
 0x2f1   :  { %2070 = vbcast.lane.b32.xlu1 %v11043_v15, 264  ;;  %2066 = vbcast.lane.b32.xlu0 %v11043_v15, 256  ;;  %v11051_v15 = vld [vmem:[#allocation57_spill] sm:$0xff] }
 0x2f3   :  { %v7861_v63 = vpop.permute.xlu1 %1762  ;;  %v7863_v51 = vpop.permute.xlu0 %1758 }
 0x2f4   :  { %11044 = vst [vmem:[#allocation55_spill] sm:$0xff] %v7861_v63  ;;  %11045 = vst [vmem:[#allocation131_spill] sm:$0xff] %v7863_v51 }
 0x2f5   :  { %2081 = vbcast.lane.b32.xlu1 %v11046_v5, 264  ;;  %2077 = vbcast.lane.b32.xlu0 %v11046_v5, 256  ;;  %v11054_v5 = vld [vmem:[#allocation58_spill] sm:$0xff] }
 0x2f7   :  { %v7867_v59 = vpop.permute.xlu1 %1773  ;;  %v7869_v40 = vpop.permute.xlu0 %1769 }
 0x2f8   :  { %11047 = vst [vmem:[#allocation56_spill] sm:$0xff] %v7867_v59  ;;  %11048 = vst [vmem:[#allocation132_spill] sm:$0xff] %v7869_v40 }
 0x2f9   :  { %2092 = vbcast.lane.b32.xlu1 %v7289_v52, 264  ;;  %2088 = vbcast.lane.b32.xlu0 %v7289_v52, 256  ;;  %v11057_v52 = vld [vmem:[#allocation59_spill] sm:$0xff] }
 0x2fb   :  { %v7873_v18 = vpop.permute.xlu1 %1784  ;;  %v7875_v1 = vpop.permute.xlu0 %1780 }
 0x2fc   :  { %11049 = vst [vmem:[#allocation133_spill] sm:$0xff] %v7873_v18  ;;  %11050 = vst [vmem:[#allocation134_spill] sm:$0xff] %v7875_v1 }
 0x2fd   :  { %2103 = vbcast.lane.b32.xlu1 %v11051_v15, 264  ;;  %2099 = vbcast.lane.b32.xlu0 %v11051_v15, 256  ;;  %v11060_v15 = vld [vmem:[#allocation60_spill] sm:$0xff] }
 0x2ff   :  { %v7879_v51 = vpop.permute.xlu1 %1795  ;;  %v7881_v63 = vpop.permute.xlu0 %1791 }
 0x300   :  { %11052 = vst [vmem:[#allocation57_spill] sm:$0xff] %v7879_v51  ;;  %11053 = vst [vmem:[#allocation135_spill] sm:$0xff] %v7881_v63 }
 0x301   :  { %2114 = vbcast.lane.b32.xlu1 %v11054_v5, 264  ;;  %2110 = vbcast.lane.b32.xlu0 %v11054_v5, 256  ;;  %v11063_v5 = vld [vmem:[#allocation61_spill] sm:$0xff] }
 0x303   :  { %v7885_v40 = vpop.permute.xlu1 %1806  ;;  %v7887_v59 = vpop.permute.xlu0 %1802 }
 0x304   :  { %11055 = vst [vmem:[#allocation58_spill] sm:$0xff] %v7885_v40  ;;  %11056 = vst [vmem:[#allocation136_spill] sm:$0xff] %v7887_v59 }
 0x305   :  { %2125 = vbcast.lane.b32.xlu1 %v11057_v52, 264  ;;  %2121 = vbcast.lane.b32.xlu0 %v11057_v52, 256  ;;  %v11065_v52 = vld [vmem:[#allocation62_spill] sm:$0xff] }
 0x307   :  { %v7891_v1 = vpop.permute.xlu1 %1817  ;;  %v7893_v18 = vpop.permute.xlu0 %1813 }
 0x308   :  { %11058 = vst [vmem:[#allocation59_spill] sm:$0xff] %v7891_v1  ;;  %11059 = vst [vmem:[#allocation137_spill] sm:$0xff] %v7893_v18 }
 0x309   :  { %2136 = vbcast.lane.b32.xlu1 %v11060_v15, 264  ;;  %2132 = vbcast.lane.b32.xlu0 %v11060_v15, 256  ;;  %v11067_v15 = vld [vmem:[#allocation63_spill] sm:$0xff] }
 0x30b   :  { %v7897_v51 = vpop.permute.xlu1 %1828  ;;  %v7899_v63 = vpop.permute.xlu0 %1824 }
 0x30c   :  { %11061 = vst [vmem:[#allocation60_spill] sm:$0xff] %v7897_v51  ;;  %11062 = vst [vmem:[#allocation138_spill] sm:$0xff] %v7899_v63 }
 0x30d   :  { %2147 = vbcast.lane.b32.xlu1 %v11063_v5, 264  ;;  %2143 = vbcast.lane.b32.xlu0 %v11063_v5, 256 }
 0x30f   :  { %v7903_v40 = vpop.permute.xlu1 %1839  ;;  %v7905_v59 = vpop.permute.xlu0 %1835 }
 0x310   :  { %11064 = vst [vmem:[#allocation61_spill] sm:$0xff] %v7903_v40 }
 0x311   :  { %2158 = vbcast.lane.b32.xlu1 %v11065_v52, 264  ;;  %2154 = vbcast.lane.b32.xlu0 %v11065_v52, 256 }
 0x313   :  { %v7909_v1 = vpop.permute.xlu1 %1850  ;;  %v7911_v18 = vpop.permute.xlu0 %1846 }
 0x314   :  { %11066 = vst [vmem:[#allocation62_spill] sm:$0xff] %v7911_v18 }
 0x315   :  { %2169 = vbcast.lane.b32.xlu1 %v11067_v15, 264  ;;  %2165 = vbcast.lane.b32.xlu0 %v11067_v15, 256 }
 0x317   :  { %v7915_v51 = vpop.permute.xlu1 %1861  ;;  %v7917_v63 = vpop.permute.xlu0 %1857 }
 0x318   :  { %11068 = vst [vmem:[#allocation63_spill] sm:$0xff] %v7917_v63 }
 0x319   :  { %2180 = vbcast.lane.b32.xlu1 %v7315_v39, 264  ;;  %2176 = vbcast.lane.b32.xlu0 %v7315_v39, 256 }
 0x31b   :  { %v7921_v5 = vpop.permute.xlu1 %1872  ;;  %v7923_v40 = vpop.permute.xlu0 %1868 }
 0x31c   :  { %11069 = vst [vmem:[#allocation139_spill] sm:$0xff] %v7923_v40 }
 0x31d   :  { %2191 = vbcast.lane.b32.xlu1 %v7318_v12, 264  ;;  %2187 = vbcast.lane.b32.xlu0 %v7318_v12, 256 }
 0x31f   :  { %v7927_v52 = vpop.permute.xlu1 %1883  ;;  %v7929_v18 = vpop.permute.xlu0 %1879 }
 0x320   :  { %11070 = vst [vmem:[#allocation140_spill] sm:$0xff] %v7927_v52 }
 0x321   :  { %2202 = vbcast.lane.b32.xlu1 %v7321_v9, 264  ;;  %2198 = vbcast.lane.b32.xlu0 %v7321_v9, 256 }
 0x323   :  { %v7933_v15 = vpop.permute.xlu1 %1894  ;;  %v7935_v63 = vpop.permute.xlu0 %1890 }
 0x324   :  { %11071 = vst [vmem:[#allocation141_spill] sm:$0xff] %v7933_v15 }
 0x325   :  { %2213 = vbcast.lane.b32.xlu1 %v7324_v38, 264  ;;  %2209 = vbcast.lane.b32.xlu0 %v7324_v38, 256 }
 0x327   :  { %v7939_v39 = vpop.permute.xlu1 %1905  ;;  %v7941_v40 = vpop.permute.xlu0 %1901 }
 0x328   :  { %11072 = vst [vmem:[#allocation142_spill] sm:$0xff] %v7939_v39 }
 0x329   :  { %2224 = vbcast.lane.b32.xlu1 %v7327_v22, 264  ;;  %2220 = vbcast.lane.b32.xlu0 %v7327_v22, 256 }
 0x32b   :  { %v7945_v12 = vpop.permute.xlu1 %1916  ;;  %v7947_v52 = vpop.permute.xlu0 %1912 }
 0x32c   :  { %11073 = vst [vmem:[#allocation143_spill] sm:$0xff] %v7945_v12 }
 0x32d   :  { %2235 = vbcast.lane.b32.xlu1 %v7330_v10, 264  ;;  %2231 = vbcast.lane.b32.xlu0 %v7330_v10, 256 }
 0x32f   :  { %v7951_v9 = vpop.permute.xlu1 %1927  ;;  %v7953_v15 = vpop.permute.xlu0 %1923 }
 0x330   :  { %11074 = vst [vmem:[#allocation144_spill] sm:$0xff] %v7951_v9  ;;  %11075 = vst [vmem:[#allocation145_spill] sm:$0xff] %v7953_v15 }
 0x331   :  { %2246 = vbcast.lane.b32.xlu1 %v7333_v28, 264  ;;  %2242 = vbcast.lane.b32.xlu0 %v7333_v28, 256 }
 0x333   :  { %v7957_v38 = vpop.permute.xlu1 %1938  ;;  %v7959_v39 = vpop.permute.xlu0 %1934 }
 0x334   :  { %11076 = vst [vmem:[#allocation146_spill] sm:$0xff] %v7957_v38  ;;  %11077 = vst [vmem:[#allocation147_spill] sm:$0xff] %v7959_v39 }
 0x335   :  { %2257 = vbcast.lane.b32.xlu1 %v7336_v46, 264  ;;  %2253 = vbcast.lane.b32.xlu0 %v7336_v46, 256 }
 0x337   :  { %v7963_v22 = vpop.permute.xlu1 %1949  ;;  %v7965_v12 = vpop.permute.xlu0 %1945 }
 0x338   :  { %11078 = vst [vmem:[#allocation148_spill] sm:$0xff] %v7963_v22  ;;  %11079 = vst [vmem:[#allocation149_spill] sm:$0xff] %v7965_v12 }
 0x339   :  { %2268 = vbcast.lane.b32.xlu1 %v7339_v36, 264  ;;  %2264 = vbcast.lane.b32.xlu0 %v7339_v36, 256  ;;  %v7990_v36 = vld [vmem:[%s10635_s3] ss:$0 sm:$0xff] }
 0x33a   :  { %vm2276_vm3 = vcmp.ge.f32.partialorder %v7425_v62, %v7990_v36  ;;  %vm2278_vm4 = vcmp.ge.f32.partialorder %v7423_v19, %v7990_v36  ;;  %vm2277_vm5 = vcmp.ge.f32.partialorder %v7431_v11, %v7990_v36  ;;  %vm2279_vm7 = vcmp.ge.f32.partialorder %v7429_v20, %v7990_v36 }
 0x33b   :  { %v7969_v10 = vpop.permute.xlu1 %1960  ;;  %v7971_v9 = vpop.permute.xlu0 %1956  ;;  %vm2280_vm8 = vcmp.ge.f32.partialorder %v7437_v56, %v7990_v36  ;;  %vm2281_vm9 = vcmp.ge.f32.partialorder %v7435_v25, %v7990_v36  ;;  %vm2282_vm10 = vcmp.ge.f32.partialorder %v7443_v0, %v7990_v36  ;;  %vm2283_vm11 = vcmp.ge.f32.partialorder %v7441_v30, %v7990_v36 }
 0x33c   :  { %vm2284_vm12 = vcmp.ge.f32.partialorder %v7449_v57, %v7990_v36  ;;  %vm2285_vm13 = vcmp.ge.f32.partialorder %v7447_v3, %v7990_v36  ;;  %vm2286_vm14 = vcmp.ge.f32.partialorder %v7455_v54, %v7990_v36  ;;  %vm2287_vm15 = vcmp.ge.f32.partialorder %v7453_v21, %v7990_v36 }
 0x33d   :  { %vm2288_vm0 = vcmp.ge.f32.partialorder %v7461_v37, %v7990_v36  ;;  %vm2289_vm1 = vcmp.ge.f32.partialorder %v7459_v13, %v7990_v36  ;;  %vm2290_vm2 = vcmp.ge.f32.partialorder %v7467_v42, %v7990_v36 }
 0x33f   :  { %v7973_v28 = vpop.permute.xlu0 %1967  ;;  %v7975_v38 = vpop.permute.xlu1 %1971 }
 0x340   :  { %11080 = vst [vmem:[#allocation150_spill] sm:$0xff] %v7973_v28  ;;  %11081 = vst [vmem:[#allocation151_spill] sm:$0xff] %v7975_v38 }
 0x343   :  { %v7977_v39 = vpop.permute.xlu0 %1978  ;;  %v7979_v15 = vpop.permute.xlu1 %1982 }
 0x344   :  { %11082 = vst [vmem:[#allocation152_spill] sm:$0xff] %v7979_v15 }
 0x347   :  { %v7981_v46 = vpop.permute.xlu0 %1989  ;;  %v7983_v22 = vpop.permute.xlu1 %1993 }
 0x348   :  { %11083 = vst [vmem:[#allocation153_spill] sm:$0xff] %v7981_v46  ;;  %11084 = vst [vmem:[#allocation154_spill] sm:$0xff] %v7983_v22  ;;  %v8001_v46 = vld [vmem:[%s10636_s4] ss:$0 sm:$0xff] }
 0x349   :  { %v2538_v22 = vsel %vm2276_vm3, %v8001_v46, 0.0  ;;  %v2539_v15 = vsel %vm2277_vm5, %v8001_v46, 0.0  ;;  %v2542_v20 = vsel %vm2280_vm8, %v8001_v46, 0.0  ;;  %v2544_v25 = vsel %vm2282_vm10, %v8001_v46, 0.0 }
 0x34a   :  { %v2795_v62 = vsel %vm2794_vm6, %v2538_v22, 0.0  ;;  %v2798_v11 = vsel %vm2794_vm6, %v2539_v15, 0.0  ;;  %v2541_v22 = vsel %vm2279_vm7, %v8001_v46, 0.0  ;;  %v2807_v15 = vsel %vm2794_vm6, %v2542_v20, 0.0 }
 0x34b   :  { %v7985_v12 = vpop.permute.xlu0 %2000  ;;  %v7994_v28 = vpop.permute.xlu1 %2004  ;;  %v2804_v56 = vsel %vm2794_vm6, %v2541_v22, 0.0  ;;  %v2545_v22 = vsel %vm2283_vm11, %v8001_v46, 0.0  ;;  %v2546_v30 = vsel %vm2284_vm12, %v8001_v46, 0.0  ;;  %v2548_v3 = vsel %vm2286_vm14, %v8001_v46, 0.0 }
 0x34c   :  { %11085 = vst [vmem:[#allocation155_spill] sm:$0xff] %v7985_v12  ;;  %11086 = vst [vmem:[#allocation156_spill] sm:$0xff] %v7994_v28  ;;  %v2816_v57 = vsel %vm2794_vm6, %v2545_v22, 0.0  ;;  %v2550_v21 = vsel %vm2288_vm0, %v8001_v46, 0.0  ;;  %vm2291_vm3 = vcmp.ge.f32.partialorder %v7465_v41, %v7990_v36  ;;  %v2552_v13 = vsel %vm2290_vm2, %v8001_v46, 0.0 }
 0x34d   :  { %vm2293_vm5 = vcmp.ge.f32.partialorder %v7373_v43, %v7990_v36  ;;  %vm2294_vm7 = vcmp.ge.f32.partialorder %v7383_v48, %v7990_v36  ;;  %vm2295_vm8 = vcmp.ge.f32.partialorder %v7381_v47, %v7990_v36  ;;  %vm2297_vm10 = vcmp.ge.f32.partialorder %v7387_v50, %v7990_v36 }
 0x34e   :  { %v2556_v43 = vsel %vm2294_vm7, %v8001_v46, 0.0  ;;  %vm2298_vm11 = vcmp.ge.f32.partialorder %v7395_v31, %v7990_v36  ;;  %vm2299_vm12 = vcmp.ge.f32.partialorder %v7393_v26, %v7990_v36  ;;  %vm2301_vm14 = vcmp.ge.f32.partialorder %v7399_v17, %v7990_v36 }
 0x34f   :  { %v7996_v38 = vpop.permute.xlu0 %2011  ;;  %v8009_v12 = vpop.permute.xlu1 %2015  ;;  %v2560_v50 = vsel %vm2298_vm11, %v8001_v46, 0.0  ;;  %vm2303_vm0 = vcmp.ge.f32.partialorder %v7405_v53, %v7990_v36  ;;  %vm2309_vm7 = vcmp.ge.f32.partialorder %v7519_v58, %v7990_v36 }
 0x350   :  { %11087 = vst [vmem:[#allocation157_spill] sm:$0xff] %v7996_v38  ;;  %v2540_v38 = vsel %vm2278_vm4, %v8001_v46, 0.0  ;;  %vm2292_vm4 = vcmp.ge.f32.partialorder %v7375_v44, %v7990_v36 }
 0x351   :  { %v2801_v19 = vsel %vm2794_vm6, %v2540_v38, 0.0  ;;  %v2543_v38 = vsel %vm2281_vm9, %v8001_v46, 0.0  ;;  %v2554_v41 = vsel %vm2292_vm4, %v8001_v46, 0.0  ;;  %vm2296_vm9 = vcmp.ge.f32.partialorder %v7389_v60, %v7990_v36 }
 0x352   :  { %v2810_v0 = vsel %vm2794_vm6, %v2543_v38, 0.0  ;;  %v2558_v47 = vsel %vm2296_vm9, %v8001_v46, 0.0  ;;  %vm2311_vm9 = vcmp.ge.f32.partialorder %v7525_v4, %v7990_v36 }
 0x353   :  { %v8014_v28 = vpop.permute.xlu0 %2022 }
 0x354   :  { %11088 = vst [vmem:[#allocation158_spill] sm:$0xff] %v8014_v28 }
 0x357   :  { %v8029_v28 = vpop.permute.xlu0 %2033 }
 0x358   :  { %2796 = vadd.xlane.f32.xlu0 %v2795_v62  ;;  %v8027_v62 = vpop.permute.xlu1 %2026 }
 0x35b   :  { %v8046_v20 = vpop.permute.xlu0 %2044 }
 0x35c   :  { %2802 = vadd.xlane.f32.xlu0 %v2801_v19  ;;  %v8040_v19 = vpop.permute.xlu1 %2037  ;;  %11089 = vst [vmem:[#allocation159_spill] sm:$0xff] %v8046_v20 }
 0x35d   :  { %2799 = vadd.xlane.f32.xlu1 %v2798_v11  ;;  %v2813_v11 = vsel %vm2794_vm6, %v2544_v25, 0.0 }
 0x35f   :  { %v8061_v25 = vpop.permute.xlu0 %2055 }
 0x360   :  { %2805 = vadd.xlane.f32.xlu0 %v2804_v56  ;;  %v2819_v56 = vsel %vm2794_vm6, %v2546_v30, 0.0  ;;  %v8059_v38 = vpop.permute.xlu1 %2048  ;;  %11091 = vst [vmem:[#allocation161_spill] sm:$0xff] %v8061_v25  ;;  %v2831_v30 = vsel %vm2794_vm6, %v2550_v21, 0.0  ;;  %v2555_v21 = vsel %vm2293_vm5, %v8001_v46, 0.0  ;;  %vm2308_vm5 = vcmp.ge.f32.partialorder %v7521_v33, %v7990_v36 }
 0x361   :  { %2808 = vadd.xlane.f32.xlu1 %v2807_v15  ;;  %v2547_v15 = vsel %vm2285_vm13, %v8001_v46, 0.0  ;;  %11090 = vst [vmem:[#allocation160_spill] sm:$0xff] %v8059_v38  ;;  %v2846_v48 = vsel %vm2794_vm6, %v2555_v21, 0.0  ;;  %vm2300_vm13 = vcmp.ge.f32.partialorder %v7401_v49, %v7990_v36  ;;  %v11182_v38 = vlaneseq }
 0x362   :  { %v2822_v54 = vsel %vm2794_vm6, %v2547_v15, 0.0  ;;  %v2837_v15 = vsel %vm2794_vm6, %v2552_v13, 0.0  ;;  %v2562_v26 = vsel %vm2300_vm13, %v8001_v46, 0.0 }
 0x364   :  { %2811 = vadd.xlane.f32.xlu0 %v2810_v0  ;;  %v2825_v0 = vsel %vm2794_vm6, %v2548_v3, 0.0  ;;  %v8072_v22 = vpop.permute.xlu1 %2059  ;;  %v2553_v3 = vsel %vm2291_vm3, %v8001_v46, 0.0 }
 0x365   :  { %2814 = vadd.xlane.f32.xlu1 %v2813_v11  ;;  %v2549_v11 = vsel %vm2287_vm15, %v8001_v46, 0.0  ;;  %11092 = vst [vmem:[#allocation162_spill] sm:$0xff] %v8072_v22  ;;  %v2840_v44 = vsel %vm2794_vm6, %v2553_v3, 0.0  ;;  %vm2302_vm15 = vcmp.ge.f32.partialorder %v7407_v61, %v7990_v36 }
 0x366   :  { %v2828_v37 = vsel %vm2794_vm6, %v2549_v11, 0.0  ;;  %v2843_v11 = vsel %vm2794_vm6, %v2554_v41, 0.0  ;;  %v2564_v17 = vsel %vm2302_vm15, %v8001_v46, 0.0 }
 0x368   :  { %2817 = vadd.xlane.f32.xlu0 %v2816_v57  ;;  %v2551_v57 = vsel %vm2289_vm1, %v8001_v46, 0.0 }
 0x369   :  { %2820 = vadd.xlane.f32.xlu1 %v2819_v56  ;;  %v8078_v56 = vpop.permute.xlu0 %2066  ;;  %v2834_v42 = vsel %vm2794_vm6, %v2551_v57, 0.0  ;;  %v2557_v57 = vsel %vm2295_vm8, %v8001_v46, 0.0  ;;  %vm2310_vm8 = vcmp.ge.f32.partialorder %v7527_v55, %v7990_v36 }
 0x36a   :  { %11093 = vst [vmem:[#allocation163_spill] sm:$0xff] %v8078_v56  ;;  %v2852_v60 = vsel %vm2794_vm6, %v2557_v57, 0.0  ;;  %v11101_v57 = vld [vmem:[#allocation65_spill] sm:$0xff]  ;;  %v2572_v58 = vsel %vm2310_vm8, %v8001_v46, 0.0 }
 0x36b   :  { %vm2304_vm1 = vcmp.ge.f32.partialorder %v11101_v57, %v7990_v36 }
 0x36c   :  { %2823 = vadd.xlane.f32.xlu0 %v2822_v54  ;;  %v8091_v54 = vpop.permute.xlu1 %2070  ;;  %v2566_v53 = vsel %vm2304_vm1, %v8001_v46, 0.0 }
 0x36d   :  { %2826 = vadd.xlane.f32.xlu1 %v2825_v0  ;;  %11094 = vst [vmem:[#allocation164_spill] sm:$0xff] %v8091_v54  ;;  %v8093_v0 = vpop.permute.xlu0 %2077 }
 0x36e   :  { %11095 = vst [vmem:[#allocation165_spill] sm:$0xff] %v8093_v0 }
 0x370   :  { %2829 = vadd.xlane.f32.xlu0 %v2828_v37  ;;  %v8104_v37 = vpop.permute.xlu1 %2081 }
 0x371   :  { %2832 = vadd.xlane.f32.xlu1 %v2831_v30  ;;  %11096 = vst [vmem:[#allocation166_spill] sm:$0xff] %v8104_v37  ;;  %v2849_v30 = vsel %vm2794_vm6, %v2556_v43, 0.0  ;;  %v8110_v13 = vpop.permute.xlu0 %2088  ;;  %v2867_v43 = vsel %vm2794_vm6, %v2562_v26, 0.0 }
 0x372   :  { %11097 = vst [vmem:[#allocation167_spill] sm:$0xff] %v8110_v13 }
 0x374   :  { %2835 = vadd.xlane.f32.xlu0 %v2834_v42  ;;  %v2855_v42 = vsel %vm2794_vm6, %v2558_v47, 0.0  ;;  %v8123_v3 = vpop.permute.xlu1 %2092  ;;  %v2873_v47 = vsel %vm2794_vm6, %v2564_v17, 0.0 }
 0x375   :  { %2838 = vadd.xlane.f32.xlu1 %v2837_v15  ;;  %v2559_v15 = vsel %vm2297_vm10, %v8001_v46, 0.0  ;;  %11098 = vst [vmem:[#allocation168_spill] sm:$0xff] %v8123_v3  ;;  %v8125_v41 = vpop.permute.xlu0 %2099 }
 0x376   :  { %v2858_v31 = vsel %vm2794_vm6, %v2559_v15, 0.0  ;;  %v11103_v15 = vld [vmem:[#allocation67_spill] sm:$0xff] }
 0x377   :  { %vm2306_vm3 = vcmp.ge.f32.partialorder %v11103_v15, %v7990_v36  ;;  %v11109_v15 = vld [vmem:[#allocation76_spill] sm:$0xff] }
 0x378   :  { %2841 = vadd.xlane.f32.xlu0 %v2840_v44  ;;  %v2861_v44 = vsel %vm2794_vm6, %v2560_v50, 0.0  ;;  %v8136_v21 = vpop.permute.xlu1 %2103  ;;  %vm2312_vm10 = vcmp.ge.f32.partialorder %v11109_v15, %v7990_v36  ;;  %v11117_v15 = vld [vmem:[#allocation79_spill] sm:$0xff] }
 0x379   :  { %2844 = vadd.xlane.f32.xlu1 %v2843_v11  ;;  %v2561_v11 = vsel %vm2299_vm12, %v8001_v46, 0.0  ;;  %11099 = vst [vmem:[#allocation169_spill] sm:$0xff] %v8136_v21  ;;  %v2574_v4 = vsel %vm2312_vm10, %v8001_v46, 0.0 }
 0x37a   :  { %v2864_v49 = vsel %vm2794_vm6, %v2561_v11, 0.0  ;;  %v2879_v11 = vsel %vm2794_vm6, %v2566_v53, 0.0  ;;  %v2571_v53 = vsel %vm2309_vm7, %v8001_v46, 0.0 }
 0x37b   :  { %v2894_v55 = vsel %vm2794_vm6, %v2571_v53, 0.0 }
 0x37c   :  { %2847 = vadd.xlane.f32.xlu0 %v2846_v48  ;;  %v2563_v48 = vsel %vm2301_vm14, %v8001_v46, 0.0  ;;  %v8155_v50 = vpop.permute.xlu1 %2114  ;;  %vm2316_vm14 = vcmp.ge.f32.partialorder %v11117_v15, %v7990_v36  ;;  %v11122_v15 = vld [vmem:[#allocation16_spill] sm:$0xff] }
 0x37d   :  { %2850 = vadd.xlane.f32.xlu1 %v2849_v30  ;;  %v8142_v30 = vpop.permute.xlu0 %2110  ;;  %v2870_v61 = vsel %vm2794_vm6, %v2563_v48, 0.0  ;;  %11104 = vst [vmem:[#allocation65_spill] sm:$0xff] %v8155_v50  ;;  %vm2319_vm1 = vcmp.ge.f32.partialorder %v11122_v15, %v7990_v36 }
 0x37e   :  { %11100 = vst [vmem:[#allocation170_spill] sm:$0xff] %v8142_v30 }
 0x380   :  { %2853 = vadd.xlane.f32.xlu0 %v2852_v60  ;;  %v2565_v60 = vsel %vm2303_vm0, %v8001_v46, 0.0  ;;  %v8168_v17 = vpop.permute.xlu1 %2125 }
 0x381   :  { %2856 = vadd.xlane.f32.xlu1 %v2855_v42  ;;  %v11102_v42 = vld [vmem:[#allocation64_spill] sm:$0xff]  ;;  %11107 = vst [vmem:[#allocation67_spill] sm:$0xff] %v8168_v17 }
 0x382   :  { %vm2305_vm2 = vcmp.ge.f32.partialorder %v11102_v42, %v7990_v36 }
 0x383   :  { %v2567_v26 = vsel %vm2305_vm2, %v8001_v46, 0.0 }
 0x384   :  { %2859 = vadd.xlane.f32.xlu0 %v2858_v31  ;;  %v8157_v31 = vpop.permute.xlu0 %2121  ;;  %v2882_v48 = vsel %vm2794_vm6, %v2567_v26, 0.0  ;;  %v2897_v26 = vsel %vm2794_vm6, %v2572_v58, 0.0 }
 0x385   :  { %2862 = vadd.xlane.f32.xlu1 %v2861_v44  ;;  %11105 = vst [vmem:[#allocation64_spill] sm:$0xff] %v8157_v31  ;;  %v2876_v44 = vsel %vm2794_vm6, %v2565_v60, 0.0  ;;  %v2570_v60 = vsel %vm2308_vm5, %v8001_v46, 0.0 }
 0x386   :  { %v2891_v42 = vsel %vm2794_vm6, %v2570_v60, 0.0  ;;  %v2903_v60 = vsel %vm2794_vm6, %v2574_v4, 0.0  ;;  %v2578_v4 = vsel %vm2316_vm14, %v8001_v46, 0.0 }
 0x388   :  { %2865 = vadd.xlane.f32.xlu0 %v2864_v49  ;;  %v11106_v49 = vld [vmem:[#allocation66_spill] sm:$0xff] }
 0x389   :  { %2868 = vadd.xlane.f32.xlu1 %v2867_v43  ;;  %vm2307_vm4 = vcmp.ge.f32.partialorder %v11106_v49, %v7990_v36  ;;  %v2568_v43 = vsel %vm2306_vm3, %v8001_v46, 0.0  ;;  %v2573_v49 = vsel %vm2311_vm9, %v8001_v46, 0.0 }
 0x38a   :  { %v2885_v57 = vsel %vm2794_vm6, %v2568_v43, 0.0  ;;  %v11112_v43 = vld [vmem:[#allocation14_spill] sm:$0xff] }
 0x38b   :  { %vm2313_vm11 = vcmp.ge.f32.partialorder %v11112_v43, %v7990_v36  ;;  %v11118_v43 = vld [vmem:[#allocation15_spill] sm:$0xff] }
 0x38c   :  { %2871 = vadd.xlane.f32.xlu0 %v2870_v61  ;;  %v2569_v61 = vsel %vm2307_vm4, %v8001_v46, 0.0  ;;  %vm2317_vm15 = vcmp.ge.f32.partialorder %v11118_v43, %v7990_v36  ;;  %vm2322_vm4 = vcmp.ge.f32.partialorder %v7563_v14, %v7990_v36 }
 0x38d   :  { %2874 = vadd.xlane.f32.xlu1 %v2873_v47  ;;  %v8174_v47 = vpop.permute.xlu0 %2132  ;;  %v2888_v33 = vsel %vm2794_vm6, %v2569_v61, 0.0 }
 0x38e   :  { %11108 = vst [vmem:[#allocation66_spill] sm:$0xff] %v8174_v47 }
 0x390   :  { %2877 = vadd.xlane.f32.xlu0 %v2876_v44  ;;  %v8187_v44 = vpop.permute.xlu1 %2136 }
 0x391   :  { %2880 = vadd.xlane.f32.xlu1 %v2879_v11  ;;  %11110 = vst [vmem:[#allocation76_spill] sm:$0xff] %v8187_v44  ;;  %v8189_v11 = vpop.permute.xlu0 %2143  ;;  %v11179_v44 = vld [vmem:[#allocation86_spill] sm:$0xff] }
 0x392   :  { %11111 = vst [vmem:[#allocation171_spill] sm:$0xff] %v8189_v11 }
 0x394   :  { %2883 = vadd.xlane.f32.xlu0 %v2882_v48  ;;  %v11113_v48 = vld [vmem:[#allocation78_spill] sm:$0xff]  ;;  %v8200_v61 = vpop.permute.xlu1 %2147 }
 0x395   :  { %2886 = vadd.xlane.f32.xlu1 %v2885_v57  ;;  %vm2314_vm12 = vcmp.ge.f32.partialorder %v11113_v48, %v7990_v36  ;;  %v2900_v57 = vsel %vm2794_vm6, %v2573_v49, 0.0  ;;  %11114 = vst [vmem:[#allocation14_spill] sm:$0xff] %v8200_v61  ;;  %v8206_v53 = vpop.permute.xlu0 %2154  ;;  %v11119_v48 = vld [vmem:[#allocation80_spill] sm:$0xff]  ;;  %v11176_v61 = vld [vmem:[#allocation85_spill] sm:$0xff] }
 0x396   :  { %11116 = vst [vmem:[#allocation78_spill] sm:$0xff] %v8206_v53  ;;  %v2576_v58 = vsel %vm2314_vm12, %v8001_v46, 0.0  ;;  %vm2318_vm0 = vcmp.ge.f32.partialorder %v11119_v48, %v7990_v36 }
 0x398   :  { %2889 = vadd.xlane.f32.xlu0 %v2888_v33  ;;  %v2575_v33 = vsel %vm2313_vm11, %v8001_v46, 0.0 }
 0x399   :  { %2892 = vadd.xlane.f32.xlu1 %v2891_v42  ;;  %v11115_v42 = vld [vmem:[#allocation77_spill] sm:$0xff] }
 0x39a   :  { %vm2315_vm13 = vcmp.ge.f32.partialorder %v11115_v42, %v7990_v36  ;;  %v2915_v42 = vsel %vm2794_vm6, %v2578_v4, 0.0  ;;  %v2581_v4 = vsel %vm2319_vm1, %v8001_v46, 0.0 }
 0x39b   :  { %v2577_v49 = vsel %vm2315_vm13, %v8001_v46, 0.0 }
 0x39c   :  { %2895 = vadd.xlane.f32.xlu0 %v2894_v55  ;;  %v2906_v55 = vsel %vm2794_vm6, %v2575_v33, 0.0  ;;  %v2912_v33 = vsel %vm2794_vm6, %v2577_v49, 0.0 }
 0x39d   :  { %2898 = vadd.xlane.f32.xlu1 %v2897_v26  ;;  %v2909_v26 = vsel %vm2794_vm6, %v2576_v58, 0.0  ;;  %v2579_v58 = vsel %vm2317_vm15, %v8001_v46, 0.0 }
 0x39e   :  { %v2918_v43 = vsel %vm2794_vm6, %v2579_v58, 0.0  ;;  %v2924_v58 = vsel %vm2794_vm6, %v2581_v4, 0.0 }
 0x3a0   :  { %2901 = vadd.xlane.f32.xlu0 %v2900_v57  ;;  %v8219_v57 = vpop.permute.xlu1 %2158 }
 0x3a1   :  { %2904 = vadd.xlane.f32.xlu1 %v2903_v60  ;;  %11120 = vst [vmem:[#allocation77_spill] sm:$0xff] %v8219_v57  ;;  %v8221_v60 = vpop.permute.xlu0 %2165 }
 0x3a2   :  { %11121 = vst [vmem:[#allocation79_spill] sm:$0xff] %v8221_v60 }
 0x3a4   :  { %2907 = vadd.xlane.f32.xlu0 %v2906_v55  ;;  %v2580_v55 = vsel %vm2318_vm0, %v8001_v46, 0.0  ;;  %v8232_v48 = vpop.permute.xlu1 %2169 }
 0x3a5   :  { %2910 = vadd.xlane.f32.xlu1 %v2909_v26  ;;  %v11123_v26 = vld [vmem:[#allocation81_spill] sm:$0xff]  ;;  %11124 = vst [vmem:[#allocation15_spill] sm:$0xff] %v8232_v48  ;;  %v2921_v49 = vsel %vm2794_vm6, %v2580_v55, 0.0  ;;  %v8238_v3 = vpop.permute.xlu0 %2176 }
 0x3a6   :  { %vm2320_vm2 = vcmp.ge.f32.partialorder %v11123_v26, %v7990_v36  ;;  %11126 = vst [vmem:[#allocation80_spill] sm:$0xff] %v8238_v3  ;;  %v11127_v26 = vld [vmem:[#allocation18_spill] sm:$0xff] }
 0x3a7   :  { %vm2323_vm5 = vcmp.ge.f32.partialorder %v11127_v26, %v7990_v36  ;;  %v11132_v26 = vld [vmem:[#allocation9_spill] sm:$0xff] }
 0x3a8   :  { %2913 = vadd.xlane.f32.xlu0 %v2912_v33  ;;  %v11125_v33 = vld [vmem:[#allocation17_spill] sm:$0xff]  ;;  %vm2326_vm9 = vcmp.ge.f32.partialorder %v11132_v26, %v7990_v36 }
 0x3a9   :  { %2916 = vadd.xlane.f32.xlu1 %v2915_v42  ;;  %vm2321_vm3 = vcmp.ge.f32.partialorder %v11125_v33, %v7990_v36  ;;  %v2582_v42 = vsel %vm2320_vm2, %v8001_v46, 0.0  ;;  %v8251_v33 = vpop.permute.xlu1 %2180  ;;  %v8253_v3 = vpop.permute.xlu0 %2187 }
 0x3aa   :  { %v2927_v15 = vsel %vm2794_vm6, %v2582_v42, 0.0  ;;  %v2583_v55 = vsel %vm2321_vm3, %v8001_v46, 0.0  ;;  %11129 = vst [vmem:[#allocation16_spill] sm:$0xff] %v8251_v33  ;;  %11130 = vst [vmem:[#allocation81_spill] sm:$0xff] %v8253_v3  ;;  %v2585_v42 = vsel %vm2323_vm5, %v8001_v46, 0.0 }
 0x3ab   :  { %v2930_v14 = vsel %vm2794_vm6, %v2583_v55, 0.0 }
 0x3ac   :  { %2919 = vadd.xlane.f32.xlu0 %v2918_v43  ;;  %v2584_v43 = vsel %vm2322_vm4, %v8001_v46, 0.0 }
 0x3ad   :  { %2922 = vadd.xlane.f32.xlu1 %v2921_v49  ;;  %v11128_v49 = vld [vmem:[#allocation7_spill] sm:$0xff]  ;;  %v2933_v4 = vsel %vm2794_vm6, %v2584_v43, 0.0  ;;  %v8264_v33 = vpop.permute.xlu1 %2191  ;;  %v8270_v13 = vpop.permute.xlu0 %2198 }
 0x3ae   :  { %vm2324_vm7 = vcmp.ge.f32.partialorder %v11128_v49, %v7990_v36  ;;  %v2936_v49 = vsel %vm2794_vm6, %v2585_v42, 0.0  ;;  %11133 = vst [vmem:[#allocation17_spill] sm:$0xff] %v8264_v33  ;;  %11135 = vst [vmem:[#allocation18_spill] sm:$0xff] %v8270_v13 }
 0x3b0   :  { %2925 = vadd.xlane.f32.xlu0 %v2924_v58  ;;  %v11131_v58 = vld [vmem:[#allocation6_spill] sm:$0xff] }
 0x3b1   :  { %2928 = vadd.xlane.f32.xlu1 %v2927_v15  ;;  %vm2325_vm8 = vcmp.ge.f32.partialorder %v11131_v58, %v7990_v36  ;;  %v2586_v15 = vsel %vm2324_vm7, %v8001_v46, 0.0  ;;  %v11136_v58 = vld [vmem:[#allocation69_spill] sm:$0xff]  ;;  %v8283_v48 = vpop.permute.xlu1 %2202  ;;  %v8285_v60 = vpop.permute.xlu0 %2209 }
 0x3b2   :  { %v2939_v55 = vsel %vm2794_vm6, %v2586_v15, 0.0  ;;  %v2587_v43 = vsel %vm2325_vm8, %v8001_v46, 0.0  ;;  %vm2328_vm11 = vcmp.ge.f32.partialorder %v11136_v58, %v7990_v36  ;;  %11139 = vst [vmem:[#allocation7_spill] sm:$0xff] %v8283_v48  ;;  %11140 = vst [vmem:[#allocation6_spill] sm:$0xff] %v8285_v60  ;;  %vm2340_vm8 = vcmp.ge.f32.partialorder %v7617_v7, %v7990_v36 }
 0x3b3   :  { %v2942_v42 = vsel %vm2794_vm6, %v2587_v43, 0.0 }
 0x3b4   :  { %2931 = vadd.xlane.f32.xlu0 %v2930_v14  ;;  %v11134_v14 = vld [vmem:[#allocation8_spill] sm:$0xff] }
 0x3b5   :  { %2934 = vadd.xlane.f32.xlu1 %v2933_v4  ;;  %vm2327_vm10 = vcmp.ge.f32.partialorder %v11134_v14, %v7990_v36  ;;  %v2588_v4 = vsel %vm2326_vm9, %v8001_v46, 0.0  ;;  %v2590_v14 = vsel %vm2328_vm11, %v8001_v46, 0.0  ;;  %v8296_v53 = vpop.permute.xlu1 %2213  ;;  %v8302_v57 = vpop.permute.xlu0 %2220  ;;  %vm2341_vm9 = vcmp.ge.f32.partialorder %v7615_v45, %v7990_v36 }
 0x3b6   :  { %v2945_v26 = vsel %vm2794_vm6, %v2588_v4, 0.0  ;;  %v2589_v15 = vsel %vm2327_vm10, %v8001_v46, 0.0  ;;  %v2951_v4 = vsel %vm2794_vm6, %v2590_v14, 0.0  ;;  %11143 = vst [vmem:[#allocation9_spill] sm:$0xff] %v8296_v53  ;;  %11145 = vst [vmem:[#allocation8_spill] sm:$0xff] %v8302_v57  ;;  %vm2342_vm10 = vcmp.ge.f32.partialorder %v7623_v2, %v7990_v36 }
 0x3b7   :  { %v2948_v43 = vsel %vm2794_vm6, %v2589_v15, 0.0  ;;  %v2604_v45 = vsel %vm2342_vm10, %v8001_v46, 0.0  ;;  %v8426_v57 = vstv %s6351_s7 }
 0x3b8   :  { %2937 = vadd.xlane.f32.xlu0 %v2936_v49  ;;  %v11137_v49 = vld [vmem:[#allocation68_spill] sm:$0xff] }
 0x3b9   :  { %2940 = vadd.xlane.f32.xlu1 %v2939_v55  ;;  %vm2329_vm12 = vcmp.ge.f32.partialorder %v11137_v49, %v7990_v36  ;;  %v11138_v55 = vld [vmem:[#allocation70_spill] sm:$0xff]  ;;  %v11142_v49 = vld [vmem:[#allocation71_spill] sm:$0xff]  ;;  %v8315_v37 = vpop.permute.xlu1 %2224  ;;  %v8317_v0 = vpop.permute.xlu0 %2231 }
 0x3ba   :  { %vm2330_vm13 = vcmp.ge.f32.partialorder %v11138_v55, %v7990_v36  ;;  %v2591_v58 = vsel %vm2329_vm12, %v8001_v46, 0.0  ;;  %vm2332_vm15 = vcmp.ge.f32.partialorder %v11142_v49, %v7990_v36  ;;  %11149 = vst [vmem:[#allocation69_spill] sm:$0xff] %v8315_v37  ;;  %11150 = vst [vmem:[#allocation68_spill] sm:$0xff] %v8317_v0 }
 0x3bb   :  { %v2954_v55 = vsel %vm2794_vm6, %v2591_v58, 0.0 }
 0x3bc   :  { %2943 = vadd.xlane.f32.xlu0 %v2942_v42  ;;  %v11141_v42 = vld [vmem:[#allocation10_spill] sm:$0xff] }
 0x3bd   :  { %2946 = vadd.xlane.f32.xlu1 %v2945_v26  ;;  %vm2331_vm14 = vcmp.ge.f32.partialorder %v11141_v42, %v7990_v36  ;;  %v2592_v26 = vsel %vm2330_vm13, %v8001_v46, 0.0  ;;  %v11146_v42 = vld [vmem:[#allocation72_spill] sm:$0xff]  ;;  %v8328_v54 = vpop.permute.xlu1 %2235  ;;  %v8334_v56 = vpop.permute.xlu0 %2242 }
 0x3be   :  { %v2957_v15 = vsel %vm2794_vm6, %v2592_v26, 0.0  ;;  %v2593_v14 = vsel %vm2331_vm14, %v8001_v46, 0.0  ;;  %vm2334_vm1 = vcmp.ge.f32.partialorder %v11146_v42, %v7990_v36  ;;  %11153 = vst [vmem:[#allocation70_spill] sm:$0xff] %v8328_v54  ;;  %11155 = vst [vmem:[#allocation10_spill] sm:$0xff] %v8334_v56  ;;  %v11168_v56 = vld [vmem:[#allocation96_spill] sm:$0xff] }
 0x3bf   :  { %v2960_v58 = vsel %vm2794_vm6, %v2593_v14, 0.0 }
 0x3c0   :  { %2949 = vadd.xlane.f32.xlu0 %v2948_v43  ;;  %v11144_v43 = vld [vmem:[#allocation11_spill] sm:$0xff] }
 0x3c1   :  { %2952 = vadd.xlane.f32.xlu1 %v2951_v4  ;;  %vm2333_vm0 = vcmp.ge.f32.partialorder %v11144_v43, %v7990_v36  ;;  %v2594_v4 = vsel %vm2332_vm15, %v8001_v46, 0.0  ;;  %v2596_v43 = vsel %vm2334_vm1, %v8001_v46, 0.0 }
 0x3c2   :  { %v2963_v49 = vsel %vm2794_vm6, %v2594_v4, 0.0  ;;  %v2595_v26 = vsel %vm2333_vm0, %v8001_v46, 0.0  ;;  %v2969_v4 = vsel %vm2794_vm6, %v2596_v43, 0.0 }
 0x3c3   :  { %v2966_v14 = vsel %vm2794_vm6, %v2595_v26, 0.0 }
 0x3c4   :  { %2955 = vadd.xlane.f32.xlu0 %v2954_v55  ;;  %v11147_v55 = vld [vmem:[#allocation12_spill] sm:$0xff] }
 0x3c5   :  { %2958 = vadd.xlane.f32.xlu1 %v2957_v15  ;;  %vm2335_vm2 = vcmp.ge.f32.partialorder %v11147_v55, %v7990_v36  ;;  %v11148_v15 = vld [vmem:[#allocation74_spill] sm:$0xff]  ;;  %v11152_v55 = vld [vmem:[#allocation75_spill] sm:$0xff] }
 0x3c6   :  { %vm2336_vm3 = vcmp.ge.f32.partialorder %v11148_v15, %v7990_v36  ;;  %v2597_v42 = vsel %vm2335_vm2, %v8001_v46, 0.0  ;;  %vm2338_vm5 = vcmp.ge.f32.partialorder %v11152_v55, %v7990_v36  ;;  %v2602_v55 = vsel %vm2340_vm8, %v8001_v46, 0.0 }
 0x3c7   :  { %v2972_v15 = vsel %vm2794_vm6, %v2597_v42, 0.0  ;;  %vm2350_vm2 = vcmp.ge.f32.partialorder %v11168_v56, %v7990_v36 }
 0x3c8   :  { %2961 = vadd.xlane.f32.xlu0 %v2960_v58  ;;  %v11151_v58 = vld [vmem:[#allocation73_spill] sm:$0xff] }
 0x3c9   :  { %2964 = vadd.xlane.f32.xlu1 %v2963_v49  ;;  %vm2337_vm4 = vcmp.ge.f32.partialorder %v11151_v58, %v7990_v36  ;;  %v2598_v49 = vsel %vm2336_vm3, %v8001_v46, 0.0 }
 0x3ca   :  { %v2975_v26 = vsel %vm2794_vm6, %v2598_v49, 0.0  ;;  %v2599_v43 = vsel %vm2337_vm4, %v8001_v46, 0.0 }
 0x3cb   :  { %v2978_v42 = vsel %vm2794_vm6, %v2599_v43, 0.0  ;;  %v2987_v43 = vsel %vm2794_vm6, %v2602_v55, 0.0 }
 0x3cc   :  { %2967 = vadd.xlane.f32.xlu0 %v2966_v14  ;;  %v11154_v14 = vld [vmem:[#allocation13_spill] sm:$0xff] }
 0x3cd   :  { %2970 = vadd.xlane.f32.xlu1 %v2969_v4  ;;  %vm2339_vm7 = vcmp.ge.f32.partialorder %v11154_v14, %v7990_v36  ;;  %v2600_v4 = vsel %vm2338_vm5, %v8001_v46, 0.0  ;;  %v2603_v14 = vsel %vm2341_vm9, %v8001_v46, 0.0 }
 0x3ce   :  { %v2981_v58 = vsel %vm2794_vm6, %v2600_v4, 0.0  ;;  %v2601_v49 = vsel %vm2339_vm7, %v8001_v46, 0.0  ;;  %v11158_v4 = vld [vmem:[#allocation25_spill] sm:$0xff]  ;;  %v2990_v2 = vsel %vm2794_vm6, %v2603_v14, 0.0 }
 0x3cf   :  { %v2984_v7 = vsel %vm2794_vm6, %v2601_v49, 0.0  ;;  %vm2343_vm11 = vcmp.ge.f32.partialorder %v11158_v4, %v7990_v36  ;;  %v2993_v49 = vsel %vm2794_vm6, %v2604_v45, 0.0  ;;  %v11163_v4 = vld [vmem:[#allocation94_spill] sm:$0xff] }
 0x3d0   :  { %2973 = vadd.xlane.f32.xlu0 %v2972_v15  ;;  %v8347_v15 = vpop.permute.xlu1 %2246  ;;  %v2605_v55 = vsel %vm2343_vm11, %v8001_v46, 0.0  ;;  %vm2346_vm14 = vcmp.ge.f32.partialorder %v11163_v4, %v7990_v36  ;;  %vm2360_vm11 = vcmp.ge.f32.partialorder %v11176_v61, %v7990_v36  ;;  %v8467_v61 = vstv %s8404_s13 }
 0x3d1   :  { %2976 = vadd.xlane.f32.xlu1 %v2975_v26  ;;  %11156 = vst [vmem:[#allocation71_spill] sm:$0xff] %v8347_v15  ;;  %v8349_v26 = vpop.permute.xlu0 %2253  ;;  %v2996_v14 = vsel %vm2794_vm6, %v2605_v55, 0.0 }
 0x3d2   :  { %11157 = vst [vmem:[#allocation11_spill] sm:$0xff] %v8349_v26 }
 0x3d4   :  { %2979 = vadd.xlane.f32.xlu0 %v2978_v42  ;;  %v11159_v42 = vld [vmem:[#allocation93_spill] sm:$0xff] }
 0x3d5   :  { %2982 = vadd.xlane.f32.xlu1 %v2981_v58  ;;  %vm2344_vm12 = vcmp.ge.f32.partialorder %v11159_v42, %v7990_v36  ;;  %v8360_v58 = vpop.permute.xlu1 %2257  ;;  %v8366_v26 = vpop.permute.xlu0 %2264 }
 0x3d6   :  { %11160 = vst [vmem:[#allocation72_spill] sm:$0xff] %v8360_v58  ;;  %11162 = vst [vmem:[#allocation12_spill] sm:$0xff] %v8366_v26  ;;  %v11165_v26 = vld [vmem:[#allocation95_spill] sm:$0xff] }
 0x3d7   :  { %vm2348_vm0 = vcmp.ge.f32.partialorder %v11165_v26, %v7990_v36 }
 0x3d8   :  { %2985 = vadd.xlane.f32.xlu0 %v2984_v7  ;;  %v11161_v7 = vld [vmem:[#allocation92_spill] sm:$0xff] }
 0x3d9   :  { %2988 = vadd.xlane.f32.xlu1 %v2987_v43  ;;  %vm2345_vm13 = vcmp.ge.f32.partialorder %v11161_v7, %v7990_v36  ;;  %v2606_v43 = vsel %vm2344_vm12, %v8001_v46, 0.0  ;;  %v8381_v58 = vpop.permute.xlu1 %2268 }
 0x3da   :  { %v2999_v42 = vsel %vm2794_vm6, %v2606_v43, 0.0  ;;  %v2607_v45 = vsel %vm2345_vm13, %v8001_v46, 0.0  ;;  %11166 = vst [vmem:[#allocation74_spill] sm:$0xff] %v8381_v58  ;;  %v11171_v58 = vld [vmem:[#allocation28_spill] sm:$0xff] }
 0x3db   :  { %v3002_v55 = vsel %vm2794_vm6, %v2607_v45, 0.0  ;;  %v11169_v45 = vld [vmem:[#allocation82_spill] sm:$0xff]  ;;  %vm2351_vm5 = vcmp.ge.f32.partialorder %v11171_v58, %v7990_v36 }
 0x3dc   :  { %2991 = vadd.xlane.f32.xlu0 %v2990_v2  ;;  %v11164_v2 = vld [vmem:[#allocation26_spill] sm:$0xff]  ;;  %vm2356_vm3 = vcmp.ge.f32.partialorder %v11169_v45, %v7990_v36  ;;  %v2612_v45 = vsel %vm2350_vm2, %v8001_v46, 0.0  ;;  %v2613_v22 = vsel %vm2351_vm5, %v8001_v46, 0.0  ;;  %vm4344_vm2 = vcmask 130112  }
 0x3dd   :  { %2994 = vadd.xlane.f32.xlu1 %v2993_v49  ;;  %vm2347_vm15 = vcmp.ge.f32.partialorder %v11164_v2, %v7990_v36  ;;  %v2608_v49 = vsel %vm2346_vm14, %v8001_v46, 0.0  ;;  %v2610_v2 = vsel %vm2348_vm0, %v8001_v46, 0.0  ;;  %v3017_v11 = vsel %vm2794_vm6, %v2612_v45, 0.0  ;;  %v11178_v45 = vld [vmem:[#allocation98_spill] sm:$0xff] }
 0x3de   :  { %v3005_v43 = vsel %vm2794_vm6, %v2608_v49, 0.0  ;;  %v2609_v4 = vsel %vm2347_vm15, %v8001_v46, 0.0  ;;  %vm2354_vm13 = vcmp.ge.f32.partialorder %v11178_v45, %v7990_v36  ;;  %vm2362_vm14 = vcmp.ge.f32.partialorder %v11179_v44, %v7990_v36  ;;  %v11183_v45 = vld [vmem:[#allocation87_spill] sm:$0xff] }
 0x3df   :  { %v3008_v49 = vsel %vm2794_vm6, %v2609_v4, 0.0  ;;  %v11172_v4 = vld [vmem:[#allocation97_spill] sm:$0xff]  ;;  %vm5491_vm5 = vcmask 1042434  }
 0x3e0   :  { %2997 = vadd.xlane.f32.xlu0 %v2996_v14  ;;  %v11167_v14 = vld [vmem:[#allocation27_spill] sm:$0xff]  ;;  %vm2352_vm7 = vcmp.ge.f32.partialorder %v11172_v4, %v7990_v36  ;;  %v3020_v4 = vsel %vm2794_vm6, %v2613_v22, 0.0 }
 0x3e1   :  { %3000 = vadd.xlane.f32.xlu1 %v2999_v42  ;;  %v8376_v7 = vpop.xlane.xlu0 %2796  ;;  %vm2349_vm1 = vcmp.ge.f32.partialorder %v11167_v14, %v7990_v36 }
 0x3e2   :  { %v2611_v14 = vsel %vm2349_vm1, %v8001_v46, 0.0  ;;  %vm2364_vm1 = vcmp.ge.f32.partialorder %v11183_v45, %v7990_v36 }
 0x3e3   :  { %v3014_v54 = vsel %vm2794_vm6, %v2611_v14, 0.0  ;;  %v11177_v14 = vld [vmem:[#allocation29_spill] sm:$0xff] }
 0x3e4   :  { %3003 = vadd.xlane.f32.xlu0 %v3002_v55  ;;  %v11170_v55 = vld [vmem:[#allocation19_spill] sm:$0xff]  ;;  %vm2353_vm12 = vcmp.ge.f32.partialorder %v11177_v14, %v7990_v36  ;;  %v4334_v14 = vand.u32 127, %v11182_v38  ;;  %v2624_v38 = vsel %vm2362_vm14, %v8001_v46, 0.0 }
 0x3e5   :  { %3006 = vadd.xlane.f32.xlu1 %v3005_v43  ;;  %v8388_v42 = vpop.xlane.xlu0 %2802  ;;  %vm2357_vm4 = vcmp.ge.f32.partialorder %v11170_v55, %v7990_v36  ;;  %v3011_v43 = vsel %vm2794_vm6, %v2610_v2, 0.0  ;;  %v11173_v2 = vld [vmem:[#allocation20_spill] sm:$0xff]  ;;  %v11174_v55 = vld [vmem:[#allocation83_spill] sm:$0xff] }
 0x3e6   :  { %v8393_v26 = vpop.xlane.xlu1 %2799  ;;  %vm2359_vm8 = vcmp.ge.f32.partialorder %v11173_v2, %v7990_v36  ;;  %vm2358_vm9 = vcmp.ge.f32.partialorder %v11174_v55, %v7990_v36  ;;  %v2619_v0 = vsel %vm2357_vm4, %v8001_v46, 0.0  ;;  %v11180_v2 = vld [vmem:[#allocation30_spill] sm:$0xff] }
 0x3e7   :  { %v2620_v53 = vsel %vm2358_vm9, %v8001_v46, 0.0  ;;  %v8447_v60 = vsel %vm2794_vm6, %v2619_v0, 0.0  ;;  %vm2355_vm15 = vcmp.ge.f32.partialorder %v11180_v2, %v7990_v36  ;;  %v2615_v0 = vsel %vm2353_vm12, %v8001_v46, 0.0 }
 0x3e8   :  { %3009 = vadd.xlane.f32.xlu0 %v3008_v49  ;;  %v2618_v49 = vsel %vm2356_vm3, %v8001_v46, 0.0  ;;  %v3041_v17 = vsel %vm2794_vm6, %v2620_v53, 0.0  ;;  %v3026_v53 = vsel %vm2794_vm6, %v2615_v0, 0.0  ;;  %v3565_v0 = vadd.f32 %v8467_v61, %v8393_v26 }
 0x3e9   :  { %3012 = vadd.xlane.f32.xlu1 %v3011_v43  ;;  %v2806_v56 = vpop.xlane.xlu0 %2805  ;;  %v11175_v43 = vld [vmem:[#allocation84_spill] sm:$0xff]  ;;  %v3035_v58 = vsel %vm2794_vm6, %v2618_v49, 0.0  ;;  %v2622_v49 = vsel %vm2360_vm11, %v8001_v46, 0.0  ;;  %v8515_v26 = vsel %vm2794_vm6, %v2624_v38, 0.0  ;;  %vm5489_vm3 = vcmask 1041409  }
 0x3ea   :  { %v2809_v15 = vpop.xlane.xlu1 %2808  ;;  %vm2361_vm10 = vcmp.ge.f32.partialorder %v11175_v43, %v7990_v36  ;;  %v2616_v43 = vsel %vm2354_vm13, %v8001_v46, 0.0  ;;  %v8481_v31 = vsel %vm2794_vm6, %v2622_v49, 0.0  ;;  %v3564_v49 = vadd.f32 %v8467_v61, %v8376_v7 }
 0x3eb   :  { %v2623_v55 = vsel %vm2361_vm10, %v8001_v46, 0.0  ;;  %v3567_v20 = vadd.f32 %v8467_v61, %v2806_v56  ;;  %v3029_v13 = vsel %vm2794_vm6, %v2616_v43, 0.0  ;;  %v3566_v7 = vadd.f32 %v8467_v61, %v8388_v42 }
 0x3ec   :  { %3015 = vadd.xlane.f32.xlu0 %v3014_v54  ;;  %v2614_v54 = vsel %vm2352_vm7, %v8001_v46, 0.0  ;;  %v3568_v56 = vadd.f32 %v8467_v61, %v2809_v15  ;;  %v3821_v15 = vmul.f32 %v8426_v57, %v3564_v49  ;;  %v3822_v45 = vmul.f32 %v8426_v57, %v3565_v0 }
 0x3ed   :  { %3018 = vadd.xlane.f32.xlu1 %v3017_v11  ;;  %v2812_v37 = vpop.xlane.xlu0 %2811  ;;  %v2621_v11 = vsel %vm2359_vm8, %v8001_v46, 0.0  ;;  %v3023_v22 = vsel %vm2794_vm6, %v2614_v54, 0.0  ;;  %v11181_v54 = vld [vmem:[#allocation21_spill] sm:$0xff]  ;;  %v3824_v50 = vmul.f32 %v8426_v57, %v3567_v20  ;;  %vm5493_vm7 = vcmask 1043459  }
 0x3ee   :  { %v2815_v25 = vpop.xlane.xlu1 %2814  ;;  %vm2363_vm0 = vcmp.ge.f32.partialorder %v11181_v54, %v7990_v36  ;;  %v3569_v2 = vadd.f32 %v8467_v61, %v2812_v37  ;;  %v8521_v37 = vsel %vm2364_vm1, %v8001_v46, 0.0  ;;  %v3825_v49 = vmul.f32 %v8426_v57, %v3568_v56 }
 0x3ef   :  { %v8509_v44 = vsel %vm2363_vm0, %v8001_v46, 0.0  ;;  %v3570_v54 = vadd.f32 %v8467_v61, %v2815_v25  ;;  %vm5495_vm8 = vcmask 1044484   ;;  %vm5497_vm9 = vcmask 1045509  }
 0x3f0   :  { %3021 = vadd.xlane.f32.xlu0 %v3020_v4  ;;  %v8475_v4 = vsel %vm2794_vm6, %v2621_v11, 0.0  ;;  %v2617_v11 = vsel %vm2355_vm15, %v8001_v46, 0.0  ;;  %vm10781_vm11 = vcmask 1046534   ;;  %vm10780_vm12 = vcmask 1047559  }
 0x3f1   :  { %3024 = vadd.xlane.f32.xlu1 %v3023_v22  ;;  %v2818_v47 = vpop.xlane.xlu0 %2817  ;;  %v8484_v22 = vsel %vm2794_vm6, %v2623_v55, 0.0  ;;  %v4339_v55 = vadd.s32 4294967288, %v4334_v14  ;;  %v3032_v42 = vsel %vm2794_vm6, %v2617_v11, 0.0  ;;  %v3823_v11 = vmul.f32 %v8426_v57, %v3566_v7 }
 0x3f2   :  { %v2821_v48 = vpop.xlane.xlu1 %2820  ;;  %v3571_v33 = vadd.f32 %v8467_v61, %v2818_v47  ;;  %v3827_v0 = vmul.f32 %v8426_v57, %v3570_v54  ;;  %vm10779_vm13 = vcmask 130048  }
 0x3f3   :  { %v3572_v25 = vadd.f32 %v8467_v61, %v2821_v48  ;;  %v11185_v48 = vld [vmem:[#allocation22_spill] sm:$0xff] }
 0x3f4   :  { %3027 = vadd.xlane.f32.xlu0 %v3026_v53  ;;  %v3828_v30 = vmul.f32 %v8426_v57, %v3571_v33  ;;  %vm2365_vm4 = vcmp.ge.f32.partialorder %v11185_v48, %v7990_v36 }
 0x3f5   :  { %3030 = vadd.xlane.f32.xlu1 %v3029_v13  ;;  %v2824_v3 = vpop.xlane.xlu0 %2823  ;;  %v11184_v13 = vld [vmem:[#allocation5_spill] sm:$0xff] }
 0x3f6   :  { %v2827_v43 = vpop.xlane.xlu1 %2826  ;;  %v8524_v47 = vsub.s32 %v4334_v14, %v11184_v13  ;;  %v3573_v53 = vadd.f32 %v8467_v61, %v2824_v3  ;;  %v8531_v38 = vsub.s32 %v4339_v55, %v11184_v13  ;;  %v3826_v14 = vmul.f32 %v8426_v57, %v3569_v2 }
 0x3f7   :  { %v3574_v55 = vadd.f32 %v8467_v61, %v2827_v43 }
 0x3f8   :  { %3033 = vadd.xlane.f32.xlu0 %v3032_v42  ;;  %v3830_v2 = vmul.f32 %v8426_v57, %v3573_v53  ;;  %v4353_v7 = vrot.slane %v3824_v50, %v8531_v38  ;;  %v4343_v43 = vrot.slane %v3822_v45, %v8531_v38  ;;  %v4362_v54 = vrot.slane %v3826_v14, %v8531_v38 }
 0x3f9   :  { %3036 = vadd.xlane.f32.xlu1 %v3035_v58  ;;  %v2830_v3 = vpop.xlane.xlu0 %2829  ;;  %v4338_v58 = vrot.slane %v3821_v15, %v8524_v47  ;;  %v4371_v53 = vrot.slane %v3828_v30, %v8531_v38  ;;  %v3829_v42 = vmul.f32 %v8426_v57, %v3572_v25  ;;  %v4358_v15 = vrot.slane %v3825_v49, %v8524_v47 }
 0x3fa   :  { %v3575_v13 = vadd.f32 %v8467_v61, %v2830_v3  ;;  %v2833_v20 = vpop.xlane.xlu1 %2832  ;;  %v3831_v50 = vmul.f32 %v8426_v57, %v3574_v55  ;;  %v4380_v45 = vrot.slane %v3830_v2, %v8531_v38 }
 0x3fb   :  { %v3576_v33 = vadd.f32 %v8467_v61, %v2833_v20  ;;  %v4349_v20 = vrot.slane %v3823_v11, %v8524_v47  ;;  %v4345_v49 = vsel %vm4344_vm2, %v4343_v43, %v4338_v58  ;;  %v4363_v55 = vsel %vm4344_vm2, %v4362_v54, %v4358_v15 }
 0x3fc   :  { %v3832_v56 = vmul.f32 %v8426_v57, %v3575_v13  ;;  %3039 = vadd.xlane.f32.xlu0 %v8447_v60  ;;  %v4367_v60 = vrot.slane %v3827_v0, %v8524_v47  ;;  %v4376_v2 = vrot.slane %v3829_v42, %v8524_v47 }
 0x3fd   :  { %3042 = vadd.xlane.f32.xlu1 %v3041_v17  ;;  %v2836_v3 = vpop.xlane.xlu0 %2835  ;;  %v3833_v14 = vmul.f32 %v8426_v57, %v3576_v33  ;;  %v4354_v17 = vsel %vm4344_vm2, %v4353_v7, %v4349_v20  ;;  %v4385_v33 = vrot.slane %v3831_v50, %v8524_v47  ;;  %v11186_v20 = vld [vmem:[#allocation89_spill] sm:$0xff] }
 0x3fe   :  { %v3577_v13 = vadd.f32 %v8467_v61, %v2836_v3  ;;  %v2839_v21 = vpop.xlane.xlu1 %2838  ;;  %v4389_v25 = vrot.slane %v3832_v56, %v8531_v38  ;;  %v4372_v0 = vsel %vm4344_vm2, %v4371_v53, %v4367_v60  ;;  %v5490_v58 = vsel %vm5489_vm3, %v4354_v17, %v4345_v49 }
 0x3ff   :  { %v3578_v30 = vadd.f32 %v8467_v61, %v2839_v21  ;;  %v4381_v43 = vsel %vm4344_vm2, %v4380_v45, %v4376_v2  ;;  %v4394_v54 = vrot.slane %v3833_v14, %v8524_v47  ;;  %vm2366_vm10 = vcmp.ge.f32.partialorder %v11186_v20, %v7990_v36 }
 0x400   :  { %v3834_v11 = vmul.f32 %v8426_v57, %v3577_v13  ;;  %3045 = vadd.xlane.f32.xlu0 %v8475_v4  ;;  %v4390_v53 = vsel %vm4344_vm2, %v4389_v25, %v4385_v33  ;;  %v3056_v17 = vsel %vm2794_vm6, %v8509_v44, 0.0  ;;  %v11187_v25 = vld [vmem:[#allocation88_spill] sm:$0xff]  ;;  %v2628_v48 = vsel %vm2366_vm10, %v8001_v46, 0.0  ;;  %v8623_v33 = vld [vmem:[%s10636_s4] ss:$0 sm:$0xff] }
 0x401   :  { %3048 = vadd.xlane.f32.xlu1 %v8481_v31  ;;  %v2842_v21 = vpop.xlane.xlu0 %2841  ;;  %v3835_v56 = vmul.f32 %v8426_v57, %v3578_v30  ;;  %v5492_v31 = vsel %vm5491_vm5, %v4363_v55, %v5490_v58  ;;  %vm2367_vm14 = vcmp.ge.f32.partialorder %v11187_v25, %v7990_v36  ;;  %v3059_v55 = vsel %vm2794_vm6, %v8521_v37, 0.0 }
 0x402   :  { %v4398_v7 = vrot.slane %v3834_v11, %v8531_v38  ;;  %v3579_v3 = vadd.f32 %v8467_v61, %v2842_v21  ;;  %v8576_v4 = vpop.xlane.xlu1 %2844  ;;  %v5494_v15 = vsel %vm5493_vm7, %v4372_v0, %v5492_v31  ;;  %v11188_v0 = vld [vmem:[#allocation90_spill] sm:$0xff] }
 0x403   :  { %v5496_v60 = vsel %vm5495_vm8, %v4381_v43, %v5494_v15  ;;  %v4403_v45 = vrot.slane %v3835_v56, %v8524_v47  ;;  %vm2368_vm15 = vcmp.ge.f32.partialorder %v11188_v0, %v7990_v36  ;;  %v8629_v36 = vld [vmem:[%s10635_s3] ss:$0 sm:$0xff]  ;;  %v11190_v56 = vld [vmem:[#allocation91_spill] sm:$0xff]  ;;  %v11191_v43 = vld [vmem:[#allocation24_spill] sm:$0xff] }
 0x404   :  { %v3836_v42 = vmul.f32 %v8426_v57, %v3579_v3  ;;  %3051 = vadd.xlane.f32.xlu0 %v8484_v22  ;;  %v4399_v50 = vsel %vm4344_vm2, %v4398_v7, %v4394_v54  ;;  %v5498_v22 = vsel %vm5497_vm9, %v4390_v53, %v5496_v60  ;;  %v2629_v7 = vsel %vm2367_vm14, %v8623_v33, 0.0  ;;  %v11192_v60 = vld [vmem:[#allocation37_spill] sm:$0xff] }
 0x405   :  { %3054 = vadd.xlane.f32.xlu1 %v8515_v26  ;;  %v2848_v13 = vpop.xlane.xlu0 %2847  ;;  %v2627_v26 = vsel %vm2365_vm4, %v8001_v46, 0.0  ;;  %v5500_v11 = vsel %vm10781_vm11, %v4399_v50, %v5498_v22  ;;  %v11189_v46 = vld [vmem:[#allocation23_spill] sm:$0xff]  ;;  %vm2370_vm1 = vcmp.ge.f32.partialorder %v11190_v56, %v8629_v36  ;;  %v3065_v3 = vsel %vm2794_vm6, %v2628_v48, 0.0  ;;  %v11194_v22 = vld [vmem:[#allocation38_spill] sm:$0xff] }
 0x406   :  { %v4407_v14 = vrot.slane %v3836_v42, %v8531_v38  ;;  %v8593_v30 = vpop.xlane.xlu1 %2850  ;;  %v3062_v37 = vsel %vm2794_vm6, %v2627_v26, 0.0  ;;  %vm2369_vm0 = vcmp.ge.f32.partialorder %v11189_v46, %v8629_v36  ;;  %v2630_v58 = vsel %vm2368_vm15, %v8623_v33, 0.0 }
 0x407   :  { %vm2371_vm4 = vcmp.ge.f32.partialorder %v11191_v43, %v8629_v36  ;;  %vm2372_vm10 = vcmp.ge.f32.partialorder %v7713_v16, %v8629_v36  ;;  %v3068_v53 = vsel %vm2794_vm6, %v2629_v7, 0.0  ;;  %v3071_v42 = vsel %vm2794_vm6, %v2630_v58, 0.0 }
 0x408   :  { %v4408_v49 = vsel %vm4344_vm2, %v4407_v14, %v4403_v45  ;;  %3057 = vadd.xlane.f32.xlu0 %v3056_v17  ;;  %v2631_v20 = vsel %vm2369_vm0, %v8623_v33, 0.0  ;;  %v2632_v15 = vsel %vm2370_vm1, %v8623_v33, 0.0  ;;  %vm2373_vm14 = vcmp.ge.f32.partialorder %v7711_v8, %v8629_v36  ;;  %v11193_v45 = vld [vmem:[#allocation109_spill] sm:$0xff] }
 0x409   :  { %v5502_v44 = vsel %vm10780_vm12, %v4408_v49, %v5500_v11  ;;  %3060 = vadd.xlane.f32.xlu1 %v3059_v55  ;;  %v2854_v2 = vpop.xlane.xlu0 %2853  ;;  %vm2374_vm15 = vcmp.ge.f32.partialorder %v7719_v27, %v8629_v36  ;;  %v2633_v16 = vsel %vm2371_vm4, %v8623_v33, 0.0  ;;  %v2634_v50 = vsel %vm2372_vm10, %v8623_v33, 0.0 }
 0x40a   :  { %5625 = vst.msk [vmem:[%s10638_s6] sm:$0xff] %vm10779_vm13, %v5502_v44  ;;  %v2857_v21 = vpop.xlane.xlu1 %2856  ;;  %vm2375_vm13 = vcmp.ge.f32.partialorder %v11192_v60, %v8629_v36  ;;  %vm2376_vm12 = vcmp.ge.f32.partialorder %v11193_v45, %v8629_v36  ;;  %vm2377_vm0 = vcmp.ge.f32.partialorder %v11194_v22, %v8629_v36  ;;  %v3074_v17 = vsel %vm2794_vm6, %v2631_v20, 0.0 }
 0x40b   :  { %v3077_v27 = vsel %vm2794_vm6, %v2632_v15, 0.0  ;;  %v3080_v26 = vsel %vm2794_vm6, %v2633_v16, 0.0  ;;  %v3083_v25 = vsel %vm2794_vm6, %v2634_v50, 0.0  ;;  %v2635_v11 = vsel %vm2373_vm14, %v8623_v33, 0.0  ;;  %v11195_v15 = vld [vmem:[#allocation110_spill] sm:$0xff] }
 0x40c   :  { %3063 = vadd.xlane.f32.xlu0 %v3062_v37  ;;  %v2636_v49 = vsel %vm2374_vm15, %v8623_v33, 0.0  ;;  %v3580_v55 = vadd.f32 %v8467_v61, %v8576_v4  ;;  %v3583_v0 = vadd.f32 %v8467_v61, %v2854_v2  ;;  %v2637_v44 = vsel %vm2375_vm13, %v8623_v33, 0.0 }
 0x40d   :  { %3066 = vadd.xlane.f32.xlu1 %v3065_v3  ;;  %v2860_v54 = vpop.xlane.xlu0 %2859  ;;  %v2638_v48 = vsel %vm2376_vm12, %v8623_v33, 0.0  ;;  %v3581_v37 = vadd.f32 %v8467_v61, %v2848_v13  ;;  %v2639_v4 = vsel %vm2377_vm0, %v8623_v33, 0.0  ;;  %v3582_v2 = vadd.f32 %v8467_v61, %v8593_v30 }
 0x40e   :  { %v2863_v31 = vpop.xlane.xlu1 %2862  ;;  %v3585_v7 = vadd.f32 %v8467_v61, %v2860_v54  ;;  %v3584_v3 = vadd.f32 %v8467_v61, %v2857_v21  ;;  %v3086_v43 = vsel %vm2794_vm6, %v2635_v11, 0.0  ;;  %v3089_v13 = vsel %vm2794_vm6, %v2636_v49, 0.0  ;;  %v11196_v49 = vld [vmem:[#allocation39_spill] sm:$0xff] }
 0x40f   :  { %v3586_v54 = vadd.f32 %v8467_v61, %v2863_v31  ;;  %v3095_v20 = vsel %vm2794_vm6, %v2638_v48, 0.0  ;;  %vm2378_vm12 = vcmp.ge.f32.partialorder %v11195_v15, %v8629_v36  ;;  %v3837_v30 = vmul.f32 %v8426_v57, %v3580_v55 }
 0x410   :  { %3069 = vadd.xlane.f32.xlu0 %v3068_v53  ;;  %v3840_v21 = vmul.f32 %v8426_v57, %v3583_v0  ;;  %v3098_v16 = vsel %vm2794_vm6, %v2639_v4, 0.0  ;;  %v3838_v50 = vmul.f32 %v8426_v57, %v3581_v37  ;;  %v3842_v31 = vmul.f32 %v8426_v57, %v3585_v7 }
 0x411   :  { %3072 = vadd.xlane.f32.xlu1 %v3071_v42  ;;  %v2866_v14 = vpop.xlane.xlu0 %2865  ;;  %v3092_v42 = vsel %vm2794_vm6, %v2637_v44, 0.0  ;;  %v3839_v22 = vmul.f32 %v8426_v57, %v3582_v2  ;;  %vm2379_vm13 = vcmp.ge.f32.partialorder %v11196_v49, %v8629_v36  ;;  %v3843_v55 = vmul.f32 %v8426_v57, %v3586_v54 }
 0x412   :  { %v2869_v8 = vpop.xlane.xlu1 %2868  ;;  %v3587_v46 = vadd.f32 %v8467_v61, %v2866_v14  ;;  %v4425_v44 = vrot.slane %v3840_v21, %v8531_v38  ;;  %v2640_v37 = vsel %vm2378_vm12, %v8623_v33, 0.0  ;;  %v4416_v7 = vrot.slane %v3838_v50, %v8531_v38 }
 0x413   :  { %v3588_v45 = vadd.f32 %v8467_v61, %v2869_v8  ;;  %v4439_v15 = vrot.slane %v3843_v55, %v8524_v47  ;;  %vm11201_vm15 = vcmask 1047559   ;;  %vm11203_vm12 = vcmask 130048  }
 0x414   :  { %3075 = vadd.xlane.f32.xlu0 %v3074_v17  ;;  %v3844_v60 = vmul.f32 %v8426_v57, %v3587_v46  ;;  %v3841_v17 = vmul.f32 %v8426_v57, %v3584_v3  ;;  %v4434_v46 = vrot.slane %v3842_v31, %v8531_v38  ;;  %v4421_v3 = vrot.slane %v3839_v22, %v8524_v47 }
 0x415   :  { %3078 = vadd.xlane.f32.xlu1 %v3077_v27  ;;  %v2872_v56 = vpop.xlane.xlu0 %2871  ;;  %v3845_v4 = vmul.f32 %v8426_v57, %v3588_v45 }
 0x416   :  { %v2875_v58 = vpop.xlane.xlu1 %2874  ;;  %v3589_v53 = vadd.f32 %v8467_v61, %v2872_v56  ;;  %v4443_v56 = vrot.slane %v3844_v60, %v8531_v38  ;;  %v4426_v31 = vsel %vm4344_vm2, %v4425_v44, %v4421_v3 }
 0x417   :  { %v3590_v27 = vadd.f32 %v8467_v61, %v2875_v58  ;;  %v4430_v58 = vrot.slane %v3841_v17, %v8524_v47 }
 0x418   :  { %3081 = vadd.xlane.f32.xlu0 %v3080_v26  ;;  %v3846_v0 = vmul.f32 %v8426_v57, %v3589_v53  ;;  %v4444_v17 = vsel %vm4344_vm2, %v4443_v56, %v4439_v15 }
 0x419   :  { %3084 = vadd.xlane.f32.xlu1 %v3083_v25  ;;  %v2878_v14 = vpop.xlane.xlu0 %2877  ;;  %v4412_v25 = vrot.slane %v3837_v30, %v8524_v47  ;;  %v4435_v22 = vsel %vm4344_vm2, %v4434_v46, %v4430_v58 }
 0x41a   :  { %v3591_v26 = vadd.f32 %v8467_v61, %v2878_v14  ;;  %v2881_v11 = vpop.xlane.xlu1 %2880  ;;  %v4452_v30 = vrot.slane %v3846_v0, %v8531_v38 }
 0x41b   :  { %v3592_v8 = vadd.f32 %v8467_v61, %v2881_v11  ;;  %v4417_v14 = vsel %vm4344_vm2, %v4416_v7, %v4412_v25 }
 0x41c   :  { %v3848_v48 = vmul.f32 %v8426_v57, %v3591_v26  ;;  %3087 = vadd.xlane.f32.xlu0 %v3086_v43  ;;  %v3847_v43 = vmul.f32 %v8426_v57, %v3590_v27  ;;  %v4448_v27 = vrot.slane %v3845_v4, %v8524_v47  ;;  %v3101_v4 = vsel %vm2794_vm6, %v2640_v37, 0.0 }
 0x41d   :  { %3090 = vadd.xlane.f32.xlu1 %v3089_v13  ;;  %v2884_v2 = vpop.xlane.xlu0 %2883  ;;  %v3849_v21 = vmul.f32 %v8426_v57, %v3592_v8  ;;  %v11197_v13 = vld [vmem:[#allocation111_spill] sm:$0xff] }
 0x41e   :  { %v3593_v54 = vadd.f32 %v8467_v61, %v2884_v2  ;;  %v2887_v53 = vpop.xlane.xlu1 %2886  ;;  %vm2380_vm1 = vcmp.ge.f32.partialorder %v11197_v13, %v8629_v36  ;;  %v4461_v60 = vrot.slane %v3848_v48, %v8531_v38  ;;  %v4457_v11 = vrot.slane %v3847_v43, %v8524_v47  ;;  %v11198_v2 = vld [vmem:[#allocation40_spill] sm:$0xff] }
 0x41f   :  { %v3594_v50 = vadd.f32 %v8467_v61, %v2887_v53  ;;  %v4453_v25 = vsel %vm4344_vm2, %v4452_v30, %v4448_v27  ;;  %v4466_v48 = vrot.slane %v3849_v21, %v8524_v47  ;;  %vm2381_vm4 = vcmp.ge.f32.partialorder %v11198_v2, %v8629_v36  ;;  %v11202_v27 = vld [vmem:[#allocation113_spill] sm:$0xff] }
 0x420   :  { %v3850_v45 = vmul.f32 %v8426_v57, %v3593_v54  ;;  %3093 = vadd.xlane.f32.xlu0 %v3092_v42  ;;  %v5503_v42 = vsel %vm5489_vm3, %v4426_v31, %v4417_v14  ;;  %v4462_v46 = vsel %vm4344_vm2, %v4461_v60, %v4457_v11  ;;  %v2642_v49 = vsel %vm2380_vm1, %v8623_v33, 0.0  ;;  %v11199_v54 = vld [vmem:[#allocation112_spill] sm:$0xff]  ;;  %v11204_v11 = vld [vmem:[#allocation99_spill] sm:$0xff] }
 0x421   :  { %3096 = vadd.xlane.f32.xlu1 %v3095_v20  ;;  %v2890_v26 = vpop.xlane.xlu0 %2889  ;;  %v3851_v0 = vmul.f32 %v8426_v57, %v3594_v50  ;;  %v2641_v20 = vsel %vm2379_vm13, %v8623_v33, 0.0  ;;  %v5504_v7 = vsel %vm5491_vm5, %v4435_v22, %v5503_v42  ;;  %vm2382_vm10 = vcmp.ge.f32.partialorder %v11199_v54, %v8629_v36 }
 0x422   :  { %v4470_v55 = vrot.slane %v3850_v45, %v8531_v38  ;;  %v3595_v8 = vadd.f32 %v8467_v61, %v2890_v26  ;;  %v8734_v44 = vpop.xlane.xlu1 %2892  ;;  %v5505_v3 = vsel %vm5493_vm7, %v4444_v17, %v5504_v7  ;;  %v3104_v21 = vsel %vm2794_vm6, %v2641_v20, 0.0  ;;  %v11200_v45 = vld [vmem:[#allocation41_spill] sm:$0xff] }
 0x423   :  { %v4475_v37 = vrot.slane %v3851_v0, %v8524_v47  ;;  %v3107_v13 = vsel %vm2794_vm6, %v2642_v49, 0.0  ;;  %v2643_v60 = vsel %vm2381_vm4, %v8623_v33, 0.0  ;;  %vm2383_vm14 = vcmp.ge.f32.partialorder %v11200_v45, %v8629_v36  ;;  %v11205_v0 = vld [vmem:[#allocation31_spill] sm:$0xff]  ;;  %v11210_v49 = vld [vmem:[#allocation101_spill] sm:$0xff] }
 0x424   :  { %v3852_v56 = vmul.f32 %v8426_v57, %v3595_v8  ;;  %3099 = vadd.xlane.f32.xlu0 %v3098_v16  ;;  %v4471_v58 = vsel %vm4344_vm2, %v4470_v55, %v4466_v48  ;;  %v5506_v16 = vsel %vm5495_vm8, %v4453_v25, %v5505_v3  ;;  %v2644_v17 = vsel %vm2382_vm10, %v8623_v33, 0.0  ;;  %v11206_v25 = vld [vmem:[#allocation42_spill] sm:$0xff] }
 0x425   :  { %3102 = vadd.xlane.f32.xlu1 %v3101_v4  ;;  %v2896_v43 = vpop.xlane.xlu0 %2895  ;;  %v5507_v30 = vsel %vm5497_vm9, %v4462_v46, %v5506_v16  ;;  %vm2384_vm0 = vcmp.ge.f32.partialorder %v11202_v27, %v8629_v36  ;;  %vm2388_vm13 = vcmp.ge.f32.partialorder %v11204_v11, %v8629_v36  ;;  %v3110_v55 = vsel %vm2794_vm6, %v2643_v60, 0.0  ;;  %v11208_v4 = vld [vmem:[#allocation100_spill] sm:$0xff]  ;;  %v11211_v16 = vld [vmem:[#allocation43_spill] sm:$0xff] }
 0x426   :  { %v4479_v53 = vrot.slane %v3852_v56, %v8531_v38  ;;  %v2899_v15 = vpop.xlane.xlu1 %2898  ;;  %v5508_v50 = vsel %vm10781_vm11, %v4471_v58, %v5507_v30  ;;  %vm2389_vm1 = vcmp.ge.f32.partialorder %v11205_v0, %v8629_v36  ;;  %v3113_v8 = vsel %vm2794_vm6, %v2644_v17, 0.0  ;;  %v11207_v56 = vld [vmem:[#allocation32_spill] sm:$0xff]  ;;  %v11209_v58 = vld [vmem:[#allocation33_spill] sm:$0xff] }
 0x427   :  { %v2645_v42 = vsel %vm2383_vm14, %v8623_v33, 0.0  ;;  %vm2385_vm4 = vcmp.ge.f32.partialorder %v11206_v25, %v8629_v36  ;;  %v2646_v20 = vsel %vm2384_vm0, %v8623_v33, 0.0  ;;  %vm2386_vm10 = vcmp.ge.f32.partialorder %v7755_v24, %v8629_v36 }
 0x428   :  { %v4480_v31 = vsel %vm4344_vm2, %v4479_v53, %v4475_v37  ;;  %3105 = vadd.xlane.f32.xlu0 %v3104_v21  ;;  %v2650_v46 = vsel %vm2388_vm13, %v8623_v33, 0.0  ;;  %v3116_v2 = vsel %vm2794_vm6, %v2645_v42, 0.0  ;;  %v2651_v3 = vsel %vm2389_vm1, %v8623_v33, 0.0 }
 0x429   :  { %v5509_v14 = vsel %vm11201_vm15, %v4480_v31, %v5508_v50  ;;  %3108 = vadd.xlane.f32.xlu1 %v3107_v13  ;;  %v2902_v22 = vpop.xlane.xlu0 %2901  ;;  %vm2391_vm15 = vcmp.ge.f32.partialorder %v11207_v56, %v8629_v36  ;;  %vm2393_vm14 = vcmp.ge.f32.partialorder %v11209_v58, %v8629_v36  ;;  %vm2392_vm0 = vcmp.ge.f32.partialorder %v11210_v49, %v8629_v36  ;;  %v11212_v58 = vld [vmem:[#allocation102_spill] sm:$0xff] }
 0x42a   :  { %5626 = vst.msk [vmem:[%s10638_s6 + $0x8] sm:$0xff] %vm11203_vm12, %v5509_v14  ;;  %v2905_v26 = vpop.xlane.xlu1 %2904  ;;  %vm2390_vm12 = vcmp.ge.f32.partialorder %v11208_v4, %v8629_v36  ;;  %v3119_v24 = vsel %vm2794_vm6, %v2646_v20, 0.0  ;;  %v2647_v54 = vsel %vm2385_vm4, %v8623_v33, 0.0  ;;  %vm2387_vm13 = vcmp.ge.f32.partialorder %v11211_v16, %v8629_v36 }
 0x42b   :  { %v2648_v53 = vsel %vm2386_vm10, %v8623_v33, 0.0  ;;  %v3131_v21 = vsel %vm2794_vm6, %v2650_v46, 0.0  ;;  %v3134_v50 = vsel %vm2794_vm6, %v2651_v3, 0.0  ;;  %v2652_v31 = vsel %vm2390_vm12, %v8623_v33, 0.0 }
 0x42c   :  { %3111 = vadd.xlane.f32.xlu0 %v3110_v55  ;;  %v3122_v13 = vsel %vm2794_vm6, %v2647_v54, 0.0  ;;  %v2653_v60 = vsel %vm2391_vm15, %v8623_v33, 0.0  ;;  %v2654_v45 = vsel %vm2392_vm0, %v8623_v33, 0.0  ;;  %v2655_v14 = vsel %vm2393_vm14, %v8623_v33, 0.0 }
 0x42d   :  { %3114 = vadd.xlane.f32.xlu1 %v3113_v8  ;;  %v2908_v48 = vpop.xlane.xlu0 %2907  ;;  %v3596_v17 = vadd.f32 %v8467_v61, %v8734_v44  ;;  %v3599_v27 = vadd.f32 %v8467_v61, %v2902_v22  ;;  %v3125_v11 = vsel %vm2794_vm6, %v2648_v53, 0.0  ;;  %v2649_v55 = vsel %vm2387_vm13, %v8623_v33, 0.0 }
 0x42e   :  { %v2911_v7 = vpop.xlane.xlu1 %2910  ;;  %v3597_v0 = vadd.f32 %v8467_v61, %v2896_v43  ;;  %v3601_v8 = vadd.f32 %v8467_v61, %v2908_v48  ;;  %v3137_v44 = vsel %vm2794_vm6, %v2652_v31, 0.0  ;;  %v3598_v22 = vadd.f32 %v8467_v61, %v2899_v15  ;;  %v11213_v15 = vld [vmem:[#allocation103_spill] sm:$0xff] }
 0x42f   :  { %v3600_v20 = vadd.f32 %v8467_v61, %v2905_v26  ;;  %v3140_v56 = vsel %vm2794_vm6, %v2653_v60, 0.0  ;;  %v3143_v4 = vsel %vm2794_vm6, %v2654_v45, 0.0  ;;  %v3128_v48 = vsel %vm2794_vm6, %v2649_v55, 0.0 }
 0x430   :  { %3117 = vadd.xlane.f32.xlu0 %v3116_v2  ;;  %v3602_v2 = vadd.f32 %v8467_v61, %v2911_v7  ;;  %v8843_v3 = vsel %vm2794_vm6, %v2655_v14, 0.0  ;;  %vm2395_vm1 = vcmp.ge.f32.partialorder %v11212_v58, %v8629_v36  ;;  %vm2394_vm4 = vcmp.ge.f32.partialorder %v11213_v15, %v8629_v36 }
 0x431   :  { %3120 = vadd.xlane.f32.xlu1 %v3119_v24  ;;  %v2914_v37 = vpop.xlane.xlu0 %2913  ;;  %v3853_v26 = vmul.f32 %v8426_v57, %v3596_v17  ;;  %v3856_v49 = vmul.f32 %v8426_v57, %v3599_v27  ;;  %v3854_v7 = vmul.f32 %v8426_v57, %v3597_v0  ;;  %v3858_v24 = vmul.f32 %v8426_v57, %v3601_v8 }
 0x432   :  { %v2917_v30 = vpop.xlane.xlu1 %2916  ;;  %v3603_v42 = vadd.f32 %v8467_v61, %v2914_v37  ;;  %v3855_v53 = vmul.f32 %v8426_v57, %v3598_v22  ;;  %v3857_v31 = vmul.f32 %v8426_v57, %v3600_v20  ;;  %v3859_v14 = vmul.f32 %v8426_v57, %v3602_v2 }
 0x433   :  { %v3604_v16 = vadd.f32 %v8467_v61, %v2917_v30  ;;  %v2656_v30 = vsel %vm2394_vm4, %v8623_v33, 0.0  ;;  %v2657_v0 = vsel %vm2395_vm1, %v8623_v33, 0.0  ;;  %v4488_v8 = vrot.slane %v3854_v7, %v8531_v38 }
 0x434   :  { %3123 = vadd.xlane.f32.xlu0 %v3122_v13  ;;  %v3860_v54 = vmul.f32 %v8426_v57, %v3603_v42  ;;  %v4506_v42 = vrot.slane %v3858_v24, %v8531_v38  ;;  %v4502_v2 = vrot.slane %v3857_v31, %v8524_v47  ;;  %v4511_v58 = vrot.slane %v3859_v14, %v8524_v47 }
 0x435   :  { %3126 = vadd.xlane.f32.xlu1 %v3125_v11  ;;  %v2920_v25 = vpop.xlane.xlu0 %2919  ;;  %v4497_v11 = vrot.slane %v3856_v49, %v8531_v38  ;;  %v3861_v22 = vmul.f32 %v8426_v57, %v3604_v16  ;;  %vm11219_vm13 = vcmask 1047559   ;;  %vm11220_vm1 = vcmask 130048  }
 0x436   :  { %v2923_v46 = vpop.xlane.xlu1 %2922  ;;  %v3605_v43 = vadd.f32 %v8467_v61, %v2920_v25  ;;  %v4515_v25 = vrot.slane %v3860_v54, %v8531_v38 }
 0x437   :  { %v3606_v13 = vadd.f32 %v8467_v61, %v2923_v46  ;;  %v4493_v46 = vrot.slane %v3855_v53, %v8524_v47  ;;  %v4520_v31 = vrot.slane %v3861_v22, %v8524_v47 }
 0x438   :  { %3129 = vadd.xlane.f32.xlu0 %v3128_v48  ;;  %v3862_v17 = vmul.f32 %v8426_v57, %v3605_v43  ;;  %v4516_v53 = vsel %vm4344_vm2, %v4515_v25, %v4511_v58 }
 0x439   :  { %3132 = vadd.xlane.f32.xlu1 %v3131_v21  ;;  %v2926_v37 = vpop.xlane.xlu0 %2925  ;;  %v4484_v21 = vrot.slane %v3853_v26, %v8524_v47  ;;  %v4498_v7 = vsel %vm4344_vm2, %v4497_v11, %v4493_v46 }
 0x43a   :  { %v3607_v60 = vadd.f32 %v8467_v61, %v2926_v37  ;;  %v2929_v45 = vpop.xlane.xlu1 %2928  ;;  %v4524_v15 = vrot.slane %v3862_v17, %v8531_v38  ;;  %v4507_v37 = vsel %vm4344_vm2, %v4506_v42, %v4502_v2  ;;  %v11216_v2 = vld [vmem:[#allocation106_spill] sm:$0xff] }
 0x43b   :  { %v3608_v27 = vadd.f32 %v8467_v61, %v2929_v45  ;;  %v4489_v16 = vsel %vm4344_vm2, %v4488_v8, %v4484_v21  ;;  %vm2398_vm12 = vcmp.ge.f32.partialorder %v11216_v2, %v8629_v36  ;;  %v11227_v2 = vld [vmem:[#allocation115_spill] sm:$0xff] }
 0x43c   :  { %v3864_v55 = vmul.f32 %v8426_v57, %v3607_v60  ;;  %3135 = vadd.xlane.f32.xlu0 %v3134_v50  ;;  %v3863_v50 = vmul.f32 %v8426_v57, %v3606_v13  ;;  %v4525_v21 = vsel %vm4344_vm2, %v4524_v15, %v4520_v31  ;;  %v3152_v15 = vsel %vm2794_vm6, %v2657_v0, 0.0 }
 0x43d   :  { %3138 = vadd.xlane.f32.xlu1 %v3137_v44  ;;  %v2932_v20 = vpop.xlane.xlu0 %2931  ;;  %v3865_v26 = vmul.f32 %v8426_v57, %v3608_v27  ;;  %v11214_v44 = vld [vmem:[#allocation105_spill] sm:$0xff] }
 0x43e   :  { %v3609_v43 = vadd.f32 %v8467_v61, %v2932_v20  ;;  %v2935_v48 = vpop.xlane.xlu1 %2934  ;;  %vm2396_vm10 = vcmp.ge.f32.partialorder %v11214_v44, %v8629_v36  ;;  %v4533_v24 = vrot.slane %v3864_v55, %v8531_v38  ;;  %v4529_v60 = vrot.slane %v3863_v50, %v8524_v47 }
 0x43f   :  { %v3610_v49 = vadd.f32 %v8467_v61, %v2935_v48  ;;  %v4538_v11 = vrot.slane %v3865_v26, %v8524_v47  ;;  %v3149_v55 = vsel %vm2794_vm6, %v2656_v30, 0.0  ;;  %v2658_v30 = vsel %vm2396_vm10, %v8623_v33, 0.0 }
 0x440   :  { %v3866_v54 = vmul.f32 %v8426_v57, %v3609_v43  ;;  %3141 = vadd.xlane.f32.xlu0 %v3140_v56  ;;  %v5510_v56 = vsel %vm5489_vm3, %v4498_v7, %v4489_v16  ;;  %v4534_v42 = vsel %vm4344_vm2, %v4533_v24, %v4529_v60  ;;  %v3155_v24 = vsel %vm2794_vm6, %v2658_v30, 0.0  ;;  %v11221_v60 = vld [vmem:[#allocation35_spill] sm:$0xff] }
 0x441   :  { %3144 = vadd.xlane.f32.xlu1 %v3143_v4  ;;  %v2938_v13 = vpop.xlane.xlu0 %2937  ;;  %v3867_v14 = vmul.f32 %v8426_v57, %v3610_v49  ;;  %v11215_v4 = vld [vmem:[#allocation104_spill] sm:$0xff]  ;;  %v5511_v8 = vsel %vm5491_vm5, %v4507_v37, %v5510_v56  ;;  %v11217_v49 = vld [vmem:[#allocation34_spill] sm:$0xff]  ;;  %v2660_v37 = vsel %vm2398_vm12, %v8623_v33, 0.0  ;;  %vm2401_vm4 = vcmp.ge.f32.partialorder %v11221_v60, %v8629_v36 }
 0x442   :  { %v4542_v45 = vrot.slane %v3866_v54, %v8531_v38  ;;  %v3611_v17 = vadd.f32 %v8467_v61, %v2938_v13  ;;  %v8898_v27 = vpop.xlane.xlu1 %2940  ;;  %vm2397_vm15 = vcmp.ge.f32.partialorder %v11215_v4, %v8629_v36  ;;  %v5512_v22 = vsel %vm5493_vm7, %v4516_v53, %v5511_v8  ;;  %v11218_v54 = vld [vmem:[#allocation107_spill] sm:$0xff]  ;;  %v11223_v56 = vld [vmem:[#allocation36_spill] sm:$0xff] }
 0x443   :  { %v5513_v50 = vsel %vm5495_vm8, %v4525_v21, %v5512_v22  ;;  %v4547_v43 = vrot.slane %v3867_v14, %v8524_v47  ;;  %v2659_v26 = vsel %vm2397_vm15, %v8623_v33, 0.0  ;;  %vm2399_vm14 = vcmp.ge.f32.partialorder %v11217_v49, %v8629_v36  ;;  %v11224_v4 = vld [vmem:[#allocation44_spill] sm:$0xff]  ;;  %v11225_v22 = vld [vmem:[#allocation45_spill] sm:$0xff] }
 0x444   :  { %v3868_v25 = vmul.f32 %v8426_v57, %v3611_v17  ;;  %3147 = vadd.xlane.f32.xlu0 %v8843_v3  ;;  %v4543_v20 = vsel %vm4344_vm2, %v4542_v45, %v4538_v11  ;;  %v5514_v58 = vsel %vm5497_vm9, %v4534_v42, %v5513_v50  ;;  %vm2400_vm0 = vcmp.ge.f32.partialorder %v11218_v54, %v8629_v36  ;;  %v11222_v45 = vld [vmem:[#allocation108_spill] sm:$0xff] }
 0x445   :  { %3150 = vadd.xlane.f32.xlu1 %v3149_v55  ;;  %v2944_v46 = vpop.xlane.xlu0 %2943  ;;  %v5515_v44 = vsel %vm10781_vm11, %v4543_v20, %v5514_v58  ;;  %v3158_v31 = vsel %vm2794_vm6, %v2659_v26, 0.0  ;;  %v2661_v13 = vsel %vm2399_vm14, %v8623_v33, 0.0  ;;  %vm2402_vm10 = vcmp.ge.f32.partialorder %v11222_v45, %v8629_v36  ;;  %v11226_v20 = vld [vmem:[#allocation114_spill] sm:$0xff]  ;;  %v11228_v50 = vld [vmem:[#allocation116_spill] sm:$0xff] }
 0x446   :  { %v4551_v3 = vrot.slane %v3868_v25, %v8531_v38  ;;  %v2947_v48 = vpop.xlane.xlu1 %2946  ;;  %v3161_v14 = vsel %vm2794_vm6, %v2660_v37, 0.0  ;;  %v2662_v17 = vsel %vm2400_vm0, %v8623_v33, 0.0  ;;  %vm2403_vm15 = vcmp.ge.f32.partialorder %v11223_v56, %v8629_v36 }
 0x447   :  { %vm2404_vm12 = vcmp.ge.f32.partialorder %v7761_v23, %v8629_v36  ;;  %v3164_v55 = vsel %vm2794_vm6, %v2661_v13, 0.0  ;;  %vm2405_vm14 = vcmp.ge.f32.partialorder %v11224_v4, %v8629_v36  ;;  %v3167_v8 = vsel %vm2794_vm6, %v2662_v17, 0.0 }
 0x448   :  { %v4552_v7 = vsel %vm4344_vm2, %v4551_v3, %v4547_v43  ;;  %3153 = vadd.xlane.f32.xlu0 %v3152_v15  ;;  %v2663_v42 = vsel %vm2401_vm4, %v8623_v33, 0.0  ;;  %v2664_v25 = vsel %vm2402_vm10, %v8623_v33, 0.0  ;;  %vm2407_vm0 = vcmp.ge.f32.partialorder %v11225_v22, %v8629_v36 }
 0x449   :  { %v5516_v0 = vsel %vm11219_vm13, %v4552_v7, %v5515_v44  ;;  %3156 = vadd.xlane.f32.xlu1 %v3155_v24  ;;  %v2950_v16 = vpop.xlane.xlu0 %2949  ;;  %vm2406_vm13 = vcmp.ge.f32.partialorder %v11226_v20, %v8629_v36  ;;  %v2665_v23 = vsel %vm2403_vm15, %v8623_v33, 0.0  ;;  %v2666_v30 = vsel %vm2404_vm12, %v8623_v33, 0.0 }
 0x44a   :  { %5627 = vst.msk [vmem:[%s10638_s6 + $0x10] sm:$0xff] %vm11220_vm1, %v5516_v0  ;;  %v2953_v53 = vpop.xlane.xlu1 %2952  ;;  %vm2409_vm1 = vcmp.ge.f32.partialorder %v11227_v2, %v8629_v36  ;;  %vm2408_vm11 = vcmp.ge.f32.partialorder %v11228_v50, %v8629_v36  ;;  %v3170_v58 = vsel %vm2794_vm6, %v2663_v42, 0.0  ;;  %v3173_v15 = vsel %vm2794_vm6, %v2664_v25, 0.0  ;;  %v11229_v25 = vld [vmem:[#allocation117_spill] sm:$0xff] }
 0x44b   :  { %v2667_v26 = vsel %vm2405_vm14, %v8623_v33, 0.0  ;;  %v3176_v49 = vsel %vm2794_vm6, %v2665_v23, 0.0  ;;  %v3179_v44 = vsel %vm2794_vm6, %v2666_v30, 0.0  ;;  %v2668_v7 = vsel %vm2406_vm13, %v8623_v33, 0.0 }
 0x44c   :  { %3159 = vadd.xlane.f32.xlu0 %v3158_v31  ;;  %v2669_v24 = vsel %vm2407_vm0, %v8623_v33, 0.0  ;;  %v3612_v54 = vadd.f32 %v8467_v61, %v8898_v27  ;;  %v3615_v0 = vadd.f32 %v8467_v61, %v2950_v16  ;;  %v2670_v37 = vsel %vm2408_vm11, %v8623_v33, 0.0 }
 0x44d   :  { %3162 = vadd.xlane.f32.xlu1 %v3161_v14  ;;  %v2956_v21 = vpop.xlane.xlu0 %2955  ;;  %v2671_v31 = vsel %vm2409_vm1, %v8623_v33, 0.0  ;;  %v3613_v13 = vadd.f32 %v8467_v61, %v2944_v46  ;;  %v3182_v27 = vsel %vm2794_vm6, %v2667_v26, 0.0  ;;  %v3614_v16 = vadd.f32 %v8467_v61, %v2947_v48  ;;  %v11230_v48 = vld [vmem:[#allocation118_spill] sm:$0xff] }
 0x44e   :  { %v2959_v11 = vpop.xlane.xlu1 %2958  ;;  %v3617_v60 = vadd.f32 %v8467_v61, %v2956_v21  ;;  %v3616_v17 = vadd.f32 %v8467_v61, %v2953_v53  ;;  %v3188_v4 = vsel %vm2794_vm6, %v2669_v24, 0.0  ;;  %v3191_v21 = vsel %vm2794_vm6, %v2670_v37, 0.0 }
 0x44f   :  { %v9004_v42 = vsel %vm2794_vm6, %v2671_v31, 0.0  ;;  %vm2411_vm11 = vcmp.ge.f32.partialorder %v11229_v25, %v8629_v36  ;;  %vm2410_vm4 = vcmp.ge.f32.partialorder %v11230_v48, %v8629_v36  ;;  %v3869_v53 = vmul.f32 %v8426_v57, %v3612_v54 }
 0x450   :  { %3165 = vadd.xlane.f32.xlu0 %v3164_v55  ;;  %v3185_v55 = vsel %vm2794_vm6, %v2668_v7, 0.0  ;;  %v3872_v22 = vmul.f32 %v8426_v57, %v3615_v0  ;;  %v3874_v20 = vmul.f32 %v8426_v57, %v3617_v60  ;;  %v3871_v50 = vmul.f32 %v8426_v57, %v3614_v16 }
 0x451   :  { %3168 = vadd.xlane.f32.xlu1 %v3167_v8  ;;  %v2962_v43 = vpop.xlane.xlu0 %2961  ;;  %v3618_v8 = vadd.f32 %v8467_v61, %v2959_v11  ;;  %v3870_v11 = vmul.f32 %v8426_v57, %v3613_v13  ;;  %v2673_v37 = vsel %vm2411_vm11, %v8623_v33, 0.0  ;;  %vm2412_vm10 = vcmp.ge.f32.partialorder %v7785_v34, %v8629_v36 }
 0x452   :  { %v2965_v3 = vpop.xlane.xlu1 %2964  ;;  %v3619_v45 = vadd.f32 %v8467_v61, %v2962_v43  ;;  %v3873_v43 = vmul.f32 %v8426_v57, %v3616_v17  ;;  %v4569_v54 = vrot.slane %v3872_v22, %v8531_v38  ;;  %v4578_v13 = vrot.slane %v3874_v20, %v8531_v38 }
 0x453   :  { %v3620_v30 = vadd.f32 %v8467_v61, %v2965_v3  ;;  %v2672_v3 = vsel %vm2410_vm4, %v8623_v33, 0.0  ;;  %v4560_v31 = vrot.slane %v3870_v11, %v8531_v38  ;;  %v4565_v16 = vrot.slane %v3871_v50, %v8524_v47 }
 0x454   :  { %3171 = vadd.xlane.f32.xlu0 %v3170_v58  ;;  %v3876_v23 = vmul.f32 %v8426_v57, %v3619_v45  ;;  %v4574_v17 = vrot.slane %v3873_v43, %v8524_v47  ;;  %vm2414_vm12 = vcmp.ge.f32.partialorder %v7791_v6, %v8629_v36  ;;  %vm11233_vm0 = vcmask 1046534  }
 0x455   :  { %3174 = vadd.xlane.f32.xlu1 %v3173_v15  ;;  %v2968_v14 = vpop.xlane.xlu0 %2967  ;;  %v3877_v45 = vmul.f32 %v8426_v57, %v3620_v30  ;;  %vm2416_vm13 = vcmp.ge.f32.partialorder %v7797_v32, %v8629_v36  ;;  %vm11234_vm1 = vcmask 1047559   ;;  %vm11235_vm11 = vcmask 130048   ;;  %v11236_v32 = vld [vmem:[#allocation48_spill] sm:$0xff] }
 0x456   :  { %v2971_v56 = vpop.xlane.xlu1 %2970  ;;  %v3621_v46 = vadd.f32 %v8467_v61, %v2968_v14  ;;  %v4587_v60 = vrot.slane %v3876_v23, %v8531_v38  ;;  %v4579_v23 = vsel %vm4344_vm2, %v4578_v13, %v4574_v17  ;;  %vm2417_vm4 = vcmp.ge.f32.partialorder %v11236_v32, %v8629_v36 }
 0x457   :  { %v3622_v58 = vadd.f32 %v8467_v61, %v2971_v56 }
 0x458   :  { %3177 = vadd.xlane.f32.xlu0 %v3176_v49  ;;  %v3875_v49 = vmul.f32 %v8426_v57, %v3618_v8  ;;  %v3878_v7 = vmul.f32 %v8426_v57, %v3621_v46 }
 0x459   :  { %3180 = vadd.xlane.f32.xlu1 %v3179_v44  ;;  %v2974_v2 = vpop.xlane.xlu0 %2973  ;;  %v4556_v44 = vrot.slane %v3869_v53, %v8524_v47 }
 0x45a   :  { %v3623_v15 = vadd.f32 %v8467_v61, %v2974_v2  ;;  %v2977_v26 = vpop.xlane.xlu1 %2976  ;;  %v4583_v46 = vrot.slane %v3875_v49, %v8524_v47  ;;  %v4596_v25 = vrot.slane %v3878_v7, %v8531_v38  ;;  %v4592_v2 = vrot.slane %v3877_v45, %v8524_v47 }
 0x45b   :  { %v3624_v24 = vadd.f32 %v8467_v61, %v2977_v26  ;;  %v4561_v20 = vsel %vm4344_vm2, %v4560_v31, %v4556_v44  ;;  %v3197_v44 = vsel %vm2794_vm6, %v2672_v3, 0.0  ;;  %v2674_v3 = vsel %vm2412_vm10, %v8623_v33, 0.0 }
 0x45c   :  { %v3880_v0 = vmul.f32 %v8426_v57, %v3623_v15  ;;  %3183 = vadd.xlane.f32.xlu0 %v3182_v27  ;;  %v3879_v27 = vmul.f32 %v8426_v57, %v3622_v58  ;;  %v4588_v30 = vsel %vm4344_vm2, %v4587_v60, %v4583_v46  ;;  %v4597_v7 = vsel %vm4344_vm2, %v4596_v25, %v4592_v2  ;;  %v11238_v2 = vld [vmem:[#allocation121_spill] sm:$0xff] }
 0x45d   :  { %3186 = vadd.xlane.f32.xlu1 %v3185_v55  ;;  %v2980_v14 = vpop.xlane.xlu0 %2979  ;;  %v3881_v48 = vmul.f32 %v8426_v57, %v3624_v24  ;;  %v4570_v55 = vsel %vm4344_vm2, %v4569_v54, %v4565_v16  ;;  %vm2418_vm10 = vcmp.ge.f32.partialorder %v7803_v29, %v8629_v36 }
 0x45e   :  { %v3625_v56 = vadd.f32 %v8467_v61, %v2980_v14  ;;  %v2983_v8 = vpop.xlane.xlu1 %2982  ;;  %v4605_v22 = vrot.slane %v3880_v0, %v8531_v38  ;;  %v4601_v43 = vrot.slane %v3879_v27, %v8524_v47 }
 0x45f   :  { %v3626_v53 = vadd.f32 %v8467_v61, %v2983_v8  ;;  %v4610_v24 = vrot.slane %v3881_v48, %v8524_v47  ;;  %v11232_v8 = vld [vmem:[#allocation47_spill] sm:$0xff]  ;;  %v3203_v48 = vsel %vm2794_vm6, %v2674_v3, 0.0 }
 0x460   :  { %v3882_v11 = vmul.f32 %v8426_v57, %v3625_v56  ;;  %3189 = vadd.xlane.f32.xlu0 %v3188_v4  ;;  %v5517_v4 = vsel %vm5489_vm3, %v4570_v55, %v4561_v20  ;;  %v4606_v0 = vsel %vm4344_vm2, %v4605_v22, %v4601_v43  ;;  %v3200_v56 = vsel %vm2794_vm6, %v2673_v37, 0.0 }
 0x461   :  { %3192 = vadd.xlane.f32.xlu1 %v3191_v21  ;;  %v2986_v50 = vpop.xlane.xlu0 %2985  ;;  %v3883_v15 = vmul.f32 %v8426_v57, %v3626_v53  ;;  %v11231_v21 = vld [vmem:[#allocation46_spill] sm:$0xff]  ;;  %v5518_v54 = vsel %vm5491_vm5, %v4579_v23, %v5517_v4  ;;  %vm2415_vm14 = vcmp.ge.f32.partialorder %v11232_v8, %v8629_v36  ;;  %v2676_v55 = vsel %vm2414_vm12, %v8623_v33, 0.0 }
 0x462   :  { %v4614_v58 = vrot.slane %v3882_v11, %v8531_v38  ;;  %v3627_v26 = vadd.f32 %v8467_v61, %v2986_v50  ;;  %v9059_v49 = vpop.xlane.xlu1 %2988  ;;  %vm2413_vm15 = vcmp.ge.f32.partialorder %v11231_v21, %v8629_v36  ;;  %v5519_v13 = vsel %vm5493_vm7, %v4588_v30, %v5518_v54  ;;  %v11237_v30 = vld [vmem:[#allocation119_spill] sm:$0xff]  ;;  %v11242_v54 = vld [vmem:[#allocation124_spill] sm:$0xff] }
 0x463   :  { %v5520_v14 = vsel %vm5495_vm8, %v4597_v7, %v5519_v13  ;;  %v4619_v16 = vrot.slane %v3883_v15, %v8524_v47  ;;  %v2675_v34 = vsel %vm2413_vm15, %v8623_v33, 0.0  ;;  %v2677_v20 = vsel %vm2415_vm14, %v8623_v33, 0.0  ;;  %v11239_v15 = vld [vmem:[#allocation120_spill] sm:$0xff]  ;;  %v11240_v7 = vld [vmem:[#allocation122_spill] sm:$0xff] }
 0x464   :  { %v3884_v31 = vmul.f32 %v8426_v57, %v3627_v26  ;;  %3195 = vadd.xlane.f32.xlu0 %v9004_v42  ;;  %v4615_v60 = vsel %vm4344_vm2, %v4614_v58, %v4610_v24  ;;  %v5521_v27 = vsel %vm5497_vm9, %v4606_v0, %v5520_v14  ;;  %v3206_v11 = vsel %vm2794_vm6, %v2675_v34, 0.0  ;;  %v11241_v24 = vld [vmem:[#allocation123_spill] sm:$0xff]  ;;  %v11243_v0 = vld [vmem:[#allocation125_spill] sm:$0xff] }
 0x465   :  { %3198 = vadd.xlane.f32.xlu1 %v3197_v44  ;;  %v2992_v45 = vpop.xlane.xlu0 %2991  ;;  %v5522_v46 = vsel %vm11233_vm0, %v4615_v60, %v5521_v27  ;;  %v3209_v6 = vsel %vm2794_vm6, %v2676_v55, 0.0  ;;  %v2678_v23 = vsel %vm2416_vm13, %v8623_v33, 0.0  ;;  %vm2419_vm15 = vcmp.ge.f32.partialorder %v11237_v30, %v8629_v36 }
 0x466   :  { %v4623_v42 = vrot.slane %v3884_v31, %v8531_v38  ;;  %v2995_v17 = vpop.xlane.xlu1 %2994  ;;  %vm2420_vm12 = vcmp.ge.f32.partialorder %v11238_v2, %v8629_v36  ;;  %v3212_v58 = vsel %vm2794_vm6, %v2677_v20, 0.0  ;;  %vm2421_vm14 = vcmp.ge.f32.partialorder %v11239_v15, %v8629_v36 }
 0x467   :  { %v3215_v29 = vsel %vm2794_vm6, %v2678_v23, 0.0  ;;  %v2679_v26 = vsel %vm2417_vm4, %v8623_v33, 0.0  ;;  %v2680_v4 = vsel %vm2418_vm10, %v8623_v33, 0.0  ;;  %vm2423_vm0 = vcmp.ge.f32.partialorder %v11240_v7, %v8629_v36 }
 0x468   :  { %v4624_v25 = vsel %vm4344_vm2, %v4623_v42, %v4619_v16  ;;  %3201 = vadd.xlane.f32.xlu0 %v3200_v56  ;;  %vm2422_vm13 = vcmp.ge.f32.partialorder %v11241_v24, %v8629_v36  ;;  %v2681_v44 = vsel %vm2419_vm15, %v8623_v33, 0.0  ;;  %v2682_v21 = vsel %vm2420_vm12, %v8623_v33, 0.0 }
 0x469   :  { %v5523_v37 = vsel %vm11234_vm1, %v4624_v25, %v5522_v46  ;;  %3204 = vadd.xlane.f32.xlu1 %v3203_v48  ;;  %v2998_v53 = vpop.xlane.xlu0 %2997  ;;  %vm2425_vm1 = vcmp.ge.f32.partialorder %v11242_v54, %v8629_v36  ;;  %v3218_v60 = vsel %vm2794_vm6, %v2679_v26, 0.0  ;;  %v3221_v3 = vsel %vm2794_vm6, %v2680_v4, 0.0 }
 0x46a   :  { %5628 = vst.msk [vmem:[%s10638_s6 + $0x18] sm:$0xff] %vm11235_vm11, %v5523_v37  ;;  %v3001_v22 = vpop.xlane.xlu1 %3000  ;;  %vm2424_vm11 = vcmp.ge.f32.partialorder %v11243_v0, %v8629_v36  ;;  %v2683_v14 = vsel %vm2421_vm14, %v8623_v33, 0.0  ;;  %v3224_v16 = vsel %vm2794_vm6, %v2681_v44, 0.0  ;;  %v3227_v42 = vsel %vm2794_vm6, %v2682_v21, 0.0 }
 0x46b   :  { %v2684_v27 = vsel %vm2422_vm13, %v8623_v33, 0.0  ;;  %v2685_v56 = vsel %vm2423_vm0, %v8623_v33, 0.0  ;;  %v3628_v34 = vadd.f32 %v8467_v61, %v9059_v49  ;;  %v3631_v8 = vadd.f32 %v8467_v61, %v2998_v53 }
 0x46c   :  { %3207 = vadd.xlane.f32.xlu0 %v3206_v11  ;;  %v2686_v46 = vsel %vm2424_vm11, %v8623_v33, 0.0  ;;  %v2687_v25 = vsel %vm2425_vm1, %v8623_v33, 0.0  ;;  %v3629_v48 = vadd.f32 %v8467_v61, %v2992_v45  ;;  %v3230_v49 = vsel %vm2794_vm6, %v2683_v14, 0.0 }
 0x46d   :  { %3210 = vadd.xlane.f32.xlu1 %v3209_v6  ;;  %v3004_v50 = vpop.xlane.xlu0 %3003  ;;  %v3630_v53 = vadd.f32 %v8467_v61, %v2995_v17  ;;  %v3632_v20 = vadd.f32 %v8467_v61, %v3001_v22  ;;  %v3233_v6 = vsel %vm2794_vm6, %v2684_v27, 0.0  ;;  %v3236_v23 = vsel %vm2794_vm6, %v2685_v56, 0.0  ;;  %v11245_v17 = vld [vmem:[#allocation126_spill] sm:$0xff] }
 0x46e   :  { %v3007_v43 = vpop.xlane.xlu1 %3006  ;;  %v3633_v37 = vadd.f32 %v8467_v61, %v3004_v50  ;;  %v3239_v2 = vsel %vm2794_vm6, %v2686_v46, 0.0  ;;  %v9165_v50 = vsel %vm2794_vm6, %v2687_v25, 0.0  ;;  %vm2426_vm10 = vcmp.ge.f32.partialorder %v11245_v17, %v8629_v36 }
 0x46f   :  { %v3634_v30 = vadd.f32 %v8467_v61, %v3007_v43  ;;  %v3885_v22 = vmul.f32 %v8426_v57, %v3628_v34  ;;  %v3888_v15 = vmul.f32 %v8426_v57, %v3631_v8  ;;  %v3886_v43 = vmul.f32 %v8426_v57, %v3629_v48 }
 0x470   :  { %3213 = vadd.xlane.f32.xlu0 %v3212_v58  ;;  %v11244_v58 = vld [vmem:[#allocation49_spill] sm:$0xff]  ;;  %v3887_v24 = vmul.f32 %v8426_v57, %v3630_v53  ;;  %v3889_v44 = vmul.f32 %v8426_v57, %v3632_v20  ;;  %vm11250_vm13 = vcmask 1046534   ;;  %vm11252_vm11 = vcmask 1047559  }
 0x471   :  { %3216 = vadd.xlane.f32.xlu1 %v3215_v29  ;;  %v3010_v31 = vpop.xlane.xlu0 %3009  ;;  %vm2427_vm4 = vcmp.ge.f32.partialorder %v11244_v58, %v8629_v36  ;;  %v3890_v29 = vmul.f32 %v8426_v57, %v3633_v37  ;;  %v4628_v14 = vrot.slane %v3885_v22, %v8524_v47  ;;  %v4632_v56 = vrot.slane %v3886_v43, %v8531_v38 }
 0x472   :  { %v3013_v13 = vpop.xlane.xlu1 %3012  ;;  %v3635_v55 = vadd.f32 %v8467_v61, %v3010_v31  ;;  %v3891_v31 = vmul.f32 %v8426_v57, %v3634_v30  ;;  %v2689_v27 = vsel %vm2427_vm4, %v8623_v33, 0.0  ;;  %v4637_v48 = vrot.slane %v3887_v24, %v8524_v47 }
 0x473   :  { %v3636_v4 = vadd.f32 %v8467_v61, %v3013_v13  ;;  %v2688_v13 = vsel %vm2426_vm10, %v8623_v33, 0.0  ;;  %v4650_v34 = vrot.slane %v3890_v29, %v8531_v38  ;;  %v4646_v37 = vrot.slane %v3889_v44, %v8524_v47 }
 0x474   :  { %3219 = vadd.xlane.f32.xlu0 %v3218_v60  ;;  %v3892_v26 = vmul.f32 %v8426_v57, %v3635_v55  ;;  %v4655_v33 = vrot.slane %v3891_v31, %v8524_v47  ;;  %v4633_v17 = vsel %vm4344_vm2, %v4632_v56, %v4628_v14  ;;  %vm11253_vm4 = vcmask 130048  }
 0x475   :  { %3222 = vadd.xlane.f32.xlu1 %v3221_v3  ;;  %v3016_v11 = vpop.xlane.xlu0 %3015  ;;  %v3893_v46 = vmul.f32 %v8426_v57, %v3636_v4  ;;  %v4651_v22 = vsel %vm4344_vm2, %v4650_v34, %v4646_v37  ;;  %v11248_v34 = vld [vmem:[#allocation128_spill] sm:$0xff]  ;;  %v3248_v37 = vsel %vm2794_vm6, %v2689_v27, 0.0 }
 0x476   :  { %v3019_v32 = vpop.xlane.xlu1 %3018  ;;  %v3637_v45 = vadd.f32 %v8467_v61, %v3016_v11  ;;  %v4659_v8 = vrot.slane %v3892_v26, %v8531_v38 }
 0x477   :  { %v3638_v21 = vadd.f32 %v8467_v61, %v3019_v32  ;;  %v9210_v32 = vld [vmem:[%s10635_s3] ss:$0 sm:$0xff]  ;;  %v4664_v43 = vrot.slane %v3893_v46, %v8524_v47 }
 0x478   :  { %3225 = vadd.xlane.f32.xlu0 %v3224_v16  ;;  %v3894_v60 = vmul.f32 %v8426_v57, %v3637_v45  ;;  %v4641_v16 = vrot.slane %v3888_v15, %v8531_v38  ;;  %v4660_v15 = vsel %vm4344_vm2, %v4659_v8, %v4655_v33  ;;  %vm2430_vm14 = vcmp.ge.f32.partialorder %v11248_v34, %v9210_v32 }
 0x479   :  { %3228 = vadd.xlane.f32.xlu1 %v3227_v42  ;;  %v3022_v7 = vpop.xlane.xlu0 %3021  ;;  %v3895_v55 = vmul.f32 %v8426_v57, %v3638_v21 }
 0x47a   :  { %v3639_v54 = vadd.f32 %v8467_v61, %v3022_v7  ;;  %v3025_v0 = vpop.xlane.xlu1 %3024  ;;  %v4642_v30 = vsel %vm4344_vm2, %v4641_v16, %v4637_v48 }
 0x47b   :  { %v3640_v3 = vadd.f32 %v8467_v61, %v3025_v0  ;;  %v4673_v26 = vrot.slane %v3895_v55, %v8524_v47  ;;  %v3245_v0 = vsel %vm2794_vm6, %v2688_v13, 0.0  ;;  %v9242_v13 = vld [vmem:[%s10636_s4] ss:$0 sm:$0xff] }
 0x47c   :  { %v3896_v42 = vmul.f32 %v8426_v57, %v3639_v54  ;;  %3231 = vadd.xlane.f32.xlu0 %v3230_v49  ;;  %v4668_v49 = vrot.slane %v3894_v60, %v8531_v38 }
 0x47d   :  { %3234 = vadd.xlane.f32.xlu1 %v3233_v6  ;;  %v3028_v25 = vpop.xlane.xlu0 %3027  ;;  %v3897_v53 = vmul.f32 %v8426_v57, %v3640_v3  ;;  %v11246_v6 = vld [vmem:[#allocation127_spill] sm:$0xff] }
 0x47e   :  { %v3641_v11 = vadd.f32 %v8467_v61, %v3028_v25  ;;  %v3031_v36 = vpop.xlane.xlu1 %3030  ;;  %vm2428_vm15 = vcmp.ge.f32.partialorder %v11246_v6, %v9210_v32  ;;  %v4677_v45 = vrot.slane %v3896_v42, %v8531_v38  ;;  %v4669_v21 = vsel %vm4344_vm2, %v4668_v49, %v4664_v43 }
 0x47f   :  { %v3642_v20 = vadd.f32 %v8467_v61, %v3031_v36  ;;  %v4682_v54 = vrot.slane %v3897_v53, %v8524_v47  ;;  %v2690_v56 = vsel %vm2428_vm15, %v9242_v13, 0.0  ;;  %v11251_v53 = vld [vmem:[#allocation129_spill] sm:$0xff]  ;;  %v2692_v6 = vsel %vm2430_vm14, %v9242_v13, 0.0 }
 0x480   :  { %v3898_v58 = vmul.f32 %v8426_v57, %v3641_v11  ;;  %3237 = vadd.xlane.f32.xlu0 %v3236_v23  ;;  %v5524_v23 = vsel %vm5489_vm3, %v4642_v30, %v4633_v17  ;;  %v4678_v60 = vsel %vm4344_vm2, %v4677_v45, %v4673_v26  ;;  %v11249_v11 = vld [vmem:[#allocation51_spill] sm:$0xff]  ;;  %v3251_v49 = vsel %vm2794_vm6, %v2690_v56, 0.0  ;;  %v11254_v17 = vld [vmem:[#allocation52_spill] sm:$0xff] }
 0x481   :  { %3240 = vadd.xlane.f32.xlu1 %v3239_v2  ;;  %v3034_v29 = vpop.xlane.xlu0 %3033  ;;  %v3899_v7 = vmul.f32 %v8426_v57, %v3642_v20  ;;  %v11247_v2 = vld [vmem:[#allocation50_spill] sm:$0xff]  ;;  %v5525_v31 = vsel %vm5491_vm5, %v4651_v22, %v5524_v23  ;;  %vm2431_vm0 = vcmp.ge.f32.partialorder %v11249_v11, %v9210_v32  ;;  %vm2432_vm1 = vcmp.ge.f32.partialorder %v11251_v53, %v9210_v32 }
 0x482   :  { %v4686_v4 = vrot.slane %v3898_v58, %v8531_v38  ;;  %v3643_v24 = vadd.f32 %v8467_v61, %v3034_v29  ;;  %v9225_v44 = vpop.xlane.xlu1 %3036  ;;  %vm2429_vm12 = vcmp.ge.f32.partialorder %v11247_v2, %v9210_v32  ;;  %v5526_v14 = vsel %vm5493_vm7, %v4660_v15, %v5525_v31  ;;  %v11255_v22 = vld [vmem:[#allocation130_spill] sm:$0xff]  ;;  %v11256_v29 = vld [vmem:[#allocation53_spill] sm:$0xff]  ;;  %v11259_v2 = vld [vmem:[#allocation131_spill] sm:$0xff] }
 0x483   :  { %v4691_v8 = vrot.slane %v3899_v7, %v8524_v47  ;;  %v2691_v55 = vsel %vm2429_vm12, %v9242_v13, 0.0  ;;  %v2693_v58 = vsel %vm2431_vm0, %v9242_v13, 0.0  ;;  %vm2433_vm10 = vcmp.ge.f32.partialorder %v11254_v17, %v9210_v32 }
 0x484   :  { %v3900_v3 = vmul.f32 %v8426_v57, %v3643_v24  ;;  %3243 = vadd.xlane.f32.xlu0 %v9165_v50  ;;  %v4687_v16 = vsel %vm4344_vm2, %v4686_v4, %v4682_v54  ;;  %v5527_v50 = vsel %vm5495_vm8, %v4669_v21, %v5526_v14  ;;  %v3254_v45 = vsel %vm2794_vm6, %v2691_v55, 0.0  ;;  %v11257_v24 = vld [vmem:[#allocation54_spill] sm:$0xff] }
 0x485   :  { %3246 = vadd.xlane.f32.xlu1 %v3245_v0  ;;  %v3040_v42 = vpop.xlane.xlu0 %3039  ;;  %v5528_v48 = vsel %vm5497_vm9, %v4678_v60, %v5527_v50  ;;  %vm2434_vm15 = vcmp.ge.f32.partialorder %v11255_v22, %v9210_v32  ;;  %v3257_v15 = vsel %vm2794_vm6, %v2692_v6, 0.0  ;;  %v2694_v43 = vsel %vm2432_vm1, %v9242_v13, 0.0  ;;  %v11258_v0 = vld [vmem:[#allocation55_spill] sm:$0xff]  ;;  %v11260_v60 = vld [vmem:[#allocation56_spill] sm:$0xff] }
 0x486   :  { %v4695_v46 = vrot.slane %v3900_v3, %v8531_v38  ;;  %v3043_v25 = vpop.xlane.xlu1 %3042  ;;  %v5529_v36 = vsel %vm11250_vm13, %v4687_v16, %v5528_v48  ;;  %vm2435_vm12 = vcmp.ge.f32.partialorder %v11256_v29, %v9210_v32  ;;  %vm2436_vm14 = vcmp.ge.f32.partialorder %v7857_v35, %v9210_v32  ;;  %v11261_v3 = vld [vmem:[#allocation132_spill] sm:$0xff] }
 0x487   :  { %v3260_v7 = vsel %vm2794_vm6, %v2693_v58, 0.0  ;;  %vm2437_vm0 = vcmp.ge.f32.partialorder %v11257_v24, %v9210_v32  ;;  %v3263_v23 = vsel %vm2794_vm6, %v2694_v43, 0.0  ;;  %v2695_v21 = vsel %vm2433_vm10, %v9242_v13, 0.0 }
 0x488   :  { %v4696_v33 = vsel %vm4344_vm2, %v4695_v46, %v4691_v8  ;;  %3249 = vadd.xlane.f32.xlu0 %v3248_v37  ;;  %v2696_v54 = vsel %vm2434_vm15, %v9242_v13, 0.0  ;;  %vm2439_vm13 = vcmp.ge.f32.partialorder %v11258_v0, %v9210_v32  ;;  %vm2438_vm1 = vcmp.ge.f32.partialorder %v11259_v2, %v9210_v32 }
 0x489   :  { %v5530_v27 = vsel %vm11252_vm11, %v4696_v33, %v5529_v36  ;;  %3252 = vadd.xlane.f32.xlu1 %v3251_v49  ;;  %v3046_v20 = vpop.xlane.xlu0 %3045  ;;  %v2697_v35 = vsel %vm2435_vm12, %v9242_v13, 0.0  ;;  %v2698_v31 = vsel %vm2436_vm14, %v9242_v13, 0.0  ;;  %vm2441_vm11 = vcmp.ge.f32.partialorder %v11260_v60, %v9210_v32 }
 0x48a   :  { %5629 = vst.msk [vmem:[%s10638_s6 + $0x20] sm:$0xff] %vm11253_vm4, %v5530_v27  ;;  %v3049_v30 = vpop.xlane.xlu1 %3048  ;;  %vm2440_vm4 = vcmp.ge.f32.partialorder %v11261_v3, %v9210_v32  ;;  %v3266_v56 = vsel %vm2794_vm6, %v2695_v21, 0.0  ;;  %v3269_v34 = vsel %vm2794_vm6, %v2696_v54, 0.0  ;;  %v2699_v50 = vsel %vm2437_vm0, %v9242_v13, 0.0 }
 0x48b   :  { %v3272_v8 = vsel %vm2794_vm6, %v2697_v35, 0.0  ;;  %v3275_v46 = vsel %vm2794_vm6, %v2698_v31, 0.0  ;;  %v2700_v48 = vsel %vm2438_vm1, %v9242_v13, 0.0  ;;  %v2701_v37 = vsel %vm2439_vm13, %v9242_v13, 0.0 }
 0x48c   :  { %3255 = vadd.xlane.f32.xlu0 %v3254_v45  ;;  %v3644_v55 = vadd.f32 %v8467_v61, %v9225_v44  ;;  %v3647_v11 = vadd.f32 %v8467_v61, %v3046_v20  ;;  %v2702_v36 = vsel %vm2440_vm4, %v9242_v13, 0.0  ;;  %v2703_v33 = vsel %vm2441_vm11, %v9242_v13, 0.0 }
 0x48d   :  { %3258 = vadd.xlane.f32.xlu1 %v3257_v15  ;;  %v3052_v26 = vpop.xlane.xlu0 %3051  ;;  %v3645_v49 = vadd.f32 %v8467_v61, %v3040_v42  ;;  %v3278_v44 = vsel %vm2794_vm6, %v2699_v50, 0.0  ;;  %v3646_v20 = vadd.f32 %v8467_v61, %v3043_v25  ;;  %v3648_v45 = vadd.f32 %v8467_v61, %v3049_v30  ;;  %v11263_v25 = vld [vmem:[#allocation134_spill] sm:$0xff] }
 0x48e   :  { %v3055_v4 = vpop.xlane.xlu1 %3054  ;;  %v3649_v53 = vadd.f32 %v8467_v61, %v3052_v26  ;;  %v3281_v17 = vsel %vm2794_vm6, %v2700_v48, 0.0  ;;  %v3284_v22 = vsel %vm2794_vm6, %v2701_v37, 0.0  ;;  %v3287_v43 = vsel %vm2794_vm6, %v2702_v36, 0.0  ;;  %v11262_v26 = vld [vmem:[#allocation133_spill] sm:$0xff] }
 0x48f   :  { %v3650_v15 = vadd.f32 %v8467_v61, %v3055_v4  ;;  %v9336_v29 = vsel %vm2794_vm6, %v2703_v33, 0.0  ;;  %vm2443_vm10 = vcmp.ge.f32.partialorder %v11262_v26, %v9210_v32  ;;  %vm2442_vm15 = vcmp.ge.f32.partialorder %v11263_v25, %v9210_v32 }
 0x490   :  { %3261 = vadd.xlane.f32.xlu0 %v3260_v7  ;;  %v3901_v30 = vmul.f32 %v8426_v57, %v3644_v55  ;;  %v3904_v7 = vmul.f32 %v8426_v57, %v3647_v11  ;;  %v3902_v4 = vmul.f32 %v8426_v57, %v3645_v49  ;;  %v3906_v24 = vmul.f32 %v8426_v57, %v3649_v53 }
 0x491   :  { %3264 = vadd.xlane.f32.xlu1 %v3263_v23  ;;  %v3058_v14 = vpop.xlane.xlu0 %3057  ;;  %v3903_v0 = vmul.f32 %v8426_v57, %v3646_v20  ;;  %v3905_v2 = vmul.f32 %v8426_v57, %v3648_v45  ;;  %v3907_v3 = vmul.f32 %v8426_v57, %v3650_v15  ;;  %vm11268_vm1 = vcmask 1046534  }
 0x492   :  { %v3061_v16 = vpop.xlane.xlu1 %3060  ;;  %v3651_v27 = vadd.f32 %v8467_v61, %v3058_v14  ;;  %v4713_v50 = vrot.slane %v3904_v7, %v8531_v38  ;;  %v4704_v48 = vrot.slane %v3902_v4, %v8531_v38  ;;  %v4722_v37 = vrot.slane %v3906_v24, %v8531_v38 }
 0x493   :  { %v3652_v21 = vadd.f32 %v8467_v61, %v3061_v16  ;;  %v2704_v16 = vsel %vm2442_vm15, %v9242_v13, 0.0  ;;  %v4709_v33 = vrot.slane %v3903_v0, %v8524_v47  ;;  %v4718_v49 = vrot.slane %v3905_v2, %v8524_v47 }
 0x494   :  { %3267 = vadd.xlane.f32.xlu0 %v3266_v56  ;;  %v3908_v23 = vmul.f32 %v8426_v57, %v3651_v27  ;;  %vm11270_vm4 = vcmask 1047559  }
 0x495   :  { %3270 = vadd.xlane.f32.xlu1 %v3269_v34  ;;  %v3064_v6 = vpop.xlane.xlu0 %3063  ;;  %v4700_v34 = vrot.slane %v3901_v30, %v8524_v47  ;;  %v3909_v11 = vmul.f32 %v8426_v57, %v3652_v21  ;;  %v4714_v15 = vsel %vm4344_vm2, %v4713_v50, %v4709_v33  ;;  %v4723_v30 = vsel %vm4344_vm2, %v4722_v37, %v4718_v49 }
 0x496   :  { %v3067_v58 = vpop.xlane.xlu1 %3066  ;;  %v3653_v42 = vadd.f32 %v8467_v61, %v3064_v6  ;;  %v4731_v55 = vrot.slane %v3908_v23, %v8531_v38 }
 0x497   :  { %v3654_v35 = vadd.f32 %v8467_v61, %v3067_v58  ;;  %v4705_v25 = vsel %vm4344_vm2, %v4704_v48, %v4700_v34  ;;  %v4736_v4 = vrot.slane %v3909_v11, %v8524_v47  ;;  %v11266_v48 = vld [vmem:[#allocation136_spill] sm:$0xff] }
 0x498   :  { %3273 = vadd.xlane.f32.xlu0 %v3272_v8  ;;  %v3910_v14 = vmul.f32 %v8426_v57, %v3653_v42  ;;  %vm2446_vm0 = vcmp.ge.f32.partialorder %v11266_v48, %v9210_v32 }
 0x499   :  { %3276 = vadd.xlane.f32.xlu1 %v3275_v46  ;;  %v3070_v54 = vpop.xlane.xlu0 %3069  ;;  %v2705_v46 = vsel %vm2443_vm10, %v9242_v13, 0.0  ;;  %v3911_v53 = vmul.f32 %v8426_v57, %v3654_v35  ;;  %vm11271_vm10 = vcmask 130048  }
 0x49a   :  { %v3655_v31 = vadd.f32 %v8467_v61, %v3070_v54  ;;  %v3073_v60 = vpop.xlane.xlu1 %3072  ;;  %v4740_v20 = vrot.slane %v3910_v14, %v8531_v38  ;;  %v3296_v33 = vsel %vm2794_vm6, %v2705_v46, 0.0 }
 0x49b   :  { %v3656_v56 = vadd.f32 %v8467_v61, %v3073_v60  ;;  %v4745_v23 = vrot.slane %v3911_v53, %v8524_v47  ;;  %v3293_v60 = vsel %vm2794_vm6, %v2704_v16, 0.0  ;;  %v11267_v53 = vld [vmem:[#allocation58_spill] sm:$0xff] }
 0x49c   :  { %v3912_v8 = vmul.f32 %v8426_v57, %v3655_v31  ;;  %3279 = vadd.xlane.f32.xlu0 %v3278_v44  ;;  %v4727_v44 = vrot.slane %v3907_v3, %v8524_v47  ;;  %v4741_v35 = vsel %vm4344_vm2, %v4740_v20, %v4736_v4  ;;  %vm2447_vm13 = vcmp.ge.f32.partialorder %v11267_v53, %v9210_v32  ;;  %v11269_v20 = vld [vmem:[#allocation137_spill] sm:$0xff]  ;;  %v11274_v4 = vld [vmem:[#allocation60_spill] sm:$0xff] }
 0x49d   :  { %3282 = vadd.xlane.f32.xlu1 %v3281_v17  ;;  %v3076_v36 = vpop.xlane.xlu0 %3075  ;;  %v3913_v45 = vmul.f32 %v8426_v57, %v3656_v56  ;;  %v11264_v17 = vld [vmem:[#allocation135_spill] sm:$0xff]  ;;  %vm2448_vm11 = vcmp.ge.f32.partialorder %v11269_v20, %v9210_v32 }
 0x49e   :  { %v3657_v27 = vadd.f32 %v8467_v61, %v3076_v36  ;;  %v3079_v6 = vpop.xlane.xlu1 %3078  ;;  %vm2444_vm12 = vcmp.ge.f32.partialorder %v11264_v17, %v9210_v32  ;;  %v4749_v42 = vrot.slane %v3912_v8, %v8531_v38  ;;  %v4732_v7 = vsel %vm4344_vm2, %v4731_v55, %v4727_v44 }
 0x49f   :  { %v3658_v58 = vadd.f32 %v8467_v61, %v3079_v6  ;;  %v4754_v31 = vrot.slane %v3913_v45, %v8524_v47  ;;  %v2706_v16 = vsel %vm2444_vm12, %v9242_v13, 0.0 }
 0x4a0   :  { %v3914_v26 = vmul.f32 %v8426_v57, %v3657_v27  ;;  %3285 = vadd.xlane.f32.xlu0 %v3284_v22  ;;  %v5531_v22 = vsel %vm5489_vm3, %v4714_v15, %v4705_v25  ;;  %v4750_v14 = vsel %vm4344_vm2, %v4749_v42, %v4745_v23  ;;  %v3299_v44 = vsel %vm2794_vm6, %v2706_v16, 0.0  ;;  %v11273_v25 = vld [vmem:[#allocation138_spill] sm:$0xff] }
 0x4a1   :  { %3288 = vadd.xlane.f32.xlu1 %v3287_v43  ;;  %v3082_v24 = vpop.xlane.xlu0 %3081  ;;  %v3915_v54 = vmul.f32 %v8426_v57, %v3658_v58  ;;  %v11265_v43 = vld [vmem:[#allocation57_spill] sm:$0xff]  ;;  %v5532_v3 = vsel %vm5491_vm5, %v4723_v30, %v5531_v22  ;;  %v2708_v58 = vsel %vm2446_vm0, %v9242_v13, 0.0  ;;  %v2709_v42 = vsel %vm2447_vm13, %v9242_v13, 0.0 }
 0x4a2   :  { %v4758_v21 = vrot.slane %v3914_v26, %v8531_v38  ;;  %v3659_v0 = vadd.f32 %v8467_v61, %v3082_v24  ;;  %v9391_v2 = vpop.xlane.xlu1 %3084  ;;  %vm2445_vm14 = vcmp.ge.f32.partialorder %v11265_v43, %v9210_v32  ;;  %v5533_v34 = vsel %vm5493_vm7, %v4732_v7, %v5532_v3  ;;  %v11272_v26 = vld [vmem:[#allocation59_spill] sm:$0xff] }
 0x4a3   :  { %v5534_v37 = vsel %vm5495_vm8, %v4741_v35, %v5533_v34  ;;  %v4763_v55 = vrot.slane %v3915_v54, %v8524_v47  ;;  %v2707_v49 = vsel %vm2445_vm14, %v9242_v13, 0.0  ;;  %vm2449_vm15 = vcmp.ge.f32.partialorder %v11272_v26, %v9210_v32  ;;  %v11275_v54 = vld [vmem:[#allocation61_spill] sm:$0xff]  ;;  %v11277_v43 = vld [vmem:[#allocation63_spill] sm:$0xff] }
 0x4a4   :  { %v3916_v56 = vmul.f32 %v8426_v57, %v3659_v0  ;;  %3291 = vadd.xlane.f32.xlu0 %v9336_v29  ;;  %v4759_v50 = vsel %vm4344_vm2, %v4758_v21, %v4754_v31  ;;  %v5535_v36 = vsel %vm5497_vm9, %v4750_v14, %v5534_v37  ;;  %v3302_v15 = vsel %vm2794_vm6, %v2707_v49, 0.0  ;;  %v11276_v31 = vld [vmem:[#allocation62_spill] sm:$0xff] }
 0x4a5   :  { %3294 = vadd.xlane.f32.xlu1 %v3293_v60  ;;  %v3088_v8 = vpop.xlane.xlu0 %3087  ;;  %v5536_v27 = vsel %vm11268_vm1, %v4759_v50, %v5535_v36  ;;  %vm2450_vm12 = vcmp.ge.f32.partialorder %v11273_v25, %v9210_v32  ;;  %v3305_v30 = vsel %vm2794_vm6, %v2708_v58, 0.0  ;;  %v2710_v7 = vsel %vm2448_vm11, %v9242_v13, 0.0 }
 0x4a6   :  { %v4767_v29 = vrot.slane %v3916_v56, %v8531_v38  ;;  %v3091_v11 = vpop.xlane.xlu1 %3090  ;;  %vm2451_vm14 = vcmp.ge.f32.partialorder %v11274_v4, %v9210_v32  ;;  %vm2452_vm0 = vcmp.ge.f32.partialorder %v7905_v59, %v9210_v32  ;;  %v3308_v21 = vsel %vm2794_vm6, %v2709_v42, 0.0 }
 0x4a7   :  { %vm2453_vm13 = vcmp.ge.f32.partialorder %v11275_v54, %v9210_v32  ;;  %v3311_v0 = vsel %vm2794_vm6, %v2710_v7, 0.0  ;;  %v2711_v22 = vsel %vm2449_vm15, %v9242_v13, 0.0  ;;  %v2712_v35 = vsel %vm2450_vm12, %v9242_v13, 0.0 }
 0x4a8   :  { %v4768_v6 = vsel %vm4344_vm2, %v4767_v29, %v4763_v55  ;;  %3297 = vadd.xlane.f32.xlu0 %v3296_v33  ;;  %vm2455_vm1 = vcmp.ge.f32.partialorder %v7909_v1, %v9210_v32  ;;  %vm2454_vm11 = vcmp.ge.f32.partialorder %v11276_v31, %v9210_v32  ;;  %v2713_v59 = vsel %vm2451_vm14, %v9242_v13, 0.0 }
 0x4a9   :  { %v5537_v46 = vsel %vm11270_vm4, %v4768_v6, %v5536_v27  ;;  %3300 = vadd.xlane.f32.xlu1 %v3299_v44  ;;  %v3094_v45 = vpop.xlane.xlu0 %3093  ;;  %v2714_v60 = vsel %vm2452_vm0, %v9242_v13, 0.0  ;;  %vm2457_vm4 = vcmp.ge.f32.partialorder %v7915_v51, %v9210_v32  ;;  %v3314_v56 = vsel %vm2794_vm6, %v2711_v22, 0.0 }
 0x4aa   :  { %5630 = vst.msk [vmem:[%s10638_s6 + $0x28] sm:$0xff] %vm11271_vm10, %v5537_v46  ;;  %v3097_v17 = vpop.xlane.xlu1 %3096  ;;  %vm2456_vm10 = vcmp.ge.f32.partialorder %v11277_v43, %v9210_v32  ;;  %v3317_v34 = vsel %vm2794_vm6, %v2712_v35, 0.0  ;;  %v2715_v50 = vsel %vm2453_vm13, %v9242_v13, 0.0  ;;  %v3320_v16 = vsel %vm2794_vm6, %v2713_v59, 0.0 }
 0x4ab   :  { %v3323_v48 = vsel %vm2794_vm6, %v2714_v60, 0.0  ;;  %v2716_v37 = vsel %vm2454_vm11, %v9242_v13, 0.0  ;;  %v2717_v55 = vsel %vm2455_vm1, %v9242_v13, 0.0  ;;  %v3660_v29 = vadd.f32 %v8467_v61, %v9391_v2 }
 0x4ac   :  { %3303 = vadd.xlane.f32.xlu0 %v3302_v15  ;;  %v3663_v36 = vadd.f32 %v8467_v61, %v3094_v45  ;;  %v2718_v33 = vsel %vm2456_vm10, %v9242_v13, 0.0  ;;  %v2719_v49 = vsel %vm2457_vm4, %v9242_v13, 0.0  ;;  %v3661_v53 = vadd.f32 %v8467_v61, %v3088_v8 }
 0x4ad   :  { %3306 = vadd.xlane.f32.xlu1 %v3305_v30  ;;  %v3100_v24 = vpop.xlane.xlu0 %3099  ;;  %v3326_v2 = vsel %vm2794_vm6, %v2715_v50, 0.0  ;;  %v3662_v44 = vadd.f32 %v8467_v61, %v3091_v11  ;;  %v3664_v20 = vadd.f32 %v8467_v61, %v3097_v17  ;;  %v3329_v45 = vsel %vm2794_vm6, %v2716_v37, 0.0  ;;  %v11278_v11 = vld [vmem:[#allocation139_spill] sm:$0xff] }
 0x4ae   :  { %v3103_v23 = vpop.xlane.xlu1 %3102  ;;  %v3665_v27 = vadd.f32 %v8467_v61, %v3100_v24  ;;  %v3332_v51 = vsel %vm2794_vm6, %v2717_v55, 0.0  ;;  %v3335_v15 = vsel %vm2794_vm6, %v2718_v33, 0.0  ;;  %v9497_v42 = vsel %vm2794_vm6, %v2719_v49, 0.0 }
 0x4af   :  { %v3666_v58 = vadd.f32 %v8467_v61, %v3103_v23  ;;  %vm2459_vm15 = vcmp.ge.f32.partialorder %v7921_v5, %v9210_v32  ;;  %vm2458_vm12 = vcmp.ge.f32.partialorder %v11278_v11, %v9210_v32  ;;  %v3917_v17 = vmul.f32 %v8426_v57, %v3660_v29 }
 0x4b0   :  { %3309 = vadd.xlane.f32.xlu0 %v3308_v21  ;;  %v3920_v26 = vmul.f32 %v8426_v57, %v3663_v36  ;;  %v3918_v25 = vmul.f32 %v8426_v57, %v3661_v53  ;;  %v3922_v30 = vmul.f32 %v8426_v57, %v3665_v27  ;;  %v3919_v23 = vmul.f32 %v8426_v57, %v3662_v44 }
 0x4b1   :  { %3312 = vadd.xlane.f32.xlu1 %v3311_v0  ;;  %v3106_v3 = vpop.xlane.xlu0 %3105  ;;  %v3921_v21 = vmul.f32 %v8426_v57, %v3664_v20  ;;  %v3923_v35 = vmul.f32 %v8426_v57, %v3666_v58  ;;  %v2720_v60 = vsel %vm2458_vm12, %v9242_v13, 0.0  ;;  %v4772_v43 = vrot.slane %v3917_v17, %v8524_v47 }
 0x4b2   :  { %v3109_v14 = vpop.xlane.xlu1 %3108  ;;  %v3667_v1 = vadd.f32 %v8467_v61, %v3106_v3  ;;  %v4785_v3 = vrot.slane %v3920_v26, %v8531_v38  ;;  %v4794_v50 = vrot.slane %v3922_v30, %v8531_v38  ;;  %v4781_v55 = vrot.slane %v3919_v23, %v8524_v47 }
 0x4b3   :  { %v3668_v4 = vadd.f32 %v8467_v61, %v3109_v14  ;;  %v4790_v29 = vrot.slane %v3921_v21, %v8524_v47  ;;  %v4799_v49 = vrot.slane %v3923_v35, %v8524_v47  ;;  %vm2460_vm14 = vcmp.ge.f32.partialorder %v7929_v18, %v9210_v32 }
 0x4b4   :  { %3315 = vadd.xlane.f32.xlu0 %v3314_v56  ;;  %v3924_v7 = vmul.f32 %v8426_v57, %v3667_v1  ;;  %v2721_v56 = vsel %vm2459_vm15, %v9242_v13, 0.0  ;;  %vm2462_vm13 = vcmp.ge.f32.partialorder %v7935_v63, %v9210_v32  ;;  %vm11281_vm11 = vcmask 1046534  }
 0x4b5   :  { %3318 = vadd.xlane.f32.xlu1 %v3317_v34  ;;  %v3112_v6 = vpop.xlane.xlu0 %3111  ;;  %v4776_v34 = vrot.slane %v3918_v25, %v8531_v38  ;;  %vm2464_vm4 = vcmp.ge.f32.partialorder %v7941_v40, %v9210_v32  ;;  %vm11282_vm10 = vcmask 1047559   ;;  %vm11283_vm15 = vcmask 130048   ;;  %v11284_v40 = vld [vmem:[#allocation142_spill] sm:$0xff] }
 0x4b6   :  { %v3115_v46 = vpop.xlane.xlu1 %3114  ;;  %v3669_v8 = vadd.f32 %v8467_v61, %v3112_v6  ;;  %v4786_v6 = vsel %vm4344_vm2, %v4785_v3, %v4781_v55  ;;  %v2724_v55 = vsel %vm2462_vm13, %v9242_v13, 0.0  ;;  %vm2465_vm12 = vcmp.ge.f32.partialorder %v11284_v40, %v9210_v32 }
 0x4b7   :  { %v3670_v54 = vadd.f32 %v8467_v61, %v3115_v46  ;;  %v4777_v20 = vsel %vm4344_vm2, %v4776_v34, %v4772_v43  ;;  %v4795_v46 = vsel %vm4344_vm2, %v4794_v50, %v4790_v29  ;;  %v11280_v34 = vld [vmem:[#allocation141_spill] sm:$0xff]  ;;  %v3353_v63 = vsel %vm2794_vm6, %v2724_v55, 0.0 }
 0x4b8   :  { %3321 = vadd.xlane.f32.xlu0 %v3320_v16  ;;  %v3926_v31 = vmul.f32 %v8426_v57, %v3669_v8  ;;  %v4803_v16 = vrot.slane %v3924_v7, %v8531_v38  ;;  %vm2463_vm1 = vcmp.ge.f32.partialorder %v11280_v34, %v9210_v32 }
 0x4b9   :  { %3324 = vadd.xlane.f32.xlu1 %v3323_v48  ;;  %v3118_v24 = vpop.xlane.xlu0 %3117  ;;  %v3925_v48 = vmul.f32 %v8426_v57, %v3668_v4  ;;  %v3927_v36 = vmul.f32 %v8426_v57, %v3670_v54 }
 0x4ba   :  { %v3671_v0 = vadd.f32 %v8467_v61, %v3118_v24  ;;  %v3121_v22 = vpop.xlane.xlu1 %3120  ;;  %v4812_v53 = vrot.slane %v3926_v31, %v8531_v38  ;;  %v3341_v24 = vsel %vm2794_vm6, %v2720_v60, 0.0  ;;  %v2722_v31 = vsel %vm2460_vm14, %v9242_v13, 0.0 }
 0x4bb   :  { %v3672_v59 = vadd.f32 %v8467_v61, %v3121_v22  ;;  %v4808_v58 = vrot.slane %v3925_v48, %v8524_v47  ;;  %v4817_v11 = vrot.slane %v3927_v36, %v8524_v47  ;;  %v3347_v48 = vsel %vm2794_vm6, %v2722_v31, 0.0 }
 0x4bc   :  { %v3928_v14 = vmul.f32 %v8426_v57, %v3671_v0  ;;  %3327 = vadd.xlane.f32.xlu0 %v3326_v2  ;;  %vm2466_vm14 = vcmp.ge.f32.partialorder %v7947_v52, %v9210_v32 }
 0x4bd   :  { %3330 = vadd.xlane.f32.xlu1 %v3329_v45  ;;  %v3124_v37 = vpop.xlane.xlu0 %3123  ;;  %v3929_v27 = vmul.f32 %v8426_v57, %v3672_v59  ;;  %v4804_v45 = vsel %vm4344_vm2, %v4803_v16, %v4799_v49  ;;  %v4813_v7 = vsel %vm4344_vm2, %v4812_v53, %v4808_v58  ;;  %v11285_v49 = vld [vmem:[#allocation143_spill] sm:$0xff]  ;;  %v11286_v53 = vld [vmem:[#allocation145_spill] sm:$0xff] }
 0x4be   :  { %v3673_v33 = vadd.f32 %v8467_v61, %v3124_v37  ;;  %v3127_v5 = vpop.xlane.xlu1 %3126  ;;  %v4821_v2 = vrot.slane %v3928_v14, %v8531_v38  ;;  %v3344_v14 = vsel %vm2794_vm6, %v2721_v56, 0.0  ;;  %vm2468_vm13 = vcmp.ge.f32.partialorder %v11286_v53, %v9210_v32 }
 0x4bf   :  { %v3674_v1 = vadd.f32 %v8467_v61, %v3127_v5  ;;  %v4826_v4 = vrot.slane %v3929_v27, %v8524_v47  ;;  %v2726_v5 = vsel %vm2464_vm4, %v9242_v13, 0.0 }
 0x4c0   :  { %v3930_v44 = vmul.f32 %v8426_v57, %v3673_v33  ;;  %3333 = vadd.xlane.f32.xlu0 %v3332_v51  ;;  %v5538_v51 = vsel %vm5489_vm3, %v4786_v6, %v4777_v20  ;;  %v4822_v21 = vsel %vm4344_vm2, %v4821_v2, %v4817_v11  ;;  %v2725_v33 = vsel %vm2463_vm1, %v9242_v13, 0.0  ;;  %v11287_v2 = vld [vmem:[#allocation144_spill] sm:$0xff] }
 0x4c1   :  { %3336 = vadd.xlane.f32.xlu1 %v3335_v15  ;;  %v3130_v8 = vpop.xlane.xlu0 %3129  ;;  %v3931_v26 = vmul.f32 %v8426_v57, %v3674_v1  ;;  %v11279_v15 = vld [vmem:[#allocation140_spill] sm:$0xff]  ;;  %v5539_v23 = vsel %vm5491_vm5, %v4795_v46, %v5538_v51  ;;  %v3356_v6 = vsel %vm2794_vm6, %v2725_v33, 0.0  ;;  %vm2469_vm1 = vcmp.ge.f32.partialorder %v11287_v2, %v9210_v32  ;;  %v11288_v46 = vld [vmem:[#allocation146_spill] sm:$0xff] }
 0x4c2   :  { %v4830_v17 = vrot.slane %v3930_v44, %v8531_v38  ;;  %v3675_v25 = vadd.f32 %v8467_v61, %v3130_v8  ;;  %v9552_v30 = vpop.xlane.xlu1 %3132  ;;  %vm2461_vm0 = vcmp.ge.f32.partialorder %v11279_v15, %v9210_v32  ;;  %v5540_v0 = vsel %vm5493_vm7, %v4804_v45, %v5539_v23  ;;  %v11289_v45 = vld [vmem:[#allocation147_spill] sm:$0xff]  ;;  %v11290_v11 = vld [vmem:[#allocation148_spill] sm:$0xff] }
 0x4c3   :  { %v5541_v59 = vsel %vm5495_vm8, %v4813_v7, %v5540_v0  ;;  %v4835_v60 = vrot.slane %v3931_v26, %v8524_v47  ;;  %v2723_v18 = vsel %vm2461_vm0, %v9242_v13, 0.0  ;;  %vm2467_vm0 = vcmp.ge.f32.partialorder %v11285_v49, %v9210_v32 }
 0x4c4   :  { %v3932_v54 = vmul.f32 %v8426_v57, %v3675_v25  ;;  %3339 = vadd.xlane.f32.xlu0 %v9497_v42  ;;  %v4831_v22 = vsel %vm4344_vm2, %v4830_v17, %v4826_v4  ;;  %v5542_v3 = vsel %vm5497_vm9, %v4822_v21, %v5541_v59  ;;  %v3350_v36 = vsel %vm2794_vm6, %v2723_v18, 0.0  ;;  %v11291_v17 = vld [vmem:[#allocation149_spill] sm:$0xff] }
 0x4c5   :  { %3342 = vadd.xlane.f32.xlu1 %v3341_v24  ;;  %v3136_v35 = vpop.xlane.xlu0 %3135  ;;  %v5543_v50 = vsel %vm11281_vm11, %v4831_v22, %v5542_v3  ;;  %v3359_v52 = vsel %vm2794_vm6, %v2726_v5, 0.0  ;;  %v2727_v44 = vsel %vm2465_vm12, %v9242_v13, 0.0  ;;  %v2728_v20 = vsel %vm2466_vm14, %v9242_v13, 0.0 }
 0x4c6   :  { %v4839_v42 = vrot.slane %v3932_v54, %v8531_v38  ;;  %v3139_v43 = vpop.xlane.xlu1 %3138  ;;  %vm2471_vm11 = vcmp.ge.f32.partialorder %v11288_v46, %v9210_v32  ;;  %vm2470_vm4 = vcmp.ge.f32.partialorder %v11289_v45, %v9210_v32  ;;  %v2729_v58 = vsel %vm2467_vm0, %v9242_v13, 0.0 }
 0x4c7   :  { %v2730_v8 = vsel %vm2468_vm13, %v9242_v13, 0.0  ;;  %v3362_v51 = vsel %vm2794_vm6, %v2727_v44, 0.0  ;;  %v3365_v7 = vsel %vm2794_vm6, %v2728_v20, 0.0  ;;  %v2731_v4 = vsel %vm2469_vm1, %v9242_v13, 0.0 }
 0x4c8   :  { %v4840_v16 = vsel %vm4344_vm2, %v4839_v42, %v4835_v60  ;;  %3345 = vadd.xlane.f32.xlu0 %v3344_v14  ;;  %v3368_v24 = vsel %vm2794_vm6, %v2729_v58, 0.0  ;;  %v3371_v15 = vsel %vm2794_vm6, %v2730_v8, 0.0  ;;  %v2732_v23 = vsel %vm2470_vm4, %v9242_v13, 0.0 }
 0x4c9   :  { %v5544_v56 = vsel %vm11282_vm10, %v4840_v16, %v5543_v50  ;;  %3348 = vadd.xlane.f32.xlu1 %v3347_v48  ;;  %v3142_v37 = vpop.xlane.xlu0 %3141  ;;  %vm2473_vm10 = vcmp.ge.f32.partialorder %v11290_v11, %v9210_v32  ;;  %v2733_v21 = vsel %vm2471_vm11, %v9242_v13, 0.0  ;;  %v3676_v54 = vadd.f32 %v8467_v61, %v9552_v30 }
 0x4ca   :  { %5631 = vst.msk [vmem:[%s10638_s6 + $0x30] sm:$0xff] %vm11283_vm15, %v5544_v56  ;;  %v3145_v29 = vpop.xlane.xlu1 %3144  ;;  %vm2472_vm15 = vcmp.ge.f32.partialorder %v11291_v17, %v9210_v32  ;;  %v3679_v0 = vadd.f32 %v8467_v61, %v3142_v37  ;;  %v2735_v31 = vsel %vm2473_vm10, %v9242_v13, 0.0  ;;  %v3677_v59 = vadd.f32 %v8467_v61, %v3136_v35 }
 0x4cb   :  { %v2734_v22 = vsel %vm2472_vm15, %v9242_v13, 0.0  ;;  %v3374_v30 = vsel %vm2794_vm6, %v2731_v4, 0.0  ;;  %v3678_v14 = vadd.f32 %v8467_v61, %v3139_v43  ;;  %v3680_v18 = vadd.f32 %v8467_v61, %v3145_v29 }
 0x4cc   :  { %3351 = vadd.xlane.f32.xlu0 %v3350_v36  ;;  %v3377_v50 = vsel %vm2794_vm6, %v2732_v23, 0.0  ;;  %v3380_v16 = vsel %vm2794_vm6, %v2733_v21, 0.0  ;;  %v3383_v56 = vsel %vm2794_vm6, %v2734_v22, 0.0  ;;  %v9658_v37 = vsel %vm2794_vm6, %v2735_v31, 0.0 }
 0x4cd   :  { %3354 = vadd.xlane.f32.xlu1 %v3353_v63  ;;  %v3148_v27 = vpop.xlane.xlu0 %3147  ;;  %vm2475_vm12 = vcmp.ge.f32.partialorder %v7969_v10, %v9210_v32  ;;  %vm2474_vm14 = vcmp.ge.f32.partialorder %v7971_v9, %v9210_v32  ;;  %v3933_v43 = vmul.f32 %v8426_v57, %v3676_v54  ;;  %v3936_v55 = vmul.f32 %v8426_v57, %v3679_v0  ;;  %v11292_v54 = vld [vmem:[#allocation150_spill] sm:$0xff] }
 0x4ce   :  { %v3151_v1 = vpop.xlane.xlu1 %3150  ;;  %v3681_v60 = vadd.f32 %v8467_v61, %v3148_v27  ;;  %v3934_v29 = vmul.f32 %v8426_v57, %v3677_v59  ;;  %v3935_v5 = vmul.f32 %v8426_v57, %v3678_v14  ;;  %v3937_v49 = vmul.f32 %v8426_v57, %v3680_v18 }
 0x4cf   :  { %v3682_v48 = vadd.f32 %v8467_v61, %v3151_v1  ;;  %v2736_v44 = vsel %vm2474_vm14, %v9242_v13, 0.0  ;;  %v4844_v20 = vrot.slane %v3933_v43, %v8524_v47  ;;  %v4857_v46 = vrot.slane %v3936_v55, %v8531_v38 }
 0x4d0   :  { %3357 = vadd.xlane.f32.xlu0 %v3356_v6  ;;  %v3938_v36 = vmul.f32 %v8426_v57, %v3681_v60  ;;  %v2737_v58 = vsel %vm2475_vm12, %v9242_v13, 0.0  ;;  %v4848_v8 = vrot.slane %v3934_v29, %v8531_v38  ;;  %vm2476_vm0 = vcmp.ge.f32.partialorder %v11292_v54, %v9210_v32 }
 0x4d1   :  { %3360 = vadd.xlane.f32.xlu1 %v3359_v52  ;;  %v3154_v26 = vpop.xlane.xlu0 %3153  ;;  %v3939_v6 = vmul.f32 %v8426_v57, %v3682_v48  ;;  %v3389_v55 = vsel %vm2794_vm6, %v2736_v44, 0.0  ;;  %vm2478_vm1 = vcmp.ge.f32.partialorder %v7977_v39, %v9210_v32  ;;  %v11294_v44 = vld [vmem:[#allocation152_spill] sm:$0xff]  ;;  %vm11295_vm4 = vcmask 1046534  }
 0x4d2   :  { %v3157_v25 = vpop.xlane.xlu1 %3156  ;;  %v3683_v42 = vadd.f32 %v8467_v61, %v3154_v26  ;;  %v4866_v11 = vrot.slane %v3938_v36, %v8531_v38  ;;  %v4849_v59 = vsel %vm4344_vm2, %v4848_v8, %v4844_v20  ;;  %vm2479_vm11 = vcmp.ge.f32.partialorder %v11294_v44, %v9210_v32  ;;  %v11296_v8 = vld [vmem:[#allocation153_spill] sm:$0xff] }
 0x4d3   :  { %v3684_v40 = vadd.f32 %v8467_v61, %v3157_v25  ;;  %v4853_v25 = vrot.slane %v3935_v5, %v8524_v47  ;;  %vm2480_vm10 = vcmp.ge.f32.partialorder %v11296_v8, %v9210_v32  ;;  %vm11297_vm15 = vcmask 1047559  }
 0x4d4   :  { %3363 = vadd.xlane.f32.xlu0 %v3362_v51  ;;  %v3940_v33 = vmul.f32 %v8426_v57, %v3683_v42  ;;  %v4862_v51 = vrot.slane %v3937_v49, %v8524_v47  ;;  %v2738_v49 = vsel %vm2476_vm0, %v9242_v13, 0.0  ;;  %vm11298_vm12 = vcmask 130048  }
 0x4d5   :  { %3366 = vadd.xlane.f32.xlu1 %v3365_v7  ;;  %v3160_v3 = vpop.xlane.xlu0 %3159  ;;  %v3941_v9 = vmul.f32 %v8426_v57, %v3684_v40  ;;  %v4858_v0 = vsel %vm4344_vm2, %v4857_v46, %v4853_v25  ;;  %v2741_v25 = vsel %vm2479_vm11, %v9242_v13, 0.0  ;;  %vm2485_vm11 = vcmp.ge.f32.partialorder %v8009_v12, %v9210_v32 }
 0x4d6   :  { %v3163_v34 = vpop.xlane.xlu1 %3162  ;;  %v3685_v35 = vadd.f32 %v8467_v61, %v3160_v3  ;;  %v4875_v17 = vrot.slane %v3940_v33, %v8531_v38  ;;  %v4867_v60 = vsel %vm4344_vm2, %v4866_v11, %v4862_v51  ;;  %v11299_v51 = vld [vmem:[#allocation154_spill] sm:$0xff] }
 0x4d7   :  { %v3686_v53 = vadd.f32 %v8467_v61, %v3163_v34  ;;  %v4880_v3 = vrot.slane %v3941_v9, %v8524_v47  ;;  %vm2481_vm14 = vcmp.ge.f32.partialorder %v11299_v51, %v9210_v32 }
 0x4d8   :  { %3369 = vadd.xlane.f32.xlu0 %v3368_v24  ;;  %v3942_v2 = vmul.f32 %v8426_v57, %v3685_v35  ;;  %v4871_v24 = vrot.slane %v3939_v6, %v8524_v47 }
 0x4d9   :  { %3372 = vadd.xlane.f32.xlu1 %v3371_v15  ;;  %v3166_v63 = vpop.xlane.xlu0 %3165  ;;  %v3943_v7 = vmul.f32 %v8426_v57, %v3686_v53 }
 0x4da   :  { %v3687_v27 = vadd.f32 %v8467_v61, %v3166_v63  ;;  %v3169_v1 = vpop.xlane.xlu1 %3168  ;;  %v4884_v15 = vrot.slane %v3942_v2, %v8531_v38  ;;  %v4876_v42 = vsel %vm4344_vm2, %v4875_v17, %v4871_v24  ;;  %v3392_v2 = vsel %vm2794_vm6, %v2737_v58, 0.0  ;;  %v11302_v24 = vld [vmem:[#allocation157_spill] sm:$0xff] }
 0x4db   :  { %v3688_v52 = vadd.f32 %v8467_v61, %v3169_v1  ;;  %v4889_v14 = vrot.slane %v3943_v7, %v8524_v47  ;;  %v2740_v17 = vsel %vm2478_vm1, %v9242_v13, 0.0  ;;  %v11300_v7 = vld [vmem:[#allocation155_spill] sm:$0xff]  ;;  %vm2484_vm1 = vcmp.ge.f32.partialorder %v11302_v24, %v9210_v32 }
 0x4dc   :  { %v3944_v45 = vmul.f32 %v8426_v57, %v3687_v27  ;;  %3375 = vadd.xlane.f32.xlu0 %v3374_v30  ;;  %v4885_v35 = vsel %vm4344_vm2, %v4884_v15, %v4880_v3  ;;  %vm2482_vm0 = vcmp.ge.f32.partialorder %v11300_v7, %v9210_v32  ;;  %v3401_v39 = vsel %vm2794_vm6, %v2740_v17, 0.0  ;;  %v11304_v17 = vld [vmem:[#allocation169_spill] sm:$0xff] }
 0x4dd   :  { %3378 = vadd.xlane.f32.xlu1 %v3377_v50  ;;  %v3172_v26 = vpop.xlane.xlu0 %3171  ;;  %v3945_v23 = vmul.f32 %v8426_v57, %v3688_v52 }
 0x4de   :  { %v3689_v4 = vadd.f32 %v8467_v61, %v3172_v26  ;;  %v3175_v10 = vpop.xlane.xlu1 %3174  ;;  %v4893_v22 = vrot.slane %v3944_v45, %v8531_v38  ;;  %v3395_v45 = vsel %vm2794_vm6, %v2738_v49, 0.0 }
 0x4df   :  { %v3690_v21 = vadd.f32 %v8467_v61, %v3175_v10  ;;  %v4898_v43 = vrot.slane %v3945_v23, %v8524_v47  ;;  %v11301_v10 = vld [vmem:[#allocation156_spill] sm:$0xff] }
 0x4e0   :  { %v3946_v31 = vmul.f32 %v8426_v57, %v3689_v4  ;;  %3381 = vadd.xlane.f32.xlu0 %v3380_v16  ;;  %v5545_v16 = vsel %vm5489_vm3, %v4858_v0, %v4849_v59  ;;  %v4894_v36 = vsel %vm4344_vm2, %v4893_v22, %v4889_v14  ;;  %v2742_v4 = vsel %vm2480_vm10, %v9242_v13, 0.0 }
 0x4e1   :  { %3384 = vadd.xlane.f32.xlu1 %v3383_v56  ;;  %v3178_v30 = vpop.xlane.xlu0 %3177  ;;  %v3947_v34 = vmul.f32 %v8426_v57, %v3690_v21  ;;  %v11293_v56 = vld [vmem:[#allocation151_spill] sm:$0xff]  ;;  %v5546_v29 = vsel %vm5491_vm5, %v4867_v60, %v5545_v16  ;;  %v3404_v21 = vsel %vm2794_vm6, %v2741_v25, 0.0  ;;  %v3407_v54 = vsel %vm2794_vm6, %v2742_v4, 0.0  ;;  %v9841_v4 = vld [vmem:[%s10636_s4] ss:$0 sm:$0xff] }
 0x4e2   :  { %v4902_v18 = vrot.slane %v3946_v31, %v8531_v38  ;;  %v3691_v50 = vadd.f32 %v8467_v61, %v3178_v30  ;;  %v9713_v48 = vpop.xlane.xlu1 %3180  ;;  %vm2477_vm13 = vcmp.ge.f32.partialorder %v11293_v56, %v9210_v32  ;;  %v5547_v40 = vsel %vm5493_vm7, %v4876_v42, %v5546_v29  ;;  %v11303_v31 = vld [vmem:[#allocation158_spill] sm:$0xff] }
 0x4e3   :  { %v5548_v53 = vsel %vm5495_vm8, %v4885_v35, %v5547_v40  ;;  %v4907_v27 = vrot.slane %v3947_v34, %v8524_v47  ;;  %v2739_v52 = vsel %vm2477_vm13, %v9242_v13, 0.0  ;;  %vm2483_vm13 = vcmp.ge.f32.partialorder %v11301_v10, %v9210_v32 }
 0x4e4   :  { %v3948_v33 = vmul.f32 %v8426_v57, %v3691_v50  ;;  %3387 = vadd.xlane.f32.xlu0 %v9658_v37  ;;  %v4903_v63 = vsel %vm4344_vm2, %v4902_v18, %v4898_v43  ;;  %v5549_v6 = vsel %vm5497_vm9, %v4894_v36, %v5548_v53  ;;  %v3398_v26 = vsel %vm2794_vm6, %v2739_v52, 0.0 }
 0x4e5   :  { %3390 = vadd.xlane.f32.xlu1 %v3389_v55  ;;  %v3184_v5 = vpop.xlane.xlu0 %3183  ;;  %v5550_v20 = vsel %vm11295_vm4, %v4903_v63, %v5549_v6  ;;  %v2743_v0 = vsel %vm2481_vm14, %v9242_v13, 0.0  ;;  %v2744_v22 = vsel %vm2482_vm0, %v9242_v13, 0.0  ;;  %vm2486_vm4 = vcmp.ge.f32.partialorder %v11303_v31, %v9210_v32 }
 0x4e6   :  { %v4911_v37 = vrot.slane %v3948_v33, %v8531_v38  ;;  %v3187_v1 = vpop.xlane.xlu1 %3186  ;;  %v2745_v59 = vsel %vm2483_vm13, %v9242_v13, 0.0  ;;  %v2746_v60 = vsel %vm2484_vm1, %v9242_v13, 0.0  ;;  %vm2487_vm10 = vcmp.ge.f32.partialorder %v8027_v62, %v9210_v32 }
 0x4e7   :  { %v3410_v3 = vsel %vm2794_vm6, %v2743_v0, 0.0  ;;  %v3413_v30 = vsel %vm2794_vm6, %v2744_v22, 0.0  ;;  %v3416_v14 = vsel %vm2794_vm6, %v2745_v59, 0.0  ;;  %v3419_v18 = vsel %vm2794_vm6, %v2746_v60, 0.0 }
 0x4e8   :  { %v4912_v46 = vsel %vm4344_vm2, %v4911_v37, %v4907_v27  ;;  %3393 = vadd.xlane.f32.xlu0 %v3392_v2  ;;  %v2747_v34 = vsel %vm2485_vm11, %v9242_v13, 0.0  ;;  %v2748_v62 = vsel %vm2486_vm4, %v9242_v13, 0.0  ;;  %v2749_v16 = vsel %vm2487_vm10, %v9242_v13, 0.0 }
 0x4e9   :  { %v5551_v58 = vsel %vm11297_vm15, %v4912_v46, %v5550_v20  ;;  %3396 = vadd.xlane.f32.xlu1 %v3395_v45  ;;  %v3190_v11 = vpop.xlane.xlu0 %3189  ;;  %vm2488_vm15 = vcmp.ge.f32.partialorder %v8029_v28, %v9210_v32  ;;  %v3692_v28 = vadd.f32 %v8467_v61, %v9713_v48  ;;  %v3693_v43 = vadd.f32 %v8467_v61, %v3184_v5 }
 0x4ea   :  { %5632 = vst.msk [vmem:[%s10638_s6 + $0x38] sm:$0xff] %vm11298_vm12, %v5551_v58  ;;  %v3193_v9 = vpop.xlane.xlu1 %3192  ;;  %vm2489_vm12 = vcmp.ge.f32.partialorder %v8040_v19, %v9210_v32  ;;  %v3695_v50 = vadd.f32 %v8467_v61, %v3190_v11  ;;  %v2750_v35 = vsel %vm2488_vm15, %v9242_v13, 0.0  ;;  %v3694_v36 = vadd.f32 %v8467_v61, %v3187_v1  ;;  %v9815_v19 = vld [vmem:[%s10635_s3] ss:$0 sm:$0xff] }
 0x4eb   :  { %v2751_v48 = vsel %vm2489_vm12, %v9242_v13, 0.0  ;;  %v3696_v33 = vadd.f32 %v8467_v61, %v3193_v9  ;;  %v3422_v63 = vsel %vm2794_vm6, %v2747_v34, 0.0  ;;  %v3425_v5 = vsel %vm2794_vm6, %v2748_v62, 0.0 }
 0x4ec   :  { %3399 = vadd.xlane.f32.xlu0 %v3398_v26  ;;  %v3428_v27 = vsel %vm2794_vm6, %v2749_v16, 0.0  ;;  %v3431_v37 = vsel %vm2794_vm6, %v2750_v35, 0.0  ;;  %vm2500_vm14 = vcmp.ge.f32.partialorder %v8125_v41, %v9815_v19  ;;  %v3949_v32 = vmul.f32 %v8426_v57, %v3692_v28 }
 0x4ed   :  { %3402 = vadd.xlane.f32.xlu1 %v3401_v39  ;;  %v3196_v15 = vpop.xlane.xlu0 %3195  ;;  %v3952_v13 = vmul.f32 %v8426_v57, %v3695_v50  ;;  %v3434_v1 = vsel %vm2794_vm6, %v2751_v48, 0.0  ;;  %v3950_v6 = vmul.f32 %v8426_v57, %v3693_v43  ;;  %v3951_v46 = vmul.f32 %v8426_v57, %v3694_v36 }
 0x4ee   :  { %v3199_v23 = vpop.xlane.xlu1 %3198  ;;  %v3697_v55 = vadd.f32 %v8467_v61, %v3196_v15  ;;  %v3953_v45 = vmul.f32 %v8426_v57, %v3696_v33  ;;  %vm2501_vm0 = vcmp.ge.f32.partialorder %v11304_v17, %v9815_v19  ;;  %v4916_v51 = vrot.slane %v3949_v32, %v8524_v47 }
 0x4ef   :  { %v3698_v49 = vadd.f32 %v8467_v61, %v3199_v23  ;;  %v4929_v7 = vrot.slane %v3952_v13, %v8531_v38  ;;  %v2762_v10 = vsel %vm2500_vm14, %v9841_v4, 0.0  ;;  %v4920_v24 = vrot.slane %v3950_v6, %v8531_v38 }
 0x4f0   :  { %3405 = vadd.xlane.f32.xlu0 %v3404_v21  ;;  %v3954_v2 = vmul.f32 %v8426_v57, %v3697_v55  ;;  %v4925_v0 = vrot.slane %v3951_v46, %v8524_v47  ;;  %v4934_v22 = vrot.slane %v3953_v45, %v8524_v47  ;;  %vm11308_vm4 = vcmask 1046534  }
 0x4f1   :  { %3408 = vadd.xlane.f32.xlu1 %v3407_v54  ;;  %v3202_v42 = vpop.xlane.xlu0 %3201  ;;  %v3955_v9 = vmul.f32 %v8426_v57, %v3698_v49  ;;  %v4921_v62 = vsel %vm4344_vm2, %v4920_v24, %v4916_v51  ;;  %vm11310_vm15 = vcmask 1047559   ;;  %vm11312_vm14 = vcmask 130048  }
 0x4f2   :  { %v3205_v12 = vpop.xlane.xlu1 %3204  ;;  %v3699_v56 = vadd.f32 %v8467_v61, %v3202_v42  ;;  %v4938_v15 = vrot.slane %v3954_v2, %v8531_v38 }
 0x4f3   :  { %v3700_v44 = vadd.f32 %v8467_v61, %v3205_v12  ;;  %v4943_v60 = vrot.slane %v3955_v9, %v8524_v47 }
 0x4f4   :  { %3411 = vadd.xlane.f32.xlu0 %v3410_v3  ;;  %v3956_v52 = vmul.f32 %v8426_v57, %v3699_v56  ;;  %v4939_v28 = vsel %vm4344_vm2, %v4938_v15, %v4934_v22  ;;  %v11313_v15 = vld [vmem:[#allocation159_spill] sm:$0xff] }
 0x4f5   :  { %3414 = vadd.xlane.f32.xlu1 %v3413_v30  ;;  %v3208_v29 = vpop.xlane.xlu0 %3207  ;;  %v3957_v21 = vmul.f32 %v8426_v57, %v3700_v44  ;;  %v11305_v30 = vld [vmem:[#allocation170_spill] sm:$0xff] }
 0x4f6   :  { %v3211_v40 = vpop.xlane.xlu1 %3210  ;;  %v3701_v53 = vadd.f32 %v8467_v61, %v3208_v29  ;;  %v4947_v23 = vrot.slane %v3956_v52, %v8531_v38  ;;  %vm2502_vm13 = vcmp.ge.f32.partialorder %v11305_v30, %v9815_v19  ;;  %v11307_v52 = vld [vmem:[#allocation81_spill] sm:$0xff] }
 0x4f7   :  { %v3702_v8 = vadd.f32 %v8467_v61, %v3211_v40  ;;  %v4952_v16 = vrot.slane %v3957_v21, %v8524_v47  ;;  %v2764_v2 = vsel %vm2502_vm13, %v9841_v4, 0.0  ;;  %vm2516_vm11 = vcmp.ge.f32.partialorder %v11307_v52, %v9815_v19 }
 0x4f8   :  { %3417 = vadd.xlane.f32.xlu0 %v3416_v14  ;;  %v3958_v26 = vmul.f32 %v8426_v57, %v3701_v53  ;;  %v4930_v14 = vsel %vm4344_vm2, %v4929_v7, %v4925_v0  ;;  %v4948_v50 = vsel %vm4344_vm2, %v4947_v23, %v4943_v60  ;;  %v3473_v17 = vsel %vm2794_vm6, %v2764_v2, 0.0  ;;  %v11315_v0 = vld [vmem:[#allocation7_spill] sm:$0xff] }
 0x4f9   :  { %3420 = vadd.xlane.f32.xlu1 %v3419_v18  ;;  %v3214_v20 = vpop.xlane.xlu0 %3213  ;;  %v3959_v31 = vmul.f32 %v8426_v57, %v3702_v8  ;;  %v5552_v36 = vsel %vm5489_vm3, %v4930_v14, %v4921_v62  ;;  %v2778_v7 = vsel %vm2516_vm11, %v9841_v4, 0.0  ;;  %v11317_v60 = vld [vmem:[#allocation67_spill] sm:$0xff]  ;;  %v11320_v62 = vld [vmem:[#allocation6_spill] sm:$0xff] }
 0x4fa   :  { %v3703_v58 = vadd.f32 %v8467_v61, %v3214_v20  ;;  %v3217_v11 = vpop.xlane.xlu1 %3216  ;;  %v4956_v42 = vrot.slane %v3958_v26, %v8531_v38  ;;  %v11309_v26 = vld [vmem:[#allocation17_spill] sm:$0xff]  ;;  %v3515_v23 = vsel %vm2794_vm6, %v2778_v7, 0.0 }
 0x4fb   :  { %v3704_v25 = vadd.f32 %v8467_v61, %v3217_v11  ;;  %v4961_v43 = vrot.slane %v3959_v31, %v8524_v47  ;;  %vm2517_vm10 = vcmp.ge.f32.partialorder %v11309_v26, %v9815_v19  ;;  %v11322_v7 = vld [vmem:[#allocation161_spill] sm:$0xff] }
 0x4fc   :  { %v3960_v39 = vmul.f32 %v8426_v57, %v3703_v58  ;;  %3423 = vadd.xlane.f32.xlu0 %v3422_v63  ;;  %v4957_v33 = vsel %vm4344_vm2, %v4956_v42, %v4952_v16  ;;  %v2763_v63 = vsel %vm2501_vm0, %v9841_v4, 0.0  ;;  %vm2490_vm0 = vcmp.ge.f32.partialorder %v11313_v15, %v9815_v19 }
 0x4fd   :  { %3426 = vadd.xlane.f32.xlu1 %v3425_v5  ;;  %v3220_v54 = vpop.xlane.xlu0 %3219  ;;  %v3961_v12 = vmul.f32 %v8426_v57, %v3704_v25  ;;  %v5553_v5 = vsel %vm5491_vm5, %v4939_v28, %v5552_v36  ;;  %v3470_v8 = vsel %vm2794_vm6, %v2763_v63, 0.0  ;;  %v2779_v21 = vsel %vm2517_vm10, %v9841_v4, 0.0 }
 0x4fe   :  { %v3705_v59 = vadd.f32 %v8467_v61, %v3220_v54  ;;  %v3223_v41 = vpop.xlane.xlu1 %3222  ;;  %v4965_v18 = vrot.slane %v3960_v39, %v8531_v38  ;;  %v5554_v32 = vsel %vm5493_vm7, %v4948_v50, %v5553_v5  ;;  %v11311_v39 = vld [vmem:[#allocation18_spill] sm:$0xff]  ;;  %v11314_v54 = vld [vmem:[#allocation64_spill] sm:$0xff]  ;;  %v3518_v42 = vsel %vm2794_vm6, %v2779_v21, 0.0  ;;  %v11321_v50 = vld [vmem:[#allocation9_spill] sm:$0xff] }
 0x4ff   :  { %v3706_v3 = vadd.f32 %v8467_v61, %v3223_v41  ;;  %v4970_v40 = vrot.slane %v3961_v12, %v8524_v47  ;;  %vm2518_vm12 = vcmp.ge.f32.partialorder %v11311_v39, %v9815_v19  ;;  %vm2504_vm13 = vcmp.ge.f32.partialorder %v11314_v54, %v9815_v19  ;;  %v11316_v41 = vld [vmem:[#allocation160_spill] sm:$0xff]  ;;  %v11323_v21 = vld [vmem:[#allocation69_spill] sm:$0xff] }
 0x500   :  { %v3962_v34 = vmul.f32 %v8426_v57, %v3705_v59  ;;  %3429 = vadd.xlane.f32.xlu0 %v3428_v27  ;;  %v4966_v49 = vsel %vm4344_vm2, %v4965_v18, %v4961_v43  ;;  %v3467_v27 = vsel %vm2794_vm6, %v2762_v10, 0.0  ;;  %v2780_v31 = vsel %vm2518_vm12, %v9841_v4, 0.0 }
 0x501   :  { %3432 = vadd.xlane.f32.xlu1 %v3431_v37  ;;  %v3226_v35 = vpop.xlane.xlu0 %3225  ;;  %v3963_v56 = vmul.f32 %v8426_v57, %v3706_v3  ;;  %v11306_v37 = vld [vmem:[#allocation65_spill] sm:$0xff]  ;;  %vm2491_vm11 = vcmp.ge.f32.partialorder %v11316_v41, %v9815_v19  ;;  %v2752_v12 = vsel %vm2490_vm0, %v9841_v4, 0.0  ;;  %v11318_v3 = vld [vmem:[#allocation66_spill] sm:$0xff]  ;;  %v3521_v30 = vsel %vm2794_vm6, %v2780_v31, 0.0  ;;  %v11324_v31 = vld [vmem:[#allocation8_spill] sm:$0xff] }
 0x502   :  { %v4974_v55 = vrot.slane %v3962_v34, %v8531_v38  ;;  %v3707_v29 = vadd.f32 %v8467_v61, %v3226_v35  ;;  %v9872_v48 = vpop.xlane.xlu1 %3228  ;;  %vm2503_vm1 = vcmp.ge.f32.partialorder %v11306_v37, %v9815_v19  ;;  %vm2506_vm10 = vcmp.ge.f32.partialorder %v11318_v3, %v9815_v19  ;;  %v11319_v34 = vld [vmem:[#allocation76_spill] sm:$0xff] }
 0x503   :  { %v4979_v44 = vrot.slane %v3963_v56, %v8524_v47  ;;  %v2765_v9 = vsel %vm2503_vm1, %v9841_v4, 0.0  ;;  %vm2519_vm1 = vcmp.ge.f32.partialorder %v11315_v0, %v9815_v19  ;;  %v2766_v18 = vsel %vm2504_vm13, %v9841_v4, 0.0 }
 0x504   :  { %v3964_v53 = vmul.f32 %v8426_v57, %v3707_v29  ;;  %3435 = vadd.xlane.f32.xlu0 %v3434_v1  ;;  %v4975_v13 = vsel %vm4344_vm2, %v4974_v55, %v4970_v40  ;;  %v5555_v1 = vsel %vm5495_vm8, %v4957_v33, %v5554_v32  ;;  %v3476_v24 = vsel %vm2794_vm6, %v2765_v9, 0.0 }
 0x505   :  { %3468 = vadd.xlane.f32.xlu1 %v3467_v27  ;;  %v3232_v6 = vpop.xlane.xlu0 %3231  ;;  %v5556_v45 = vsel %vm5497_vm9, %v4966_v49, %v5555_v1  ;;  %v2781_v14 = vsel %vm2519_vm1, %v9841_v4, 0.0  ;;  %vm2520_vm12 = vcmp.ge.f32.partialorder %v11320_v62, %v9815_v19  ;;  %v3437_v35 = vsel %vm2794_vm6, %v2752_v12, 0.0 }
 0x506   :  { %v4983_v20 = vrot.slane %v3964_v53, %v8531_v38  ;;  %v3235_v46 = vpop.xlane.xlu1 %3234  ;;  %v5557_v58 = vsel %vm11308_vm4, %v4975_v13, %v5556_v45  ;;  %vm2505_vm4 = vcmp.ge.f32.partialorder %v11317_v60, %v9815_v19  ;;  %v2753_v43 = vsel %vm2491_vm11, %v9841_v4, 0.0 }
 0x507   :  { %v3524_v55 = vsel %vm2794_vm6, %v2781_v14, 0.0  ;;  %v3479_v56 = vsel %vm2794_vm6, %v2766_v18, 0.0  ;;  %v2767_v29 = vsel %vm2505_vm4, %v9841_v4, 0.0  ;;  %v2768_v36 = vsel %vm2506_vm10, %v9841_v4, 0.0 }
 0x508   :  { %v4984_v11 = vsel %vm4344_vm2, %v4983_v20, %v4979_v44  ;;  %3471 = vadd.xlane.f32.xlu0 %v3470_v8  ;;  %v3708_v33 = vadd.f32 %v8467_v61, %v9872_v48  ;;  %v2782_v63 = vsel %vm2520_vm12, %v9841_v4, 0.0  ;;  %v3709_v49 = vadd.f32 %v8467_v61, %v3232_v6 }
 0x509   :  { %v5558_v25 = vsel %vm11310_vm15, %v4984_v11, %v5557_v58  ;;  %3474 = vadd.xlane.f32.xlu1 %v3473_v17  ;;  %v3238_v51 = vpop.xlane.xlu0 %3237  ;;  %vm2507_vm15 = vcmp.ge.f32.partialorder %v11319_v34, %v9815_v19  ;;  %v3710_v32 = vadd.f32 %v8467_v61, %v3235_v46  ;;  %v3482_v52 = vsel %vm2794_vm6, %v2767_v29, 0.0 }
 0x50a   :  { %5633 = vst.msk [vmem:[%s10638_s6 + $0x40] sm:$0xff] %vm11312_vm14, %v5558_v25  ;;  %v3241_v10 = vpop.xlane.xlu1 %3240  ;;  %vm2521_vm14 = vcmp.ge.f32.partialorder %v11321_v50, %v9815_v19  ;;  %v3711_v40 = vadd.f32 %v8467_v61, %v3238_v51  ;;  %v2769_v5 = vsel %vm2507_vm15, %v9841_v4, 0.0  ;;  %v3440_v6 = vsel %vm2794_vm6, %v2753_v43, 0.0 }
 0x50b   :  { %v2783_v48 = vsel %vm2521_vm14, %v9841_v4, 0.0  ;;  %v3712_v13 = vadd.f32 %v8467_v61, %v3241_v10  ;;  %v3485_v20 = vsel %vm2794_vm6, %v2768_v36, 0.0  ;;  %v9985_v45 = vsel %vm2794_vm6, %v2769_v5, 0.0 }
 0x50c   :  { %3477 = vadd.xlane.f32.xlu0 %v3476_v24  ;;  %v3965_v8 = vmul.f32 %v8426_v57, %v3708_v33  ;;  %v3968_v46 = vmul.f32 %v8426_v57, %v3711_v40  ;;  %v3527_v58 = vsel %vm2794_vm6, %v2782_v63, 0.0  ;;  %v3530_v11 = vsel %vm2794_vm6, %v2783_v48, 0.0 }
 0x50d   :  { %3516 = vadd.xlane.f32.xlu1 %v3515_v23  ;;  %v3244_v22 = vpop.xlane.xlu0 %3243  ;;  %v3966_v17 = vmul.f32 %v8426_v57, %v3709_v49  ;;  %vm2492_vm0 = vcmp.ge.f32.partialorder %v11322_v7, %v9815_v19  ;;  %v3967_v39 = vmul.f32 %v8426_v57, %v3710_v32  ;;  %v3969_v10 = vmul.f32 %v8426_v57, %v3712_v13 }
 0x50e   :  { %v3247_v59 = vpop.xlane.xlu1 %3246  ;;  %v3713_v53 = vadd.f32 %v8467_v61, %v3244_v22  ;;  %vm2523_vm13 = vcmp.ge.f32.partialorder %v11323_v21, %v9815_v19  ;;  %vm2522_vm1 = vcmp.ge.f32.partialorder %v11324_v31, %v9815_v19  ;;  %v5001_v41 = vrot.slane %v3968_v46, %v8531_v38 }
 0x50f   :  { %v3714_v1 = vadd.f32 %v8467_v61, %v3247_v59  ;;  %v4988_v59 = vrot.slane %v3965_v8, %v8524_v47  ;;  %v4997_v18 = vrot.slane %v3967_v39, %v8524_v47  ;;  %v5006_v34 = vrot.slane %v3969_v10, %v8524_v47 }
 0x510   :  { %3519 = vadd.xlane.f32.xlu0 %v3518_v42  ;;  %v3970_v9 = vmul.f32 %v8426_v57, %v3713_v53  ;;  %v4992_v42 = vrot.slane %v3966_v17, %v8531_v38  ;;  %v2784_v33 = vsel %vm2522_vm1, %v9841_v4, 0.0  ;;  %vm11327_vm10 = vcmask 1046534  }
 0x511   :  { %3522 = vadd.xlane.f32.xlu1 %v3521_v30  ;;  %v3250_v28 = vpop.xlane.xlu0 %3249  ;;  %v3971_v54 = vmul.f32 %v8426_v57, %v3714_v1  ;;  %v2785_v1 = vsel %vm2523_vm13, %v9841_v4, 0.0  ;;  %v3533_v46 = vsel %vm2794_vm6, %v2784_v33, 0.0  ;;  %vm11329_vm12 = vcmask 1047559  }
 0x512   :  { %v3253_v16 = vpop.xlane.xlu1 %3252  ;;  %v3715_v27 = vadd.f32 %v8467_v61, %v3250_v28  ;;  %v5010_v12 = vrot.slane %v3970_v9, %v8531_v38  ;;  %v4993_v40 = vsel %vm4344_vm2, %v4992_v42, %v4988_v59  ;;  %v11332_v42 = vld [vmem:[#allocation163_spill] sm:$0xff] }
 0x513   :  { %v3716_v25 = vadd.f32 %v8467_v61, %v3253_v16  ;;  %v5015_v16 = vrot.slane %v3971_v54, %v8524_v47  ;;  %vm2494_vm13 = vcmp.ge.f32.partialorder %v11332_v42, %v9815_v19 }
 0x514   :  { %3525 = vadd.xlane.f32.xlu0 %v3524_v55  ;;  %v3972_v26 = vmul.f32 %v8426_v57, %v3715_v27  ;;  %v5011_v63 = vsel %vm4344_vm2, %v5010_v12, %v5006_v34  ;;  %v11335_v34 = vld [vmem:[#allocation70_spill] sm:$0xff] }
 0x515   :  { %3480 = vadd.xlane.f32.xlu1 %v3479_v56  ;;  %v3256_v37 = vpop.xlane.xlu0 %3255  ;;  %v3973_v30 = vmul.f32 %v8426_v57, %v3716_v25  ;;  %v11326_v25 = vld [vmem:[#allocation171_spill] sm:$0xff] }
 0x516   :  { %v3259_v2 = vpop.xlane.xlu1 %3258  ;;  %v3717_v44 = vadd.f32 %v8467_v61, %v3256_v37  ;;  %v5019_v3 = vrot.slane %v3972_v26, %v8531_v38  ;;  %v2754_v26 = vsel %vm2492_vm0, %v9841_v4, 0.0  ;;  %vm2508_vm4 = vcmp.ge.f32.partialorder %v11326_v25, %v9815_v19 }
 0x517   :  { %v3718_v24 = vadd.f32 %v8467_v61, %v3259_v2  ;;  %v5024_v49 = vrot.slane %v3973_v30, %v8524_v47  ;;  %v3443_v7 = vsel %vm2794_vm6, %v2754_v26, 0.0  ;;  %v2770_v59 = vsel %vm2508_vm4, %v9841_v4, 0.0  ;;  %v11334_v30 = vld [vmem:[#allocation165_spill] sm:$0xff] }
 0x518   :  { %3483 = vadd.xlane.f32.xlu0 %v3482_v52  ;;  %v3974_v0 = vmul.f32 %v8426_v57, %v3717_v44  ;;  %v5020_v5 = vsel %vm4344_vm2, %v5019_v3, %v5015_v16  ;;  %vm11331_vm0 = vcmask 130048   ;;  %v11333_v3 = vld [vmem:[#allocation164_spill] sm:$0xff]  ;;  %vm2525_vm4 = vcmp.ge.f32.partialorder %v11335_v34, %v9815_v19 }
 0x519   :  { %3528 = vadd.xlane.f32.xlu1 %v3527_v58  ;;  %v3262_v51 = vpop.xlane.xlu0 %3261  ;;  %v3975_v62 = vmul.f32 %v8426_v57, %v3718_v24  ;;  %v11325_v58 = vld [vmem:[#allocation162_spill] sm:$0xff]  ;;  %vm2495_vm1 = vcmp.ge.f32.partialorder %v11333_v3, %v9815_v19  ;;  %v2756_v16 = vsel %vm2494_vm13, %v9841_v4, 0.0 }
 0x51a   :  { %v3719_v15 = vadd.f32 %v8467_v61, %v3262_v51  ;;  %v3265_v23 = vpop.xlane.xlu1 %3264  ;;  %v5028_v43 = vrot.slane %v3974_v0, %v8531_v38  ;;  %vm2493_vm11 = vcmp.ge.f32.partialorder %v11325_v58, %v9815_v19  ;;  %v11328_v0 = vld [vmem:[#allocation14_spill] sm:$0xff] }
 0x51b   :  { %v3720_v22 = vadd.f32 %v8467_v61, %v3265_v23  ;;  %v5033_v27 = vrot.slane %v3975_v62, %v8524_v47  ;;  %v2755_v54 = vsel %vm2493_vm11, %v9841_v4, 0.0  ;;  %vm2509_vm15 = vcmp.ge.f32.partialorder %v11328_v0, %v9815_v19 }
 0x51c   :  { %v3976_v60 = vmul.f32 %v8426_v57, %v3719_v15  ;;  %3531 = vadd.xlane.f32.xlu0 %v3530_v11  ;;  %v5029_v52 = vsel %vm4344_vm2, %v5028_v43, %v5024_v49  ;;  %v3536_v15 = vsel %vm2794_vm6, %v2785_v1, 0.0  ;;  %v3446_v12 = vsel %vm2794_vm6, %v2755_v54, 0.0  ;;  %v11336_v43 = vld [vmem:[#allocation166_spill] sm:$0xff] }
 0x51d   :  { %3438 = vadd.xlane.f32.xlu1 %v3437_v35  ;;  %v3268_v14 = vpop.xlane.xlu0 %3267  ;;  %v3977_v55 = vmul.f32 %v8426_v57, %v3720_v22  ;;  %v5002_v35 = vsel %vm4344_vm2, %v5001_v41, %v4997_v18  ;;  %v11330_v41 = vld [vmem:[#allocation68_spill] sm:$0xff]  ;;  %vm2496_vm11 = vcmp.ge.f32.partialorder %v11334_v30, %v9815_v19  ;;  %v2771_v18 = vsel %vm2509_vm15, %v9841_v4, 0.0 }
 0x51e   :  { %v3721_v28 = vadd.f32 %v8467_v61, %v3268_v14  ;;  %v3271_v50 = vpop.xlane.xlu1 %3270  ;;  %v5037_v29 = vrot.slane %v3976_v60, %v8531_v38  ;;  %v5559_v2 = vsel %vm5489_vm3, %v5002_v35, %v4993_v40  ;;  %vm2524_vm14 = vcmp.ge.f32.partialorder %v11330_v41, %v9815_v19 }
 0x51f   :  { %v3722_v56 = vadd.f32 %v8467_v61, %v3271_v50  ;;  %v5560_v44 = vsel %vm5491_vm5, %v5011_v63, %v5559_v2  ;;  %v3491_v14 = vsel %vm2794_vm6, %v2770_v59, 0.0  ;;  %v2758_v35 = vsel %vm2496_vm11, %v9841_v4, 0.0 }
 0x520   :  { %v3978_v36 = vmul.f32 %v8426_v57, %v3721_v28  ;;  %3441 = vadd.xlane.f32.xlu0 %v3440_v6  ;;  %v5042_v6 = vrot.slane %v3977_v55, %v8524_v47  ;;  %v5561_v11 = vsel %vm5493_vm7, %v5020_v5, %v5560_v44  ;;  %v2786_v28 = vsel %vm2524_vm14, %v9841_v4, 0.0 }
 0x521   :  { %3486 = vadd.xlane.f32.xlu1 %v3485_v20  ;;  %v3274_v53 = vpop.xlane.xlu0 %3273  ;;  %v3979_v48 = vmul.f32 %v8426_v57, %v3722_v56  ;;  %v5038_v20 = vsel %vm4344_vm2, %v5037_v29, %v5033_v27  ;;  %v3494_v55 = vsel %vm2794_vm6, %v2771_v18, 0.0  ;;  %v2757_v56 = vsel %vm2495_vm1, %v9841_v4, 0.0  ;;  %v11337_v29 = vld [vmem:[#allocation77_spill] sm:$0xff] }
 0x522   :  { %v5046_v37 = vrot.slane %v3978_v36, %v8531_v38  ;;  %v3723_v32 = vadd.f32 %v8467_v61, %v3274_v53  ;;  %v10038_v13 = vpop.xlane.xlu1 %3276  ;;  %vm2511_vm15 = vcmp.ge.f32.partialorder %v11337_v29, %v9815_v19  ;;  %v11338_v36 = vld [vmem:[#allocation78_spill] sm:$0xff]  ;;  %v3539_v33 = vsel %vm2794_vm6, %v2786_v28, 0.0 }
 0x523   :  { %v5051_v51 = vrot.slane %v3979_v48, %v8524_v47  ;;  %v2787_v40 = vsel %vm2525_vm4, %v9841_v4, 0.0  ;;  %v3449_v49 = vsel %vm2794_vm6, %v2756_v16, 0.0  ;;  %v3452_v53 = vsel %vm2794_vm6, %v2757_v56, 0.0 }
 0x524   :  { %v3980_v8 = vmul.f32 %v8426_v57, %v3723_v32  ;;  %3489 = vadd.xlane.f32.xlu0 %v9985_v45  ;;  %v5047_v17 = vsel %vm4344_vm2, %v5046_v37, %v5042_v6  ;;  %v5562_v45 = vsel %vm5495_vm8, %v5029_v52, %v5561_v11  ;;  %v3542_v37 = vsel %vm2794_vm6, %v2787_v40, 0.0  ;;  %v11339_v52 = vld [vmem:[#allocation79_spill] sm:$0xff] }
 0x525   :  { %3534 = vadd.xlane.f32.xlu1 %v3533_v46  ;;  %v3280_v9 = vpop.xlane.xlu0 %3279  ;;  %v5563_v24 = vsel %vm5497_vm9, %v5038_v20, %v5562_v45  ;;  %v2773_v32 = vsel %vm2511_vm15, %v9841_v4, 0.0  ;;  %v10118_v2 = vsel %vm2794_vm6, %v2758_v35, 0.0  ;;  %vm2512_vm14 = vcmp.ge.f32.partialorder %v11339_v52, %v9815_v19  ;;  %v11340_v6 = vld [vmem:[#allocation71_spill] sm:$0xff]  ;;  %v11341_v20 = vld [vmem:[#allocation10_spill] sm:$0xff] }
 0x526   :  { %v5055_v39 = vrot.slane %v3980_v8, %v8531_v38  ;;  %v3283_v10 = vpop.xlane.xlu1 %3282  ;;  %v5564_v23 = vsel %vm11327_vm10, %v5047_v17, %v5563_v24  ;;  %vm2497_vm10 = vcmp.ge.f32.partialorder %v11336_v43, %v9815_v19  ;;  %v3724_v1 = vadd.f32 %v8467_v61, %v10038_v13 }
 0x527   :  { %v2759_v27 = vsel %vm2497_vm10, %v9841_v4, 0.0  ;;  %vm2526_vm13 = vcmp.ge.f32.partialorder %v11341_v20, %v9815_v19  ;;  %v3725_v8 = vadd.f32 %v8467_v61, %v3280_v9  ;;  %v3726_v17 = vadd.f32 %v8467_v61, %v3283_v10  ;;  %v11342_v10 = vld [vmem:[#allocation15_spill] sm:$0xff] }
 0x528   :  { %v5056_v21 = vsel %vm4344_vm2, %v5055_v39, %v5051_v51  ;;  %3537 = vadd.xlane.f32.xlu0 %v3536_v15  ;;  %v10136_v45 = vsel %vm2794_vm6, %v2759_v27, 0.0  ;;  %v3500_v39 = vsel %vm2794_vm6, %v2773_v32, 0.0  ;;  %v10145_v24 = vsel %vm2512_vm14, %v9841_v4, 0.0 }
 0x529   :  { %v5565_v22 = vsel %vm11329_vm12, %v5056_v21, %v5564_v23  ;;  %3444 = vadd.xlane.f32.xlu1 %v3443_v7  ;;  %v3286_v31 = vpop.xlane.xlu0 %3285  ;;  %vm2510_vm12 = vcmp.ge.f32.partialorder %v11338_v36, %v9815_v19  ;;  %vm2513_vm1 = vcmp.ge.f32.partialorder %v11342_v10, %v9815_v19  ;;  %v3981_v15 = vmul.f32 %v8426_v57, %v3724_v1 }
 0x52a   :  { %5634 = vst.msk [vmem:[%s10638_s6 + $0x48] sm:$0xff] %vm11331_vm0, %v5565_v22  ;;  %v3289_v60 = vpop.xlane.xlu1 %3288  ;;  %v2772_v48 = vsel %vm2510_vm12, %v9841_v4, 0.0  ;;  %vm2527_vm0 = vcmp.ge.f32.partialorder %v11340_v6, %v9815_v19  ;;  %v3727_v44 = vadd.f32 %v8467_v61, %v3286_v31  ;;  %v2788_v21 = vsel %vm2526_vm13, %v9841_v4, 0.0 }
 0x52b   :  { %v3728_v26 = vadd.f32 %v8467_v61, %v3289_v60  ;;  %v3497_v13 = vsel %vm2794_vm6, %v2772_v48, 0.0  ;;  %v2789_v7 = vsel %vm2527_vm0, %v9841_v4, 0.0  ;;  %v3982_v54 = vmul.f32 %v8426_v57, %v3725_v8  ;;  %v11343_v48 = vld [vmem:[#allocation11_spill] sm:$0xff] }
 0x52c   :  { %3447 = vadd.xlane.f32.xlu0 %v3446_v12  ;;  %v3984_v23 = vmul.f32 %v8426_v57, %v3727_v44  ;;  %v3983_v41 = vmul.f32 %v8426_v57, %v3726_v17  ;;  %v3545_v34 = vsel %vm2794_vm6, %v2788_v21, 0.0  ;;  %v3548_v16 = vsel %vm2794_vm6, %v2789_v7, 0.0  ;;  %v11344_v7 = vld [vmem:[#allocation72_spill] sm:$0xff] }
 0x52d   :  { %3492 = vadd.xlane.f32.xlu1 %v3491_v14  ;;  %v3292_v62 = vpop.xlane.xlu0 %3291  ;;  %v3985_v60 = vmul.f32 %v8426_v57, %v3728_v26  ;;  %v5064_v43 = vrot.slane %v3982_v54, %v8531_v38  ;;  %vm2528_vm11 = vcmp.ge.f32.partialorder %v11343_v48, %v9815_v19  ;;  %v3503_v21 = vsel %vm2794_vm6, %v10145_v24, 0.0 }
 0x52e   :  { %v3295_v50 = vpop.xlane.xlu1 %3294  ;;  %v3729_v46 = vadd.f32 %v8467_v61, %v3292_v62  ;;  %v5060_v62 = vrot.slane %v3981_v15, %v8524_v47  ;;  %v5073_v28 = vrot.slane %v3984_v23, %v8531_v38  ;;  %v5069_v36 = vrot.slane %v3983_v41, %v8524_v47 }
 0x52f   :  { %v3730_v51 = vadd.f32 %v8467_v61, %v3295_v50  ;;  %vm2529_vm4 = vcmp.ge.f32.partialorder %v11344_v7, %v9815_v19  ;;  %vm11346_vm15 = vcmask 1046534   ;;  %vm11348_vm14 = vcmask 1047559  }
 0x530   :  { %3495 = vadd.xlane.f32.xlu0 %v3494_v55  ;;  %v3986_v0 = vmul.f32 %v8426_v57, %v3729_v46  ;;  %v5074_v32 = vsel %vm4344_vm2, %v5073_v28, %v5069_v36  ;;  %v5065_v1 = vsel %vm4344_vm2, %v5064_v43, %v5060_v62  ;;  %vm11350_vm13 = vcmask 130048  }
 0x531   :  { %3540 = vadd.xlane.f32.xlu1 %v3539_v33  ;;  %v3298_v63 = vpop.xlane.xlu0 %3297  ;;  %v3987_v30 = vmul.f32 %v8426_v57, %v3730_v51  ;;  %v5078_v33 = vrot.slane %v3985_v60, %v8524_v47 }
 0x532   :  { %v3301_v5 = vpop.xlane.xlu1 %3300  ;;  %v3731_v58 = vadd.f32 %v8467_v61, %v3298_v63  ;;  %v5082_v55 = vrot.slane %v3986_v0, %v8531_v38 }
 0x533   :  { %v3732_v31 = vadd.f32 %v8467_v61, %v3301_v5 }
 0x534   :  { %3543 = vadd.xlane.f32.xlu0 %v3542_v37  ;;  %v3988_v22 = vmul.f32 %v8426_v57, %v3731_v58  ;;  %v5083_v44 = vsel %vm4344_vm2, %v5082_v55, %v5078_v33  ;;  %v11352_v33 = vld [vmem:[#allocation12_spill] sm:$0xff] }
 0x535   :  { %3450 = vadd.xlane.f32.xlu1 %v3449_v49  ;;  %v3304_v11 = vpop.xlane.xlu0 %3303  ;;  %v3989_v35 = vmul.f32 %v8426_v57, %v3732_v31  ;;  %v5087_v49 = vrot.slane %v3987_v30, %v8524_v47  ;;  %v11345_v31 = vld [vmem:[#allocation167_spill] sm:$0xff] }
 0x536   :  { %v3307_v25 = vpop.xlane.xlu1 %3306  ;;  %v3733_v9 = vadd.f32 %v8467_v61, %v3304_v11  ;;  %v5091_v56 = vrot.slane %v3988_v22, %v8531_v38  ;;  %v2790_v22 = vsel %vm2528_vm11, %v9841_v4, 0.0  ;;  %vm2498_vm10 = vcmp.ge.f32.partialorder %v11345_v31, %v9815_v19 }
 0x537   :  { %v3734_v42 = vadd.f32 %v8467_v61, %v3307_v25  ;;  %v5096_v8 = vrot.slane %v3989_v35, %v8524_v47  ;;  %v3551_v30 = vsel %vm2794_vm6, %v2790_v22, 0.0  ;;  %v2760_v28 = vsel %vm2498_vm10, %v9841_v4, 0.0  ;;  %v11351_v35 = vld [vmem:[#allocation16_spill] sm:$0xff]  ;;  %vm11355_vm10 = vmmov %vm11348_vm14 }
 0x538   :  { %3453 = vadd.xlane.f32.xlu0 %v3452_v53  ;;  %v3990_v14 = vmul.f32 %v8426_v57, %v3733_v9  ;;  %v5092_v20 = vsel %vm4344_vm2, %v5091_v56, %v5087_v49  ;;  %v3461_v55 = vsel %vm2794_vm6, %v2760_v28, 0.0  ;;  %vm2530_vm11 = vcmp.ge.f32.partialorder %v11352_v33, %v9815_v19 }
 0x539   :  { %3498 = vadd.xlane.f32.xlu1 %v3497_v13  ;;  %v3310_v59 = vpop.xlane.xlu0 %3309  ;;  %v3991_v40 = vmul.f32 %v8426_v57, %v3734_v42  ;;  %v5566_v13 = vsel %vm5489_vm3, %v5074_v32, %v5065_v1 }
 0x53a   :  { %v3735_v12 = vadd.f32 %v8467_v61, %v3310_v59  ;;  %v3313_v3 = vpop.xlane.xlu1 %3312  ;;  %v5100_v53 = vrot.slane %v3990_v14, %v8531_v38  ;;  %v2791_v14 = vsel %vm2529_vm4, %v9841_v4, 0.0 }
 0x53b   :  { %v3736_v18 = vadd.f32 %v8467_v61, %v3313_v3  ;;  %v5105_v58 = vrot.slane %v3991_v40, %v8524_v47  ;;  %v3554_v43 = vsel %vm2794_vm6, %v2791_v14, 0.0 }
 0x53c   :  { %v3992_v50 = vmul.f32 %v8426_v57, %v3735_v12  ;;  %3501 = vadd.xlane.f32.xlu0 %v3500_v39  ;;  %v5101_v51 = vsel %vm4344_vm2, %v5100_v53, %v5096_v8  ;;  %v5567_v39 = vsel %vm5491_vm5, %v5083_v44, %v5566_v13  ;;  %v11353_v53 = vld [vmem:[#allocation74_spill] sm:$0xff] }
 0x53d   :  { %3546 = vadd.xlane.f32.xlu1 %v3545_v34  ;;  %v3316_v29 = vpop.xlane.xlu0 %3315  ;;  %v3993_v27 = vmul.f32 %v8426_v57, %v3736_v18  ;;  %v5568_v54 = vsel %vm5493_vm7, %v5092_v20, %v5567_v39  ;;  %v11347_v18 = vld [vmem:[#allocation168_spill] sm:$0xff]  ;;  %vm2531_vm4 = vcmp.ge.f32.partialorder %v11353_v53, %v9815_v19 }
 0x53e   :  { %v3737_v63 = vadd.f32 %v8467_v61, %v3316_v29  ;;  %v3319_v5 = vpop.xlane.xlu1 %3318  ;;  %v5109_v52 = vrot.slane %v3992_v50, %v8531_v38  ;;  %vm2499_vm12 = vcmp.ge.f32.partialorder %v11347_v18, %v9815_v19  ;;  %v11349_v50 = vld [vmem:[#allocation80_spill] sm:$0xff]  ;;  %v2793_v44 = vsel %vm2531_vm4, %v9841_v4, 0.0 }
 0x53f   :  { %v3738_v37 = vadd.f32 %v8467_v61, %v3319_v5  ;;  %v5114_v9 = vrot.slane %v3993_v27, %v8524_v47  ;;  %vm2514_vm0 = vcmp.ge.f32.partialorder %v11349_v50, %v9815_v19  ;;  %v2761_v56 = vsel %vm2499_vm12, %v9841_v4, 0.0 }
 0x540   :  { %v3994_v6 = vmul.f32 %v8426_v57, %v3737_v63  ;;  %3549 = vadd.xlane.f32.xlu0 %v3548_v16  ;;  %v5110_v15 = vsel %vm4344_vm2, %v5109_v52, %v5105_v58  ;;  %v2776_v36 = vsel %vm2514_vm0, %v9841_v4, 0.0  ;;  %v3464_v63 = vsel %vm2794_vm6, %v2761_v56, 0.0  ;;  %vm11359_vm0 = vmmov %vm11350_vm13 }
 0x541   :  { %3456 = vadd.xlane.f32.xlu1 %v10118_v2  ;;  %v3322_v46 = vpop.xlane.xlu0 %3321  ;;  %v3995_v17 = vmul.f32 %v8426_v57, %v3738_v37  ;;  %v2775_v2 = vsel %vm2513_vm1, %v9841_v4, 0.0  ;;  %vm2515_vm1 = vcmp.ge.f32.partialorder %v11351_v35, %v9815_v19  ;;  %v3509_v5 = vsel %vm2794_vm6, %v2776_v36, 0.0  ;;  %vm11365_vm4 = vmmov %vm11359_vm0 }
 0x542   :  { %v5118_v11 = vrot.slane %v3994_v6, %v8531_v38  ;;  %v3739_v26 = vadd.f32 %v8467_v61, %v3322_v46  ;;  %v3325_v25 = vpop.xlane.xlu1 %3324  ;;  %v3506_v42 = vsel %vm2794_vm6, %v2775_v2, 0.0  ;;  %v2777_v49 = vsel %vm2515_vm1, %v9841_v4, 0.0  ;;  %vm11362_vm1 = vmmov %vm11359_vm0 }
 0x543   :  { %v5123_v24 = vrot.slane %v3995_v17, %v8524_v47  ;;  %v2792_v37 = vsel %vm2530_vm11, %v9841_v4, 0.0  ;;  %v3512_v32 = vsel %vm2794_vm6, %v2777_v49, 0.0  ;;  %v3740_v52 = vadd.f32 %v8467_v61, %v3325_v25 }
 0x544   :  { %v3996_v23 = vmul.f32 %v8426_v57, %v3739_v26  ;;  %3459 = vadd.xlane.f32.xlu0 %v10136_v45  ;;  %v5119_v0 = vsel %vm4344_vm2, %v5118_v11, %v5114_v9  ;;  %v5569_v45 = vsel %vm5495_vm8, %v5101_v51, %v5568_v54  ;;  %v3557_v1 = vsel %vm2794_vm6, %v2792_v37, 0.0 }
 0x545   :  { %3504 = vadd.xlane.f32.xlu1 %v3503_v21  ;;  %v3328_v10 = vpop.xlane.xlu0 %3327  ;;  %v5570_v60 = vsel %vm5497_vm9, %v5110_v15, %v5569_v45  ;;  %v3560_v13 = vsel %vm2794_vm6, %v2793_v44, 0.0  ;;  %v3997_v4 = vmul.f32 %v8426_v57, %v3740_v52  ;;  %vm11354_vm6 = vmmov %vm11346_vm15 }
 0x546   :  { %v5127_v59 = vrot.slane %v3996_v23, %v8531_v38  ;;  %v3331_v41 = vpop.xlane.xlu1 %3330  ;;  %v5571_v12 = vsel %vm11346_vm15, %v5119_v0, %v5570_v60  ;;  %v3741_v20 = vadd.f32 %v8467_v61, %v3328_v10  ;;  %vm11356_vm15 = vmmov %vm11350_vm13 }
 0x547   :  { %v3742_v58 = vadd.f32 %v8467_v61, %v3331_v41  ;;  %vm11357_vm12 = vmmov %vm11354_vm6 }
 0x548   :  { %v5128_v3 = vsel %vm4344_vm2, %v5127_v59, %v5123_v24  ;;  %3507 = vadd.xlane.f32.xlu0 %v3506_v42  ;;  %v3998_v9 = vmul.f32 %v8426_v57, %v3741_v20  ;;  %v5132_v24 = vrot.slane %v3997_v4, %v8524_v47 }
 0x549   :  { %v5572_v34 = vsel %vm11348_vm14, %v5128_v3, %v5571_v12  ;;  %3552 = vadd.xlane.f32.xlu1 %v3551_v30  ;;  %v3334_v62 = vpop.xlane.xlu0 %3333  ;;  %v3999_v21 = vmul.f32 %v8426_v57, %v3742_v58  ;;  %vm11358_vm14 = vmmov %vm11355_vm10 }
 0x54a   :  { %5635 = vst.msk [vmem:[%s10638_s6 + $0x50] sm:$0xff] %vm11350_vm13, %v5572_v34  ;;  %v3337_v16 = vpop.xlane.xlu1 %3336  ;;  %v3743_v6 = vadd.f32 %v8467_v61, %v3334_v62  ;;  %v5136_v60 = vrot.slane %v3998_v9, %v8531_v38  ;;  %vm11361_vm13 = vmmov %vm11355_vm10 }
 0x54b   :  { %v3744_v11 = vadd.f32 %v8467_v61, %v3337_v16  ;;  %v5141_v14 = vrot.slane %v3999_v21, %v8524_v47 }
 0x54c   :  { %3555 = vadd.xlane.f32.xlu0 %v3554_v43  ;;  %v4000_v51 = vmul.f32 %v8426_v57, %v3743_v6  ;;  %v5137_v36 = vsel %vm4344_vm2, %v5136_v60, %v5132_v24 }
 0x54d   :  { %3462 = vadd.xlane.f32.xlu1 %v3461_v55  ;;  %v3340_v29 = vpop.xlane.xlu0 %3339  ;;  %v4001_v7 = vmul.f32 %v8426_v57, %v3744_v11 }
 0x54e   :  { %v3343_v40 = vpop.xlane.xlu1 %3342  ;;  %v3745_v19 = vadd.f32 %v8467_v61, %v3340_v29  ;;  %v5145_v59 = vrot.slane %v4000_v51, %v8531_v38 }
 0x54f   :  { %v3746_v26 = vadd.f32 %v8467_v61, %v3343_v40  ;;  %v5150_v18 = vrot.slane %v4001_v7, %v8524_v47 }
 0x550   :  { %3465 = vadd.xlane.f32.xlu0 %v3464_v63  ;;  %v4002_v2 = vmul.f32 %v8426_v57, %v3745_v19  ;;  %v5146_v56 = vsel %vm4344_vm2, %v5145_v59, %v5141_v14 }
 0x551   :  { %3510 = vadd.xlane.f32.xlu1 %v3509_v5  ;;  %v3346_v27 = vpop.xlane.xlu0 %3345  ;;  %v4003_v22 = vmul.f32 %v8426_v57, %v3746_v26 }
 0x552   :  { %v3349_v48 = vpop.xlane.xlu1 %3348  ;;  %v3747_v8 = vadd.f32 %v8467_v61, %v3346_v27  ;;  %v5154_v42 = vrot.slane %v4002_v2, %v8531_v38 }
 0x553   :  { %v3748_v15 = vadd.f32 %v8467_v61, %v3349_v48  ;;  %v5159_v50 = vrot.slane %v4003_v22, %v8524_v47 }
 0x554   :  { %3513 = vadd.xlane.f32.xlu0 %v3512_v32  ;;  %v4004_v39 = vmul.f32 %v8426_v57, %v3747_v8  ;;  %v5155_v33 = vsel %vm4344_vm2, %v5154_v42, %v5150_v18  ;;  %v5573_v32 = vsel %vm5489_vm3, %v5146_v56, %v5137_v36 }
 0x555   :  { %3558 = vadd.xlane.f32.xlu1 %v3557_v1  ;;  %v3352_v46 = vpop.xlane.xlu0 %3351  ;;  %v4005_v3 = vmul.f32 %v8426_v57, %v3748_v15  ;;  %v5574_v1 = vsel %vm5491_vm5, %v5155_v33, %v5573_v32 }
 0x556   :  { %v3355_v17 = vpop.xlane.xlu1 %3354  ;;  %v3749_v25 = vadd.f32 %v8467_v61, %v3352_v46  ;;  %v5163_v12 = vrot.slane %v4004_v39, %v8531_v38 }
 0x557   :  { %v3750_v54 = vadd.f32 %v8467_v61, %v3355_v17  ;;  %v5168_v63 = vrot.slane %v4005_v3, %v8524_v47 }
 0x558   :  { %3561 = vadd.xlane.f32.xlu0 %v3560_v13  ;;  %v4006_v31 = vmul.f32 %v8426_v57, %v3749_v25  ;;  %v5164_v40 = vsel %vm4344_vm2, %v5163_v12, %v5159_v50 }
 0x559   :  { %v3358_v23 = vpop.xlane.xlu0 %3357  ;;  %v4007_v34 = vmul.f32 %v8426_v57, %v3750_v54  ;;  %v5575_v19 = vsel %vm5493_vm7, %v5164_v40, %v5574_v1 }
 0x55a   :  { %v3751_v0 = vadd.f32 %v8467_v61, %v3358_v23  ;;  %v3361_v10 = vpop.xlane.xlu1 %3360  ;;  %v5172_v16 = vrot.slane %v4006_v31, %v8531_v38 }
 0x55b   :  { %v3752_v45 = vadd.f32 %v8467_v61, %v3361_v10  ;;  %v5177_v49 = vrot.slane %v4007_v34, %v8524_v47 }
 0x55c   :  { %v4008_v41 = vmul.f32 %v8426_v57, %v3751_v0  ;;  %v5173_v52 = vsel %vm4344_vm2, %v5172_v16, %v5168_v63 }
 0x55d   :  { %v3364_v30 = vpop.xlane.xlu0 %3363  ;;  %v4009_v43 = vmul.f32 %v8426_v57, %v3752_v45  ;;  %v5576_v58 = vsel %vm5495_vm8, %v5173_v52, %v5575_v19 }
 0x55e   :  { %v3753_v62 = vadd.f32 %v8467_v61, %v3364_v30  ;;  %v3367_v28 = vpop.xlane.xlu1 %3366  ;;  %v5181_v35 = vrot.slane %v4008_v41, %v8531_v38 }
 0x55f   :  { %v3754_v55 = vadd.f32 %v8467_v61, %v3367_v28  ;;  %v5186_v6 = vrot.slane %v4009_v43, %v8524_v47 }
 0x560   :  { %v4010_v29 = vmul.f32 %v8426_v57, %v3753_v62  ;;  %v5182_v44 = vsel %vm4344_vm2, %v5181_v35, %v5177_v49 }
 0x561   :  { %v3370_v5 = vpop.xlane.xlu0 %3369  ;;  %v4011_v27 = vmul.f32 %v8426_v57, %v3754_v55  ;;  %v5577_v25 = vsel %vm5497_vm9, %v5182_v44, %v5576_v58 }
 0x562   :  { %v5190_v53 = vrot.slane %v4010_v29, %v8531_v38  ;;  %v3755_v37 = vadd.f32 %v8467_v61, %v3370_v5  ;;  %v3373_v48 = vpop.xlane.xlu1 %3372 }
 0x563   :  { %v5195_v11 = vrot.slane %v4011_v27, %v8524_v47  ;;  %v3756_v22 = vadd.f32 %v8467_v61, %v3373_v48 }
 0x564   :  { %v4012_v20 = vmul.f32 %v8426_v57, %v3755_v37  ;;  %v5191_v8 = vsel %vm4344_vm2, %v5190_v53, %v5186_v6 }
 0x565   :  { %v3376_v46 = vpop.xlane.xlu0 %3375  ;;  %v5578_v13 = vsel %vm11354_vm6, %v5191_v8, %v5577_v25  ;;  %v4013_v18 = vmul.f32 %v8426_v57, %v3756_v22 }
 0x566   :  { %v5199_v17 = vrot.slane %v4012_v20, %v8531_v38  ;;  %v3379_v26 = vpop.xlane.xlu1 %3378  ;;  %v3757_v54 = vadd.f32 %v8467_v61, %v3376_v46 }
 0x567   :  { %v3758_v0 = vadd.f32 %v8467_v61, %v3379_v26  ;;  %v5204_v49 = vrot.slane %v4013_v18, %v8524_v47 }
 0x568   :  { %v5200_v4 = vsel %vm4344_vm2, %v5199_v17, %v5195_v11  ;;  %v4014_v42 = vmul.f32 %v8426_v57, %v3757_v54 }
 0x569   :  { %v5579_v51 = vsel %vm11355_vm10, %v5200_v4, %v5578_v13  ;;  %v3382_v9 = vpop.xlane.xlu0 %3381  ;;  %v4015_v3 = vmul.f32 %v8426_v57, %v3758_v0 }
 0x56a   :  { %5636 = vst.msk [vmem:[%s10638_s6 + $0x58] sm:$0xff] %vm11356_vm15, %v5579_v51  ;;  %v3385_v2 = vpop.xlane.xlu1 %3384  ;;  %v3759_v21 = vadd.f32 %v8467_v61, %v3382_v9  ;;  %v5208_v35 = vrot.slane %v4014_v42, %v8531_v38 }
 0x56b   :  { %v3760_v59 = vadd.f32 %v8467_v61, %v3385_v2  ;;  %v5213_v33 = vrot.slane %v4015_v3, %v8524_v47 }
 0x56c   :  { %v4016_v24 = vmul.f32 %v8426_v57, %v3759_v21  ;;  %v5209_v44 = vsel %vm4344_vm2, %v5208_v35, %v5204_v49 }
 0x56d   :  { %v3388_v39 = vpop.xlane.xlu0 %3387  ;;  %v4017_v16 = vmul.f32 %v8426_v57, %v3760_v59 }
 0x56e   :  { %v3391_v15 = vpop.xlane.xlu1 %3390  ;;  %v3761_v10 = vadd.f32 %v8467_v61, %v3388_v39  ;;  %v5217_v50 = vrot.slane %v4016_v24, %v8531_v38 }
 0x56f   :  { %v3762_v12 = vadd.f32 %v8467_v61, %v3391_v15  ;;  %v5222_v32 = vrot.slane %v4017_v16, %v8524_v47 }
 0x570   :  { %v4018_v30 = vmul.f32 %v8426_v57, %v3761_v10  ;;  %v5218_v48 = vsel %vm4344_vm2, %v5217_v50, %v5213_v33 }
 0x571   :  { %v3394_v23 = vpop.xlane.xlu0 %3393  ;;  %v4019_v29 = vmul.f32 %v8426_v57, %v3762_v12  ;;  %v5580_v26 = vsel %vm5489_vm3, %v5218_v48, %v5209_v44 }
 0x572   :  { %v3397_v7 = vpop.xlane.xlu1 %3396  ;;  %v3763_v31 = vadd.f32 %v8467_v61, %v3394_v23  ;;  %v5226_v40 = vrot.slane %v4018_v30, %v8531_v38 }
 0x573   :  { %v3764_v14 = vadd.f32 %v8467_v61, %v3397_v7  ;;  %v5231_v20 = vrot.slane %v4019_v29, %v8524_v47 }
 0x574   :  { %v4020_v34 = vmul.f32 %v8426_v57, %v3763_v31  ;;  %v5227_v46 = vsel %vm4344_vm2, %v5226_v40, %v5222_v32 }
 0x575   :  { %v3400_v45 = vpop.xlane.xlu0 %3399  ;;  %v4021_v63 = vmul.f32 %v8426_v57, %v3764_v14  ;;  %v5581_v23 = vsel %vm5491_vm5, %v5227_v46, %v5580_v26 }
 0x576   :  { %v3765_v41 = vadd.f32 %v8467_v61, %v3400_v45  ;;  %v3403_v60 = vpop.xlane.xlu1 %3402  ;;  %v5235_v53 = vrot.slane %v4020_v34, %v8531_v38 }
 0x577   :  { %v3766_v62 = vadd.f32 %v8467_v61, %v3403_v60  ;;  %v5240_v58 = vrot.slane %v4021_v63, %v8524_v47 }
 0x578   :  { %v4022_v43 = vmul.f32 %v8426_v57, %v3765_v41  ;;  %v5236_v25 = vsel %vm4344_vm2, %v5235_v53, %v5231_v20 }
 0x579   :  { %v3406_v28 = vpop.xlane.xlu0 %3405  ;;  %v4023_v27 = vmul.f32 %v8426_v57, %v3766_v62  ;;  %v5582_v54 = vsel %vm5493_vm7, %v5236_v25, %v5581_v23 }
 0x57a   :  { %v3767_v55 = vadd.f32 %v8467_v61, %v3406_v28  ;;  %v3409_v56 = vpop.xlane.xlu1 %3408  ;;  %v5244_v52 = vrot.slane %v4022_v43, %v8531_v38 }
 0x57b   :  { %v3768_v36 = vadd.f32 %v8467_v61, %v3409_v56  ;;  %v5249_v13 = vrot.slane %v4023_v27, %v8524_v47 }
 0x57c   :  { %v4024_v5 = vmul.f32 %v8426_v57, %v3767_v55  ;;  %v5245_v51 = vsel %vm4344_vm2, %v5244_v52, %v5240_v58 }
 0x57d   :  { %v3412_v37 = vpop.xlane.xlu0 %3411  ;;  %v4025_v19 = vmul.f32 %v8426_v57, %v3768_v36  ;;  %v5583_v22 = vsel %vm5495_vm8, %v5245_v51, %v5582_v54 }
 0x57e   :  { %v3769_v6 = vadd.f32 %v8467_v61, %v3412_v37  ;;  %v3415_v1 = vpop.xlane.xlu1 %3414  ;;  %v5253_v11 = vrot.slane %v4024_v5, %v8531_v38 }
 0x57f   :  { %v3770_v8 = vadd.f32 %v8467_v61, %v3415_v1  ;;  %v5258_v21 = vrot.slane %v4025_v19, %v8524_v47 }
 0x580   :  { %v4026_v17 = vmul.f32 %v8426_v57, %v3769_v6  ;;  %v5254_v0 = vsel %vm4344_vm2, %v5253_v11, %v5249_v13 }
 0x581   :  { %v3418_v4 = vpop.xlane.xlu0 %3417  ;;  %v4027_v2 = vmul.f32 %v8426_v57, %v3770_v8  ;;  %v5584_v12 = vsel %vm5497_vm9, %v5254_v0, %v5583_v22 }
 0x582   :  { %v5262_v9 = vrot.slane %v4026_v17, %v8531_v38  ;;  %v3771_v39 = vadd.f32 %v8467_v61, %v3418_v4  ;;  %v3421_v15 = vpop.xlane.xlu1 %3420 }
 0x583   :  { %v3772_v7 = vadd.f32 %v8467_v61, %v3421_v15  ;;  %v5267_v24 = vrot.slane %v4027_v2, %v8524_v47 }
 0x584   :  { %v4028_v10 = vmul.f32 %v8426_v57, %v3771_v39  ;;  %v5263_v31 = vsel %vm4344_vm2, %v5262_v9, %v5258_v21 }
 0x585   :  { %v3424_v45 = vpop.xlane.xlu0 %3423  ;;  %v4029_v41 = vmul.f32 %v8426_v57, %v3772_v7  ;;  %v5585_v30 = vsel %vm11357_vm12, %v5263_v31, %v5584_v12 }
 0x586   :  { %v5271_v59 = vrot.slane %v4028_v10, %v8531_v38  ;;  %v3773_v60 = vadd.f32 %v8467_v61, %v3424_v45  ;;  %v3427_v42 = vpop.xlane.xlu1 %3426 }
 0x587   :  { %v3774_v3 = vadd.f32 %v8467_v61, %v3427_v42  ;;  %v5276_v28 = vrot.slane %v4029_v41, %v8524_v47 }
 0x588   :  { %v5272_v14 = vsel %vm4344_vm2, %v5271_v59, %v5267_v24  ;;  %v4030_v18 = vmul.f32 %v8426_v57, %v3773_v60 }
 0x589   :  { %v5586_v34 = vsel %vm11358_vm14, %v5272_v14, %v5585_v30  ;;  %v3430_v62 = vpop.xlane.xlu0 %3429  ;;  %v4031_v16 = vmul.f32 %v8426_v57, %v3774_v3 }
 0x58a   :  { %5637 = vst.msk [vmem:[%s10638_s6 + $0x60] sm:$0xff] %vm11359_vm0, %v5586_v34  ;;  %v5280_v50 = vrot.slane %v4030_v18, %v8531_v38  ;;  %v3775_v43 = vadd.f32 %v8467_v61, %v3430_v62  ;;  %v3433_v55 = vpop.xlane.xlu1 %3432 }
 0x58b   :  { %v3776_v56 = vadd.f32 %v8467_v61, %v3433_v55  ;;  %v5285_v33 = vrot.slane %v4031_v16, %v8524_v47 }
 0x58c   :  { %v5281_v35 = vsel %vm4344_vm2, %v5280_v50, %v5276_v28  ;;  %v4032_v29 = vmul.f32 %v8426_v57, %v3775_v43 }
 0x58d   :  { %v3436_v36 = vpop.xlane.xlu0 %3435  ;;  %v4033_v63 = vmul.f32 %v8426_v57, %v3776_v56 }
 0x58e   :  { %v5289_v40 = vrot.slane %v4032_v29, %v8531_v38  ;;  %v3777_v5 = vadd.f32 %v8467_v61, %v3436_v36  ;;  %v3469_v49 = vpop.xlane.xlu1 %3468 }
 0x58f   :  { %v3788_v53 = vadd.f32 %v8467_v61, %v3469_v49  ;;  %v5294_v52 = vrot.slane %v4033_v63, %v8524_v47 }
 0x590   :  { %v5290_v27 = vsel %vm4344_vm2, %v5289_v40, %v5285_v33  ;;  %v4034_v37 = vmul.f32 %v8426_v57, %v3777_v5 }
 0x591   :  { %v5587_v48 = vsel %vm5489_vm3, %v5290_v27, %v5281_v35  ;;  %v3472_v32 = vpop.xlane.xlu0 %3471  ;;  %v4045_v1 = vmul.f32 %v8426_v57, %v3788_v53 }
 0x592   :  { %v5298_v6 = vrot.slane %v4034_v37, %v8531_v38  ;;  %v3789_v44 = vadd.f32 %v8467_v61, %v3472_v32  ;;  %v3475_v20 = vpop.xlane.xlu1 %3474 }
 0x593   :  { %v3790_v19 = vadd.f32 %v8467_v61, %v3475_v20  ;;  %v5348_v17 = vrot.slane %v4045_v1, %v8524_v47 }
 0x594   :  { %v5299_v8 = vsel %vm4344_vm2, %v5298_v6, %v5294_v52  ;;  %v4046_v46 = vmul.f32 %v8426_v57, %v3789_v44 }
 0x595   :  { %v10429_v58 = vsel %vm5491_vm5, %v5299_v8, %v5587_v48  ;;  %v3478_v11 = vpop.xlane.xlu0 %3477  ;;  %v4047_v25 = vmul.f32 %v8426_v57, %v3790_v19 }
 0x596   :  { %v5352_v26 = vrot.slane %v4046_v46, %v8531_v38  ;;  %v3791_v13 = vadd.f32 %v8467_v61, %v3478_v11  ;;  %v3517_v4 = vpop.xlane.xlu1 %3516 }
 0x597   :  { %v3804_v51 = vadd.f32 %v8467_v61, %v3517_v4  ;;  %v5357_v15 = vrot.slane %v4047_v25, %v8524_v47 }
 0x598   :  { %v5353_v9 = vsel %vm4344_vm2, %v5352_v26, %v5348_v17  ;;  %v4048_v2 = vmul.f32 %v8426_v57, %v3791_v13 }
 0x599   :  { %v3520_v39 = vpop.xlane.xlu0 %3519  ;;  %v4061_v21 = vmul.f32 %v8426_v57, %v3804_v51 }
 0x59a   :  { %v5361_v23 = vrot.slane %v4048_v2, %v8531_v38  ;;  %v3805_v7 = vadd.f32 %v8467_v61, %v3520_v39  ;;  %v3523_v54 = vpop.xlane.xlu1 %3522 }
 0x59b   :  { %v5420_v45 = vrot.slane %v4061_v21, %v8524_v47  ;;  %v3806_v35 = vadd.f32 %v8467_v61, %v3523_v54 }
 0x59c   :  { %v5362_v0 = vsel %vm4344_vm2, %v5361_v23, %v5357_v15  ;;  %v4062_v10 = vmul.f32 %v8426_v57, %v3805_v7 }
 0x59d   :  { %v10445_v22 = vsel %vm5489_vm3, %v5362_v0, %v5353_v9  ;;  %v3526_v31 = vpop.xlane.xlu0 %3525  ;;  %v4063_v63 = vmul.f32 %v8426_v57, %v3806_v35 }
 0x59e   :  { %v5424_v24 = vrot.slane %v4062_v10, %v8531_v38  ;;  %v3481_v59 = vpop.xlane.xlu1 %3480  ;;  %v3807_v56 = vadd.f32 %v8467_v61, %v3526_v31 }
 0x59f   :  { %v3792_v5 = vadd.f32 %v8467_v61, %v3481_v59  ;;  %v5429_v6 = vrot.slane %v4063_v63, %v8524_v47 }
 0x5a0   :  { %v5425_v41 = vsel %vm4344_vm2, %v5424_v24, %v5420_v45  ;;  %v4064_v33 = vmul.f32 %v8426_v57, %v3807_v56 }
 0x5a1   :  { %v3484_v60 = vpop.xlane.xlu0 %3483  ;;  %v4049_v1 = vmul.f32 %v8426_v57, %v3792_v5 }
 0x5a2   :  { %v3529_v42 = vpop.xlane.xlu1 %3528  ;;  %v3793_v40 = vadd.f32 %v8467_v61, %v3484_v60  ;;  %v5433_v27 = vrot.slane %v4064_v33, %v8531_v38 }
 0x5a3   :  { %v3808_v44 = vadd.f32 %v8467_v61, %v3529_v42  ;;  %v5366_v9 = vrot.slane %v4049_v1, %v8524_v47 }
 0x5a4   :  { %v4050_v37 = vmul.f32 %v8426_v57, %v3793_v40  ;;  %v5434_v11 = vsel %vm4344_vm2, %v5433_v27, %v5429_v6 }
 0x5a5   :  { %v3532_v12 = vpop.xlane.xlu0 %3531  ;;  %v4065_v2 = vmul.f32 %v8426_v57, %v3808_v44  ;;  %v10489_v10 = vsel %vm5489_vm3, %v5434_v11, %v5425_v41  ;;  %vm11360_vm3 = vmmov %vm11354_vm6 }
 0x5a6   :  { %v3439_v3 = vpop.xlane.xlu1 %3438  ;;  %v3809_v48 = vadd.f32 %v8467_v61, %v3532_v12  ;;  %v5370_v17 = vrot.slane %v4050_v37, %v8531_v38  ;;  %vm11363_vm11 = vmmov %vm11360_vm3 }
 0x5a7   :  { %v3778_v19 = vadd.f32 %v8467_v61, %v3439_v3  ;;  %v5438_v3 = vrot.slane %v4065_v2, %v8524_v47  ;;  %vm11366_vm6 = vmmov %vm11360_vm3 }
 0x5a8   :  { %v4066_v25 = vmul.f32 %v8426_v57, %v3809_v48  ;;  %v5371_v31 = vsel %vm4344_vm2, %v5370_v17, %v5366_v9 }
 0x5a9   :  { %v3442_v30 = vpop.xlane.xlu0 %3441  ;;  %v4035_v21 = vmul.f32 %v8426_v57, %v3778_v19 }
 0x5aa   :  { %v3487_v14 = vpop.xlane.xlu1 %3486  ;;  %v3779_v32 = vadd.f32 %v8467_v61, %v3442_v30  ;;  %v5442_v59 = vrot.slane %v4066_v25, %v8531_v38 }
 0x5ab   :  { %v3794_v8 = vadd.f32 %v8467_v61, %v3487_v14 }
 0x5ac   :  { %v4036_v13 = vmul.f32 %v8426_v57, %v3779_v32  ;;  %v10512_v40 = vsel %vm4344_vm2, %v5442_v59, %v5438_v3 }
 0x5ad   :  { %v3490_v18 = vpop.xlane.xlu0 %3489  ;;  %v4051_v7 = vmul.f32 %v8426_v57, %v3794_v8 }
 0x5ae   :  { %v3535_v34 = vpop.xlane.xlu1 %3534  ;;  %v3795_v52 = vadd.f32 %v8467_v61, %v3490_v18  ;;  %v5307_v60 = vrot.slane %v4036_v13, %v8531_v38 }
 0x5af   :  { %v3810_v54 = vadd.f32 %v8467_v61, %v3535_v34  ;;  %v5303_v34 = vrot.slane %v4035_v21, %v8524_v47 }
 0x5b0   :  { %v4052_v4 = vmul.f32 %v8426_v57, %v3795_v52 }
 0x5b1   :  { %v3538_v62 = vpop.xlane.xlu0 %3537  ;;  %v5308_v63 = vsel %vm4344_vm2, %v5307_v60, %v5303_v34 }
 0x5b2   :  { %v3445_v28 = vpop.xlane.xlu1 %3444  ;;  %v3811_v51 = vadd.f32 %v8467_v61, %v3538_v62  ;;  %v5379_v42 = vrot.slane %v4052_v4, %v8531_v38  ;;  %v5375_v62 = vrot.slane %v4051_v7, %v8524_v47  ;;  %v5589_v17 = vsel %vm5493_vm7, %v5308_v63, %v10429_v58 }
 0x5b3   :  { %v3780_v39 = vadd.f32 %v8467_v61, %v3445_v28  ;;  %v4067_v28 = vmul.f32 %v8426_v57, %v3810_v54 }
 0x5b4   :  { %v4068_v12 = vmul.f32 %v8426_v57, %v3811_v51  ;;  %v5380_v5 = vsel %vm4344_vm2, %v5379_v42, %v5375_v62 }
 0x5b5   :  { %v3448_v50 = vpop.xlane.xlu0 %3447  ;;  %v4037_v30 = vmul.f32 %v8426_v57, %v3780_v39 }
 0x5b6   :  { %v3493_v16 = vpop.xlane.xlu1 %3492  ;;  %v3781_v26 = vadd.f32 %v8467_v61, %v3448_v50 }
 0x5b7   :  { %v3796_v24 = vadd.f32 %v8467_v61, %v3493_v16 }
 0x5b8   :  { %v4038_v45 = vmul.f32 %v8426_v57, %v3781_v26 }
 0x5b9   :  { %v3496_v43 = vpop.xlane.xlu0 %3495  ;;  %v4053_v35 = vmul.f32 %v8426_v57, %v3796_v24 }
 0x5ba   :  { %v3541_v55 = vpop.xlane.xlu1 %3540  ;;  %v3797_v15 = vadd.f32 %v8467_v61, %v3496_v43  ;;  %v5595_v43 = vsel %vm5491_vm5, %v5371_v31, %v10445_v22  ;;  %v5316_v56 = vrot.slane %v4038_v45, %v8531_v38 }
 0x5bb   :  { %v3812_v50 = vadd.f32 %v8467_v61, %v3541_v55  ;;  %v5312_v55 = vrot.slane %v4037_v30, %v8524_v47  ;;  %v5384_v19 = vrot.slane %v4053_v35, %v8524_v47  ;;  %v5596_v26 = vsel %vm5493_vm7, %v5380_v5, %v5595_v43 }
 0x5bc   :  { %v4054_v41 = vmul.f32 %v8426_v57, %v3797_v15 }
 0x5bd   :  { %v10452_v29 = vpop.xlane.xlu0 %3543  ;;  %v10523_v32 = vmul.f32 %v8426_v57, %v3812_v50  ;;  %v5317_v44 = vsel %vm4344_vm2, %v5316_v56, %v5312_v55 }
 0x5be   :  { %v3451_v36 = vpop.xlane.xlu1 %3450  ;;  %v5388_v27 = vrot.slane %v4054_v41, %v8531_v38  ;;  %v3813_v52 = vadd.f32 %v8467_v61, %v10452_v29  ;;  %v5590_v2 = vsel %vm5495_vm8, %v5317_v44, %v5589_v17 }
 0x5bf   :  { %v3782_v33 = vadd.f32 %v8467_v61, %v3451_v36  ;;  %v5447_v36 = vrot.slane %v4067_v28, %v8524_v47  ;;  %v5456_v58 = vrot.slane %v10523_v32, %v8524_v47 }
 0x5c0   :  { %v4070_v39 = vmul.f32 %v8426_v57, %v3813_v52 }
 0x5c1   :  { %v3454_v49 = vpop.xlane.xlu0 %3453  ;;  %v4039_v8 = vmul.f32 %v8426_v57, %v3782_v33 }
 0x5c2   :  { %v10458_v53 = vpop.xlane.xlu1 %3498  ;;  %v3783_v14 = vadd.f32 %v8467_v61, %v3454_v49  ;;  %v5451_v49 = vrot.slane %v4068_v12, %v8531_v38  ;;  %v5460_v41 = vrot.slane %v4070_v39, %v8531_v38  ;;  %v5602_v39 = vsel %vm5491_vm5, %v10512_v40, %v10489_v10  ;;  %vm11364_vm5 = vmmov %vm11355_vm10 }
 0x5c3   :  { %v3798_v29 = vadd.f32 %v8467_v61, %v10458_v53  ;;  %v5321_v53 = vrot.slane %v4039_v8, %v8524_v47  ;;  %vm11368_vm10 = vmmov %vm11359_vm0 }
 0x5c4   :  { %v4040_v22 = vmul.f32 %v8426_v57, %v3783_v14  ;;  %v10536_v25 = vsel %vm4344_vm2, %v5451_v49, %v5447_v36 }
 0x5c5   :  { %v3502_v20 = vpop.xlane.xlu0 %3501  ;;  %v4055_v45 = vmul.f32 %v8426_v57, %v3798_v29 }
 0x5c6   :  { %v10470_v46 = vpop.xlane.xlu1 %3546  ;;  %v3799_v6 = vadd.f32 %v8467_v61, %v3502_v20  ;;  %v5389_v20 = vsel %vm4344_vm2, %v5388_v27, %v5384_v19  ;;  %v5325_v13 = vrot.slane %v4040_v22, %v8531_v38 }
 0x5c7   :  { %v5597_v31 = vsel %vm5495_vm8, %v5389_v20, %v5596_v26  ;;  %v3814_v24 = vadd.f32 %v8467_v61, %v10470_v46  ;;  %v5393_v43 = vrot.slane %v4055_v45, %v8524_v47 }
 0x5c8   :  { %v4056_v15 = vmul.f32 %v8426_v57, %v3799_v6  ;;  %v5326_v60 = vsel %vm4344_vm2, %v5325_v13, %v5321_v53 }
 0x5c9   :  { %v10483_v23 = vpop.xlane.xlu0 %3549  ;;  %v4071_v33 = vmul.f32 %v8426_v57, %v3814_v24 }
 0x5ca   :  { %v3457_v0 = vpop.xlane.xlu1 %3456  ;;  %v3815_v59 = vadd.f32 %v8467_v61, %v10483_v23  ;;  %v5397_v14 = vrot.slane %v4056_v15, %v8531_v38  ;;  %v5461_v15 = vsel %vm4344_vm2, %v5460_v41, %v5456_v58 }
 0x5cb   :  { %v3784_v11 = vadd.f32 %v8467_v61, %v3457_v0  ;;  %v5465_v17 = vrot.slane %v4071_v33, %v8524_v47 }
 0x5cc   :  { %v4072_v56 = vmul.f32 %v8426_v57, %v3815_v59  ;;  %v5398_v32 = vsel %vm4344_vm2, %v5397_v14, %v5393_v43 }
 0x5cd   :  { %v3460_v18 = vpop.xlane.xlu0 %3459  ;;  %v4041_v7 = vmul.f32 %v8426_v57, %v3784_v11 }
 0x5ce   :  { %v3505_v16 = vpop.xlane.xlu1 %3504  ;;  %v3785_v37 = vadd.f32 %v8467_v61, %v3460_v18  ;;  %v5469_v44 = vrot.slane %v4072_v56, %v8531_v38 }
 0x5cf   :  { %v3800_v54 = vadd.f32 %v8467_v61, %v3505_v16  ;;  %v5330_v23 = vrot.slane %v4041_v7, %v8524_v47  ;;  %v5591_v16 = vsel %vm5497_vm9, %v5326_v60, %v5590_v2 }
 0x5d0   :  { %v4042_v4 = vmul.f32 %v8426_v57, %v3785_v37  ;;  %v5470_v7 = vsel %vm4344_vm2, %v5469_v44, %v5465_v17 }
 0x5d1   :  { %v3508_v48 = vpop.xlane.xlu0 %3507  ;;  %v4057_v62 = vmul.f32 %v8426_v57, %v3800_v54 }
 0x5d2   :  { %v3553_v1 = vpop.xlane.xlu1 %3552  ;;  %v3801_v51 = vadd.f32 %v8467_v61, %v3508_v48  ;;  %v5334_v42 = vrot.slane %v4042_v4, %v8531_v38 }
 0x5d3   :  { %v3816_v28 = vadd.f32 %v8467_v61, %v3553_v1  ;;  %v5402_v52 = vrot.slane %v4057_v62, %v8524_v47 }
 0x5d4   :  { %v4058_v12 = vmul.f32 %v8426_v57, %v3801_v51  ;;  %v5335_v63 = vsel %vm4344_vm2, %v5334_v42, %v5330_v23 }
 0x5d5   :  { %v3556_v9 = vpop.xlane.xlu0 %3555  ;;  %v4073_v6 = vmul.f32 %v8426_v57, %v3816_v28  ;;  %v5592_v19 = vsel %vm11360_vm3, %v5335_v63, %v5591_v16 }
 0x5d6   :  { %v3463_v21 = vpop.xlane.xlu1 %3462  ;;  %v3817_v3 = vadd.f32 %v8467_v61, %v3556_v9  ;;  %v5406_v5 = vrot.slane %v4058_v12, %v8531_v38 }
 0x5d7   :  { %v3786_v0 = vadd.f32 %v8467_v61, %v3463_v21  ;;  %v5598_v21 = vsel %vm5497_vm9, %v5398_v32, %v5597_v31  ;;  %v5474_v53 = vrot.slane %v4073_v6, %v8524_v47 }
 0x5d8   :  { %v4074_v49 = vmul.f32 %v8426_v57, %v3817_v3  ;;  %v5407_v26 = vsel %vm4344_vm2, %v5406_v5, %v5402_v52 }
 0x5d9   :  { %v3466_v30 = vpop.xlane.xlu0 %3465  ;;  %v4043_v18 = vmul.f32 %v8426_v57, %v3786_v0  ;;  %v5599_v54 = vsel %vm11363_vm11, %v5407_v26, %v5598_v21 }
 0x5da   :  { %v3787_v46 = vadd.f32 %v8467_v61, %v3466_v30  ;;  %v3511_v34 = vpop.xlane.xlu1 %3510  ;;  %v5478_v29 = vrot.slane %v4074_v49, %v8531_v38 }
 0x5db   :  { %v3802_v50 = vadd.f32 %v8467_v61, %v3511_v34  ;;  %v5339_v27 = vrot.slane %v4043_v18, %v8524_v47 }
 0x5dc   :  { %v4044_v35 = vmul.f32 %v8426_v57, %v3787_v46  ;;  %v5479_v24 = vsel %vm4344_vm2, %v5478_v29, %v5474_v53 }
 0x5dd   :  { %v3514_v55 = vpop.xlane.xlu0 %3513  ;;  %v4059_v37 = vmul.f32 %v8426_v57, %v3802_v50 }
 0x5de   :  { %v5343_v22 = vrot.slane %v4044_v35, %v8531_v38  ;;  %v3803_v48 = vadd.f32 %v8467_v61, %v3514_v55  ;;  %v3559_v36 = vpop.xlane.xlu1 %3558 }
 0x5df   :  { %v3818_v1 = vadd.f32 %v8467_v61, %v3559_v36  ;;  %v5411_v4 = vrot.slane %v4059_v37, %v8524_v47 }
 0x5e0   :  { %v5344_v8 = vsel %vm4344_vm2, %v5343_v22, %v5339_v27  ;;  %v4060_v11 = vmul.f32 %v8426_v57, %v3803_v48 }
 0x5e1   :  { %v5593_v20 = vsel %vm11361_vm13, %v5344_v8, %v5592_v19  ;;  %v3562_v13 = vpop.xlane.xlu0 %3561  ;;  %v4075_v9 = vmul.f32 %v8426_v57, %v3818_v1 }
 0x5e2   :  { %5638 = vst.msk [vmem:[%s10638_s6 + $0x68] sm:$0xff] %vm11362_vm1, %v5593_v20  ;;  %v5415_v51 = vrot.slane %v4060_v11, %v8531_v38  ;;  %v3819_v2 = vadd.f32 %v8467_v61, %v3562_v13  ;;  %v5603_v61 = vsel %vm5493_vm7, %v10536_v25, %v5602_v39  ;;  %vm11367_vm7 = vmmov %vm11364_vm5 }
 0x5e3   :  { %v5604_v40 = vsel %vm5495_vm8, %v5461_v15, %v5603_v61  ;;  %v5483_v58 = vrot.slane %v4075_v9, %v8524_v47 }
 0x5e4   :  { %v5416_v0 = vsel %vm4344_vm2, %v5415_v51, %v5411_v4  ;;  %v4076_v45 = vmul.f32 %v8426_v57, %v3819_v2  ;;  %v5605_v57 = vsel %vm5497_vm9, %v5470_v7, %v5604_v40 }
 0x5e5   :  { %v5600_v10 = vsel %vm11364_vm5, %v5416_v0, %v5599_v54  ;;  %v5606_v59 = vsel %vm11366_vm6, %v5479_v24, %v5605_v57 }
 0x5e6   :  { %5639 = vst.msk [vmem:[%s10638_s6 + $0x70] sm:$0xff] %vm11365_vm4, %v5600_v10  ;;  %v5487_v31 = vrot.slane %v4076_v45, %v8531_v38 }
 0x5e8   :  { %v5488_v25 = vsel %vm4344_vm2, %v5487_v31, %v5483_v58 }
 0x5e9   :  { %v5607_v60 = vsel %vm11367_vm7, %v5488_v25, %v5606_v59 }
 0x5ea   :  { %5640 = vst.msk [vmem:[%s10638_s6 + $0x78] sm:$0xff] %vm11368_vm10, %v5607_v60 }
 0x5eb   :  { %5645 = vsyncpa [#allocation3], 1 }

// kernel: modified_cnn_forward.5
= control target key start
LH: loop header
LB: loop body
LE: loop exit
PB: predicated region body
PF: predicated region fallthrough
CT: control target
= control target key end

     0   :  { %13 = vsyncpa [#allocation4], 0  ;;  %s1745_s0 = inlined_call_operand.vmem [shape: f32[2,512], index: 0, kind: input, shape index: {}]   ;;  %s1746_s1 = inlined_call_operand.vmem [shape: f32[512,120], index: 1, kind: input, shape index: {}]   ;;  %s1747_s2 = inlined_call_operand.vmem [shape: f32[1,120], index: 2, kind: input, shape index: {}]   ;;  %s1748_s3 = inlined_call_operand.vmem [shape: f32[120,10], index: 3, kind: input, shape index: {}]   ;;  %s1749_s4 = inlined_call_operand.vmem [shape: f32[1,10], index: 4, kind: input, shape index: {}]   ;;  %s1750_s5 = inlined_call_operand.vmem [shape: f32[1,127], index: 5, kind: input, shape index: {}]   ;;  %s1751_s6 = inlined_call_operand.vmem [shape: f32[1,127], index: 6, kind: input, shape index: {}]   ;;  %s1752_s7 = inlined_call_operand.vmem [shape: f32[2], index: 7, kind: input, shape index: {}]   ;;  %s1753_s8 = inlined_call_operand.hbm [shape: f32[2,10], index: 8, kind: output, shape index: {}]  }
   0x1   :  { %14 = vsyncpa [#allocation3], 0  ;;  %s35_s29 = sshll.u32 %s1752_s7, 4  ;;  %s36_s29 = int_to_ptr.vmem [resolvable:$true] %s35_s29 }
   0x2   :  { %s1097_s30 = scalar_lea.vmem %s36_s29, 16  ;;  %p1102_p1 = scmp.lt.s32.totalorder %s36_s29, %s36_s29 }
   0x3   :  { %p1098_p0 = scmp.ne.s32.totalorder %s36_s29, %s1097_s30  ;;  %p1103_p2 = scmp.lt.s32.totalorder %s1097_s30, %s1097_s30 }
   0x5   :  { %p1104_p3 = por %p1103_p2, %p1102_p1 }
   0x7   :  { %p1105_p4 = pnand %p1104_p3, %p1098_p0 }
   0x9   :  { %1108 = shalt.err (!%p1105_p4)
}
   0xa   :  { %s1133_s9 = smov [#allocation2]  }
   0xb   :  { %38 = dma.vmem_to_smem %s36_s29, 16, %s1133_s9, [#allocation4]  }
   0xc   :  { %1129 = dma.done.wait [#allocation4], 16  }
   0xd   :  { %1130 = vsyncadd [#allocation4], 4294967280 }
   0xe   :  { %42 = sfence }
   0xf   :  { %v75_v0 = vld [vmem:[%s1746_s1 + $0xf8] sm:$0xff]  ;;  %v74_v4 = vld [vmem:[%s1746_s1 + $0xf0] sm:$0xff]  ;;  %v73_v8 = vld [vmem:[%s1746_s1 + $0xe8] sm:$0xff]  ;;  %v1134_v30 = vmov 1983009808   ;;  %v120_v32 = vlaneseq  ;;  %vm483_vm1 = vcmask 1039360  }
  0x10   :  { %v107_v1 = vld [vmem:[%s1746_s1 + $0x1f8] sm:$0xff]  ;;  %964 = vmatprep.subr.mxu0 %v75_v0  ;;  %v106_v5 = vld [vmem:[%s1746_s1 + $0x1f0] sm:$0xff]  ;;  %v105_v9 = vld [vmem:[%s1746_s1 + $0x1e8] sm:$0xff]  ;;  %v118_v31 = vunpack.c.l.s4 %v1134_v30  ;;  %s277_s26 = sld [smem:[#allocation2]]  ;;  %s1137_s29 = smov [#allocation5]  }
  0x11   :  { %v59_v2 = vld [vmem:[%s1746_s1 + $0x78] sm:$0xff]  ;;  %999 = vmatprep.subr.mxu1 %v107_v1  ;;  %v58_v6 = vld [vmem:[%s1746_s1 + $0x70] sm:$0xff]  ;;  %v57_v10 = vld [vmem:[%s1746_s1 + $0x68] sm:$0xff]  ;;  %v1301_v42 = vshrl.u32 %v120_v32, 7  ;;  %s959_s27 = sld [smem:[#allocation2 + $0x1]]  ;;  %s949_s30 = sshll.u32 %s1137_s29, 4  ;;  %s950_s30 = int_to_ptr.vmem [resolvable:$true] %s949_s30 }
  0x12   :  { %v91_v3 = vld [vmem:[%s1746_s1 + $0x178] sm:$0xff]  ;;  %965 = vmatpush3.msra.mxu0 %v59_v2  ;;  %v90_v7 = vld [vmem:[%s1746_s1 + $0x170] sm:$0xff]  ;;  %v89_v11 = vld [vmem:[%s1746_s1 + $0x168] sm:$0xff]  ;;  %v119_v41 = vunpack.c.0.s8 %v118_v31  ;;  %s1109_s9 = scalar_lea.vmem %s950_s30, 32  ;;  %p1114_p6 = scmp.lt.s32.totalorder %s950_s30, %s950_s30 }
  0x13   :  { %1000 = vmatpush3.msra.mxu1 %v91_v3  ;;  %966 = vmatprep.subr.mxu0 %v74_v4  ;;  %v72_v12 = vld [vmem:[%s1746_s1 + $0xe0] sm:$0xff]  ;;  %v71_v16 = vld [vmem:[%s1746_s1 + $0xd8] sm:$0xff]  ;;  %v70_v20 = vld [vmem:[%s1746_s1 + $0xd0] sm:$0xff]  ;;  %p1110_p5 = scmp.ne.s32.totalorder %s950_s30, %s1109_s9  ;;  %p1115_p7 = scmp.lt.s32.totalorder %s1109_s9, %s1109_s9 }
  0x14   :  { %1001 = vmatprep.subr.mxu1 %v106_v5  ;;  %967 = vmatpush3.msra.mxu0 %v58_v6  ;;  %v104_v13 = vld [vmem:[%s1746_s1 + $0x1e0] sm:$0xff]  ;;  %v103_v17 = vld [vmem:[%s1746_s1 + $0x1d8] sm:$0xff]  ;;  %v102_v21 = vld [vmem:[%s1746_s1 + $0x1d0] sm:$0xff]  ;;  %v122_v51 = vsub.s32 %v119_v41, %v1301_v42 }
  0x15   :  { %1002 = vmatpush3.msra.mxu1 %v90_v7  ;;  %968 = vmatprep.subr.mxu0 %v73_v8  ;;  %v56_v14 = vld [vmem:[%s1746_s1 + $0x60] sm:$0xff]  ;;  %v55_v18 = vld [vmem:[%s1746_s1 + $0x58] sm:$0xff]  ;;  %v54_v22 = vld [vmem:[%s1746_s1 + $0x50] sm:$0xff]  ;;  %p1116_p8 = por %p1115_p7, %p1114_p6 }
  0x16   :  { %1003 = vmatprep.subr.mxu1 %v105_v9  ;;  %v88_v15 = vld [vmem:[%s1746_s1 + $0x160] sm:$0xff]  ;;  %969 = vmatpush3.msra.mxu0 %v57_v10  ;;  %v87_v19 = vld [vmem:[%s1746_s1 + $0x158] sm:$0xff]  ;;  %v86_v23 = vld [vmem:[%s1746_s1 + $0x150] sm:$0xff] }
  0x17   :  { %1004 = vmatpush3.msra.mxu1 %v89_v11  ;;  %970 = vmatprep.subr.mxu0 %v72_v12  ;;  %v69_v24 = vld [vmem:[%s1746_s1 + $0xc8] sm:$0xff]  ;;  %v68_v28 = vld [vmem:[%s1746_s1 + $0xc0] sm:$0xff]  ;;  %v67_v35 = vld [vmem:[%s1746_s1 + $0xb8] sm:$0xff]  ;;  %p1117_p9 = pnand %p1116_p8, %p1110_p5 }
  0x18   :  { %1005 = vmatprep.subr.mxu1 %v104_v13  ;;  %971 = vmatpush3.msra.mxu0 %v56_v14  ;;  %v101_v25 = vld [vmem:[%s1746_s1 + $0x1c8] sm:$0xff]  ;;  %v100_v29 = vld [vmem:[%s1746_s1 + $0x1c0] sm:$0xff]  ;;  %v99_v36 = vld [vmem:[%s1746_s1 + $0x1b8] sm:$0xff] }
  0x19   :  { %1006 = vmatpush3.msra.mxu1 %v88_v15  ;;  %972 = vmatprep.subr.mxu0 %v71_v16  ;;  %v53_v26 = vld [vmem:[%s1746_s1 + $0x48] sm:$0xff]  ;;  %v52_v33 = vld [vmem:[%s1746_s1 + $0x40] sm:$0xff]  ;;  %v51_v37 = vld [vmem:[%s1746_s1 + $0x38] sm:$0xff] }
  0x1a   :  { %1007 = vmatprep.subr.mxu1 %v103_v17  ;;  %973 = vmatpush3.msra.mxu0 %v55_v18  ;;  %v85_v27 = vld [vmem:[%s1746_s1 + $0x148] sm:$0xff]  ;;  %v84_v34 = vld [vmem:[%s1746_s1 + $0x140] sm:$0xff]  ;;  %v83_v38 = vld [vmem:[%s1746_s1 + $0x138] sm:$0xff] }
  0x1b   :  { %1008 = vmatpush3.msra.mxu1 %v87_v19  ;;  %974 = vmatprep.subr.mxu0 %v70_v20  ;;  %v66_v39 = vld [vmem:[%s1746_s1 + $0xb0] sm:$0xff]  ;;  %v65_v45 = vld [vmem:[%s1746_s1 + $0xa8] sm:$0xff]  ;;  %v64_v49 = vld [vmem:[%s1746_s1 + $0xa0] sm:$0xff] }
  0x1c   :  { %1009 = vmatprep.subr.mxu1 %v102_v21  ;;  %975 = vmatpush3.msra.mxu0 %v54_v22  ;;  %v98_v40 = vld [vmem:[%s1746_s1 + $0x1b0] sm:$0xff]  ;;  %v97_v46 = vld [vmem:[%s1746_s1 + $0x1a8] sm:$0xff]  ;;  %v96_v50 = vld [vmem:[%s1746_s1 + $0x1a0] sm:$0xff] }
  0x1d   :  { %1010 = vmatpush3.msra.mxu1 %v86_v23  ;;  %976 = vmatprep.subr.mxu0 %v69_v24  ;;  %v50_v43 = vld [vmem:[%s1746_s1 + $0x30] sm:$0xff]  ;;  %v49_v47 = vld [vmem:[%s1746_s1 + $0x28] sm:$0xff]  ;;  %v48_v52 = vld [vmem:[%s1746_s1 + $0x20] sm:$0xff] }
  0x1e   :  { %1011 = vmatprep.subr.mxu1 %v101_v25  ;;  %977 = vmatpush3.msra.mxu0 %v53_v26  ;;  %v82_v44 = vld [vmem:[%s1746_s1 + $0x130] sm:$0xff]  ;;  %v81_v48 = vld [vmem:[%s1746_s1 + $0x128] sm:$0xff]  ;;  %v80_v53 = vld [vmem:[%s1746_s1 + $0x120] sm:$0xff] }
  0x1f   :  { %1012 = vmatpush3.msra.mxu1 %v85_v27  ;;  %978 = vmatprep.subr.mxu0 %v68_v28  ;;  %v43_v54 = vld [vmem:[%s1745_s0] sm:$0xff]  ;;  %v63_v55 = vld [vmem:[%s1746_s1 + $0x98] sm:$0xff]  ;;  %v62_v60 = vld [vmem:[%s1746_s1 + $0x90] sm:$0xff]  ;;  %v287_v28 = vsub.s32 0, %v1301_v42 }
  0x20   :  { %1013 = vmatprep.subr.mxu1 %v100_v29  ;;  %979 = vmatpush3.msra.mxu0 %v52_v33  ;;  %v95_v56 = vld [vmem:[%s1746_s1 + $0x198] sm:$0xff]  ;;  %v116_v57 = vcombine.high %v43_v54, %v43_v54  ;;  %v94_v61 = vld [vmem:[%s1746_s1 + $0x190] sm:$0xff]  ;;  %v123_v62 = vrot.slane %v43_v54, %v122_v51  ;;  %v61_v2 = vld [vmem:[%s1746_s1 + $0x88] sm:$0xff]  ;;  %v350_v29 = vsub.s32 1, %v1301_v42 }
  0x21   :  { %1014 = vmatpush3.msra.mxu1 %v84_v34  ;;  %980 = vmatprep.subr.mxu0 %v67_v35  ;;  %v47_v58 = vld [vmem:[%s1746_s1 + $0x18] sm:$0xff]  ;;  %v46_v63 = vld [vmem:[%s1746_s1 + $0x10] sm:$0xff]  ;;  %v93_v3 = vld [vmem:[%s1746_s1 + $0x188] sm:$0xff] }
  0x22   :  { %1015 = vmatprep.subr.mxu1 %v99_v36  ;;  %981 = vmatpush3.msra.mxu0 %v51_v37  ;;  %v79_v59 = vld [vmem:[%s1746_s1 + $0x118] sm:$0xff]  ;;  %v78_v0 = vld [vmem:[%s1746_s1 + $0x110] sm:$0xff]  ;;  %v130_v1 = vrot.slane %v116_v57, %v122_v51  ;;  %v45_v4 = vld [vmem:[%s1746_s1 + $0x8] sm:$0xff]  ;;  %v131_v8 = vcombine.high %v123_v62, %v123_v62 }
  0x23   :  { %1016 = vmatpush3.msra.mxu1 %v83_v38  ;;  %982 = vmatprep.subr.mxu0 %v66_v39  ;;  %v77_v5 = vld [vmem:[%s1746_s1 + $0x108] sm:$0xff]  ;;  %v60_v6 = vld [vmem:[%s1746_s1 + $0x80] sm:$0xff] }
  0x24   :  { %1017 = vmatprep.subr.mxu1 %v98_v40  ;;  %983 = vmatpush3.msra.mxu0 %v50_v43  ;;  %v92_v7 = vld [vmem:[%s1746_s1 + $0x180] sm:$0xff]  ;;  %v132_v10 = vcombine.high %v130_v1, %v130_v1 }
  0x25   :  { %1018 = vmatpush3.msra.mxu1 %v82_v44  ;;  %984 = vmatprep.subr.mxu0 %v65_v45  ;;  %v44_v9 = vld [vmem:[%s1746_s1] sm:$0xff] }
  0x26   :  { %1019 = vmatprep.subr.mxu1 %v97_v46  ;;  %985 = vmatpush3.msra.mxu0 %v49_v47  ;;  %v76_v11 = vld [vmem:[%s1746_s1 + $0x100] sm:$0xff] }
  0x27   :  { %1020 = vmatpush3.msra.mxu1 %v81_v48  ;;  %986 = vmatprep.subr.mxu0 %v64_v49  ;;  %v958_v14 = vld [vmem:[%s1747_s2] ss:$0 sm:$0xff] }
  0x28   :  { %1021 = vmatprep.subr.mxu1 %v96_v50  ;;  %987 = vmatpush3.msra.mxu0 %v48_v52  ;;  %v1393_v35 = vld [vmem:[%s1750_s5] ss:$0 sm:$0xff] }
  0x29   :  { %1022 = vmatpush3.msra.mxu1 %v80_v53  ;;  %988 = vmatprep.subr.mxu0 %v63_v55  ;;  %v1398_v36 = vld [vmem:[%s1751_s6] ss:$0 sm:$0xff] }
  0x2a   :  { %1023 = vmatprep.subr.mxu1 %v95_v56  ;;  %989 = vmatpush3.msra.mxu0 %v47_v58 }
  0x2b   :  { %1024 = vmatpush3.msra.mxu1 %v79_v59  ;;  %990 = vmatprep.subr.mxu0 %v62_v60 }
  0x2c   :  { %1025 = vmatprep.subr.mxu1 %v94_v61  ;;  %991 = vmatpush3.msra.mxu0 %v46_v63 }
  0x2d   :  { %1026 = vmatpush3.msra.mxu1 %v78_v0  ;;  %992 = vmatprep.subr.mxu0 %v61_v2 }
  0x2e   :  { %1027 = vmatprep.subr.mxu1 %v93_v3  ;;  %993 = vmatpush3.msra.mxu0 %v45_v4 }
  0x2f   :  { %1028 = vmatpush3.msra.mxu1 %v77_v5  ;;  %994 = vmatprep.subr.mxu0 %v60_v6 }
  0x30   :  { %1029 = vmatprep.subr.mxu1 %v92_v7  ;;  %995 = vmatpush3.msra.mxu0 %v44_v9 }
  0x31   :  { %201 = vmatprep.mubr.f32.mxu0 %v131_v8  ;;  %1030 = vmatpush3.msra.mxu1 %v76_v11 }
  0x32   :  { %271 = vmatprep.mubr.f32.mxu1 %v132_v10  ;;  %202 = vmatmul.mubr.f32.vlgmr.msra.gmra.mxu0 %v123_v62 }
  0x33   :  { %272 = vmatmul.mubr.f32.vlgmr.msra.gmra.mxu1 %v130_v1 }
  0xf2   :  { %v996_v12 = vpop.f32.mrf.mxu0 }
  0xf3   :  { %v1031_v13 = vpop.f32.mrf.mxu1 }
  0xf4   :  { %v997_v15 = vpop.f32.mrf.mxu0 }
  0xf5   :  { %v1032_v16 = vpop.f32.mrf.mxu1  ;;  %v998_v17 = vadd.f32 %v997_v15, %v996_v12 }
  0xf6   :  { %v1033_v19 = vadd.f32 %v1032_v16, %v1031_v13 }
  0xf7   :  { %v204_v18 = vadd.f32 %v998_v17, %v958_v14 }
  0xf9   :  { %v274_v20 = vadd.f32 %v1033_v19, %v204_v18 }
  0xfb   :  { %v281_v21 = vmul.f32 100.0, %v274_v20 }
  0xfd   :  { %v1085_v22 = vcvt.f32.s32 %v281_v21  ;;  %v1083_v24 = vand.u32 2147483647, %v281_v21  ;;  %v1088_v26 = vand.u32 2147483648, %v281_v21 }
  0xff   :  { %v1086_v23 = vcvt.s32.f32 %v1085_v22  ;;  %vm1084_vm0 = vcmp.lt.f32.partialorder %v1083_v24, 8388608.0 }
 0x101   :  { %v1087_v25 = vand.u32 2147483647, %v1086_v23 }
 0x103   :  { %v1089_v27 = vor.u32 %v1088_v26, %v1087_v25 }
 0x105   :  { %v1090_v30 = vsel %vm1084_vm0, %v1089_v27, %v281_v21 }
 0x106   :  { %v284_v31 = vmul.f32 0.01, %v1090_v30 }
 0x108   :  { %v288_v33 = vrot.slane %v284_v31, %v287_v28  ;;  %v351_v34 = vrot.slane %v284_v31, %v350_v29 }
 0x10a   :  { %353 = vbcast.lane.b32.xlu1 %v351_v34, 256  ;;  %290 = vbcast.lane.b32.xlu0 %v288_v33, 256 }
 0x10e   :  { %357 = vbcast.lane.b32.xlu1 %v351_v34, 264  ;;  %294 = vbcast.lane.b32.xlu0 %v288_v33, 264 }
 0x112   :  { %361 = vbcast.lane.b32.xlu1 %v351_v34, 272  ;;  %298 = vbcast.lane.b32.xlu0 %v288_v33, 272 }
 0x116   :  { %365 = vbcast.lane.b32.xlu1 %v351_v34, 280  ;;  %302 = vbcast.lane.b32.xlu0 %v288_v33, 280 }
 0x11a   :  { %369 = vbcast.lane.b32.xlu1 %v351_v34, 288  ;;  %306 = vbcast.lane.b32.xlu0 %v288_v33, 288 }
 0x11e   :  { %373 = vbcast.lane.b32.xlu1 %v351_v34, 296  ;;  %310 = vbcast.lane.b32.xlu0 %v288_v33, 296 }
 0x122   :  { %377 = vbcast.lane.b32.xlu1 %v351_v34, 304  ;;  %314 = vbcast.lane.b32.xlu0 %v288_v33, 304 }
 0x126   :  { %381 = vbcast.lane.b32.xlu1 %v351_v34, 312  ;;  %318 = vbcast.lane.b32.xlu0 %v288_v33, 312 }
 0x12a   :  { %385 = vbcast.lane.b32.xlu1 %v351_v34, 320  ;;  %322 = vbcast.lane.b32.xlu0 %v288_v33, 320 }
 0x12e   :  { %389 = vbcast.lane.b32.xlu1 %v351_v34, 328  ;;  %326 = vbcast.lane.b32.xlu0 %v288_v33, 328 }
 0x132   :  { %393 = vbcast.lane.b32.xlu1 %v351_v34, 336  ;;  %330 = vbcast.lane.b32.xlu0 %v288_v33, 336 }
 0x136   :  { %397 = vbcast.lane.b32.xlu1 %v351_v34, 344  ;;  %334 = vbcast.lane.b32.xlu0 %v288_v33, 344 }
 0x13a   :  { %401 = vbcast.lane.b32.xlu1 %v351_v34, 352  ;;  %338 = vbcast.lane.b32.xlu0 %v288_v33, 352 }
 0x13e   :  { %405 = vbcast.lane.b32.xlu1 %v351_v34, 360  ;;  %342 = vbcast.lane.b32.xlu0 %v288_v33, 360 }
 0x142   :  { %409 = vbcast.lane.b32.xlu1 %v351_v34, 368  ;;  %346 = vbcast.lane.b32.xlu0 %v288_v33, 368 }
 0x17c   :  { %v354_v37 = vpop.permute.xlu1 %353  ;;  %v291_v38 = vpop.permute.xlu0 %290 }
 0x17d   :  { %vm432_vm2 = vcmp.ge.f32.partialorder %v354_v37, %v1393_v35  ;;  %vm417_vm3 = vcmp.ge.f32.partialorder %v291_v38, %v1393_v35 }
 0x17e   :  { %v453_v39 = vsel %vm417_vm3, %v1398_v36, 0.0  ;;  %v468_v44 = vsel %vm432_vm2, %v1398_v36, 0.0 }
 0x17f   :  { %v484_v40 = vsel %vm483_vm1, %v453_v39, 0.0  ;;  %v529_v46 = vsel %vm483_vm1, %v468_v44, 0.0 }
 0x180   :  { %v358_v41 = vpop.permute.xlu1 %357  ;;  %485 = vadd.xlane.f32.xlu0 %v484_v40  ;;  %v295_v43 = vpop.permute.xlu0 %294 }
 0x181   :  { %vm433_vm4 = vcmp.ge.f32.partialorder %v358_v41, %v1393_v35  ;;  %vm418_vm5 = vcmp.ge.f32.partialorder %v295_v43, %v1393_v35 }
 0x182   :  { %v454_v45 = vsel %vm418_vm5, %v1398_v36, 0.0  ;;  %v469_v50 = vsel %vm433_vm4, %v1398_v36, 0.0 }
 0x183   :  { %v487_v47 = vsel %vm483_vm1, %v454_v45, 0.0  ;;  %v532_v52 = vsel %vm483_vm1, %v469_v50, 0.0 }
 0x184   :  { %v362_v48 = vpop.permute.xlu1 %361  ;;  %530 = vadd.xlane.f32.xlu0 %v529_v46  ;;  %488 = vadd.xlane.f32.xlu1 %v487_v47  ;;  %v299_v49 = vpop.permute.xlu0 %298 }
 0x185   :  { %vm434_vm6 = vcmp.ge.f32.partialorder %v362_v48, %v1393_v35  ;;  %vm419_vm7 = vcmp.ge.f32.partialorder %v299_v49, %v1393_v35 }
 0x186   :  { %v455_v51 = vsel %vm419_vm7, %v1398_v36, 0.0  ;;  %v470_v56 = vsel %vm434_vm6, %v1398_v36, 0.0 }
 0x187   :  { %v490_v53 = vsel %vm483_vm1, %v455_v51, 0.0  ;;  %v535_v58 = vsel %vm483_vm1, %v470_v56, 0.0 }
 0x188   :  { %v366_v54 = vpop.permute.xlu1 %365  ;;  %533 = vadd.xlane.f32.xlu0 %v532_v52  ;;  %491 = vadd.xlane.f32.xlu1 %v490_v53  ;;  %v303_v55 = vpop.permute.xlu0 %302 }
 0x189   :  { %vm435_vm8 = vcmp.ge.f32.partialorder %v366_v54, %v1393_v35  ;;  %vm420_vm9 = vcmp.ge.f32.partialorder %v303_v55, %v1393_v35 }
 0x18a   :  { %v456_v57 = vsel %vm420_vm9, %v1398_v36, 0.0  ;;  %v471_v62 = vsel %vm435_vm8, %v1398_v36, 0.0 }
 0x18b   :  { %v493_v59 = vsel %vm483_vm1, %v456_v57, 0.0  ;;  %v538_v0 = vsel %vm483_vm1, %v471_v62, 0.0  ;;  %v650_v57 = vld [vmem:[%s1748_s3 + $0x70] sm:$0xff] }
 0x18c   :  { %v370_v60 = vpop.permute.xlu1 %369  ;;  %536 = vadd.xlane.f32.xlu0 %v535_v58  ;;  %494 = vadd.xlane.f32.xlu1 %v493_v59  ;;  %v307_v61 = vpop.permute.xlu0 %306  ;;  %v1135_v58 = vmov 0.0  }
 0x18d   :  { %vm436_vm10 = vcmp.ge.f32.partialorder %v370_v60, %v1393_v35  ;;  %vm421_vm11 = vcmp.ge.f32.partialorder %v307_v61, %v1393_v35  ;;  %1050 = vmatprep.subr.mxu0 %v1135_v58  ;;  %v649_v60 = vld [vmem:[%s1748_s3 + $0x68] sm:$0xff] }
 0x18e   :  { %v457_v63 = vsel %vm421_vm11, %v1398_v36, 0.0  ;;  %v472_v4 = vsel %vm436_vm10, %v1398_v36, 0.0  ;;  %1051 = vmatpush3.msra.mxu0 %v650_v57 }
 0x18f   :  { %v496_v1 = vsel %vm483_vm1, %v457_v63, 0.0  ;;  %v541_v6 = vsel %vm483_vm1, %v472_v4, 0.0  ;;  %1052 = vmatprep.subr.mxu0 %v1135_v58 }
 0x190   :  { %v374_v2 = vpop.permute.xlu1 %373  ;;  %539 = vadd.xlane.f32.xlu0 %v538_v0  ;;  %497 = vadd.xlane.f32.xlu1 %v496_v1  ;;  %v311_v3 = vpop.permute.xlu0 %310 }
 0x191   :  { %vm437_vm12 = vcmp.ge.f32.partialorder %v374_v2, %v1393_v35  ;;  %vm422_vm13 = vcmp.ge.f32.partialorder %v311_v3, %v1393_v35  ;;  %v648_v2 = vld [vmem:[%s1748_s3 + $0x60] sm:$0xff]  ;;  %1053 = vmatpush3.msra.mxu0 %v649_v60 }
 0x192   :  { %v458_v5 = vsel %vm422_vm13, %v1398_v36, 0.0  ;;  %v473_v10 = vsel %vm437_vm12, %v1398_v36, 0.0  ;;  %1054 = vmatprep.subr.mxu0 %v1135_v58 }
 0x193   :  { %v499_v7 = vsel %vm483_vm1, %v458_v5, 0.0  ;;  %v544_v12 = vsel %vm483_vm1, %v473_v10, 0.0  ;;  %1055 = vmatpush3.msra.mxu0 %v648_v2  ;;  %v643_v10 = vld [vmem:[%s1748_s3 + $0x38] sm:$0xff] }
 0x194   :  { %v378_v8 = vpop.permute.xlu1 %377  ;;  %542 = vadd.xlane.f32.xlu0 %v541_v6  ;;  %500 = vadd.xlane.f32.xlu1 %v499_v7  ;;  %v315_v9 = vpop.permute.xlu0 %314  ;;  %v647_v6 = vld [vmem:[%s1748_s3 + $0x58] sm:$0xff] }
 0x195   :  { %vm438_vm14 = vcmp.ge.f32.partialorder %v378_v8, %v1393_v35  ;;  %vm423_vm15 = vcmp.ge.f32.partialorder %v315_v9, %v1393_v35  ;;  %1056 = vmatprep.subr.mxu0 %v1135_v58  ;;  %v645_v9 = vld [vmem:[%s1748_s3 + $0x48] sm:$0xff] }
 0x196   :  { %v459_v11 = vsel %vm423_vm15, %v1398_v36, 0.0  ;;  %v474_v16 = vsel %vm438_vm14, %v1398_v36, 0.0  ;;  %1057 = vmatpush3.msra.mxu0 %v647_v6 }
 0x197   :  { %v502_v13 = vsel %vm483_vm1, %v459_v11, 0.0  ;;  %v547_v18 = vsel %vm483_vm1, %v474_v16, 0.0  ;;  %1058 = vmatprep.subr.mxu0 %v1135_v58  ;;  %v642_v11 = vld [vmem:[%s1748_s3 + $0x30] sm:$0xff]  ;;  %v637_v16 = vld [vmem:[%s1748_s3 + $0x8] sm:$0xff] }
 0x198   :  { %v382_v14 = vpop.permute.xlu1 %381  ;;  %545 = vadd.xlane.f32.xlu0 %v544_v12  ;;  %503 = vadd.xlane.f32.xlu1 %v502_v13  ;;  %v319_v15 = vpop.permute.xlu0 %318  ;;  %v641_v12 = vld [vmem:[%s1748_s3 + $0x28] sm:$0xff]  ;;  %v640_v13 = vld [vmem:[%s1748_s3 + $0x20] sm:$0xff] }
 0x199   :  { %vm439_vm0 = vcmp.ge.f32.partialorder %v382_v14, %v1393_v35  ;;  %vm424_vm2 = vcmp.ge.f32.partialorder %v319_v15, %v1393_v35  ;;  %v639_v14 = vld [vmem:[%s1748_s3 + $0x18] sm:$0xff]  ;;  %v638_v15 = vld [vmem:[%s1748_s3 + $0x10] sm:$0xff] }
 0x19a   :  { %v460_v17 = vsel %vm424_vm2, %v1398_v36, 0.0  ;;  %v475_v22 = vsel %vm439_vm0, %v1398_v36, 0.0  ;;  %vm699_vm2 = vcmask 130112  }
 0x19b   :  { %v505_v19 = vsel %vm483_vm1, %v460_v17, 0.0  ;;  %v550_v24 = vsel %vm483_vm1, %v475_v22, 0.0  ;;  %v636_v17 = vld [vmem:[%s1748_s3] sm:$0xff] }
 0x19c   :  { %v386_v20 = vpop.permute.xlu1 %385  ;;  %548 = vadd.xlane.f32.xlu0 %v547_v18  ;;  %506 = vadd.xlane.f32.xlu1 %v505_v19  ;;  %v323_v21 = vpop.permute.xlu0 %322 }
 0x19d   :  { %vm440_vm3 = vcmp.ge.f32.partialorder %v386_v20, %v1393_v35  ;;  %vm425_vm4 = vcmp.ge.f32.partialorder %v323_v21, %v1393_v35 }
 0x19e   :  { %v461_v23 = vsel %vm425_vm4, %v1398_v36, 0.0  ;;  %v476_v28 = vsel %vm440_vm3, %v1398_v36, 0.0  ;;  %vm706_vm3 = vcmask 195712   ;;  %vm713_vm4 = vcmask 261312  }
 0x19f   :  { %v508_v25 = vsel %vm483_vm1, %v461_v23, 0.0  ;;  %v553_v30 = vsel %vm483_vm1, %v476_v28, 0.0 }
 0x1a0   :  { %v390_v26 = vpop.permute.xlu1 %389  ;;  %551 = vadd.xlane.f32.xlu0 %v550_v24  ;;  %509 = vadd.xlane.f32.xlu1 %v508_v25  ;;  %v327_v27 = vpop.permute.xlu0 %326 }
 0x1a1   :  { %vm441_vm5 = vcmp.ge.f32.partialorder %v390_v26, %v1393_v35  ;;  %vm426_vm6 = vcmp.ge.f32.partialorder %v327_v27, %v1393_v35 }
 0x1a2   :  { %v462_v29 = vsel %vm426_vm6, %v1398_v36, 0.0  ;;  %v477_v37 = vsel %vm441_vm5, %v1398_v36, 0.0  ;;  %vm720_vm5 = vcmask 326912   ;;  %vm727_vm6 = vcmask 392512  }
 0x1a3   :  { %v511_v31 = vsel %vm483_vm1, %v462_v29, 0.0  ;;  %v556_v39 = vsel %vm483_vm1, %v477_v37, 0.0 }
 0x1a4   :  { %v394_v33 = vpop.permute.xlu1 %393  ;;  %554 = vadd.xlane.f32.xlu0 %v553_v30  ;;  %512 = vadd.xlane.f32.xlu1 %v511_v31  ;;  %v331_v34 = vpop.permute.xlu0 %330  ;;  %v1540_v31 = vand.u32 127, %v120_v32 }
 0x1a5   :  { %vm442_vm7 = vcmp.ge.f32.partialorder %v394_v33, %v1393_v35  ;;  %vm427_vm8 = vcmp.ge.f32.partialorder %v331_v34, %v1393_v35 }
 0x1a6   :  { %v463_v38 = vsel %vm427_vm8, %v1398_v36, 0.0  ;;  %v478_v44 = vsel %vm442_vm7, %v1398_v36, 0.0  ;;  %v694_v33 = vadd.s32 4294967288, %v1540_v31  ;;  %v701_v34 = vadd.s32 4294967280, %v1540_v31 }
 0x1a7   :  { %v514_v40 = vsel %vm483_vm1, %v463_v38, 0.0  ;;  %v559_v46 = vsel %vm483_vm1, %v478_v44, 0.0  ;;  %v708_v37 = vadd.s32 4294967272, %v1540_v31  ;;  %v715_v38 = vadd.s32 4294967264, %v1540_v31 }
 0x1a8   :  { %v398_v41 = vpop.permute.xlu1 %397  ;;  %557 = vadd.xlane.f32.xlu0 %v556_v39  ;;  %515 = vadd.xlane.f32.xlu1 %v514_v40  ;;  %v335_v43 = vpop.permute.xlu0 %334  ;;  %v1554_v32 = vsub.s32 %v1540_v31, %v1301_v42  ;;  %v736_v44 = vadd.s32 4294967240, %v1540_v31  ;;  %v750_v57 = vadd.s32 4294967224, %v1540_v31  ;;  %v771_v2 = vadd.s32 4294967200, %v1540_v31 }
 0x1a9   :  { %vm443_vm9 = vcmp.ge.f32.partialorder %v398_v41, %v1393_v35  ;;  %vm428_vm10 = vcmp.ge.f32.partialorder %v335_v43, %v1393_v35  ;;  %v722_v41 = vadd.s32 4294967256, %v1540_v31  ;;  %v729_v43 = vadd.s32 4294967248, %v1540_v31 }
 0x1aa   :  { %v464_v45 = vsel %vm428_vm10, %v1398_v36, 0.0  ;;  %v479_v50 = vsel %vm443_vm9, %v1398_v36, 0.0  ;;  %vm734_vm7 = vcmask 458112   ;;  %vm741_vm8 = vcmask 523712  }
 0x1ab   :  { %v517_v47 = vsel %vm483_vm1, %v464_v45, 0.0  ;;  %v562_v52 = vsel %vm483_vm1, %v479_v50, 0.0  ;;  %v1557_v45 = vstv %s959_s27  ;;  %v1567_v50 = vsub.s32 %v701_v34, %v1301_v42 }
 0x1ac   :  { %v402_v48 = vpop.permute.xlu1 %401  ;;  %560 = vadd.xlane.f32.xlu0 %v559_v46  ;;  %518 = vadd.xlane.f32.xlu1 %v517_v47  ;;  %v339_v49 = vpop.permute.xlu0 %338  ;;  %v1559_v46 = vstv %s277_s26  ;;  %v1562_v47 = vsub.s32 %v694_v33, %v1301_v42  ;;  %vm748_vm9 = vcmask 589312   ;;  %vm755_vm10 = vcmask 654912  }
 0x1ad   :  { %vm444_vm11 = vcmp.ge.f32.partialorder %v402_v48, %v1393_v35  ;;  %vm429_vm12 = vcmp.ge.f32.partialorder %v339_v49, %v1393_v35  ;;  %v743_v48 = vadd.s32 4294967232, %v1540_v31 }
 0x1ae   :  { %v465_v51 = vsel %vm429_vm12, %v1398_v36, 0.0  ;;  %v480_v56 = vsel %vm444_vm11, %v1398_v36, 0.0  ;;  %vm762_vm11 = vcmask 720512   ;;  %vm769_vm12 = vcmask 786112  }
 0x1af   :  { %v520_v53 = vsel %vm483_vm1, %v465_v51, 0.0  ;;  %v565_v61 = vsel %vm483_vm1, %v480_v56, 0.0  ;;  %v1570_v51 = vsub.s32 %v708_v37, %v1301_v42  ;;  %v1583_v56 = vsub.s32 %v729_v43, %v1301_v42 }
 0x1b0   :  { %v406_v54 = vpop.permute.xlu1 %405  ;;  %563 = vadd.xlane.f32.xlu0 %v562_v52  ;;  %521 = vadd.xlane.f32.xlu1 %v520_v53  ;;  %v343_v55 = vpop.permute.xlu0 %342  ;;  %v1573_v52 = vsub.s32 %v715_v38, %v1301_v42  ;;  %v785_v38 = vadd.s32 4294967184, %v1540_v31 }
 0x1b1   :  { %vm445_vm13 = vcmp.ge.f32.partialorder %v406_v54, %v1393_v35  ;;  %vm430_vm14 = vcmp.ge.f32.partialorder %v343_v55, %v1393_v35  ;;  %v1580_v55 = vsub.s32 %v722_v41, %v1301_v42 }
 0x1b2   :  { %v466_v59 = vsel %vm430_vm14, %v1398_v36, 0.0  ;;  %v481_v1 = vsel %vm445_vm13, %v1398_v36, 0.0  ;;  %vm776_vm13 = vcmask 851712   ;;  %vm783_vm14 = vcmask 917312  }
 0x1b3   :  { %v523_v62 = vsel %vm483_vm1, %v466_v59, 0.0  ;;  %v568_v4 = vsel %vm483_vm1, %v481_v1, 0.0  ;;  %v1596_v1 = vsub.s32 %v743_v48, %v1301_v42 }
 0x1b4   :  { %v410_v63 = vpop.permute.xlu1 %409  ;;  %566 = vadd.xlane.f32.xlu0 %v565_v61  ;;  %524 = vadd.xlane.f32.xlu1 %v523_v62  ;;  %v347_v0 = vpop.permute.xlu0 %346  ;;  %v1590_v61 = vsub.s32 %v736_v44, %v1301_v42  ;;  %v764_v62 = vadd.s32 4294967208, %v1540_v31 }
 0x1b5   :  { %vm446_vm15 = vcmp.ge.f32.partialorder %v410_v63, %v1393_v35  ;;  %vm431_vm0 = vcmp.ge.f32.partialorder %v347_v0, %v1393_v35  ;;  %v646_v35 = vld [vmem:[%s1748_s3 + $0x50] sm:$0xff] }
 0x1b6   :  { %v467_v3 = vsel %vm431_vm0, %v1398_v36, 0.0  ;;  %v482_v7 = vsel %vm446_vm15, %v1398_v36, 0.0  ;;  %1059 = vmatpush3.msra.mxu0 %v646_v35  ;;  %v644_v36 = vld [vmem:[%s1748_s3 + $0x40] sm:$0xff]  ;;  %vm790_vm15 = vcmask 982912   ;;  %vm866_vm0 = vcmask 1041409  }
 0x1b7   :  { %v526_v5 = vsel %vm483_vm1, %v467_v3, 0.0  ;;  %v571_v8 = vsel %vm483_vm1, %v482_v7, 0.0  ;;  %1060 = vmatprep.subr.mxu0 %v1135_v58  ;;  %vm1136_vm1 = vmmov 0  }
 0x1b8   :  { %569 = vadd.xlane.f32.xlu0 %v568_v4  ;;  %527 = vadd.xlane.f32.xlu1 %v526_v5 }
 0x1b9   :  { %1061 = vmatpush3.msra.mxu0 %v645_v9  ;;  %1080 = vmatprep.mubr.msk.f32.mxu0 %vm1136_vm1, %v1135_v58  ;;  %vm868_vm1 = vcmask 982016  }
 0x1ba   :  { %1062 = vmatprep.subr.mxu0 %v1135_v58 }
 0x1bb   :  { %1063 = vmatpush3.msra.mxu0 %v644_v36  ;;  %v1608_v36 = vsub.s32 %v750_v57, %v1301_v42 }
 0x1bc   :  { %572 = vadd.xlane.f32.xlu0 %v571_v8  ;;  %1064 = vmatprep.subr.mxu0 %v1135_v58 }
 0x1bd   :  { %1065 = vmatpush3.msra.mxu0 %v643_v10 }
 0x1be   :  { %1066 = vmatprep.subr.mxu0 %v1135_v58 }
 0x1bf   :  { %1067 = vmatpush3.msra.mxu0 %v642_v11 }
 0x1c0   :  { %1068 = vmatprep.subr.mxu0 %v1135_v58 }
 0x1c1   :  { %1069 = vmatpush3.msra.mxu0 %v641_v12 }
 0x1c2   :  { %1070 = vmatprep.subr.mxu0 %v1135_v58 }
 0x1c3   :  { %1071 = vmatpush3.msra.mxu0 %v640_v13 }
 0x1c4   :  { %1072 = vmatprep.subr.mxu0 %v1135_v58 }
 0x1c5   :  { %1073 = vmatpush3.msra.mxu0 %v639_v14  ;;  %v1617_v14 = vsub.s32 %v764_v62, %v1301_v42 }
 0x1c6   :  { %1074 = vmatprep.subr.mxu0 %v1135_v58 }
 0x1c7   :  { %1075 = vmatpush3.msra.mxu0 %v638_v15 }
 0x1c8   :  { %1076 = vmatprep.subr.mxu0 %v1135_v58 }
 0x1c9   :  { %1077 = vmatpush3.msra.mxu0 %v637_v16 }
 0x1ca   :  { %1078 = vmatprep.subr.mxu0 %v1135_v58  ;;  %v757_v58 = vadd.s32 4294967216, %v1540_v31 }
 0x1cb   :  { %1079 = vmatpush3.msra.mxu0 %v636_v17  ;;  %v1622_v17 = vsub.s32 %v771_v2, %v1301_v42 }
 0x1cc   :  { %v1611_v10 = vsub.s32 %v757_v58, %v1301_v42 }
 0x209   :  { %v486_v18 = vpop.xlane.xlu0 %485 }
 0x20a   :  { %v575_v59 = vadd.f32 %v1557_v45, %v486_v18  ;;  %v778_v18 = vadd.s32 4294967192, %v1540_v31 }
 0x20c   :  { %v606_v11 = vmul.f32 %v1559_v46, %v575_v59 }
 0x20d   :  { %v489_v19 = vpop.xlane.xlu1 %488  ;;  %v531_v20 = vpop.xlane.xlu0 %530 }
 0x20e   :  { %v576_v49 = vadd.f32 %v1557_v45, %v489_v19  ;;  %v590_v4 = vadd.f32 %v1557_v45, %v531_v20  ;;  %v693_v33 = vrot.slane %v606_v11, %v1554_v32 }
 0x210   :  { %v607_v3 = vmul.f32 %v1559_v46, %v576_v49  ;;  %v621_v20 = vmul.f32 %v1559_v46, %v590_v4 }
 0x211   :  { %v492_v21 = vpop.xlane.xlu1 %491  ;;  %v534_v22 = vpop.xlane.xlu0 %533 }
 0x212   :  { %v577_v60 = vadd.f32 %v1557_v45, %v492_v21  ;;  %v591_v63 = vadd.f32 %v1557_v45, %v534_v22  ;;  %v698_v19 = vrot.slane %v607_v3, %v1562_v47  ;;  %v795_v48 = vrot.slane %v621_v20, %v1554_v32 }
 0x214   :  { %v608_v12 = vmul.f32 %v1559_v46, %v577_v60  ;;  %v622_v15 = vmul.f32 %v1559_v46, %v591_v63 }
 0x215   :  { %v495_v23 = vpop.xlane.xlu1 %494  ;;  %v537_v24 = vpop.xlane.xlu0 %536 }
 0x216   :  { %v578_v0 = vadd.f32 %v1557_v45, %v495_v23  ;;  %v592_v5 = vadd.f32 %v1557_v45, %v537_v24  ;;  %v705_v34 = vrot.slane %v608_v12, %v1567_v50  ;;  %v799_v41 = vrot.slane %v622_v15, %v1562_v47 }
 0x218   :  { %v609_v16 = vmul.f32 %v1559_v46, %v578_v0  ;;  %v623_v21 = vmul.f32 %v1559_v46, %v592_v5  ;;  %v800_v0 = vsel %vm699_vm2, %v799_v41, %v795_v48 }
 0x219   :  { %v498_v25 = vpop.xlane.xlu1 %497  ;;  %v540_v26 = vpop.xlane.xlu0 %539 }
 0x21a   :  { %v579_v6 = vadd.f32 %v1557_v45, %v498_v25  ;;  %v593_v8 = vadd.f32 %v1557_v45, %v540_v26  ;;  %v712_v43 = vrot.slane %v609_v16, %v1570_v51  ;;  %v804_v49 = vrot.slane %v623_v21, %v1567_v50 }
 0x21b   :  { %v1659_v50 = vsub.s32 %v785_v38, %v1301_v42 }
 0x21c   :  { %v610_v22 = vmul.f32 %v1559_v46, %v579_v6  ;;  %v624_v25 = vmul.f32 %v1559_v46, %v593_v8  ;;  %v805_v4 = vsel %vm706_vm3, %v804_v49, %v800_v0 }
 0x21d   :  { %v501_v27 = vpop.xlane.xlu1 %500  ;;  %v543_v28 = vpop.xlane.xlu0 %542 }
 0x21e   :  { %v580_v9 = vadd.f32 %v1557_v45, %v501_v27  ;;  %v594_v13 = vadd.f32 %v1557_v45, %v543_v28  ;;  %v719_v57 = vrot.slane %v610_v22, %v1573_v52  ;;  %v809_v47 = vrot.slane %v624_v25, %v1570_v51 }
 0x220   :  { %v611_v26 = vmul.f32 %v1559_v46, %v580_v9  ;;  %v625_v37 = vmul.f32 %v1559_v46, %v594_v13  ;;  %v810_v8 = vsel %vm713_vm4, %v809_v47, %v805_v4 }
 0x221   :  { %v1535_v29 = vpop.xlane.xlu1 %503  ;;  %v1537_v30 = vpop.xlane.xlu0 %545 }
 0x222   :  { %v581_v27 = vadd.f32 %v1557_v45, %v1535_v29  ;;  %v595_v28 = vadd.f32 %v1557_v45, %v1537_v30  ;;  %v1644_v29 = vsub.s32 %v778_v18, %v1301_v42  ;;  %v700_v30 = vsel %vm699_vm2, %v698_v19, %v693_v33 }
 0x223   :  { %v726_v59 = vrot.slane %v611_v26, %v1580_v55  ;;  %v707_v62 = vsel %vm706_vm3, %v705_v34, %v700_v30  ;;  %v814_v63 = vrot.slane %v625_v37, %v1573_v52  ;;  %vm941_vm2 = vcmask 74752  }
 0x224   :  { %v626_v60 = vmul.f32 %v1559_v46, %v595_v28  ;;  %v714_v51 = vsel %vm713_vm4, %v712_v43, %v707_v62 }
 0x225   :  { %v1546_v39 = vpop.xlane.xlu1 %506  ;;  %v1548_v40 = vpop.xlane.xlu0 %548  ;;  %v721_v5 = vsel %vm720_vm5, %v719_v57, %v714_v51 }
 0x226   :  { %v582_v44 = vadd.f32 %v1557_v45, %v1546_v39  ;;  %v612_v39 = vmul.f32 %v1559_v46, %v581_v27  ;;  %v596_v32 = vadd.f32 %v1557_v45, %v1548_v40  ;;  %v728_v9 = vsel %vm727_vm6, %v726_v59, %v721_v5 }
 0x227   :  { %v819_v12 = vrot.slane %v626_v60, %v1580_v55 }
 0x228   :  { %v613_v2 = vmul.f32 %v1559_v46, %v582_v44  ;;  %v733_v11 = vrot.slane %v612_v39, %v1583_v56  ;;  %v627_v13 = vmul.f32 %v1559_v46, %v596_v32 }
 0x229   :  { %v1575_v53 = vpop.xlane.xlu1 %509  ;;  %v1577_v54 = vpop.xlane.xlu0 %551 }
 0x22a   :  { %v583_v3 = vadd.f32 %v1557_v45, %v1575_v53  ;;  %v597_v52 = vadd.f32 %v1557_v45, %v1577_v54  ;;  %v815_v53 = vsel %vm720_vm5, %v814_v63, %v810_v8  ;;  %v740_v15 = vrot.slane %v613_v2, %v1590_v61 }
 0x22b   :  { %v735_v25 = vsel %vm734_vm7, %v733_v11, %v728_v9  ;;  %v820_v26 = vsel %vm727_vm6, %v819_v12, %v815_v53  ;;  %v824_v28 = vrot.slane %v627_v13, %v1583_v56 }
 0x22c   :  { %v614_v16 = vmul.f32 %v1559_v46, %v583_v3  ;;  %v628_v55 = vmul.f32 %v1559_v46, %v597_v52  ;;  %v742_v38 = vsel %vm741_vm8, %v740_v15, %v735_v25 }
 0x22d   :  { %v1603_v7 = vpop.xlane.xlu1 %512  ;;  %v555_v35 = vpop.xlane.xlu0 %554  ;;  %v825_v60 = vsel %vm734_vm7, %v824_v28, %v820_v26 }
 0x22e   :  { %v598_v40 = vadd.f32 %v1557_v45, %v555_v35  ;;  %v584_v54 = vadd.f32 %v1557_v45, %v1603_v7  ;;  %v747_v41 = vrot.slane %v614_v16, %v1596_v1  ;;  %v829_v30 = vrot.slane %v628_v55, %v1590_v61  ;;  %v962_v55 = vld [vmem:[%s1749_s4] ss:$0 sm:$0xff] }
 0x230   :  { %v629_v20 = vmul.f32 %v1559_v46, %v598_v40  ;;  %v615_v33 = vmul.f32 %v1559_v46, %v584_v54  ;;  %v749_v2 = vsel %vm748_vm9, %v747_v41, %v742_v38  ;;  %v830_v3 = vsel %vm741_vm8, %v829_v30, %v825_v60 }
 0x231   :  { %v516_v23 = vpop.xlane.xlu1 %515  ;;  %v558_v24 = vpop.xlane.xlu0 %557 }
 0x232   :  { %v599_v35 = vadd.f32 %v1557_v45, %v558_v24  ;;  %v585_v18 = vadd.f32 %v1557_v45, %v516_v23  ;;  %v834_v56 = vrot.slane %v629_v20, %v1596_v1  ;;  %v754_v61 = vrot.slane %v615_v33, %v1608_v36 }
 0x234   :  { %v630_v34 = vmul.f32 %v1559_v46, %v599_v35  ;;  %v616_v43 = vmul.f32 %v1559_v46, %v585_v18 }
 0x235   :  { %v519_v31 = vpop.xlane.xlu1 %518  ;;  %v561_v58 = vpop.xlane.xlu0 %560 }
 0x236   :  { %v600_v19 = vadd.f32 %v1557_v45, %v561_v58  ;;  %v586_v21 = vadd.f32 %v1557_v45, %v519_v31  ;;  %v839_v1 = vrot.slane %v630_v34, %v1608_v36  ;;  %v761_v63 = vrot.slane %v616_v43, %v1611_v10 }
 0x237   :  { %v835_v36 = vsel %vm748_vm9, %v834_v56, %v830_v3 }
 0x238   :  { %v631_v44 = vmul.f32 %v1559_v46, %v600_v19  ;;  %v617_v48 = vmul.f32 %v1559_v46, %v586_v21  ;;  %v840_v8 = vsel %vm755_vm10, %v839_v1, %v835_v36 }
 0x239   :  { %v522_v42 = vpop.xlane.xlu1 %521  ;;  %v564_v6 = vpop.xlane.xlu0 %563 }
 0x23a   :  { %v601_v7 = vadd.f32 %v1557_v45, %v564_v6  ;;  %v587_v23 = vadd.f32 %v1557_v45, %v522_v42  ;;  %v844_v32 = vrot.slane %v631_v44, %v1611_v10  ;;  %v768_v4 = vrot.slane %v617_v48, %v1617_v14 }
 0x23b   :  { %v756_v6 = vsel %vm755_vm10, %v754_v61, %v749_v2 }
 0x23c   :  { %v632_v49 = vmul.f32 %v1559_v46, %v601_v7  ;;  %v618_v58 = vmul.f32 %v1559_v46, %v587_v23  ;;  %v763_v12 = vsel %vm762_vm11, %v761_v63, %v756_v6 }
 0x23d   :  { %v525_v22 = vpop.xlane.xlu1 %524  ;;  %v567_v24 = vpop.xlane.xlu0 %566 }
 0x23e   :  { %v602_v27 = vadd.f32 %v1557_v45, %v567_v24  ;;  %v588_v37 = vadd.f32 %v1557_v45, %v525_v22  ;;  %v849_v5 = vrot.slane %v632_v49, %v1617_v14  ;;  %v775_v40 = vrot.slane %v618_v58, %v1622_v17 }
 0x23f   :  { %v845_v14 = vsel %vm762_vm11, %v844_v32, %v840_v8 }
 0x240   :  { %v633_v47 = vmul.f32 %v1559_v46, %v602_v27  ;;  %v619_v62 = vmul.f32 %v1559_v46, %v588_v37 }
 0x241   :  { %v528_v57 = vpop.xlane.xlu1 %527  ;;  %v570_v31 = vpop.xlane.xlu0 %569 }
 0x242   :  { %v589_v59 = vadd.f32 %v1557_v45, %v528_v57  ;;  %v603_v39 = vadd.f32 %v1557_v45, %v570_v31  ;;  %v854_v42 = vrot.slane %v633_v47, %v1622_v17  ;;  %v782_v9 = vrot.slane %v619_v62, %v1644_v29 }
 0x243   :  { %v770_v17 = vsel %vm769_vm12, %v768_v4, %v763_v12 }
 0x244   :  { %v620_v0 = vmul.f32 %v1559_v46, %v589_v59  ;;  %v634_v51 = vmul.f32 %v1559_v46, %v603_v39  ;;  %v777_v54 = vsel %vm776_vm13, %v775_v40, %v770_v17 }
 0x245   :  { %v573_v52 = vpop.xlane.xlu0 %572 }
 0x246   :  { %v604_v10 = vadd.f32 %v1557_v45, %v573_v52  ;;  %v859_v11 = vrot.slane %v634_v51, %v1644_v29  ;;  %v789_v53 = vrot.slane %v620_v0, %v1659_v50  ;;  %v850_v45 = vsel %vm769_vm12, %v849_v5, %v845_v14 }
 0x247   :  { %v855_v35 = vsel %vm776_vm13, %v854_v42, %v850_v45  ;;  %v784_v29 = vsel %vm783_vm14, %v782_v9, %v777_v54 }
 0x248   :  { %v635_v13 = vmul.f32 %v1559_v46, %v604_v10  ;;  %v860_v16 = vsel %vm783_vm14, %v859_v11, %v855_v35  ;;  %v791_v18 = vsel %vm790_vm15, %v789_v53, %v784_v29 }
 0x24a   :  { %v864_v15 = vrot.slane %v635_v13, %v1659_v50 }
 0x24c   :  { %v865_v19 = vsel %vm790_vm15, %v864_v15, %v860_v16 }
 0x24d   :  { %v867_v46 = vsel %vm866_vm0, %v865_v19, %v791_v18 }
 0x24e   :  { %1081 = vmatmul.mubr.msk.f32.vlgmr.msra.gmra.mxu0 %vm868_vm1, %v867_v46 }
 0x30e   :  { %v937_v20 = vpop.f32.mrf.mxu0 }
 0x30f   :  { %v938_v21 = vadd.f32 %v962_v55, %v937_v20 }
 0x310   :  { %v1082_v50 = vpop.f32.mrf.mxu0 }
 0x311   :  { %942 = vst.msk [vmem:[#allocation5] sm:$0x3] %vm941_vm2, %v938_v21 }
 0x312   :  { %1120 = shalt.err (!%p1117_p9)
}
 0x313   :  { %952 = dma.vmem_to_hbm [thread:$0]  %s950_s30, 32, %s1753_s8, [#allocation3]  }
 0x314   :  { %1131 = dma.done.wait [#allocation3], 32  }
 0x315   :  { %1132 = vsyncadd [#allocation3], 4294967264 }
 0x316   :  { %956 = vsyncpa [#allocation3], 1 }
 0x317   :  { %957 = vsyncpa [#allocation4], 1 }

// kernel: modified_cnn_forward.4
= control target key start
LH: loop header
LB: loop body
LE: loop exit
PB: predicated region body
PF: predicated region fallthrough
CT: control target
= control target key end

     0   :  { %11 = vsyncpa [#allocation3], 0  ;;  %s4841_s0 = inlined_call_operand.vmem [shape: f32[128,144], index: 0, kind: input, shape index: {}]   ;;  %s4842_s1 = inlined_call_operand.vmem [shape: f32[144,32], index: 1, kind: input, shape index: {}]   ;;  %s4843_s2 = inlined_call_operand.vmem [shape: f32[1,32], index: 2, kind: input, shape index: {}]   ;;  %s4844_s3 = inlined_call_operand.vmem [shape: f32[1,127], index: 3, kind: input, shape index: {}]   ;;  %s4845_s4 = inlined_call_operand.vmem [shape: f32[1,127], index: 4, kind: input, shape index: {}]   ;;  %s4846_s5 = inlined_call_operand.vmem [shape: f32[2], index: 5, kind: input, shape index: {}]   ;;  %s4847_s6 = inlined_call_operand.vmem [shape: f32[32,32], index: 6, kind: output, shape index: {}]  }
   0x1   :  { %s28_s23 = sshll.u32 %s4846_s5, 4  ;;  %s29_s23 = int_to_ptr.vmem [resolvable:$true] %s28_s23 }
   0x2   :  { %s2740_s24 = scalar_lea.vmem %s29_s23, 16  ;;  %p2745_p1 = scmp.lt.s32.totalorder %s29_s23, %s29_s23 }
   0x3   :  { %p2741_p0 = scmp.ne.s32.totalorder %s29_s23, %s2740_s24  ;;  %p2746_p2 = scmp.lt.s32.totalorder %s2740_s24, %s2740_s24 }
   0x5   :  { %p2747_p3 = por %p2746_p2, %p2745_p1 }
   0x7   :  { %p2748_p4 = pnand %p2747_p3, %p2741_p0 }
   0x9   :  { %2751 = shalt.err (!%p2748_p4)
}
   0xa   :  { %s2754_s25 = smov [#allocation2]  }
   0xb   :  { %31 = dma.vmem_to_smem %s29_s23, 16, %s2754_s25, [#allocation3]  }
   0xc   :  { %2752 = dma.done.wait [#allocation3], 16  }
   0xd   :  { %2753 = vsyncadd [#allocation3], 4294967280 }
   0xe   :  { %35 = sfence }
   0xf   :  { %v83_v0 = vld [vmem:[%s4842_s1 + $0x78] sm:$0xff]  ;;  %v2755_v1 = vmov 0.0   ;;  %v82_v2 = vld [vmem:[%s4842_s1 + $0x70] sm:$0xff]  ;;  %v81_v3 = vld [vmem:[%s4842_s1 + $0x68] sm:$0xff]  ;;  %vm93_vm0 = vcmask 130048   ;;  %s2996_s23 = sld [smem:[#allocation2]] }
  0x10   :  { %142 = vmatprep.subr.mxu0 %v2755_v1  ;;  %2668 = vmatprep.subr.mxu1 %v2755_v1  ;;  %v80_v4 = vld [vmem:[%s4842_s1 + $0x60] sm:$0xff]  ;;  %v79_v5 = vld [vmem:[%s4842_s1 + $0x58] sm:$0xff]  ;;  %v78_v6 = vld [vmem:[%s4842_s1 + $0x50] sm:$0xff]  ;;  %vm1212_vm7 = vcmask 1039360   ;;  %s3830_s28 = sld [smem:[#allocation2 + $0x1]] }
  0x11   :  { %143 = vmatpush1.msra.mxu0 %v83_v0  ;;  %2686 = vmatpush1.msra.mxu1 %v83_v0  ;;  %v77_v7 = vld [vmem:[%s4842_s1 + $0x48] sm:$0xff]  ;;  %v76_v8 = vld [vmem:[%s4842_s1 + $0x40] sm:$0xff]  ;;  %v75_v9 = vld [vmem:[%s4842_s1 + $0x38] sm:$0xff] }
  0x12   :  { %144 = vmatprep.subr.mxu0 %v2755_v1  ;;  %2669 = vmatprep.subr.mxu1 %v2755_v1  ;;  %v74_v10 = vld [vmem:[%s4842_s1 + $0x30] sm:$0xff]  ;;  %v73_v11 = vld [vmem:[%s4842_s1 + $0x28] sm:$0xff]  ;;  %v72_v12 = vld [vmem:[%s4842_s1 + $0x20] sm:$0xff] }
  0x13   :  { %145 = vmatpush1.msra.mxu0 %v82_v2  ;;  %2687 = vmatpush1.msra.mxu1 %v82_v2  ;;  %v71_v13 = vld [vmem:[%s4842_s1 + $0x18] sm:$0xff]  ;;  %v70_v14 = vld [vmem:[%s4842_s1 + $0x10] sm:$0xff]  ;;  %v69_v15 = vld [vmem:[%s4842_s1 + $0x8] sm:$0xff] }
  0x14   :  { %146 = vmatprep.subr.mxu0 %v2755_v1  ;;  %2670 = vmatprep.subr.mxu1 %v2755_v1  ;;  %v68_v16 = vld [vmem:[%s4842_s1] sm:$0xff]  ;;  %v85_v17 = vld [vmem:[%s4842_s1 + $0x88] sm:$0xff]  ;;  %v39_v23 = vld [vmem:[%s4841_s0 + $0x18] sm:$0xff] }
  0x15   :  { %147 = vmatpush1.msra.mxu0 %v81_v3  ;;  %2688 = vmatpush1.msra.mxu1 %v81_v3  ;;  %v84_v18 = vld [vmem:[%s4842_s1 + $0x80] sm:$0xff]  ;;  %v37_v19 = vld [vmem:[%s4841_s0 + $0x8] sm:$0xff]  ;;  %v55_v24 = vld [vmem:[%s4841_s0 + $0x98] sm:$0xff]  ;;  %p313_p5 = scmp.ge.f32.partialorder %s2996_s23, 0.0 }
  0x16   :  { %148 = vmatprep.subr.mxu0 %v2755_v1  ;;  %2671 = vmatprep.subr.mxu1 %v2755_v1  ;;  %v53_v20 = vld [vmem:[%s4841_s0 + $0x88] sm:$0xff]  ;;  %v36_v21 = vld [vmem:[%s4841_s0] sm:$0xff]  ;;  %v38_v25 = vld [vmem:[%s4841_s0 + $0x10] sm:$0xff] }
  0x17   :  { %149 = vmatpush1.msra.mxu0 %v80_v4  ;;  %2689 = vmatpush1.msra.mxu1 %v80_v4  ;;  %v52_v22 = vld [vmem:[%s4841_s0 + $0x80] sm:$0xff]  ;;  %v54_v26 = vld [vmem:[%s4841_s0 + $0x90] sm:$0xff]  ;;  %v41_v27 = vld [vmem:[%s4841_s0 + $0x28] sm:$0xff] }
  0x18   :  { %150 = vmatprep.subr.mxu0 %v2755_v1  ;;  %2672 = vmatprep.subr.mxu1 %v2755_v1  ;;  %v57_v28 = vld [vmem:[%s4841_s0 + $0xa8] sm:$0xff]  ;;  %v40_v29 = vld [vmem:[%s4841_s0 + $0x20] sm:$0xff]  ;;  %v43_v31 = vld [vmem:[%s4841_s0 + $0x38] sm:$0xff] }
  0x19   :  { %151 = vmatpush1.msra.mxu0 %v79_v5  ;;  %2690 = vmatpush1.msra.mxu1 %v79_v5  ;;  %v56_v30 = vld [vmem:[%s4841_s0 + $0xa0] sm:$0xff]  ;;  %v59_v32 = vld [vmem:[%s4841_s0 + $0xb8] sm:$0xff]  ;;  %v42_v33 = vld [vmem:[%s4841_s0 + $0x30] sm:$0xff] }
  0x1a   :  { %152 = vmatprep.subr.mxu0 %v2755_v1  ;;  %2673 = vmatprep.subr.mxu1 %v2755_v1  ;;  %v58_v34 = vld [vmem:[%s4841_s0 + $0xb0] sm:$0xff]  ;;  %v45_v35 = vld [vmem:[%s4841_s0 + $0x48] sm:$0xff]  ;;  %v44_v37 = vld [vmem:[%s4841_s0 + $0x40] sm:$0xff] }
  0x1b   :  { %153 = vmatpush1.msra.mxu0 %v78_v6  ;;  %2691 = vmatpush1.msra.mxu1 %v78_v6  ;;  %v61_v36 = vld [vmem:[%s4841_s0 + $0xc8] sm:$0xff]  ;;  %v60_v38 = vld [vmem:[%s4841_s0 + $0xc0] sm:$0xff]  ;;  %v47_v39 = vld [vmem:[%s4841_s0 + $0x58] sm:$0xff] }
  0x1c   :  { %154 = vmatprep.subr.mxu0 %v2755_v1  ;;  %2674 = vmatprep.subr.mxu1 %v2755_v1  ;;  %v63_v40 = vld [vmem:[%s4841_s0 + $0xd8] sm:$0xff]  ;;  %v46_v41 = vld [vmem:[%s4841_s0 + $0x50] sm:$0xff]  ;;  %v49_v43 = vld [vmem:[%s4841_s0 + $0x68] sm:$0xff] }
  0x1d   :  { %155 = vmatpush1.msra.mxu0 %v77_v7  ;;  %2692 = vmatpush1.msra.mxu1 %v77_v7  ;;  %v62_v42 = vld [vmem:[%s4841_s0 + $0xd0] sm:$0xff]  ;;  %v65_v44 = vld [vmem:[%s4841_s0 + $0xe8] sm:$0xff]  ;;  %v48_v45 = vld [vmem:[%s4841_s0 + $0x60] sm:$0xff] }
  0x1e   :  { %156 = vmatprep.subr.mxu0 %v2755_v1  ;;  %2675 = vmatprep.subr.mxu1 %v2755_v1  ;;  %v64_v46 = vld [vmem:[%s4841_s0 + $0xe0] sm:$0xff]  ;;  %v51_v47 = vld [vmem:[%s4841_s0 + $0x78] sm:$0xff]  ;;  %v50_v49 = vld [vmem:[%s4841_s0 + $0x70] sm:$0xff] }
  0x1f   :  { %157 = vmatpush1.msra.mxu0 %v76_v8  ;;  %2693 = vmatpush1.msra.mxu1 %v76_v8  ;;  %v67_v48 = vld [vmem:[%s4841_s0 + $0xf8] sm:$0xff]  ;;  %v66_v50 = vld [vmem:[%s4841_s0 + $0xf0] sm:$0xff]  ;;  %v3001_v55 = vld [vmem:[%s4843_s2] ss:$0 sm:$0xff]  ;;  %s314_s0 = scalar_select %p313_p5, 1, 0 }
  0x20   :  { %158 = vmatprep.subr.mxu0 %v2755_v1  ;;  %2676 = vmatprep.subr.mxu1 %v2755_v1 }
  0x21   :  { %159 = vmatpush1.msra.mxu0 %v75_v9  ;;  %2694 = vmatpush1.msra.mxu1 %v75_v9 }
  0x22   :  { %160 = vmatprep.subr.mxu0 %v2755_v1  ;;  %2677 = vmatprep.subr.mxu1 %v2755_v1 }
  0x23   :  { %161 = vmatpush1.msra.mxu0 %v74_v10  ;;  %2695 = vmatpush1.msra.mxu1 %v74_v10 }
  0x24   :  { %162 = vmatprep.subr.mxu0 %v2755_v1  ;;  %2678 = vmatprep.subr.mxu1 %v2755_v1 }
  0x25   :  { %163 = vmatpush1.msra.mxu0 %v73_v11  ;;  %2696 = vmatpush1.msra.mxu1 %v73_v11 }
  0x26   :  { %164 = vmatprep.subr.mxu0 %v2755_v1  ;;  %2679 = vmatprep.subr.mxu1 %v2755_v1 }
  0x27   :  { %165 = vmatpush1.msra.mxu0 %v72_v12  ;;  %2697 = vmatpush1.msra.mxu1 %v72_v12  ;;  %v315_v12 = vstv %s314_s0 }
  0x28   :  { %166 = vmatprep.subr.mxu0 %v2755_v1  ;;  %2680 = vmatprep.subr.mxu1 %v2755_v1  ;;  %vm3018_vm1 = vcmp.eq.s32.totalorder %v315_v12, 1 }
  0x29   :  { %167 = vmatpush1.msra.mxu0 %v71_v13  ;;  %2698 = vmatpush1.msra.mxu1 %v71_v13 }
  0x2a   :  { %168 = vmatprep.subr.mxu0 %v2755_v1  ;;  %2681 = vmatprep.subr.mxu1 %v2755_v1 }
  0x2b   :  { %169 = vmatpush1.msra.mxu0 %v70_v14  ;;  %2699 = vmatpush1.msra.mxu1 %v70_v14 }
  0x2c   :  { %170 = vmatprep.subr.mxu0 %v2755_v1  ;;  %2682 = vmatprep.subr.mxu1 %v2755_v1 }
  0x2d   :  { %171 = vmatpush1.msra.mxu0 %v69_v15  ;;  %2700 = vmatpush1.msra.mxu1 %v69_v15 }
  0x2e   :  { %172 = vmatprep.subr.mxu0 %v2755_v1  ;;  %2683 = vmatprep.subr.mxu1 %v2755_v1 }
  0x2f   :  { %173 = vmatpush1.msra.mxu0 %v68_v16  ;;  %2701 = vmatpush1.msra.mxu1 %v68_v16 }
  0x30   :  { %202 = vmatprep.subr.mxu0 %v2755_v1  ;;  %2684 = vmatprep.subr.mxu1 %v2755_v1 }
  0x31   :  { %203 = vmatpush2.msra.mxu0 %v85_v17  ;;  %2702 = vmatpush2.msra.mxu1 %v85_v17 }
  0x32   :  { %204 = vmatprep.subr.mxu0 %v2755_v1  ;;  %2685 = vmatprep.subr.mxu1 %v2755_v1 }
  0x33   :  { %205 = vmatpush2.msra.mxu0 %v84_v18  ;;  %2703 = vmatpush2.msra.mxu1 %v84_v18 }
  0x34   :  { %2649 = vmatprep.mubr.msk.f32.mxu0 %vm93_vm0, %v37_v19  ;;  %2657 = vmatprep.mubr.msk.f32.mxu1 %vm93_vm0, %v53_v20 }
  0x35   :  { %207 = vmatmul.mubr.f32.vlgmr.msra.gmra.mxu0 %v36_v21  ;;  %247 = vmatmul.mubr.f32.vlgmr.msra.gmra.mxu1 %v52_v22 }
  0x36   :  { %2650 = vmatprep.mubr.msk.f32.mxu0 %vm93_vm0, %v39_v23  ;;  %2658 = vmatprep.mubr.msk.f32.mxu1 %vm93_vm0, %v55_v24 }
  0x39   :  { %212 = vmatmul.mubr.f32.gmra.mxu0 %v38_v25  ;;  %252 = vmatmul.mubr.f32.gmra.mxu1 %v54_v26 }
  0x3a   :  { %2651 = vmatprep.mubr.msk.f32.mxu0 %vm93_vm0, %v41_v27  ;;  %2659 = vmatprep.mubr.msk.f32.mxu1 %vm93_vm0, %v57_v28 }
  0x3d   :  { %217 = vmatmul.mubr.f32.gmra.mxu0 %v40_v29  ;;  %257 = vmatmul.mubr.f32.gmra.mxu1 %v56_v30 }
  0x3e   :  { %2652 = vmatprep.mubr.msk.f32.mxu0 %vm93_vm0, %v43_v31  ;;  %2660 = vmatprep.mubr.msk.f32.mxu1 %vm93_vm0, %v59_v32  ;;  %v4848_v32 = vlaneseq }
  0x41   :  { %222 = vmatmul.mubr.f32.gmra.mxu0 %v42_v33  ;;  %262 = vmatmul.mubr.f32.gmra.mxu1 %v58_v34 }
  0x42   :  { %2653 = vmatprep.mubr.msk.f32.mxu0 %vm93_vm0, %v45_v35  ;;  %2661 = vmatprep.mubr.msk.f32.mxu1 %vm93_vm0, %v61_v36 }
  0x45   :  { %227 = vmatmul.mubr.f32.gmra.mxu0 %v44_v37  ;;  %267 = vmatmul.mubr.f32.gmra.mxu1 %v60_v38 }
  0x46   :  { %2654 = vmatprep.mubr.msk.f32.mxu0 %vm93_vm0, %v47_v39  ;;  %2662 = vmatprep.mubr.msk.f32.mxu1 %vm93_vm0, %v63_v40 }
  0x49   :  { %232 = vmatmul.mubr.f32.gmra.mxu0 %v46_v41  ;;  %272 = vmatmul.mubr.f32.gmra.mxu1 %v62_v42 }
  0x4a   :  { %2655 = vmatprep.mubr.msk.f32.mxu0 %vm93_vm0, %v49_v43  ;;  %2663 = vmatprep.mubr.msk.f32.mxu1 %vm93_vm0, %v65_v44 }
  0x4d   :  { %237 = vmatmul.mubr.f32.gmra.mxu0 %v48_v45  ;;  %277 = vmatmul.mubr.f32.gmra.mxu1 %v64_v46 }
  0x4e   :  { %2656 = vmatprep.mubr.msk.f32.mxu0 %vm93_vm0, %v51_v47  ;;  %2664 = vmatprep.mubr.msk.f32.mxu1 %vm93_vm0, %v67_v48  ;;  %v3029_v48 = vshrl.u32 %v4848_v32, 7 }
  0x50   :  { %4864 = vst [vmem:[#allocation5_spill] sm:$0xff] %v3029_v48 }
  0x51   :  { %242 = vmatmul.mubr.f32.gmra.mxu0 %v50_v49  ;;  %282 = vmatmul.mubr.f32.gmra.mxu1 %v66_v50 }
  0xf5   :  { %v208_v51 = vpop.f32.mrf.mxu0  ;;  %v248_v52 = vpop.f32.mrf.mxu1 }
  0xf6   :  { %v209_v13 = vadd.f32 %v3001_v55, %v208_v51  ;;  %v249_v14 = vadd.f32 %v3001_v55, %v248_v52 }
  0xf7   :  { %v210_v53 = vpop.f32.mrf.mxu0  ;;  %v250_v54 = vpop.f32.mrf.mxu1 }
  0xf9   :  { %v213_v56 = vpop.f32.mrf.mxu0  ;;  %v253_v57 = vpop.f32.mrf.mxu1 }
  0xfa   :  { %v214_v58 = vadd.f32 %v3001_v55, %v213_v56  ;;  %v254_v59 = vadd.f32 %v3001_v55, %v253_v57 }
  0xfb   :  { %v215_v60 = vpop.f32.mrf.mxu0  ;;  %v255_v61 = vpop.f32.mrf.mxu1 }
  0xfd   :  { %v218_v62 = vpop.f32.mrf.mxu0  ;;  %v258_v63 = vpop.f32.mrf.mxu1 }
  0xfe   :  { %v219_v0 = vadd.f32 %v3001_v55, %v218_v62  ;;  %v259_v1 = vadd.f32 %v3001_v55, %v258_v63 }
  0xff   :  { %v220_v2 = vpop.f32.mrf.mxu0  ;;  %v260_v3 = vpop.f32.mrf.mxu1 }
 0x101   :  { %v223_v4 = vpop.f32.mrf.mxu0  ;;  %v263_v5 = vpop.f32.mrf.mxu1 }
 0x102   :  { %v3009_v6 = vadd.f32 %v3001_v55, %v223_v4  ;;  %v3012_v7 = vadd.f32 %v3001_v55, %v263_v5 }
 0x103   :  { %v225_v8 = vpop.f32.mrf.mxu0  ;;  %v265_v9 = vpop.f32.mrf.mxu1 }
 0x104   :  { %v3038_v8 = vsub.s32 0, %v3029_v48 }
 0x105   :  { %v228_v10 = vpop.f32.mrf.mxu0  ;;  %v268_v11 = vpop.f32.mrf.mxu1 }
 0x106   :  { %v229_v15 = vadd.f32 %v3001_v55, %v228_v10  ;;  %v269_v16 = vadd.f32 %v3001_v55, %v268_v11 }
 0x107   :  { %v230_v17 = vpop.f32.mrf.mxu0  ;;  %v270_v18 = vpop.f32.mrf.mxu1 }
 0x108   :  { %v287_v19 = vmax.f32 %v209_v13, %v229_v15  ;;  %v299_v20 = vmin.f32 %v209_v13, %v229_v15  ;;  %v291_v21 = vmax.f32 %v249_v14, %v269_v16  ;;  %v303_v22 = vmin.f32 %v249_v14, %v269_v16 }
 0x109   :  { %v233_v24 = vpop.f32.mrf.mxu0  ;;  %v273_v25 = vpop.f32.mrf.mxu1 }
 0x10a   :  { %v295_v26 = vmax.f32 %v287_v19, %v291_v21  ;;  %v307_v27 = vmin.f32 %v299_v20, %v303_v22  ;;  %v234_v28 = vadd.f32 %v3001_v55, %v233_v24  ;;  %v274_v29 = vadd.f32 %v3001_v55, %v273_v25 }
 0x10b   :  { %v235_v30 = vpop.f32.mrf.mxu0  ;;  %v275_v31 = vpop.f32.mrf.mxu1  ;;  %v357_v25 = vsub.s32 1, %v3029_v48 }
 0x10c   :  { %v317_v33 = vsel %vm3018_vm1, %v295_v26, %v307_v27  ;;  %v288_v34 = vmax.f32 %v214_v58, %v234_v28  ;;  %v300_v35 = vmin.f32 %v214_v58, %v234_v28  ;;  %v292_v36 = vmax.f32 %v254_v59, %v274_v29 }
 0x10d   :  { %v323_v37 = vmul.f32 100.0, %v317_v33  ;;  %v304_v38 = vmin.f32 %v254_v59, %v274_v29  ;;  %v238_v39 = vpop.f32.mrf.mxu0  ;;  %v278_v40 = vpop.f32.mrf.mxu1 }
 0x10e   :  { %v296_v41 = vmax.f32 %v288_v34, %v292_v36  ;;  %v239_v42 = vadd.f32 %v3001_v55, %v238_v39  ;;  %v279_v43 = vadd.f32 %v3001_v55, %v278_v40  ;;  %v395_v34 = vsub.s32 3, %v3029_v48 }
 0x10f   :  { %v2706_v44 = vcvt.f32.s32 %v323_v37  ;;  %v308_v45 = vmin.f32 %v300_v35, %v304_v38  ;;  %v240_v46 = vpop.f32.mrf.mxu0  ;;  %v280_v47 = vpop.f32.mrf.mxu1  ;;  %v2704_v53 = vand.u32 2147483647, %v323_v37  ;;  %v2709_v2 = vand.u32 2147483648, %v323_v37 }
 0x110   :  { %v289_v49 = vmax.f32 %v219_v0, %v239_v42  ;;  %v301_v50 = vmin.f32 %v219_v0, %v239_v42  ;;  %v293_v51 = vmax.f32 %v259_v1, %v279_v43  ;;  %v305_v52 = vmin.f32 %v259_v1, %v279_v43 }
 0x111   :  { %v2707_v54 = vcvt.s32.f32 %v2706_v44  ;;  %v318_v56 = vsel %vm3018_vm1, %v296_v41, %v308_v45  ;;  %v243_v57 = vpop.f32.mrf.mxu0  ;;  %v283_v58 = vpop.f32.mrf.mxu1  ;;  %vm2705_vm2 = vcmp.lt.f32.partialorder %v2704_v53, 8388608.0  ;;  %v414_v35 = vsub.s32 4, %v3029_v48 }
 0x112   :  { %v324_v59 = vmul.f32 100.0, %v318_v56  ;;  %v297_v60 = vmax.f32 %v289_v49, %v293_v51  ;;  %v309_v61 = vmin.f32 %v301_v50, %v305_v52  ;;  %v244_v62 = vadd.f32 %v3001_v55, %v243_v57 }
 0x113   :  { %v2708_v63 = vand.u32 2147483647, %v2707_v54  ;;  %v284_v3 = vadd.f32 %v3001_v55, %v283_v58  ;;  %v245_v4 = vpop.f32.mrf.mxu0  ;;  %v285_v0 = vpop.f32.mrf.mxu1  ;;  %v3055_v36 = vsub.s32 5, %v3029_v48  ;;  %v3058_v39 = vsub.s32 6, %v3029_v48 }
 0x114   :  { %v2714_v5 = vcvt.f32.s32 %v324_v59  ;;  %v319_v1 = vsel %vm3018_vm1, %v297_v60, %v309_v61  ;;  %v290_v11 = vmax.f32 %v3009_v6, %v244_v62  ;;  %v302_v12 = vmin.f32 %v3009_v6, %v244_v62 }
 0x115   :  { %v2710_v9 = vor.u32 %v2709_v2, %v2708_v63  ;;  %v325_v10 = vmul.f32 100.0, %v319_v1  ;;  %v294_v14 = vmax.f32 %v3012_v7, %v284_v3  ;;  %v306_v55 = vmin.f32 %v3012_v7, %v284_v3 }
 0x116   :  { %v2715_v13 = vcvt.s32.f32 %v2714_v5  ;;  %v2712_v16 = vand.u32 2147483647, %v324_v59  ;;  %v2717_v17 = vand.u32 2147483648, %v324_v59  ;;  %v376_v6 = vsub.s32 2, %v3029_v48 }
 0x117   :  { %v2711_v15 = vsel %vm2705_vm2, %v2710_v9, %v323_v37  ;;  %v2722_v18 = vcvt.f32.s32 %v325_v10  ;;  %v298_v21 = vmax.f32 %v290_v11, %v294_v14  ;;  %v310_v22 = vmin.f32 %v302_v12, %v306_v55 }
 0x118   :  { %v3044_v19 = vmul.f32 0.01, %v2711_v15  ;;  %v2716_v20 = vand.u32 2147483647, %v2715_v13  ;;  %v2720_v27 = vand.u32 2147483647, %v325_v10 }
 0x119   :  { %v2723_v24 = vcvt.s32.f32 %v2722_v18  ;;  %v320_v28 = vsel %vm3018_vm1, %v298_v21, %v310_v22  ;;  %vm2713_vm3 = vcmp.lt.f32.partialorder %v2712_v16, 8388608.0  ;;  %v2725_v30 = vand.u32 2147483648, %v325_v10 }
 0x11a   :  { %v2718_v26 = vor.u32 %v2717_v17, %v2716_v20  ;;  %v339_v7 = vrot.slane %v3044_v19, %v3038_v8  ;;  %v326_v31 = vmul.f32 100.0, %v320_v28  ;;  %vm2721_vm4 = vcmp.lt.f32.partialorder %v2720_v27, 8388608.0 }
 0x11b   :  { %v2724_v29 = vand.u32 2147483647, %v2723_v24  ;;  %v358_v41 = vrot.slane %v3044_v19, %v357_v25  ;;  %v3062_v42 = vsub.s32 7, %v3029_v48  ;;  %v377_v55 = vrot.slane %v3044_v19, %v376_v6 }
 0x11c   :  { %v2719_v33 = vsel %vm2713_vm3, %v2718_v26, %v324_v59  ;;  %349 = vbcast.lane.b32.xlu1 %v339_v7, 272  ;;  %341 = vbcast.lane.b32.xlu0 %v339_v7, 256  ;;  %v2730_v38 = vcvt.f32.s32 %v326_v31  ;;  %v2728_v40 = vand.u32 2147483647, %v326_v31  ;;  %v2733_v45 = vand.u32 2147483648, %v326_v31 }
 0x11d   :  { %v333_v37 = vmul.f32 0.01, %v2719_v33  ;;  %v2726_v23 = vor.u32 %v2725_v30, %v2724_v29  ;;  %v415_v16 = vrot.slane %v3044_v19, %v414_v35  ;;  %v434_v17 = vrot.slane %v3044_v19, %v3055_v36 }
 0x11e   :  { %v2731_v44 = vcvt.s32.f32 %v2730_v38  ;;  %vm2729_vm5 = vcmp.lt.f32.partialorder %v2728_v40, 8388608.0  ;;  %v453_v18 = vrot.slane %v3044_v19, %v3058_v39  ;;  %v472_v20 = vrot.slane %v3044_v19, %v3062_v42 }
 0x11f   :  { %v2727_v43 = vsel %vm2721_vm4, %v2726_v23, %v325_v10  ;;  %v3065_v46 = vrot.slane %v333_v37, %v3038_v8  ;;  %v3067_v49 = vrot.slane %v333_v37, %v357_v25  ;;  %v3069_v50 = vrot.slane %v333_v37, %v376_v6 }
 0x120   :  { %v334_v47 = vmul.f32 0.01, %v2727_v43  ;;  %353 = vbcast.lane.b32.xlu1 %v339_v7, 280  ;;  %345 = vbcast.lane.b32.xlu0 %v339_v7, 264  ;;  %v3071_v51 = vrot.slane %v333_v37, %v395_v34  ;;  %v2732_v52 = vand.u32 2147483647, %v2731_v44  ;;  %v3073_v53 = vrot.slane %v333_v37, %v414_v35 }
 0x121   :  { %v3076_v54 = vrot.slane %v333_v37, %v3055_v36  ;;  %v3079_v56 = vrot.slane %v333_v37, %v3058_v39  ;;  %v3082_v57 = vrot.slane %v333_v37, %v3062_v42 }
 0x122   :  { %v3085_v58 = vrot.slane %v334_v47, %v3038_v8  ;;  %v3087_v59 = vrot.slane %v334_v47, %v357_v25  ;;  %v3089_v60 = vrot.slane %v334_v47, %v376_v6  ;;  %v2734_v61 = vor.u32 %v2733_v45, %v2732_v52 }
 0x123   :  { %v3091_v62 = vrot.slane %v334_v47, %v395_v34  ;;  %v3093_v63 = vrot.slane %v334_v47, %v414_v35  ;;  %v3096_v2 = vrot.slane %v334_v47, %v3055_v36  ;;  %v3099_v3 = vrot.slane %v334_v47, %v3058_v39 }
 0x124   :  { %364 = vbcast.lane.b32.xlu1 %v358_v41, 264  ;;  %360 = vbcast.lane.b32.xlu0 %v358_v41, 256  ;;  %v3102_v4 = vrot.slane %v334_v47, %v3062_v42  ;;  %v2735_v0 = vsel %vm2729_vm5, %v2734_v61, %v326_v31 }
 0x125   :  { %v335_v5 = vmul.f32 0.01, %v2735_v0 }
 0x127   :  { %v3105_v1 = vrot.slane %v335_v5, %v3038_v8  ;;  %v3107_v9 = vrot.slane %v335_v5, %v357_v25  ;;  %v3109_v10 = vrot.slane %v335_v5, %v376_v6  ;;  %v3111_v11 = vrot.slane %v335_v5, %v395_v34 }
 0x128   :  { %372 = vbcast.lane.b32.xlu1 %v358_v41, 280  ;;  %368 = vbcast.lane.b32.xlu0 %v358_v41, 272  ;;  %v3113_v12 = vrot.slane %v335_v5, %v414_v35  ;;  %v3116_v13 = vrot.slane %v335_v5, %v3055_v36  ;;  %v3119_v14 = vrot.slane %v335_v5, %v3058_v39 }
 0x129   :  { %v3123_v15 = vrot.slane %v335_v5, %v3062_v42  ;;  %v396_v8 = vrot.slane %v3044_v19, %v395_v34 }
 0x12c   :  { %383 = vbcast.lane.b32.xlu1 %v377_v55, 264  ;;  %379 = vbcast.lane.b32.xlu0 %v377_v55, 256 }
 0x130   :  { %391 = vbcast.lane.b32.xlu1 %v377_v55, 280  ;;  %387 = vbcast.lane.b32.xlu0 %v377_v55, 272 }
 0x134   :  { %402 = vbcast.lane.b32.xlu1 %v396_v8, 264  ;;  %398 = vbcast.lane.b32.xlu0 %v396_v8, 256 }
 0x138   :  { %410 = vbcast.lane.b32.xlu1 %v396_v8, 280  ;;  %406 = vbcast.lane.b32.xlu0 %v396_v8, 272 }
 0x13c   :  { %421 = vbcast.lane.b32.xlu1 %v415_v16, 264  ;;  %417 = vbcast.lane.b32.xlu0 %v415_v16, 256 }
 0x140   :  { %429 = vbcast.lane.b32.xlu1 %v415_v16, 280  ;;  %425 = vbcast.lane.b32.xlu0 %v415_v16, 272 }
 0x144   :  { %440 = vbcast.lane.b32.xlu1 %v434_v17, 264  ;;  %436 = vbcast.lane.b32.xlu0 %v434_v17, 256 }
 0x148   :  { %448 = vbcast.lane.b32.xlu1 %v434_v17, 280  ;;  %444 = vbcast.lane.b32.xlu0 %v434_v17, 272 }
 0x14c   :  { %459 = vbcast.lane.b32.xlu1 %v453_v18, 264  ;;  %455 = vbcast.lane.b32.xlu0 %v453_v18, 256 }
 0x150   :  { %467 = vbcast.lane.b32.xlu1 %v453_v18, 280  ;;  %463 = vbcast.lane.b32.xlu0 %v453_v18, 272 }
 0x154   :  { %478 = vbcast.lane.b32.xlu1 %v472_v20, 264  ;;  %474 = vbcast.lane.b32.xlu0 %v472_v20, 256 }
 0x158   :  { %486 = vbcast.lane.b32.xlu1 %v472_v20, 280  ;;  %482 = vbcast.lane.b32.xlu0 %v472_v20, 272 }
 0x15c   :  { %497 = vbcast.lane.b32.xlu1 %v3065_v46, 264  ;;  %493 = vbcast.lane.b32.xlu0 %v3065_v46, 256 }
 0x160   :  { %505 = vbcast.lane.b32.xlu1 %v3065_v46, 280  ;;  %501 = vbcast.lane.b32.xlu0 %v3065_v46, 272 }
 0x164   :  { %516 = vbcast.lane.b32.xlu1 %v3067_v49, 264  ;;  %512 = vbcast.lane.b32.xlu0 %v3067_v49, 256 }
 0x168   :  { %524 = vbcast.lane.b32.xlu1 %v3067_v49, 280  ;;  %520 = vbcast.lane.b32.xlu0 %v3067_v49, 272 }
 0x16c   :  { %535 = vbcast.lane.b32.xlu1 %v3069_v50, 264  ;;  %531 = vbcast.lane.b32.xlu0 %v3069_v50, 256 }
 0x170   :  { %543 = vbcast.lane.b32.xlu1 %v3069_v50, 280  ;;  %539 = vbcast.lane.b32.xlu0 %v3069_v50, 272 }
 0x174   :  { %554 = vbcast.lane.b32.xlu1 %v3071_v51, 264  ;;  %550 = vbcast.lane.b32.xlu0 %v3071_v51, 256 }
 0x178   :  { %562 = vbcast.lane.b32.xlu1 %v3071_v51, 280  ;;  %558 = vbcast.lane.b32.xlu0 %v3071_v51, 272 }
 0x17c   :  { %573 = vbcast.lane.b32.xlu1 %v3073_v53, 264  ;;  %569 = vbcast.lane.b32.xlu0 %v3073_v53, 256 }
 0x180   :  { %581 = vbcast.lane.b32.xlu1 %v3073_v53, 280  ;;  %577 = vbcast.lane.b32.xlu0 %v3073_v53, 272 }
 0x184   :  { %592 = vbcast.lane.b32.xlu1 %v3076_v54, 264  ;;  %588 = vbcast.lane.b32.xlu0 %v3076_v54, 256 }
 0x188   :  { %600 = vbcast.lane.b32.xlu1 %v3076_v54, 280  ;;  %596 = vbcast.lane.b32.xlu0 %v3076_v54, 272 }
 0x18c   :  { %611 = vbcast.lane.b32.xlu1 %v3079_v56, 264  ;;  %607 = vbcast.lane.b32.xlu0 %v3079_v56, 256 }
 0x18e   :  { %v3159_v19 = vpop.permute.xlu1 %349  ;;  %v3161_v21 = vpop.permute.xlu0 %341 }
 0x190   :  { %619 = vbcast.lane.b32.xlu1 %v3079_v56, 280  ;;  %615 = vbcast.lane.b32.xlu0 %v3079_v56, 272 }
 0x192   :  { %v3165_v22 = vpop.permute.xlu1 %353  ;;  %v3167_v24 = vpop.permute.xlu0 %345 }
 0x194   :  { %630 = vbcast.lane.b32.xlu1 %v3082_v57, 264  ;;  %626 = vbcast.lane.b32.xlu0 %v3082_v57, 256 }
 0x196   :  { %v3171_v25 = vpop.permute.xlu1 %364  ;;  %v3173_v6 = vpop.permute.xlu0 %360 }
 0x198   :  { %638 = vbcast.lane.b32.xlu1 %v3082_v57, 280  ;;  %634 = vbcast.lane.b32.xlu0 %v3082_v57, 272 }
 0x19a   :  { %v3177_v26 = vpop.permute.xlu1 %372  ;;  %v3179_v27 = vpop.permute.xlu0 %368 }
 0x19c   :  { %649 = vbcast.lane.b32.xlu1 %v3085_v58, 264  ;;  %645 = vbcast.lane.b32.xlu0 %v3085_v58, 256 }
 0x19e   :  { %v3183_v28 = vpop.permute.xlu1 %383  ;;  %v3185_v7 = vpop.permute.xlu0 %379 }
 0x1a0   :  { %657 = vbcast.lane.b32.xlu1 %v3085_v58, 280  ;;  %653 = vbcast.lane.b32.xlu0 %v3085_v58, 272 }
 0x1a2   :  { %v3189_v29 = vpop.permute.xlu1 %391  ;;  %v3191_v30 = vpop.permute.xlu0 %387 }
 0x1a4   :  { %668 = vbcast.lane.b32.xlu1 %v3087_v59, 264  ;;  %664 = vbcast.lane.b32.xlu0 %v3087_v59, 256 }
 0x1a6   :  { %v3195_v31 = vpop.permute.xlu1 %402  ;;  %v3197_v33 = vpop.permute.xlu0 %398 }
 0x1a8   :  { %676 = vbcast.lane.b32.xlu1 %v3087_v59, 280  ;;  %672 = vbcast.lane.b32.xlu0 %v3087_v59, 272 }
 0x1aa   :  { %v3201_v34 = vpop.permute.xlu1 %410  ;;  %v3203_v35 = vpop.permute.xlu0 %406 }
 0x1ac   :  { %687 = vbcast.lane.b32.xlu1 %v3089_v60, 264  ;;  %683 = vbcast.lane.b32.xlu0 %v3089_v60, 256 }
 0x1ae   :  { %v3207_v36 = vpop.permute.xlu1 %421  ;;  %v3209_v37 = vpop.permute.xlu0 %417 }
 0x1b0   :  { %695 = vbcast.lane.b32.xlu1 %v3089_v60, 280  ;;  %691 = vbcast.lane.b32.xlu0 %v3089_v60, 272 }
 0x1b2   :  { %v3213_v23 = vpop.permute.xlu1 %429  ;;  %v3215_v38 = vpop.permute.xlu0 %425 }
 0x1b4   :  { %706 = vbcast.lane.b32.xlu1 %v3091_v62, 264  ;;  %702 = vbcast.lane.b32.xlu0 %v3091_v62, 256 }
 0x1b6   :  { %v3219_v39 = vpop.permute.xlu1 %440  ;;  %v3221_v40 = vpop.permute.xlu0 %436 }
 0x1b8   :  { %714 = vbcast.lane.b32.xlu1 %v3091_v62, 280  ;;  %710 = vbcast.lane.b32.xlu0 %v3091_v62, 272 }
 0x1ba   :  { %v3225_v41 = vpop.permute.xlu1 %448  ;;  %v3227_v42 = vpop.permute.xlu0 %444 }
 0x1bc   :  { %725 = vbcast.lane.b32.xlu1 %v3093_v63, 264  ;;  %721 = vbcast.lane.b32.xlu0 %v3093_v63, 256 }
 0x1be   :  { %v3231_v43 = vpop.permute.xlu1 %459  ;;  %v3233_v44 = vpop.permute.xlu0 %455 }
 0x1c0   :  { %733 = vbcast.lane.b32.xlu1 %v3093_v63, 280  ;;  %729 = vbcast.lane.b32.xlu0 %v3093_v63, 272 }
 0x1c2   :  { %v3237_v45 = vpop.permute.xlu1 %467  ;;  %v3239_v46 = vpop.permute.xlu0 %463 }
 0x1c4   :  { %744 = vbcast.lane.b32.xlu1 %v3096_v2, 264  ;;  %740 = vbcast.lane.b32.xlu0 %v3096_v2, 256 }
 0x1c6   :  { %v3243_v47 = vpop.permute.xlu1 %478  ;;  %v3245_v49 = vpop.permute.xlu0 %474 }
 0x1c8   :  { %752 = vbcast.lane.b32.xlu1 %v3096_v2, 280  ;;  %748 = vbcast.lane.b32.xlu0 %v3096_v2, 272 }
 0x1ca   :  { %v3249_v50 = vpop.permute.xlu1 %486  ;;  %v3251_v51 = vpop.permute.xlu0 %482 }
 0x1cc   :  { %763 = vbcast.lane.b32.xlu1 %v3099_v3, 264  ;;  %759 = vbcast.lane.b32.xlu0 %v3099_v3, 256 }
 0x1ce   :  { %v3255_v52 = vpop.permute.xlu1 %497  ;;  %v3257_v53 = vpop.permute.xlu0 %493 }
 0x1d0   :  { %771 = vbcast.lane.b32.xlu1 %v3099_v3, 280  ;;  %767 = vbcast.lane.b32.xlu0 %v3099_v3, 272 }
 0x1d2   :  { %v3261_v54 = vpop.permute.xlu1 %505  ;;  %v3263_v56 = vpop.permute.xlu0 %501 }
 0x1d4   :  { %782 = vbcast.lane.b32.xlu1 %v3102_v4, 264  ;;  %778 = vbcast.lane.b32.xlu0 %v3102_v4, 256 }
 0x1d6   :  { %v3267_v57 = vpop.permute.xlu1 %516  ;;  %v3269_v58 = vpop.permute.xlu0 %512 }
 0x1d8   :  { %790 = vbcast.lane.b32.xlu1 %v3102_v4, 280  ;;  %786 = vbcast.lane.b32.xlu0 %v3102_v4, 272 }
 0x1da   :  { %v3273_v59 = vpop.permute.xlu1 %524  ;;  %v3275_v60 = vpop.permute.xlu0 %520 }
 0x1dc   :  { %801 = vbcast.lane.b32.xlu1 %v3105_v1, 264  ;;  %797 = vbcast.lane.b32.xlu0 %v3105_v1, 256 }
 0x1de   :  { %v3279_v61 = vpop.permute.xlu1 %535  ;;  %v3281_v62 = vpop.permute.xlu0 %531 }
 0x1e0   :  { %809 = vbcast.lane.b32.xlu1 %v3105_v1, 280  ;;  %805 = vbcast.lane.b32.xlu0 %v3105_v1, 272 }
 0x1e2   :  { %v3285_v63 = vpop.permute.xlu1 %543  ;;  %v3287_v2 = vpop.permute.xlu0 %539 }
 0x1e4   :  { %820 = vbcast.lane.b32.xlu1 %v3107_v9, 264  ;;  %816 = vbcast.lane.b32.xlu0 %v3107_v9, 256 }
 0x1e6   :  { %v3291_v3 = vpop.permute.xlu1 %554  ;;  %v3293_v4 = vpop.permute.xlu0 %550 }
 0x1e8   :  { %828 = vbcast.lane.b32.xlu1 %v3107_v9, 280  ;;  %824 = vbcast.lane.b32.xlu0 %v3107_v9, 272 }
 0x1ea   :  { %v3297_v0 = vpop.permute.xlu1 %562  ;;  %v3299_v5 = vpop.permute.xlu0 %558 }
 0x1ec   :  { %839 = vbcast.lane.b32.xlu1 %v3109_v10, 264  ;;  %835 = vbcast.lane.b32.xlu0 %v3109_v10, 256 }
 0x1ee   :  { %v3303_v1 = vpop.permute.xlu1 %573  ;;  %v3305_v55 = vpop.permute.xlu0 %569 }
 0x1f0   :  { %847 = vbcast.lane.b32.xlu1 %v3109_v10, 280  ;;  %843 = vbcast.lane.b32.xlu0 %v3109_v10, 272 }
 0x1f2   :  { %v3309_v8 = vpop.permute.xlu1 %581  ;;  %v3311_v16 = vpop.permute.xlu0 %577 }
 0x1f4   :  { %858 = vbcast.lane.b32.xlu1 %v3111_v11, 264  ;;  %854 = vbcast.lane.b32.xlu0 %v3111_v11, 256 }
 0x1f6   :  { %v3315_v9 = vpop.permute.xlu1 %592  ;;  %v3317_v17 = vpop.permute.xlu0 %588 }
 0x1f7   :  { %4865 = vst [vmem:[#allocation6_spill] sm:$0xff] %v3315_v9 }
 0x1f8   :  { %866 = vbcast.lane.b32.xlu1 %v3111_v11, 280  ;;  %862 = vbcast.lane.b32.xlu0 %v3111_v11, 272 }
 0x1fa   :  { %v3321_v18 = vpop.permute.xlu1 %600  ;;  %v3323_v20 = vpop.permute.xlu0 %596 }
 0x1fb   :  { %4866 = vst [vmem:[#allocation7_spill] sm:$0xff] %v3321_v18 }
 0x1fc   :  { %877 = vbcast.lane.b32.xlu1 %v3113_v12, 264  ;;  %873 = vbcast.lane.b32.xlu0 %v3113_v12, 256 }
 0x1fe   :  { %v3327_v10 = vpop.permute.xlu1 %611  ;;  %v3329_v32 = vpop.permute.xlu0 %607 }
 0x1ff   :  { %4867 = vst [vmem:[#allocation8_spill] sm:$0xff] %v3327_v10  ;;  %4868 = vst [vmem:[#allocation9_spill] sm:$0xff] %v3329_v32 }
 0x200   :  { %885 = vbcast.lane.b32.xlu1 %v3113_v12, 280  ;;  %881 = vbcast.lane.b32.xlu0 %v3113_v12, 272 }
 0x202   :  { %v3333_v48 = vpop.permute.xlu1 %619  ;;  %v3335_v9 = vpop.permute.xlu0 %615 }
 0x203   :  { %4869 = vst [vmem:[#allocation10_spill] sm:$0xff] %v3333_v48  ;;  %4870 = vst [vmem:[#allocation11_spill] sm:$0xff] %v3335_v9 }
 0x204   :  { %896 = vbcast.lane.b32.xlu1 %v3116_v13, 264  ;;  %892 = vbcast.lane.b32.xlu0 %v3116_v13, 256 }
 0x206   :  { %v3339_v11 = vpop.permute.xlu1 %630  ;;  %v3341_v18 = vpop.permute.xlu0 %626 }
 0x207   :  { %4871 = vst [vmem:[#allocation12_spill] sm:$0xff] %v3339_v11  ;;  %4872 = vst [vmem:[#allocation13_spill] sm:$0xff] %v3341_v18 }
 0x208   :  { %904 = vbcast.lane.b32.xlu1 %v3116_v13, 280  ;;  %900 = vbcast.lane.b32.xlu0 %v3116_v13, 272 }
 0x20a   :  { %v3345_v10 = vpop.permute.xlu1 %638  ;;  %v3347_v32 = vpop.permute.xlu0 %634 }
 0x20b   :  { %4873 = vst [vmem:[#allocation14_spill] sm:$0xff] %v3345_v10  ;;  %4874 = vst [vmem:[#allocation15_spill] sm:$0xff] %v3347_v32 }
 0x20c   :  { %915 = vbcast.lane.b32.xlu1 %v3119_v14, 264  ;;  %911 = vbcast.lane.b32.xlu0 %v3119_v14, 256 }
 0x20e   :  { %v3351_v12 = vpop.permute.xlu1 %649  ;;  %v3353_v48 = vpop.permute.xlu0 %645 }
 0x20f   :  { %4875 = vst [vmem:[#allocation16_spill] sm:$0xff] %v3351_v12  ;;  %4876 = vst [vmem:[#allocation17_spill] sm:$0xff] %v3353_v48 }
 0x210   :  { %923 = vbcast.lane.b32.xlu1 %v3119_v14, 280  ;;  %919 = vbcast.lane.b32.xlu0 %v3119_v14, 272 }
 0x212   :  { %v3357_v11 = vpop.permute.xlu1 %657  ;;  %v3359_v18 = vpop.permute.xlu0 %653 }
 0x213   :  { %4877 = vst [vmem:[#allocation18_spill] sm:$0xff] %v3357_v11  ;;  %4878 = vst [vmem:[#allocation19_spill] sm:$0xff] %v3359_v18 }
 0x214   :  { %934 = vbcast.lane.b32.xlu1 %v3123_v15, 264  ;;  %930 = vbcast.lane.b32.xlu0 %v3123_v15, 256 }
 0x216   :  { %v3363_v13 = vpop.permute.xlu1 %668  ;;  %v3365_v10 = vpop.permute.xlu0 %664 }
 0x217   :  { %4879 = vst [vmem:[#allocation20_spill] sm:$0xff] %v3363_v13  ;;  %4880 = vst [vmem:[#allocation21_spill] sm:$0xff] %v3365_v10 }
 0x218   :  { %942 = vbcast.lane.b32.xlu1 %v3123_v15, 280  ;;  %938 = vbcast.lane.b32.xlu0 %v3123_v15, 272  ;;  %v3390_v15 = vld [vmem:[%s4844_s3] ss:$0 sm:$0xff] }
 0x219   :  { %vm950_vm6 = vcmp.ge.f32.partialorder %v3161_v21, %v3390_v15  ;;  %vm952_vm8 = vcmp.ge.f32.partialorder %v3159_v19, %v3390_v15  ;;  %vm951_vm9 = vcmp.ge.f32.partialorder %v3167_v24, %v3390_v15  ;;  %vm953_vm10 = vcmp.ge.f32.partialorder %v3165_v22, %v3390_v15 }
 0x21a   :  { %v3369_v12 = vpop.permute.xlu1 %676  ;;  %v3371_v48 = vpop.permute.xlu0 %672  ;;  %vm954_vm11 = vcmp.ge.f32.partialorder %v3173_v6, %v3390_v15  ;;  %vm955_vm12 = vcmp.ge.f32.partialorder %v3171_v25, %v3390_v15  ;;  %vm956_vm13 = vcmp.ge.f32.partialorder %v3179_v27, %v3390_v15  ;;  %vm957_vm14 = vcmp.ge.f32.partialorder %v3177_v26, %v3390_v15 }
 0x21b   :  { %vm958_vm15 = vcmp.ge.f32.partialorder %v3185_v7, %v3390_v15  ;;  %vm959_vm0 = vcmp.ge.f32.partialorder %v3183_v28, %v3390_v15  ;;  %vm960_vm1 = vcmp.ge.f32.partialorder %v3191_v30, %v3390_v15  ;;  %vm961_vm2 = vcmp.ge.f32.partialorder %v3189_v29, %v3390_v15 }
 0x21c   :  { %vm962_vm3 = vcmp.ge.f32.partialorder %v3197_v33, %v3390_v15  ;;  %vm963_vm4 = vcmp.ge.f32.partialorder %v3195_v31, %v3390_v15  ;;  %vm964_vm5 = vcmp.ge.f32.partialorder %v3203_v35, %v3390_v15 }
 0x21e   :  { %v3373_v14 = vpop.permute.xlu0 %683  ;;  %v3375_v11 = vpop.permute.xlu1 %687 }
 0x21f   :  { %4881 = vst [vmem:[#allocation22_spill] sm:$0xff] %v3375_v11 }
 0x222   :  { %v3377_v18 = vpop.permute.xlu0 %691  ;;  %v3379_v32 = vpop.permute.xlu1 %695 }
 0x223   :  { %4882 = vst [vmem:[#allocation23_spill] sm:$0xff] %v3377_v18  ;;  %4883 = vst [vmem:[#allocation24_spill] sm:$0xff] %v3379_v32  ;;  %v3397_v18 = vld [vmem:[%s4845_s4] ss:$0 sm:$0xff] }
 0x224   :  { %v1086_v11 = vsel %vm952_vm8, %v3397_v18, 0.0  ;;  %v1088_v22 = vsel %vm954_vm11, %v3397_v18, 0.0  ;;  %v1090_v25 = vsel %vm956_vm13, %v3397_v18, 0.0  ;;  %v1092_v26 = vsel %vm958_vm15, %v3397_v18, 0.0 }
 0x225   :  { %v1219_v19 = vsel %vm1212_vm7, %v1086_v11, 0.0  ;;  %v1089_v11 = vsel %vm955_vm12, %v3397_v18, 0.0  ;;  %v1094_v28 = vsel %vm960_vm1, %v3397_v18, 0.0  ;;  %v1096_v29 = vsel %vm962_vm3, %v3397_v18, 0.0 }
 0x226   :  { %v3381_v9 = vpop.permute.xlu0 %702  ;;  %v3383_v13 = vpop.permute.xlu1 %706  ;;  %v1228_v27 = vsel %vm1212_vm7, %v1089_v11, 0.0  ;;  %v1098_v31 = vsel %vm964_vm5, %v3397_v18, 0.0  ;;  %vm966_vm8 = vcmp.ge.f32.partialorder %v3209_v37, %v3390_v15  ;;  %vm969_vm11 = vcmp.ge.f32.partialorder %v3213_v23, %v3390_v15 }
 0x227   :  { %4884 = vst [vmem:[#allocation25_spill] sm:$0xff] %v3381_v9  ;;  %4885 = vst [vmem:[#allocation26_spill] sm:$0xff] %v3383_v13  ;;  %v1084_v13 = vsel %vm950_vm6, %v3397_v18, 0.0  ;;  %vm965_vm6 = vcmp.ge.f32.partialorder %v3201_v34, %v3390_v15  ;;  %v1100_v34 = vsel %vm966_vm8, %v3397_v18, 0.0  ;;  %vm970_vm12 = vcmp.ge.f32.partialorder %v3221_v40, %v3390_v15 }
 0x228   :  { %v1213_v21 = vsel %vm1212_vm7, %v1084_v13, 0.0  ;;  %v1087_v13 = vsel %vm953_vm10, %v3397_v18, 0.0  ;;  %vm968_vm10 = vcmp.ge.f32.partialorder %v3215_v38, %v3390_v15  ;;  %vm971_vm13 = vcmp.ge.f32.partialorder %v3219_v39, %v3390_v15 }
 0x229   :  { %v1222_v6 = vsel %vm1212_vm7, %v1087_v13, 0.0  ;;  %v1091_v13 = vsel %vm957_vm14, %v3397_v18, 0.0  ;;  %v1104_v23 = vsel %vm970_vm12, %v3397_v18, 0.0  ;;  %vm972_vm14 = vcmp.ge.f32.partialorder %v3227_v42, %v3390_v15 }
 0x22a   :  { %v3385_v10 = vpop.permute.xlu0 %710  ;;  %v3399_v32 = vpop.permute.xlu1 %714  ;;  %v1234_v7 = vsel %vm1212_vm7, %v1091_v13, 0.0  ;;  %vm973_vm15 = vcmp.ge.f32.partialorder %v3225_v41, %v3390_v15  ;;  %v1106_v39 = vsel %vm972_vm14, %v3397_v18, 0.0  ;;  %vm975_vm1 = vcmp.ge.f32.partialorder %v3231_v43, %v3390_v15 }
 0x22b   :  { %4886 = vst [vmem:[#allocation27_spill] sm:$0xff] %v3385_v10  ;;  %4887 = vst [vmem:[#allocation28_spill] sm:$0xff] %v3399_v32  ;;  %v1085_v32 = vsel %vm951_vm9, %v3397_v18, 0.0  ;;  %vm967_vm9 = vcmp.ge.f32.partialorder %v3207_v36, %v3390_v15  ;;  %v1102_v36 = vsel %vm968_vm10, %v3397_v18, 0.0  ;;  %vm977_vm3 = vcmp.ge.f32.partialorder %v3237_v45, %v3390_v15 }
 0x22c   :  { %v1216_v24 = vsel %vm1212_vm7, %v1085_v32, 0.0  ;;  %v1225_v32 = vsel %vm1212_vm7, %v1088_v22, 0.0  ;;  %vm979_vm5 = vcmp.ge.f32.partialorder %v3243_v47, %v3390_v15  ;;  %vm981_vm8 = vcmp.ge.f32.partialorder %v3249_v50, %v3390_v15 }
 0x22d   :  { %vm983_vm10 = vcmp.ge.f32.partialorder %v3255_v52, %v3390_v15  ;;  %vm985_vm12 = vcmp.ge.f32.partialorder %v3261_v54, %v3390_v15  ;;  %vm987_vm14 = vcmp.ge.f32.partialorder %v3267_v57, %v3390_v15 }
 0x22e   :  { %v3401_v9 = vpop.permute.xlu0 %721  ;;  %v3409_v10 = vpop.permute.xlu1 %725 }
 0x22f   :  { %4888 = vst [vmem:[#allocation29_spill] sm:$0xff] %v3401_v9 }
 0x232   :  { %v3414_v9 = vpop.permute.xlu0 %729 }
 0x233   :  { %4889 = vst [vmem:[#allocation30_spill] sm:$0xff] %v3414_v9 }
 0x236   :  { %v3429_v9 = vpop.permute.xlu0 %740 }
 0x237   :  { %1214 = vadd.xlane.f32.xlu0 %v1213_v21  ;;  %v3427_v21 = vpop.permute.xlu1 %733 }
 0x23a   :  { %v3446_v22 = vpop.permute.xlu0 %748 }
 0x23b   :  { %1220 = vadd.xlane.f32.xlu0 %v1219_v19  ;;  %v3440_v19 = vpop.permute.xlu1 %744 }
 0x23c   :  { %1217 = vadd.xlane.f32.xlu1 %v1216_v24  ;;  %v1231_v24 = vsel %vm1212_vm7, %v1090_v25, 0.0 }
 0x23e   :  { %v3461_v25 = vpop.permute.xlu0 %759 }
 0x23f   :  { %1223 = vadd.xlane.f32.xlu0 %v1222_v6  ;;  %v1237_v6 = vsel %vm1212_vm7, %v1092_v26, 0.0  ;;  %v3459_v11 = vpop.permute.xlu1 %752  ;;  %v1249_v26 = vsel %vm1212_vm7, %v1096_v29, 0.0  ;;  %v1101_v29 = vsel %vm967_vm9, %v3397_v18, 0.0  ;;  %vm982_vm9 = vcmp.ge.f32.partialorder %v3257_v53, %v3390_v15 }
 0x240   :  { %1226 = vadd.xlane.f32.xlu1 %v1225_v32  ;;  %v1093_v32 = vsel %vm959_vm0, %v3397_v18, 0.0  ;;  %v1264_v38 = vsel %vm1212_vm7, %v1101_v29, 0.0  ;;  %vm974_vm0 = vcmp.ge.f32.partialorder %v3233_v44, %v3390_v15  ;;  %v1116_v50 = vsel %vm982_vm9, %v3397_v18, 0.0 }
 0x241   :  { %v1240_v30 = vsel %vm1212_vm7, %v1093_v32, 0.0  ;;  %v1255_v32 = vsel %vm1212_vm7, %v1098_v31, 0.0  ;;  %v1108_v41 = vsel %vm974_vm0, %v3397_v18, 0.0  ;;  %vm989_vm0 = vcmp.ge.f32.partialorder %v3273_v59, %v3390_v15 }
 0x242   :  { %vm997_vm9 = vcmp.ge.f32.partialorder %v3297_v0, %v3390_v15 }
 0x243   :  { %1229 = vadd.xlane.f32.xlu0 %v1228_v27  ;;  %v1243_v27 = vsel %vm1212_vm7, %v1094_v28, 0.0  ;;  %v3472_v13 = vpop.permute.xlu1 %763  ;;  %v1099_v28 = vsel %vm965_vm6, %v3397_v18, 0.0  ;;  %vm980_vm6 = vcmp.ge.f32.partialorder %v3251_v51, %v3390_v15 }
 0x244   :  { %1232 = vadd.xlane.f32.xlu1 %v1231_v24  ;;  %v1095_v24 = vsel %vm961_vm2, %v3397_v18, 0.0  ;;  %v1258_v37 = vsel %vm1212_vm7, %v1099_v28, 0.0  ;;  %vm976_vm2 = vcmp.ge.f32.partialorder %v3239_v46, %v3390_v15  ;;  %v1114_v47 = vsel %vm980_vm6, %v3397_v18, 0.0 }
 0x245   :  { %v1246_v33 = vsel %vm1212_vm7, %v1095_v24, 0.0  ;;  %v1261_v24 = vsel %vm1212_vm7, %v1100_v34, 0.0  ;;  %v1110_v43 = vsel %vm976_vm2, %v3397_v18, 0.0  ;;  %vm991_vm2 = vcmp.ge.f32.partialorder %v3279_v61, %v3390_v15 }
 0x246   :  { %vm995_vm6 = vcmp.ge.f32.partialorder %v3291_v3, %v3390_v15 }
 0x247   :  { %1235 = vadd.xlane.f32.xlu0 %v1234_v7  ;;  %v1097_v7 = vsel %vm963_vm4, %v3397_v18, 0.0  ;;  %vm978_vm4 = vcmp.ge.f32.partialorder %v3245_v49, %v3390_v15 }
 0x248   :  { %1238 = vadd.xlane.f32.xlu1 %v1237_v6  ;;  %v3478_v6 = vpop.permute.xlu0 %767  ;;  %v1252_v35 = vsel %vm1212_vm7, %v1097_v7, 0.0  ;;  %v1103_v7 = vsel %vm969_vm11, %v3397_v18, 0.0  ;;  %v1112_v45 = vsel %vm978_vm4, %v3397_v18, 0.0  ;;  %vm984_vm11 = vcmp.ge.f32.partialorder %v3263_v56, %v3390_v15 }
 0x249   :  { %v1270_v40 = vsel %vm1212_vm7, %v1103_v7, 0.0  ;;  %v1291_v7 = vsel %vm1212_vm7, %v1110_v43, 0.0  ;;  %v1118_v52 = vsel %vm984_vm11, %v3397_v18, 0.0  ;;  %vm993_vm4 = vcmp.ge.f32.partialorder %v3285_v63, %v3390_v15 }
 0x24a   :  { %vm999_vm11 = vcmp.ge.f32.partialorder %v3303_v1, %v3390_v15 }
 0x24b   :  { %1241 = vadd.xlane.f32.xlu0 %v1240_v30  ;;  %v3491_v30 = vpop.permute.xlu1 %771 }
 0x24c   :  { %1244 = vadd.xlane.f32.xlu1 %v1243_v27  ;;  %4890 = vst [vmem:[#allocation31_spill] sm:$0xff] %v3491_v30  ;;  %v3493_v27 = vpop.permute.xlu0 %778 }
 0x24d   :  { %4891 = vst [vmem:[#allocation32_spill] sm:$0xff] %v3493_v27 }
 0x24f   :  { %1247 = vadd.xlane.f32.xlu0 %v1246_v33  ;;  %v3504_v33 = vpop.permute.xlu1 %782 }
 0x250   :  { %1250 = vadd.xlane.f32.xlu1 %v1249_v26  ;;  %4892 = vst [vmem:[#allocation33_spill] sm:$0xff] %v3504_v33  ;;  %v1267_v26 = vsel %vm1212_vm7, %v1102_v36, 0.0  ;;  %v3510_v31 = vpop.permute.xlu0 %786  ;;  %v1285_v36 = vsel %vm1212_vm7, %v1108_v41, 0.0 }
 0x251   :  { %4893 = vst [vmem:[#allocation34_spill] sm:$0xff] %v3510_v31 }
 0x253   :  { %1253 = vadd.xlane.f32.xlu0 %v1252_v35  ;;  %v1273_v35 = vsel %vm1212_vm7, %v1104_v23, 0.0  ;;  %v3523_v28 = vpop.permute.xlu1 %790  ;;  %v1111_v23 = vsel %vm977_vm3, %v3397_v18, 0.0  ;;  %vm992_vm3 = vcmp.ge.f32.partialorder %v3287_v2, %v3390_v15 }
 0x254   :  { %1256 = vadd.xlane.f32.xlu1 %v1255_v32  ;;  %v1105_v32 = vsel %vm971_vm13, %v3397_v18, 0.0  ;;  %4894 = vst [vmem:[#allocation35_spill] sm:$0xff] %v3523_v28  ;;  %v3525_v34 = vpop.permute.xlu0 %797  ;;  %v1294_v49 = vsel %vm1212_vm7, %v1111_v23, 0.0  ;;  %vm986_vm13 = vcmp.ge.f32.partialorder %v3269_v58, %v3390_v15  ;;  %v1126_v61 = vsel %vm992_vm3, %v3397_v18, 0.0 }
 0x255   :  { %v1276_v42 = vsel %vm1212_vm7, %v1105_v32, 0.0  ;;  %v1297_v32 = vsel %vm1212_vm7, %v1112_v45, 0.0  ;;  %v1120_v54 = vsel %vm986_vm13, %v3397_v18, 0.0  ;;  %vm1001_vm13 = vcmp.ge.f32.partialorder %v3309_v8, %v3390_v15 }
 0x256   :  { %v1321_v45 = vsel %vm1212_vm7, %v1120_v54, 0.0  ;;  %v3857_v28 = vstv %s2996_s23 }
 0x257   :  { %1259 = vadd.xlane.f32.xlu0 %v1258_v37  ;;  %v1279_v37 = vsel %vm1212_vm7, %v1106_v39, 0.0  ;;  %v3536_v29 = vpop.permute.xlu1 %801  ;;  %v1113_v39 = vsel %vm979_vm5, %v3397_v18, 0.0  ;;  %vm994_vm5 = vcmp.ge.f32.partialorder %v3293_v4, %v3390_v15 }
 0x258   :  { %1262 = vadd.xlane.f32.xlu1 %v1261_v24  ;;  %v1107_v24 = vsel %vm973_vm15, %v3397_v18, 0.0  ;;  %v1300_v51 = vsel %vm1212_vm7, %v1113_v39, 0.0  ;;  %vm988_vm15 = vcmp.ge.f32.partialorder %v3275_v60, %v3390_v15  ;;  %v1128_v63 = vsel %vm994_vm5, %v3397_v18, 0.0 }
 0x259   :  { %v1282_v44 = vsel %vm1212_vm7, %v1107_v24, 0.0  ;;  %v1115_v24 = vsel %vm981_vm8, %v3397_v18, 0.0  ;;  %v1122_v57 = vsel %vm988_vm15, %v3397_v18, 0.0  ;;  %vm996_vm8 = vcmp.ge.f32.partialorder %v3299_v5, %v3390_v15 }
 0x25a   :  { %v1306_v53 = vsel %vm1212_vm7, %v1115_v24, 0.0  ;;  %v1327_v39 = vsel %vm1212_vm7, %v1122_v57, 0.0  ;;  %v1130_v3 = vsel %vm996_vm8, %v3397_v18, 0.0 }
 0x25b   :  { %1265 = vadd.xlane.f32.xlu0 %v1264_v38  ;;  %v1109_v38 = vsel %vm975_vm1, %v3397_v18, 0.0  ;;  %vm990_vm1 = vcmp.ge.f32.partialorder %v3281_v62, %v3390_v15 }
 0x25c   :  { %1268 = vadd.xlane.f32.xlu1 %v1267_v26  ;;  %v3542_v26 = vpop.permute.xlu0 %805  ;;  %v1288_v46 = vsel %vm1212_vm7, %v1109_v38, 0.0  ;;  %v1124_v59 = vsel %vm990_vm1, %v3397_v18, 0.0 }
 0x25d   :  { %v1333_v24 = vsel %vm1212_vm7, %v1124_v59, 0.0  ;;  %v1135_v59 = vsel %vm1001_vm13, %v3397_v18, 0.0 }
 0x25f   :  { %1271 = vadd.xlane.f32.xlu0 %v1270_v40  ;;  %v3555_v40 = vpop.permute.xlu1 %809 }
 0x260   :  { %1274 = vadd.xlane.f32.xlu1 %v1273_v35  ;;  %v3557_v35 = vpop.permute.xlu0 %816 }
 0x263   :  { %1277 = vadd.xlane.f32.xlu0 %v1276_v42  ;;  %v3568_v42 = vpop.permute.xlu1 %820 }
 0x264   :  { %1280 = vadd.xlane.f32.xlu1 %v1279_v37  ;;  %v1303_v37 = vsel %vm1212_vm7, %v1114_v47, 0.0  ;;  %v3574_v41 = vpop.permute.xlu0 %824  ;;  %v1123_v47 = vsel %vm989_vm0, %v3397_v18, 0.0  ;;  %vm1004_vm0 = vcmp.ge.f32.partialorder %v3323_v20, %v3390_v15 }
 0x265   :  { %v1330_v62 = vsel %vm1212_vm7, %v1123_v47, 0.0 }
 0x267   :  { %1283 = vadd.xlane.f32.xlu0 %v1282_v44  ;;  %v1309_v44 = vsel %vm1212_vm7, %v1116_v50, 0.0  ;;  %v3587_v38 = vpop.permute.xlu1 %828  ;;  %v1125_v50 = vsel %vm991_vm2, %v3397_v18, 0.0 }
 0x268   :  { %1286 = vadd.xlane.f32.xlu1 %v1285_v36  ;;  %v1117_v36 = vsel %vm983_vm10, %v3397_v18, 0.0  ;;  %v3589_v43 = vpop.permute.xlu0 %835  ;;  %v1336_v2 = vsel %vm1212_vm7, %v1125_v50, 0.0  ;;  %vm998_vm10 = vcmp.ge.f32.partialorder %v3305_v55, %v3390_v15 }
 0x269   :  { %v1312_v56 = vsel %vm1212_vm7, %v1117_v36, 0.0  ;;  %v1127_v36 = vsel %vm993_vm4, %v3397_v18, 0.0  ;;  %v1132_v0 = vsel %vm998_vm10, %v3397_v18, 0.0 }
 0x26a   :  { %v1342_v4 = vsel %vm1212_vm7, %v1127_v36, 0.0  ;;  %v1357_v57 = vsel %vm1212_vm7, %v1132_v0, 0.0  ;;  %v1138_v36 = vsel %vm1004_vm0, %v3397_v18, 0.0 }
 0x26b   :  { %1289 = vadd.xlane.f32.xlu0 %v1288_v46  ;;  %v1315_v46 = vsel %vm1212_vm7, %v1118_v52, 0.0  ;;  %v3600_v23 = vpop.permute.xlu1 %839 }
 0x26c   :  { %1292 = vadd.xlane.f32.xlu1 %v1291_v7  ;;  %v1119_v7 = vsel %vm985_vm12, %v3397_v18, 0.0  ;;  %vm1000_vm12 = vcmp.ge.f32.partialorder %v3311_v16, %v3390_v15 }
 0x26d   :  { %v1318_v58 = vsel %vm1212_vm7, %v1119_v7, 0.0  ;;  %v1134_v1 = vsel %vm1000_vm12, %v3397_v18, 0.0 }
 0x26e   :  { %v1363_v47 = vsel %vm1212_vm7, %v1134_v1, 0.0 }
 0x26f   :  { %1295 = vadd.xlane.f32.xlu0 %v1294_v49  ;;  %v1121_v49 = vsel %vm987_vm14, %v3397_v18, 0.0  ;;  %vm1002_vm14 = vcmp.ge.f32.partialorder %v3317_v17, %v3390_v15  ;;  %v1366_v17 = vsel %vm1212_vm7, %v1135_v59, 0.0 }
 0x270   :  { %1298 = vadd.xlane.f32.xlu1 %v1297_v32  ;;  %v3606_v32 = vpop.permute.xlu0 %843  ;;  %v1324_v60 = vsel %vm1212_vm7, %v1121_v49, 0.0  ;;  %v1136_v8 = vsel %vm1002_vm14, %v3397_v18, 0.0 }
 0x273   :  { %1301 = vadd.xlane.f32.xlu0 %v1300_v51  ;;  %v3619_v51 = vpop.permute.xlu1 %847 }
 0x274   :  { %1304 = vadd.xlane.f32.xlu1 %v1303_v37  ;;  %v3621_v37 = vpop.permute.xlu0 %854 }
 0x277   :  { %1307 = vadd.xlane.f32.xlu0 %v1306_v53  ;;  %v3632_v53 = vpop.permute.xlu1 %858 }
 0x278   :  { %1310 = vadd.xlane.f32.xlu1 %v1309_v44  ;;  %v1339_v44 = vsel %vm1212_vm7, %v1126_v61, 0.0  ;;  %v3638_v52 = vpop.permute.xlu0 %862  ;;  %v1369_v61 = vsel %vm1212_vm7, %v1136_v8, 0.0 }
 0x27b   :  { %1313 = vadd.xlane.f32.xlu0 %v1312_v56  ;;  %v1345_v56 = vsel %vm1212_vm7, %v1128_v63, 0.0  ;;  %v3651_v7 = vpop.permute.xlu1 %866  ;;  %v4897_v63 = vld [vmem:[#allocation9_spill] sm:$0xff] }
 0x27c   :  { %1316 = vadd.xlane.f32.xlu1 %v1315_v46  ;;  %v1129_v46 = vsel %vm995_vm6, %v3397_v18, 0.0  ;;  %v3653_v54 = vpop.permute.xlu0 %873  ;;  %vm1006_vm2 = vcmp.ge.f32.partialorder %v4897_v63, %v3390_v15 }
 0x27d   :  { %v1348_v5 = vsel %vm1212_vm7, %v1129_v46, 0.0 }
 0x27f   :  { %1319 = vadd.xlane.f32.xlu0 %v1318_v58  ;;  %v1351_v58 = vsel %vm1212_vm7, %v1130_v3, 0.0  ;;  %v3664_v49 = vpop.permute.xlu1 %877  ;;  %v4898_v3 = vld [vmem:[#allocation8_spill] sm:$0xff] }
 0x280   :  { %1322 = vadd.xlane.f32.xlu1 %v1321_v45  ;;  %v1131_v45 = vsel %vm997_vm9, %v3397_v18, 0.0  ;;  %vm1007_vm3 = vcmp.ge.f32.partialorder %v4898_v3, %v3390_v15 }
 0x281   :  { %v1354_v55 = vsel %vm1212_vm7, %v1131_v45, 0.0  ;;  %v4899_v45 = vld [vmem:[#allocation11_spill] sm:$0xff] }
 0x282   :  { %vm1008_vm4 = vcmp.ge.f32.partialorder %v4899_v45, %v3390_v15  ;;  %v4907_v45 = vld [vmem:[#allocation17_spill] sm:$0xff] }
 0x283   :  { %1325 = vadd.xlane.f32.xlu0 %v1324_v60  ;;  %v1133_v60 = vsel %vm999_vm11, %v3397_v18, 0.0  ;;  %v1142_v1 = vsel %vm1008_vm4, %v3397_v18, 0.0  ;;  %vm1014_vm11 = vcmp.ge.f32.partialorder %v4907_v45, %v3390_v15 }
 0x284   :  { %1328 = vadd.xlane.f32.xlu1 %v1327_v39  ;;  %v3670_v39 = vpop.permute.xlu0 %881  ;;  %v1360_v16 = vsel %vm1212_vm7, %v1133_v60, 0.0  ;;  %v4900_v60 = vld [vmem:[#allocation10_spill] sm:$0xff]  ;;  %v1387_v8 = vsel %vm1212_vm7, %v1142_v1, 0.0  ;;  %v1148_v1 = vsel %vm1014_vm11, %v3397_v18, 0.0 }
 0x285   :  { %vm1009_vm5 = vcmp.ge.f32.partialorder %v4900_v60, %v3390_v15  ;;  %v4908_v60 = vld [vmem:[#allocation16_spill] sm:$0xff] }
 0x286   :  { %vm1015_vm12 = vcmp.ge.f32.partialorder %v4908_v60, %v3390_v15 }
 0x287   :  { %1331 = vadd.xlane.f32.xlu0 %v1330_v62  ;;  %v4895_v62 = vld [vmem:[#allocation6_spill] sm:$0xff] }
 0x288   :  { %1334 = vadd.xlane.f32.xlu1 %v1333_v24  ;;  %vm1003_vm15 = vcmp.ge.f32.partialorder %v4895_v62, %v3390_v15  ;;  %v3683_v24 = vpop.permute.xlu1 %885  ;;  %v3685_v50 = vpop.permute.xlu0 %892 }
 0x28b   :  { %1337 = vadd.xlane.f32.xlu0 %v1336_v2  ;;  %v1137_v2 = vsel %vm1003_vm15, %v3397_v18, 0.0 }
 0x28c   :  { %1340 = vadd.xlane.f32.xlu1 %v1339_v44  ;;  %v4896_v44 = vld [vmem:[#allocation7_spill] sm:$0xff]  ;;  %v1372_v20 = vsel %vm1212_vm7, %v1137_v2, 0.0 }
 0x28d   :  { %vm1005_vm1 = vcmp.ge.f32.partialorder %v4896_v44, %v3390_v15  ;;  %v4904_v44 = vld [vmem:[#allocation15_spill] sm:$0xff] }
 0x28e   :  { %v1139_v46 = vsel %vm1005_vm1, %v3397_v18, 0.0  ;;  %vm1012_vm9 = vcmp.ge.f32.partialorder %v4904_v44, %v3390_v15  ;;  %v4912_v44 = vld [vmem:[#allocation18_spill] sm:$0xff]  ;;  %vm1020_vm1 = vcmp.ge.f32.partialorder %v3371_v48, %v3390_v15 }
 0x28f   :  { %1343 = vadd.xlane.f32.xlu0 %v1342_v4  ;;  %v3696_v4 = vpop.permute.xlu1 %896  ;;  %v1378_v0 = vsel %vm1212_vm7, %v1139_v46, 0.0  ;;  %v4905_v46 = vld [vmem:[#allocation14_spill] sm:$0xff]  ;;  %vm1017_vm14 = vcmp.ge.f32.partialorder %v4912_v44, %v3390_v15 }
 0x290   :  { %1346 = vadd.xlane.f32.xlu1 %v1345_v56  ;;  %v1375_v56 = vsel %vm1212_vm7, %v1138_v36, 0.0  ;;  %vm1013_vm10 = vcmp.ge.f32.partialorder %v4905_v46, %v3390_v15  ;;  %v1151_v45 = vsel %vm1017_vm14, %v3397_v18, 0.0 }
 0x291   :  { %v1414_v60 = vsel %vm1212_vm7, %v1151_v45, 0.0 }
 0x293   :  { %1349 = vadd.xlane.f32.xlu0 %v1348_v5  ;;  %v3702_v5 = vpop.permute.xlu0 %900 }
 0x294   :  { %1352 = vadd.xlane.f32.xlu1 %v1351_v58  ;;  %v1140_v58 = vsel %vm1006_vm2, %v3397_v18, 0.0  ;;  %vm1021_vm2 = vcmp.ge.f32.partialorder %v3369_v12, %v3390_v15 }
 0x297   :  { %1355 = vadd.xlane.f32.xlu0 %v1354_v55  ;;  %v1381_v55 = vsel %vm1212_vm7, %v1140_v58, 0.0  ;;  %v3717_v59 = vpop.permute.xlu0 %911  ;;  %v1146_v58 = vsel %vm1012_vm9, %v3397_v18, 0.0 }
 0x298   :  { %1358 = vadd.xlane.f32.xlu1 %v1357_v57  ;;  %v1141_v57 = vsel %vm1007_vm3, %v3397_v18, 0.0  ;;  %vm1022_vm3 = vcmp.ge.f32.partialorder %v3373_v14, %v3390_v15 }
 0x299   :  { %v1384_v62 = vsel %vm1212_vm7, %v1141_v57, 0.0  ;;  %v1147_v57 = vsel %vm1013_vm10, %v3397_v18, 0.0 }
 0x29b   :  { %1361 = vadd.xlane.f32.xlu0 %v1360_v16  ;;  %v4901_v16 = vld [vmem:[#allocation13_spill] sm:$0xff]  ;;  %v3734_v3 = vpop.permute.xlu0 %919 }
 0x29c   :  { %1364 = vadd.xlane.f32.xlu1 %v1363_v47  ;;  %vm1010_vm6 = vcmp.ge.f32.partialorder %v4901_v16, %v3390_v15  ;;  %v3715_v47 = vpop.permute.xlu1 %904  ;;  %4906 = vst [vmem:[#allocation7_spill] sm:$0xff] %v3734_v3  ;;  %v4909_v16 = vld [vmem:[#allocation19_spill] sm:$0xff]  ;;  %v4928_v3 = vld [vmem:[#allocation5_spill] sm:$0xff] }
 0x29d   :  { %4902 = vst [vmem:[#allocation6_spill] sm:$0xff] %v3715_v47  ;;  %v1144_v2 = vsel %vm1010_vm6, %v3397_v18, 0.0  ;;  %vm1016_vm13 = vcmp.ge.f32.partialorder %v4909_v16, %v3390_v15 }
 0x29f   :  { %1367 = vadd.xlane.f32.xlu0 %v1366_v17  ;;  %v1143_v17 = vsel %vm1009_vm5, %v3397_v18, 0.0 }
 0x2a0   :  { %1370 = vadd.xlane.f32.xlu1 %v1369_v61  ;;  %v4903_v61 = vld [vmem:[#allocation12_spill] sm:$0xff]  ;;  %v1390_v36 = vsel %vm1212_vm7, %v1143_v17, 0.0  ;;  %v3728_v63 = vpop.permute.xlu1 %915  ;;  %v1402_v17 = vsel %vm1212_vm7, %v1147_v57, 0.0 }
 0x2a1   :  { %vm1011_vm8 = vcmp.ge.f32.partialorder %v4903_v61, %v3390_v15  ;;  %v1405_v61 = vsel %vm1212_vm7, %v1148_v1, 0.0 }
 0x2a3   :  { %1373 = vadd.xlane.f32.xlu0 %v1372_v20  ;;  %v1393_v20 = vsel %vm1212_vm7, %v1144_v2, 0.0  ;;  %v1149_v2 = vsel %vm1015_vm12, %v3397_v18, 0.0 }
 0x2a4   :  { %1376 = vadd.xlane.f32.xlu1 %v1375_v56  ;;  %v1145_v56 = vsel %vm1011_vm8, %v3397_v18, 0.0 }
 0x2a7   :  { %1379 = vadd.xlane.f32.xlu0 %v1378_v0  ;;  %v1396_v0 = vsel %vm1212_vm7, %v1145_v56, 0.0  ;;  %v1408_v56 = vsel %vm1212_vm7, %v1149_v2, 0.0 }
 0x2a8   :  { %1382 = vadd.xlane.f32.xlu1 %v1381_v55  ;;  %v1399_v55 = vsel %vm1212_vm7, %v1146_v58, 0.0 }
 0x2ab   :  { %1385 = vadd.xlane.f32.xlu0 %v1384_v62  ;;  %v3747_v62 = vpop.permute.xlu1 %923 }
 0x2ac   :  { %1388 = vadd.xlane.f32.xlu1 %v1387_v8  ;;  %4910 = vst [vmem:[#allocation9_spill] sm:$0xff] %v3747_v62  ;;  %v3749_v8 = vpop.permute.xlu0 %930 }
 0x2ad   :  { %4911 = vst [vmem:[#allocation8_spill] sm:$0xff] %v3749_v8 }
 0x2af   :  { %1391 = vadd.xlane.f32.xlu0 %v1390_v36  ;;  %v1150_v36 = vsel %vm1016_vm13, %v3397_v18, 0.0  ;;  %v3760_v46 = vpop.permute.xlu1 %934  ;;  %vm1031_vm13 = vcmp.ge.f32.partialorder %v3409_v10, %v3390_v15 }
 0x2b0   :  { %1394 = vadd.xlane.f32.xlu1 %v1393_v20  ;;  %v4913_v20 = vld [vmem:[#allocation21_spill] sm:$0xff]  ;;  %4914 = vst [vmem:[#allocation11_spill] sm:$0xff] %v3760_v46  ;;  %v1411_v58 = vsel %vm1212_vm7, %v1150_v36, 0.0  ;;  %v1155_v36 = vsel %vm1021_vm2, %v3397_v18, 0.0  ;;  %vm1047_vm2 = vcmp.ge.f32.partialorder %v3536_v29, %v3390_v15 }
 0x2b1   :  { %vm1018_vm15 = vcmp.ge.f32.partialorder %v4913_v20, %v3390_v15  ;;  %v4918_v20 = vld [vmem:[#allocation22_spill] sm:$0xff]  ;;  %v1426_v45 = vsel %vm1212_vm7, %v1155_v36, 0.0 }
 0x2b2   :  { %v1152_v57 = vsel %vm1018_vm15, %v3397_v18, 0.0  ;;  %vm1023_vm4 = vcmp.ge.f32.partialorder %v4918_v20, %v3390_v15  ;;  %vm1033_vm15 = vcmp.ge.f32.partialorder %v3427_v21, %v3390_v15 }
 0x2b3   :  { %1397 = vadd.xlane.f32.xlu0 %v1396_v0  ;;  %v4915_v0 = vld [vmem:[#allocation20_spill] sm:$0xff]  ;;  %v1417_v1 = vsel %vm1212_vm7, %v1152_v57, 0.0  ;;  %v3781_v2 = vpop.permute.xlu1 %942  ;;  %v1157_v57 = vsel %vm1023_vm4, %v3397_v18, 0.0  ;;  %vm1048_vm4 = vcmp.ge.f32.partialorder %v3542_v26, %v3390_v15 }
 0x2b4   :  { %1400 = vadd.xlane.f32.xlu1 %v1399_v55  ;;  %vm1019_vm0 = vcmp.ge.f32.partialorder %v4915_v0, %v3390_v15  ;;  %v3766_v55 = vpop.permute.xlu0 %938  ;;  %4917 = vst [vmem:[#allocation13_spill] sm:$0xff] %v3781_v2 }
 0x2b5   :  { %4916 = vst [vmem:[#allocation10_spill] sm:$0xff] %v3766_v55  ;;  %v1153_v16 = vsel %vm1019_vm0, %v3397_v18, 0.0  ;;  %vm1035_vm0 = vcmp.ge.f32.partialorder %v3440_v19, %v3390_v15  ;;  %v4927_v55 = vlaneseq }
 0x2b6   :  { %v1420_v48 = vsel %vm1212_vm7, %v1153_v16, 0.0 }
 0x2b7   :  { %1403 = vadd.xlane.f32.xlu0 %v1402_v17  ;;  %v1984_v2 = vand.u32 127, %v4927_v55  ;;  %v1167_v55 = vsel %vm1033_vm15, %v3397_v18, 0.0  ;;  %vm1058_vm15 = vcmp.ge.f32.partialorder %v3621_v37, %v3390_v15 }
 0x2b8   :  { %1406 = vadd.xlane.f32.xlu1 %v1405_v61  ;;  %v1154_v61 = vsel %vm1020_vm1, %v3397_v18, 0.0  ;;  %vm1034_vm1 = vcmp.ge.f32.partialorder %v3429_v9, %v3390_v15  ;;  %v1462_v19 = vsel %vm1212_vm7, %v1167_v55, 0.0 }
 0x2b9   :  { %v1423_v44 = vsel %vm1212_vm7, %v1154_v61, 0.0  ;;  %v4921_v61 = vld [vmem:[#allocation25_spill] sm:$0xff]  ;;  %v1989_v9 = vadd.s32 4294967288, %v1984_v2  ;;  %v3892_v31 = vsub.s32 %v1984_v2, %v4928_v3 }
 0x2ba   :  { %vm1026_vm8 = vcmp.ge.f32.partialorder %v4921_v61, %v3390_v15 }
 0x2bb   :  { %1409 = vadd.xlane.f32.xlu0 %v1408_v56  ;;  %v1156_v56 = vsel %vm1022_vm3, %v3397_v18, 0.0  ;;  %vm1046_vm3 = vcmp.ge.f32.partialorder %v3525_v34, %v3390_v15  ;;  %v3932_v29 = vsub.s32 %v1989_v9, %v4928_v3 }
 0x2bc   :  { %1412 = vadd.xlane.f32.xlu1 %v1411_v58  ;;  %v4919_v58 = vld [vmem:[#allocation23_spill] sm:$0xff]  ;;  %v1429_v0 = vsel %vm1212_vm7, %v1156_v56, 0.0  ;;  %v4922_v56 = vld [vmem:[#allocation26_spill] sm:$0xff] }
 0x2bd   :  { %vm1024_vm5 = vcmp.ge.f32.partialorder %v4919_v58, %v3390_v15  ;;  %vm1027_vm9 = vcmp.ge.f32.partialorder %v4922_v56, %v3390_v15  ;;  %v4926_v56 = vld [vmem:[#allocation30_spill] sm:$0xff] }
 0x2be   :  { %v1158_v16 = vsel %vm1024_vm5, %v3397_v18, 0.0  ;;  %vm1032_vm14 = vcmp.ge.f32.partialorder %v4926_v56, %v3390_v15  ;;  %vm1049_vm5 = vcmp.ge.f32.partialorder %v3555_v40, %v3390_v15 }
 0x2bf   :  { %1415 = vadd.xlane.f32.xlu0 %v1414_v60  ;;  %v4920_v60 = vld [vmem:[#allocation24_spill] sm:$0xff]  ;;  %v1435_v36 = vsel %vm1212_vm7, %v1158_v16, 0.0  ;;  %v4925_v16 = vld [vmem:[#allocation29_spill] sm:$0xff]  ;;  %v1166_v62 = vsel %vm1032_vm14, %v3397_v18, 0.0  ;;  %v1183_v34 = vsel %vm1049_vm5, %v3397_v18, 0.0  ;;  %vm1056_vm14 = vcmp.ge.f32.partialorder %v3606_v32, %v3390_v15 }
 0x2c0   :  { %1418 = vadd.xlane.f32.xlu1 %v1417_v1  ;;  %v3776_v17 = vpop.xlane.xlu0 %1214  ;;  %vm1025_vm6 = vcmp.ge.f32.partialorder %v4920_v60, %v3390_v15  ;;  %vm1030_vm12 = vcmp.ge.f32.partialorder %v4925_v16, %v3390_v15  ;;  %v1459_v21 = vsel %vm1212_vm7, %v1166_v62, 0.0  ;;  %v1192_v32 = vsel %vm1058_vm15, %v3397_v18, 0.0 }
 0x2c1   :  { %v1159_v20 = vsel %vm1025_vm6, %v3397_v18, 0.0  ;;  %v1164_v16 = vsel %vm1030_vm12, %v3397_v18, 0.0  ;;  %vm1051_vm6 = vcmp.ge.f32.partialorder %v3568_v42, %v3390_v15  ;;  %vm1055_vm12 = vcmp.ge.f32.partialorder %v3600_v23, %v3390_v15 }
 0x2c2   :  { %v1438_v61 = vsel %vm1212_vm7, %v1159_v20, 0.0  ;;  %v1453_v10 = vsel %vm1212_vm7, %v1164_v16, 0.0  ;;  %v2003_v16 = vadd.s32 4294967272, %v1984_v2  ;;  %vm1061_vm5 = vcmp.ge.f32.partialorder %v3651_v7, %v3390_v15 }
 0x2c3   :  { %1421 = vadd.xlane.f32.xlu0 %v1420_v48 }
 0x2c4   :  { %1424 = vadd.xlane.f32.xlu1 %v1423_v44  ;;  %v3788_v12 = vpop.xlane.xlu0 %1220  ;;  %v1432_v44 = vsel %vm1212_vm7, %v1157_v57, 0.0  ;;  %v4924_v57 = vld [vmem:[#allocation28_spill] sm:$0xff]  ;;  %v3935_v26 = vsub.s32 %v2003_v16, %v4928_v3 }
 0x2c5   :  { %v3793_v14 = vpop.xlane.xlu1 %1217  ;;  %vm1029_vm11 = vcmp.ge.f32.partialorder %v4924_v57, %v3390_v15 }
 0x2c7   :  { %1427 = vadd.xlane.f32.xlu0 %v1426_v45  ;;  %v1160_v45 = vsel %vm1026_vm8, %v3397_v18, 0.0  ;;  %vm1050_vm8 = vcmp.ge.f32.partialorder %v3557_v35, %v3390_v15 }
 0x2c8   :  { %1430 = vadd.xlane.f32.xlu1 %v1429_v0  ;;  %v3800_v1 = vpop.xlane.xlu0 %1223  ;;  %v4923_v0 = vld [vmem:[#allocation27_spill] sm:$0xff] }
 0x2c9   :  { %v3805_v48 = vpop.xlane.xlu1 %1226  ;;  %vm1028_vm10 = vcmp.ge.f32.partialorder %v4923_v0, %v3390_v15 }
 0x2ca   :  { %v1162_v57 = vsel %vm1028_vm10, %v3397_v18, 0.0  ;;  %vm1053_vm10 = vcmp.ge.f32.partialorder %v3587_v38, %v3390_v15 }
 0x2cb   :  { %1433 = vadd.xlane.f32.xlu0 %v1432_v44  ;;  %v1441_v44 = vsel %vm1212_vm7, %v1160_v45, 0.0  ;;  %v1163_v45 = vsel %vm1029_vm11, %v3397_v18, 0.0  ;;  %v1447_v46 = vsel %vm1212_vm7, %v1162_v57, 0.0  ;;  %v1996_v57 = vadd.s32 4294967280, %v1984_v2 }
 0x2cc   :  { %1436 = vadd.xlane.f32.xlu1 %v1435_v36  ;;  %v3812_v58 = vpop.xlane.xlu0 %1229  ;;  %v1161_v36 = vsel %vm1027_vm9, %v3397_v18, 0.0  ;;  %v1181_v2 = vsel %vm1047_vm2, %v3397_v18, 0.0  ;;  %vm1052_vm9 = vcmp.ge.f32.partialorder %v3574_v41, %v3390_v15  ;;  %vm1054_vm11 = vcmp.ge.f32.partialorder %v3589_v43, %v3390_v15 }
 0x2cd   :  { %v3817_v60 = vpop.xlane.xlu1 %1232  ;;  %v3901_v30 = vsub.s32 %v1996_v57, %v4928_v3  ;;  %v1504_v55 = vsel %vm1212_vm7, %v1181_v2, 0.0  ;;  %v1185_v3 = vsel %vm1051_vm6, %v3397_v18, 0.0  ;;  %v1188_v42 = vsel %vm1054_vm11, %v3397_v18, 0.0 }
 0x2ce   :  { %v1187_v41 = vsel %vm1053_vm10, %v3397_v18, 0.0  ;;  %v1189_v43 = vsel %vm1055_vm12, %v3397_v18, 0.0  ;;  %vm2001_vm2 = vcmask 195712   ;;  %vm2599_vm6 = vcmask 1041409  }
 0x2cf   :  { %1439 = vadd.xlane.f32.xlu0 %v1438_v61  ;;  %v1444_v61 = vsel %vm1212_vm7, %v1161_v36, 0.0  ;;  %v1450_v36 = vsel %vm1212_vm7, %v1163_v45, 0.0  ;;  %v1169_v45 = vsel %vm1035_vm0, %v3397_v18, 0.0  ;;  %vm1059_vm0 = vcmp.ge.f32.partialorder %v3632_v53, %v3390_v15 }
 0x2d0   :  { %1442 = vadd.xlane.f32.xlu1 %v1441_v44  ;;  %v3832_v0 = vpop.xlane.xlu0 %1235  ;;  %v1165_v44 = vsel %vm1031_vm13, %v3397_v18, 0.0  ;;  %v3898_v62 = vsel %vm1212_vm7, %v1169_v45, 0.0  ;;  %v1184_v45 = vsel %vm1050_vm8, %v3397_v18, 0.0  ;;  %vm1057_vm13 = vcmp.ge.f32.partialorder %v3619_v51, %v3390_v15 }
 0x2d1   :  { %v3837_v20 = vpop.xlane.xlu1 %1238  ;;  %v1456_v56 = vsel %vm1212_vm7, %v1165_v44, 0.0  ;;  %v3889_v44 = vstv %s3830_s28  ;;  %vm1063_vm8 = vcmp.ge.f32.partialorder %v3664_v49, %v3390_v15  ;;  %vm2601_vm11 = vcmask 1042434  }
 0x2d2   :  { %v1599_v9 = vadd.f32 %v3889_v44, %v3793_v14  ;;  %v1603_v16 = vadd.f32 %v3889_v44, %v3812_v58  ;;  %v1516_v14 = vsel %vm1212_vm7, %v1185_v3, 0.0  ;;  %v1598_v58 = vadd.f32 %v3889_v44, %v3776_v17 }
 0x2d3   :  { %1445 = vadd.xlane.f32.xlu0 %v1444_v61  ;;  %v1602_v23 = vadd.f32 %v3889_v44, %v3805_v48  ;;  %v4007_v17 = vsel %vm1212_vm7, %v1189_v43, 0.0  ;;  %v4010_v48 = vsel %vm1212_vm7, %v1187_v41, 0.0  ;;  %v1604_v51 = vadd.f32 %v3889_v44, %v3817_v60 }
 0x2d4   :  { %1448 = vadd.xlane.f32.xlu1 %v1447_v46  ;;  %v3859_v8 = vpop.xlane.xlu0 %1241  ;;  %v1168_v46 = vsel %vm1034_vm1, %v3397_v18, 0.0  ;;  %vm1994_vm1 = vcmask 130112   ;;  %v1732_v3 = vmul.f32 %v3857_v28, %v1603_v16  ;;  %v1727_v53 = vmul.f32 %v3857_v28, %v1598_v58 }
 0x2d5   :  { %v3867_v61 = vpop.xlane.xlu1 %1244  ;;  %v1465_v33 = vsel %vm1212_vm7, %v1168_v46, 0.0  ;;  %v1607_v37 = vadd.f32 %v3889_v44, %v3859_v8  ;;  %v1606_v16 = vadd.f32 %v3889_v44, %v3837_v20  ;;  %v4049_v43 = vsel %vm1212_vm7, %v1192_v32, 0.0 }
 0x2d6   :  { %vm2603_vm12 = vcmask 1043459  }
 0x2d7   :  { %1451 = vadd.xlane.f32.xlu0 %v1450_v36  ;;  %v1180_v36 = vsel %vm1046_vm3, %v3397_v18, 0.0  ;;  %vm1060_vm3 = vcmp.ge.f32.partialorder %v3638_v52, %v3390_v15  ;;  %v1736_v20 = vmul.f32 %v3857_v28, %v1607_v37 }
 0x2d8   :  { %1454 = vadd.xlane.f32.xlu1 %v1453_v10  ;;  %v3894_v47 = vpop.xlane.xlu0 %1247  ;;  %v1182_v10 = vsel %vm1048_vm4, %v3397_v18, 0.0  ;;  %v1501_v40 = vsel %vm1212_vm7, %v1180_v36, 0.0  ;;  %v1513_v36 = vsel %vm1212_vm7, %v1184_v45, 0.0  ;;  %v1728_v45 = vmul.f32 %v3857_v28, %v1599_v9 }
 0x2d9   :  { %v3903_v27 = vpop.xlane.xlu1 %1250  ;;  %v3944_v57 = vsel %vm1212_vm7, %v1182_v10, 0.0  ;;  %v1191_v10 = vsel %vm1057_vm13, %v3397_v18, 0.0  ;;  %vm2008_vm4 = vcmask 261312   ;;  %vm2605_vm13 = vcmask 1044484  }
 0x2da   :  { %v4034_v60 = vsel %vm1212_vm7, %v1191_v10, 0.0  ;;  %v1993_v58 = vrot.slane %v1728_v45, %v3932_v29  ;;  %v1608_v10 = vadd.f32 %v3889_v44, %v3867_v61  ;;  %v1194_v45 = vsel %vm1060_vm3, %v3397_v18, 0.0 }
 0x2db   :  { %1457 = vadd.xlane.f32.xlu0 %v1456_v56  ;;  %v1186_v56 = vsel %vm1052_vm9, %v3397_v18, 0.0  ;;  %v1988_v61 = vrot.slane %v1727_v53, %v3892_v31  ;;  %vm1062_vm9 = vcmp.ge.f32.partialorder %v3653_v54, %v3390_v15  ;;  %v4119_v54 = vld [vmem:[%s4844_s3] ss:$0 sm:$0xff] }
 0x2dc   :  { %1460 = vadd.xlane.f32.xlu1 %v1459_v21  ;;  %v3939_v35 = vpop.xlane.xlu0 %1253  ;;  %v3958_v21 = vsel %vm1212_vm7, %v1183_v34, 0.0  ;;  %v1519_v2 = vsel %vm1212_vm7, %v1186_v56, 0.0  ;;  %v4004_v34 = vsel %vm1212_vm7, %v1188_v42, 0.0  ;;  %v1193_v56 = vsel %vm1059_vm0, %v3397_v18, 0.0 }
 0x2dd   :  { %v3946_v46 = vpop.xlane.xlu1 %1256  ;;  %v1605_v42 = vadd.f32 %v3889_v44, %v3832_v0  ;;  %v1600_v0 = vadd.f32 %v3889_v44, %v3788_v12  ;;  %v2017_v12 = vrot.slane %v1732_v3, %v3932_v29  ;;  %v1995_v52 = vsel %vm1994_vm1, %v1993_v58, %v1988_v61 }
 0x2de   :  { %v1737_v53 = vmul.f32 %v3857_v28, %v1608_v10  ;;  %vm1064_vm10 = vcmp.ge.f32.partialorder %v3670_v39, %v4119_v54  ;;  %vm1066_vm15 = vcmp.ge.f32.partialorder %v3685_v50, %v4119_v54  ;;  %vm2609_vm0 = vcmask 1046534  }
 0x2df   :  { %1463 = vadd.xlane.f32.xlu0 %v1462_v19  ;;  %vm1067_vm3 = vcmp.ge.f32.partialorder %v3696_v4, %v4119_v54 }
 0x2e0   :  { %1466 = vadd.xlane.f32.xlu1 %v1465_v33  ;;  %v3984_v38 = vpop.xlane.xlu0 %1259  ;;  %v1190_v33 = vsel %vm1056_vm14, %v3397_v18, 0.0  ;;  %v1611_v18 = vadd.f32 %v3889_v44, %v3939_v35  ;;  %v1610_v35 = vadd.f32 %v3889_v44, %v3903_v27  ;;  %v2041_v61 = vrot.slane %v1737_v53, %v3901_v30 }
 0x2e1   :  { %v3993_v19 = vpop.xlane.xlu1 %1262  ;;  %v4031_v9 = vsel %vm1212_vm7, %v1190_v33, 0.0  ;;  %v4052_v33 = vsel %vm1212_vm7, %v1193_v56, 0.0  ;;  %v1735_v56 = vmul.f32 %v3857_v28, %v1606_v16  ;;  %v1613_v39 = vadd.f32 %v3889_v44, %v3984_v38 }
 0x2e2   :  { %v1740_v10 = vmul.f32 %v3857_v28, %v1611_v18  ;;  %vm2607_vm14 = vcmask 1045509  }
 0x2e3   :  { %1502 = vadd.xlane.f32.xlu0 %v1501_v40  ;;  %v1731_v40 = vmul.f32 %v3857_v28, %v1602_v23  ;;  %v1733_v23 = vmul.f32 %v3857_v28, %v1604_v51 }
 0x2e4   :  { %1505 = vadd.xlane.f32.xlu1 %v1504_v55  ;;  %v4028_v41 = vpop.xlane.xlu0 %1265  ;;  %v1601_v55 = vadd.f32 %v3889_v44, %v3800_v1  ;;  %v1734_v1 = vmul.f32 %v3857_v28, %v1605_v42  ;;  %v2055_v53 = vrot.slane %v1740_v10, %v3932_v29 }
 0x2e5   :  { %v4042_v8 = vpop.xlane.xlu1 %1268  ;;  %v2013_v3 = vrot.slane %v1731_v40, %v3892_v31  ;;  %v2022_v37 = vrot.slane %v1733_v23, %v3901_v30  ;;  %v2036_v40 = vrot.slane %v1736_v20, %v3932_v29  ;;  %v1615_v18 = vadd.f32 %v3889_v44, %v4028_v41 }
 0x2e7   :  { %1514 = vadd.xlane.f32.xlu0 %v1513_v36  ;;  %v1729_v36 = vmul.f32 %v3857_v28, %v1600_v0  ;;  %v2018_v42 = vsel %vm1994_vm1, %v2017_v12, %v2013_v3  ;;  %v2027_v0 = vrot.slane %v1734_v1, %v3935_v26  ;;  %v1612_v12 = vadd.f32 %v3889_v44, %v3946_v46 }
 0x2e8   :  { %1517 = vadd.xlane.f32.xlu1 %v1516_v14  ;;  %v4063_v32 = vpop.xlane.xlu0 %1271  ;;  %v1730_v14 = vmul.f32 %v3857_v28, %v1601_v55  ;;  %v1609_v55 = vadd.f32 %v3889_v44, %v3894_v47  ;;  %v2032_v46 = vrot.slane %v1735_v56, %v3892_v31  ;;  %v2023_v20 = vsel %vm2001_vm2, %v2022_v37, %v2018_v42 }
 0x2e9   :  { %v1275_v51 = vpop.xlane.xlu1 %1274  ;;  %v2000_v58 = vrot.slane %v1729_v36, %v3901_v30  ;;  %v2028_v36 = vsel %vm2008_vm4, %v2027_v0, %v2023_v20  ;;  %v1739_v3 = vmul.f32 %v3857_v28, %v1610_v35  ;;  %v1741_v56 = vmul.f32 %v3857_v28, %v1612_v12 }
 0x2ea   :  { %v2037_v15 = vsel %vm1994_vm1, %v2036_v40, %v2032_v46  ;;  %v1738_v49 = vmul.f32 %v3857_v28, %v1609_v55  ;;  %v4136_v42 = vsel %vm1212_vm7, %v1194_v45, 0.0  ;;  %v1614_v40 = vadd.f32 %v3889_v44, %v3993_v19 }
 0x2eb   :  { %1508 = vadd.xlane.f32.xlu0 %v3944_v57  ;;  %v4097_v57 = vld [vmem:[%s4845_s4] ss:$0 sm:$0xff]  ;;  %v2002_v7 = vsel %vm2001_vm2, %v2000_v58, %v1995_v52  ;;  %v2042_v45 = vsel %vm2001_vm2, %v2041_v61, %v2037_v15  ;;  %v2051_v58 = vrot.slane %v1739_v3, %v3892_v31  ;;  %v1616_v12 = vadd.f32 %v3889_v44, %v4042_v8 }
 0x2ec   :  { %1520 = vadd.xlane.f32.xlu1 %v1519_v2  ;;  %v1278_v16 = vpop.xlane.xlu0 %1277  ;;  %v1196_v47 = vsel %vm1062_vm9, %v4097_v57, 0.0  ;;  %v4107_v27 = vsel %vm1061_vm5, %v4097_v57, 0.0  ;;  %v2007_v2 = vrot.slane %v1730_v14, %v3935_v26  ;;  %v1197_v1 = vsel %vm1063_vm8, %v4097_v57, 0.0 }
 0x2ed   :  { %v1281_v23 = vpop.xlane.xlu1 %1280  ;;  %v4144_v0 = vsel %vm1212_vm7, %v1197_v1, 0.0  ;;  %v1619_v55 = vadd.f32 %v3889_v44, %v1278_v16  ;;  %v2046_v35 = vrot.slane %v1738_v49, %v3935_v26  ;;  %v1744_v19 = vmul.f32 %v3857_v28, %v1615_v18 }
 0x2ee   :  { %v2009_v37 = vsel %vm2008_vm4, %v2007_v2, %v2002_v7  ;;  %v2060_v2 = vrot.slane %v1741_v56, %v3901_v30  ;;  %v1618_v16 = vadd.f32 %v3889_v44, %v1275_v51  ;;  %v2056_v10 = vsel %vm1994_vm1, %v2055_v53, %v2051_v58 }
 0x2ef   :  { %1526 = vadd.xlane.f32.xlu0 %v4004_v34  ;;  %v4139_v34 = vsel %vm1212_vm7, %v1196_v47, 0.0  ;;  %v4153_v41 = vsel %vm2599_vm6, %v2028_v36, %v2009_v37  ;;  %v1617_v38 = vadd.f32 %v3889_v44, %v4063_v32  ;;  %v1620_v1 = vadd.f32 %v3889_v44, %v1281_v23 }
 0x2f0   :  { %1529 = vadd.xlane.f32.xlu1 %v4007_v17  ;;  %v1284_v14 = vpop.xlane.xlu0 %1283  ;;  %v4150_v17 = vsel %vm1064_vm10, %v4097_v57, 0.0  ;;  %v1748_v7 = vmul.f32 %v3857_v28, %v1619_v55  ;;  %v2047_v61 = vsel %vm2008_vm4, %v2046_v35, %v2042_v45  ;;  %v1742_v36 = vmul.f32 %v3857_v28, %v1613_v39 }
 0x2f1   :  { %v1287_v52 = vpop.xlane.xlu1 %1286  ;;  %v1621_v20 = vadd.f32 %v3889_v44, %v1284_v14  ;;  %v1745_v32 = vmul.f32 %v3857_v28, %v1616_v12  ;;  %v2061_v49 = vsel %vm2001_vm2, %v2060_v2, %v2056_v10  ;;  %v2074_v3 = vrot.slane %v1744_v19, %v3932_v29 }
 0x2f2   :  { %v1622_v8 = vadd.f32 %v3889_v44, %v1287_v52  ;;  %v1747_v14 = vmul.f32 %v3857_v28, %v1618_v16  ;;  %v1746_v18 = vmul.f32 %v3857_v28, %v1617_v38  ;;  %v1749_v52 = vmul.f32 %v3857_v28, %v1620_v1 }
 0x2f3   :  { %1511 = vadd.xlane.f32.xlu0 %v3958_v21  ;;  %v2093_v45 = vrot.slane %v1748_v7, %v3932_v29  ;;  %v2065_v35 = vrot.slane %v1742_v36, %v3935_v26  ;;  %v2079_v58 = vrot.slane %v1745_v32, %v3901_v30  ;;  %vm4861_vm5 = vcmask 1047559  }
 0x2f4   :  { %1523 = vadd.xlane.f32.xlu1 %v4010_v48  ;;  %v1290_v47 = vpop.xlane.xlu0 %1289  ;;  %v1743_v48 = vmul.f32 %v3857_v28, %v1614_v40  ;;  %v1751_v37 = vmul.f32 %v3857_v28, %v1622_v8  ;;  %v1750_v40 = vmul.f32 %v3857_v28, %v1621_v20  ;;  %v2089_v19 = vrot.slane %v1747_v14, %v3892_v31 }
 0x2f5   :  { %v1623_v21 = vadd.f32 %v3889_v44, %v1290_v47  ;;  %v1293_v46 = vpop.xlane.xlu1 %1292  ;;  %v2098_v10 = vrot.slane %v1749_v52, %v3901_v30  ;;  %v2066_v20 = vsel %vm2008_vm4, %v2065_v35, %v2061_v49  ;;  %v2602_v49 = vsel %vm2601_vm11, %v2047_v61, %v4153_v41 }
 0x2f6   :  { %v1624_v51 = vadd.f32 %v3889_v44, %v1293_v46  ;;  %v2070_v53 = vrot.slane %v1743_v48, %v3892_v31  ;;  %v2084_v46 = vrot.slane %v1746_v18, %v3935_v26  ;;  %v2108_v38 = vrot.slane %v1751_v37, %v3892_v31 }
 0x2f7   :  { %1532 = vadd.xlane.f32.xlu0 %v4031_v9  ;;  %v1752_v23 = vmul.f32 %v3857_v28, %v1623_v21  ;;  %v2103_v8 = vrot.slane %v1750_v40, %v3935_v26  ;;  %v2604_v41 = vsel %vm2603_vm12, %v2066_v20, %v2602_v49  ;;  %vm4860_vm8 = vcmask 261120   ;;  %v4932_v49 = vld [vmem:[#allocation6_spill] sm:$0xff] }
 0x2f8   :  { %1538 = vadd.xlane.f32.xlu1 %v4049_v43  ;;  %v1296_v15 = vpop.xlane.xlu0 %1295  ;;  %v1753_v55 = vmul.f32 %v3857_v28, %v1624_v51  ;;  %v2075_v2 = vsel %vm1994_vm1, %v2074_v3, %v2070_v53  ;;  %vm1036_vm9 = vcmp.ge.f32.partialorder %v3446_v22, %v4119_v54  ;;  %vm1038_vm10 = vcmp.ge.f32.partialorder %v3461_v25, %v4119_v54 }
 0x2f9   :  { %v1625_v9 = vadd.f32 %v3889_v44, %v1296_v15  ;;  %v1299_v56 = vpop.xlane.xlu1 %1298  ;;  %v2112_v39 = vrot.slane %v1752_v23, %v3932_v29  ;;  %v2080_v15 = vsel %vm2001_vm2, %v2079_v58, %v2075_v2  ;;  %v1200_v2 = vsel %vm1066_vm15, %v4097_v57, 0.0 }
 0x2fa   :  { %v1626_v43 = vadd.f32 %v3889_v44, %v1299_v56  ;;  %v2117_v48 = vrot.slane %v1753_v55, %v3901_v30  ;;  %v2085_v56 = vsel %vm2008_vm4, %v2084_v46, %v2080_v15  ;;  %v1561_v22 = vsel %vm1212_vm7, %v1200_v2, 0.0  ;;  %v4930_v15 = vld [vmem:[#allocation31_spill] sm:$0xff] }
 0x2fb   :  { %1541 = vadd.xlane.f32.xlu0 %v4052_v33  ;;  %v1754_v12 = vmul.f32 %v3857_v28, %v1625_v9  ;;  %v2113_v51 = vsel %vm1994_vm1, %v2112_v39, %v2108_v38  ;;  %v2606_v40 = vsel %vm2605_vm13, %v2085_v56, %v2604_v41  ;;  %vm1039_vm15 = vcmp.ge.f32.partialorder %v3472_v13, %v4119_v54  ;;  %v4934_v41 = vld [vmem:[#allocation7_spill] sm:$0xff] }
 0x2fc   :  { %1535 = vadd.xlane.f32.xlu1 %v4034_v60  ;;  %v1302_v47 = vpop.xlane.xlu0 %1301  ;;  %v1755_v16 = vmul.f32 %v3857_v28, %v1626_v43  ;;  %v2094_v60 = vsel %vm1994_vm1, %v2093_v45, %v2089_v19  ;;  %v2118_v37 = vsel %vm2001_vm2, %v2117_v48, %v2113_v51  ;;  %v1172_v25 = vsel %vm1038_vm10, %v4097_v57, 0.0 }
 0x2fd   :  { %v1627_v21 = vadd.f32 %v3889_v44, %v1302_v47  ;;  %v1305_v33 = vpop.xlane.xlu1 %1304  ;;  %v2122_v36 = vrot.slane %v1754_v12, %v3935_v26  ;;  %v2099_v18 = vsel %vm2001_vm2, %v2098_v10, %v2094_v60  ;;  %v1555_v47 = vsel %vm1212_vm7, %v4150_v17, 0.0 }
 0x2fe   :  { %v1628_v1 = vadd.f32 %v3889_v44, %v1305_v33  ;;  %v2127_v3 = vrot.slane %v1755_v16, %v3892_v31  ;;  %v2104_v52 = vsel %vm2008_vm4, %v2103_v8, %v2099_v18  ;;  %v1201_v16 = vsel %vm1067_vm3, %v4097_v57, 0.0 }
 0x2ff   :  { %v1756_v7 = vmul.f32 %v3857_v28, %v1627_v21  ;;  %1544 = vadd.xlane.f32.xlu0 %v4136_v42  ;;  %v2123_v61 = vsel %vm2008_vm4, %v2122_v36, %v2118_v37  ;;  %v2608_v35 = vsel %vm2607_vm14, %v2104_v52, %v2606_v40  ;;  %v1564_v17 = vsel %vm1212_vm7, %v1201_v16, 0.0 }
 0x300   :  { %v1757_v32 = vmul.f32 %v3857_v28, %v1628_v1  ;;  %1550 = vadd.xlane.f32.xlu1 %v4139_v34  ;;  %v1308_v23 = vpop.xlane.xlu0 %1307  ;;  %v2610_v39 = vsel %vm2609_vm0, %v2123_v61, %v2608_v35  ;;  %v1170_v21 = vsel %vm1036_vm9, %v4097_v57, 0.0  ;;  %vm1065_vm3 = vcmp.ge.f32.partialorder %v3683_v24, %v4119_v54  ;;  %v4935_v35 = vld [vmem:[#allocation8_spill] sm:$0xff] }
 0x301   :  { %v2131_v14 = vrot.slane %v1756_v7, %v3932_v29  ;;  %v1629_v9 = vadd.f32 %v3889_v44, %v1308_v23  ;;  %v4226_v42 = vpop.xlane.xlu1 %1310  ;;  %v1471_v46 = vsel %vm1212_vm7, %v1170_v21, 0.0  ;;  %v1477_v10 = vsel %vm1212_vm7, %v1172_v25, 0.0  ;;  %v4929_v23 = vld [vmem:[#allocation32_spill] sm:$0xff] }
 0x302   :  { %v2136_v34 = vrot.slane %v1757_v32, %v3901_v30  ;;  %v1173_v38 = vsel %vm1039_vm15, %v4097_v57, 0.0  ;;  %vm1068_vm9 = vcmp.ge.f32.partialorder %v3702_v5, %v4119_v54  ;;  %v1199_v1 = vsel %vm1065_vm3, %v4097_v57, 0.0 }
 0x303   :  { %v2132_v43 = vsel %vm1994_vm1, %v2131_v14, %v2127_v3  ;;  %v1758_v53 = vmul.f32 %v3857_v28, %v1629_v9  ;;  %1553 = vadd.xlane.f32.xlu0 %v4144_v0  ;;  %vm1070_vm10 = vcmp.ge.f32.partialorder %v3717_v59, %v4119_v54  ;;  %v1480_v60 = vsel %vm1212_vm7, %v1173_v38, 0.0  ;;  %v4931_v3 = vld [vmem:[#allocation33_spill] sm:$0xff] }
 0x304   :  { %1469 = vadd.xlane.f32.xlu1 %v3898_v62  ;;  %v4243_v45 = vpop.xlane.xlu0 %1313  ;;  %v2137_v58 = vsel %vm2001_vm2, %v2136_v34, %v2132_v43  ;;  %v1546_v62 = vsel %vm1212_vm7, %v4107_v27, 0.0  ;;  %v1558_v8 = vsel %vm1212_vm7, %v1199_v1, 0.0  ;;  %v1202_v48 = vsel %vm1068_vm9, %v4097_v57, 0.0  ;;  %v4933_v43 = vld [vmem:[#allocation34_spill] sm:$0xff] }
 0x305   :  { %v2141_v0 = vrot.slane %v1758_v53, %v3935_v26  ;;  %v4249_v55 = vpop.xlane.xlu1 %1316  ;;  %vm1071_vm15 = vcmp.ge.f32.partialorder %v3728_v63, %v4119_v54  ;;  %v1204_v7 = vsel %vm1070_vm10, %v4097_v57, 0.0  ;;  %vm1037_vm3 = vcmp.ge.f32.partialorder %v3459_v11, %v4119_v54 }
 0x306   :  { %v1567_v20 = vsel %vm1212_vm7, %v1202_v48, 0.0  ;;  %v1573_v51 = vsel %vm1212_vm7, %v1204_v7, 0.0  ;;  %v1205_v36 = vsel %vm1071_vm15, %v4097_v57, 0.0  ;;  %vm1040_vm9 = vcmp.ge.f32.partialorder %v3478_v6, %v4119_v54 }
 0x307   :  { %v2142_v12 = vsel %vm2008_vm4, %v2141_v0, %v2137_v58  ;;  %1547 = vadd.xlane.f32.xlu0 %v1546_v62  ;;  %v1171_v32 = vsel %vm1037_vm3, %v4097_v57, 0.0  ;;  %vm1042_vm10 = vcmp.ge.f32.partialorder %v4929_v23, %v4119_v54  ;;  %v1576_v14 = vsel %vm1212_vm7, %v1205_v36, 0.0 }
 0x308   :  { %v2612_v19 = vsel %vm4861_vm5, %v2142_v12, %v2610_v39  ;;  %1556 = vadd.xlane.f32.xlu1 %v1555_v47  ;;  %v4266_v27 = vpop.xlane.xlu0 %1319  ;;  %vm1043_vm5 = vcmp.ge.f32.partialorder %v4931_v3, %v4119_v54  ;;  %v1474_v6 = vsel %vm1212_vm7, %v1171_v32, 0.0  ;;  %v1174_v9 = vsel %vm1040_vm9, %v4097_v57, 0.0  ;;  %v4936_v12 = vld [vmem:[#allocation35_spill] sm:$0xff]  ;;  %v4937_v47 = vld [vmem:[#allocation9_spill] sm:$0xff] }
 0x309   :  { %2639 = vst.msk [vmem:[%s4847_s6] sm:$0xff] %vm4860_vm8, %v2612_v19  ;;  %v4278_v50 = vpop.xlane.xlu1 %1322  ;;  %vm1041_vm8 = vcmp.ge.f32.partialorder %v4930_v15, %v4119_v54  ;;  %vm1069_vm15 = vcmp.ge.f32.partialorder %v4932_v49, %v4119_v54  ;;  %v1176_v18 = vsel %vm1042_vm10, %v4097_v57, 0.0  ;;  %v1177_v52 = vsel %vm1043_vm5, %v4097_v57, 0.0  ;;  %v4940_v49 = vld [vmem:[#allocation10_spill] sm:$0xff] }
 0x30a   :  { %v1175_v37 = vsel %vm1041_vm8, %v4097_v57, 0.0  ;;  %vm1044_vm3 = vcmp.ge.f32.partialorder %v4933_v43, %v4119_v54  ;;  %v1483_v53 = vsel %vm1212_vm7, %v1174_v9, 0.0  ;;  %vm1072_vm9 = vcmp.ge.f32.partialorder %v4934_v41, %v4119_v54  ;;  %v4939_v9 = vld [vmem:[#allocation13_spill] sm:$0xff] }
 0x30b   :  { %1562 = vadd.xlane.f32.xlu0 %v1561_v22  ;;  %v1489_v40 = vsel %vm1212_vm7, %v1176_v18, 0.0  ;;  %v1203_v0 = vsel %vm1069_vm15, %v4097_v57, 0.0  ;;  %vm1074_vm5 = vcmp.ge.f32.partialorder %v4935_v35, %v4119_v54  ;;  %v1492_v62 = vsel %vm1212_vm7, %v1177_v52, 0.0  ;;  %v4938_v22 = vld [vmem:[#allocation11_spill] sm:$0xff] }
 0x30c   :  { %1565 = vadd.xlane.f32.xlu1 %v1564_v17  ;;  %v1326_v4 = vpop.xlane.xlu0 %1325  ;;  %v1486_v39 = vsel %vm1212_vm7, %v1175_v37, 0.0  ;;  %vm1045_vm8 = vcmp.ge.f32.partialorder %v4936_v12, %v4119_v54  ;;  %vm1073_vm10 = vcmp.ge.f32.partialorder %v4937_v47, %v4119_v54  ;;  %v1634_v2 = vadd.f32 %v3889_v44, %v4278_v50 }
 0x30d   :  { %v4288_v33 = vpop.xlane.xlu1 %1328  ;;  %v1635_v61 = vadd.f32 %v3889_v44, %v1326_v4  ;;  %v1178_v16 = vsel %vm1044_vm3, %v4097_v57, 0.0  ;;  %vm1075_vm15 = vcmp.ge.f32.partialorder %v4938_v22, %v4119_v54  ;;  %v1631_v17 = vadd.f32 %v3889_v44, %v4243_v45 }
 0x30e   :  { %v1570_v21 = vsel %vm1212_vm7, %v1203_v0, 0.0  ;;  %v1206_v50 = vsel %vm1072_vm9, %v4097_v57, 0.0  ;;  %v1630_v4 = vadd.f32 %v3889_v44, %v4226_v42  ;;  %v1208_v45 = vsel %vm1074_vm5, %v4097_v57, 0.0 }
 0x30f   :  { %1472 = vadd.xlane.f32.xlu0 %v1471_v46  ;;  %v1764_v25 = vmul.f32 %v3857_v28, %v1635_v61  ;;  %v1636_v46 = vadd.f32 %v3889_v44, %v4288_v33  ;;  %v1207_v42 = vsel %vm1073_vm10, %v4097_v57, 0.0  ;;  %v4397_v33 = vsel %vm1045_vm8, %v4097_v57, 0.0 }
 0x310   :  { %1478 = vadd.xlane.f32.xlu1 %v1477_v10  ;;  %v4295_v13 = vpop.xlane.xlu0 %1331  ;;  %v1579_v48 = vsel %vm1212_vm7, %v1206_v50, 0.0  ;;  %v1760_v7 = vmul.f32 %v3857_v28, %v1631_v17  ;;  %v1759_v36 = vmul.f32 %v3857_v28, %v1630_v4  ;;  %vm1077_vm3 = vcmp.ge.f32.partialorder %v4939_v9, %v4119_v54 }
 0x311   :  { %v4300_v24 = vpop.xlane.xlu1 %1334  ;;  %v1637_v10 = vadd.f32 %v3889_v44, %v4295_v13  ;;  %v1763_v13 = vmul.f32 %v3857_v28, %v1634_v2  ;;  %v2169_v32 = vrot.slane %v1764_v25, %v3932_v29  ;;  %v1765_v23 = vmul.f32 %v3857_v28, %v1636_v46 }
 0x312   :  { %vm1076_vm9 = vcmp.ge.f32.partialorder %v4940_v49, %v4119_v54  ;;  %v2150_v37 = vrot.slane %v1760_v7, %v3932_v29  ;;  %v2146_v41 = vrot.slane %v1759_v36, %v3892_v31  ;;  %v1582_v50 = vsel %vm1212_vm7, %v1207_v42, 0.0 }
 0x313   :  { %1481 = vadd.xlane.f32.xlu0 %v1480_v60  ;;  %v1632_v60 = vadd.f32 %v3889_v44, %v4249_v55  ;;  %v1585_v55 = vsel %vm1212_vm7, %v1208_v45, 0.0  ;;  %v1766_v3 = vmul.f32 %v3857_v28, %v1637_v10  ;;  %v2165_v18 = vrot.slane %v1763_v13, %v3892_v31 }
 0x314   :  { %1559 = vadd.xlane.f32.xlu1 %v1558_v8  ;;  %v1338_v5 = vpop.xlane.xlu0 %1337  ;;  %v2151_v4 = vsel %vm1994_vm1, %v2150_v37, %v2146_v41  ;;  %vm4942_vm5 = vcmask 261120  }
 0x315   :  { %v4310_v59 = vpop.xlane.xlu1 %1340  ;;  %v1639_v38 = vadd.f32 %v3889_v44, %v1338_v5  ;;  %v1209_v5 = vsel %vm1075_vm15, %v4097_v57, 0.0  ;;  %v2170_v61 = vsel %vm1994_vm1, %v2169_v32, %v2165_v18  ;;  %v2179_v35 = vrot.slane %v1766_v3, %v3935_v26 }
 0x316   :  { %v1640_v15 = vadd.f32 %v3889_v44, %v4310_v59  ;;  %v1761_v59 = vmul.f32 %v3857_v28, %v1632_v60 }
 0x317   :  { %1568 = vadd.xlane.f32.xlu0 %v1567_v20  ;;  %v1633_v20 = vadd.f32 %v3889_v44, %v4266_v27 }
 0x318   :  { %1574 = vadd.xlane.f32.xlu1 %v1573_v51  ;;  %v4317_v63 = vpop.xlane.xlu0 %1343  ;;  %v1638_v51 = vadd.f32 %v3889_v44, %v4300_v24  ;;  %v1769_v0 = vmul.f32 %v3857_v28, %v1640_v15  ;;  %v2155_v2 = vrot.slane %v1761_v59, %v3901_v30 }
 0x319   :  { %v4322_v11 = vpop.xlane.xlu1 %1346  ;;  %v1641_v27 = vadd.f32 %v3889_v44, %v4317_v63  ;;  %v1762_v63 = vmul.f32 %v3857_v28, %v1633_v20 }
 0x31a   :  { %v1767_v43 = vmul.f32 %v3857_v28, %v1638_v51  ;;  %v1642_v47 = vadd.f32 %v3889_v44, %v4322_v11  ;;  %v2193_v45 = vrot.slane %v1769_v0, %v3901_v30 }
 0x31b   :  { %1577 = vadd.xlane.f32.xlu0 %v1576_v14  ;;  %v1768_v14 = vmul.f32 %v3857_v28, %v1639_v38  ;;  %v1770_v12 = vmul.f32 %v3857_v28, %v1641_v27  ;;  %v2160_v25 = vrot.slane %v1762_v63, %v3935_v26 }
 0x31c   :  { %1475 = vadd.xlane.f32.xlu1 %v1474_v6  ;;  %v4333_v56 = vpop.xlane.xlu0 %1349  ;;  %v1588_v6 = vsel %vm1212_vm7, %v1209_v5, 0.0  ;;  %v2184_v46 = vrot.slane %v1767_v43, %v3892_v31  ;;  %v1771_v60 = vmul.f32 %v3857_v28, %v1642_v47 }
 0x31d   :  { %v4336_v34 = vpop.xlane.xlu1 %1352  ;;  %v2198_v42 = vrot.slane %v1770_v12, %v3935_v26 }
 0x31e   :  { %v1644_v22 = vadd.f32 %v3889_v44, %v4336_v34  ;;  %v1210_v34 = vsel %vm1076_vm9, %v4097_v57, 0.0  ;;  %v2203_v3 = vrot.slane %v1771_v60, %v3892_v31 }
 0x31f   :  { %1484 = vadd.xlane.f32.xlu0 %v1483_v53  ;;  %v1643_v53 = vadd.f32 %v3889_v44, %v4333_v56 }
 0x320   :  { %1490 = vadd.xlane.f32.xlu1 %v1489_v40  ;;  %v4350_v58 = vpop.xlane.xlu0 %1355  ;;  %v2174_v40 = vrot.slane %v1765_v23, %v3901_v30  ;;  %v1773_v5 = vmul.f32 %v3857_v28, %v1644_v22 }
 0x321   :  { %v4360_v19 = vpop.xlane.xlu1 %1358  ;;  %v1772_v11 = vmul.f32 %v3857_v28, %v1643_v53 }
 0x322   :  { %v1646_v15 = vadd.f32 %v3889_v44, %v4360_v19  ;;  %v2212_v9 = vrot.slane %v1773_v5, %v3901_v30 }
 0x323   :  { %1493 = vadd.xlane.f32.xlu0 %v1492_v62  ;;  %v2188_v62 = vrot.slane %v1768_v14, %v3932_v29  ;;  %v2207_v51 = vrot.slane %v1772_v11, %v3932_v29  ;;  %v1645_v14 = vadd.f32 %v3889_v44, %v4350_v58 }
 0x324   :  { %1571 = vadd.xlane.f32.xlu1 %v1570_v21  ;;  %v4387_v1 = vpop.xlane.xlu0 %1361  ;;  %v1495_v21 = vsel %vm1212_vm7, %v1178_v16, 0.0  ;;  %v1211_v16 = vsel %vm1077_vm3, %v4097_v57, 0.0  ;;  %v1498_v57 = vsel %vm1212_vm7, %v4397_v33, 0.0  ;;  %v1775_v43 = vmul.f32 %v3857_v28, %v1646_v15 }
 0x325   :  { %v4402_v8 = vpop.xlane.xlu1 %1364  ;;  %v2189_v38 = vsel %vm1994_vm1, %v2188_v62, %v2184_v46  ;;  %v1647_v7 = vadd.f32 %v3889_v44, %v4387_v1  ;;  %v1594_v36 = vsel %vm1212_vm7, %v1211_v16, 0.0  ;;  %v2208_v37 = vsel %vm1994_vm1, %v2207_v51, %v2203_v3 }
 0x326   :  { %v2194_v23 = vsel %vm2001_vm2, %v2193_v45, %v2189_v38  ;;  %v1648_v27 = vadd.f32 %v3889_v44, %v4402_v8  ;;  %v2213_v62 = vsel %vm2001_vm2, %v2212_v9, %v2208_v37 }
 0x327   :  { %1580 = vadd.xlane.f32.xlu0 %v1579_v48  ;;  %v2156_v48 = vsel %vm2001_vm2, %v2155_v2, %v2151_v4  ;;  %v2199_v33 = vsel %vm2008_vm4, %v2198_v42, %v2194_v23  ;;  %v1776_v49 = vmul.f32 %v3857_v28, %v1647_v7  ;;  %v2222_v4 = vrot.slane %v1775_v43, %v3892_v31 }
 0x328   :  { %1586 = vadd.xlane.f32.xlu1 %v1585_v55  ;;  %v4424_v24 = vpop.xlane.xlu0 %1367  ;;  %v2161_v54 = vsel %vm2008_vm4, %v2160_v25, %v2156_v48  ;;  %v1591_v55 = vsel %vm1212_vm7, %v1210_v34, 0.0  ;;  %v1777_v0 = vmul.f32 %v3857_v28, %v1648_v27  ;;  %vm4941_vm7 = vcmask 1047559  }
 0x329   :  { %v1371_v52 = vpop.xlane.xlu1 %1370  ;;  %v1649_v63 = vadd.f32 %v3889_v44, %v4424_v24  ;;  %v2226_v12 = vrot.slane %v1776_v49, %v3932_v29 }
 0x32a   :  { %v1650_v19 = vadd.f32 %v3889_v44, %v1371_v52  ;;  %v2231_v45 = vrot.slane %v1777_v0, %v3901_v30 }
 0x32b   :  { %1589 = vadd.xlane.f32.xlu0 %v1588_v6  ;;  %v1778_v22 = vmul.f32 %v3857_v28, %v1649_v63  ;;  %v2227_v38 = vsel %vm1994_vm1, %v2226_v12, %v2222_v4 }
 0x32c   :  { %1487 = vadd.xlane.f32.xlu1 %v1486_v39  ;;  %v1374_v56 = vpop.xlane.xlu0 %1373  ;;  %v2175_v39 = vsel %vm2001_vm2, %v2174_v40, %v2170_v61  ;;  %v1774_v40 = vmul.f32 %v3857_v28, %v1645_v14  ;;  %v1779_v47 = vmul.f32 %v3857_v28, %v1650_v19  ;;  %v2232_v3 = vsel %vm2001_vm2, %v2231_v45, %v2227_v38 }
 0x32d   :  { %v1377_v17 = vpop.xlane.xlu1 %1376  ;;  %v2180_v10 = vsel %vm2008_vm4, %v2179_v35, %v2175_v39  ;;  %v1651_v1 = vadd.f32 %v3889_v44, %v1374_v56  ;;  %v2236_v5 = vrot.slane %v1778_v22, %v3935_v26 }
 0x32e   :  { %v2613_v32 = vsel %vm2599_vm6, %v2180_v10, %v2161_v54  ;;  %v1652_v58 = vadd.f32 %v3889_v44, %v1377_v17  ;;  %v2217_v39 = vrot.slane %v1774_v40, %v3935_v26  ;;  %v2241_v42 = vrot.slane %v1779_v47, %v3892_v31 }
 0x32f   :  { %1496 = vadd.xlane.f32.xlu0 %v1495_v21  ;;  %v1780_v53 = vmul.f32 %v3857_v28, %v1651_v1  ;;  %v2614_v61 = vsel %vm2601_vm11, %v2199_v33, %v2613_v32  ;;  %v2237_v49 = vsel %vm2008_vm4, %v2236_v5, %v2232_v3 }
 0x330   :  { %1583 = vadd.xlane.f32.xlu1 %v1582_v50  ;;  %v1380_v13 = vpop.xlane.xlu0 %1379  ;;  %v1781_v17 = vmul.f32 %v3857_v28, %v1652_v58  ;;  %v2218_v32 = vsel %vm2008_vm4, %v2217_v39, %v2213_v62 }
 0x331   :  { %v1383_v20 = vpop.xlane.xlu1 %1382  ;;  %v1653_v41 = vadd.f32 %v3889_v44, %v1380_v13  ;;  %v2245_v25 = vrot.slane %v1780_v53, %v3932_v29  ;;  %v2615_v43 = vsel %vm2603_vm12, %v2218_v32, %v2614_v61 }
 0x332   :  { %v1654_v8 = vadd.f32 %v3889_v44, %v1383_v20  ;;  %v2250_v7 = vrot.slane %v1781_v17, %v3901_v30 }
 0x333   :  { %1592 = vadd.xlane.f32.xlu0 %v1591_v55  ;;  %v1782_v46 = vmul.f32 %v3857_v28, %v1653_v41  ;;  %v2246_v54 = vsel %vm1994_vm1, %v2245_v25, %v2241_v42 }
 0x334   :  { %1499 = vadd.xlane.f32.xlu1 %v1498_v57  ;;  %v1386_v6 = vpop.xlane.xlu0 %1385  ;;  %v1783_v21 = vmul.f32 %v3857_v28, %v1654_v8  ;;  %v2251_v19 = vsel %vm2001_vm2, %v2250_v7, %v2246_v54 }
 0x335   :  { %v1655_v59 = vadd.f32 %v3889_v44, %v1386_v6  ;;  %v1389_v18 = vpop.xlane.xlu1 %1388  ;;  %v2255_v51 = vrot.slane %v1782_v46, %v3935_v26 }
 0x336   :  { %v1656_v52 = vadd.f32 %v3889_v44, %v1389_v18  ;;  %v2260_v20 = vrot.slane %v1783_v21, %v3892_v31 }
 0x337   :  { %1595 = vadd.xlane.f32.xlu0 %v1594_v36  ;;  %v1784_v24 = vmul.f32 %v3857_v28, %v1655_v59  ;;  %v2256_v37 = vsel %vm2008_vm4, %v2255_v51, %v2251_v19 }
 0x338   :  { %v1392_v35 = vpop.xlane.xlu0 %1391  ;;  %v1785_v11 = vmul.f32 %v3857_v28, %v1656_v52  ;;  %v2616_v52 = vsel %vm2605_vm13, %v2237_v49, %v2615_v43 }
 0x339   :  { %v1657_v56 = vadd.f32 %v3889_v44, %v1392_v35  ;;  %v1395_v2 = vpop.xlane.xlu1 %1394  ;;  %v2264_v34 = vrot.slane %v1784_v24, %v3932_v29  ;;  %v2617_v62 = vsel %vm2607_vm14, %v2256_v37, %v2616_v52 }
 0x33a   :  { %v1658_v50 = vadd.f32 %v3889_v44, %v1395_v2  ;;  %v2269_v55 = vrot.slane %v1785_v11, %v3901_v30 }
 0x33b   :  { %v1786_v16 = vmul.f32 %v3857_v28, %v1657_v56  ;;  %v2265_v23 = vsel %vm1994_vm1, %v2264_v34, %v2260_v20 }
 0x33c   :  { %v1398_v10 = vpop.xlane.xlu0 %1397  ;;  %v1787_v60 = vmul.f32 %v3857_v28, %v1658_v50  ;;  %v2270_v63 = vsel %vm2001_vm2, %v2269_v55, %v2265_v23 }
 0x33d   :  { %v1659_v13 = vadd.f32 %v3889_v44, %v1398_v10  ;;  %v1401_v48 = vpop.xlane.xlu1 %1400  ;;  %v2274_v15 = vrot.slane %v1786_v16, %v3935_v26 }
 0x33e   :  { %v1660_v57 = vadd.f32 %v3889_v44, %v1401_v48  ;;  %v2279_v14 = vrot.slane %v1787_v60, %v3892_v31 }
 0x33f   :  { %v1788_v36 = vmul.f32 %v3857_v28, %v1659_v13  ;;  %v2275_v53 = vsel %vm2008_vm4, %v2274_v15, %v2270_v63 }
 0x340   :  { %v1789_v1 = vmul.f32 %v3857_v28, %v1660_v57  ;;  %v1404_v33 = vpop.xlane.xlu0 %1403  ;;  %v2618_v61 = vsel %vm2609_vm0, %v2275_v53, %v2617_v62 }
 0x341   :  { %v2283_v27 = vrot.slane %v1788_v36, %v3932_v29  ;;  %v1661_v6 = vadd.f32 %v3889_v44, %v1404_v33  ;;  %v1407_v9 = vpop.xlane.xlu1 %1406 }
 0x342   :  { %v2288_v59 = vrot.slane %v1789_v1, %v3901_v30  ;;  %v1662_v18 = vadd.f32 %v3889_v44, %v1407_v9 }
 0x343   :  { %v2284_v58 = vsel %vm1994_vm1, %v2283_v27, %v2279_v14  ;;  %v1790_v8 = vmul.f32 %v3857_v28, %v1661_v6 }
 0x344   :  { %v1410_v41 = vpop.xlane.xlu0 %1409  ;;  %v1791_v0 = vmul.f32 %v3857_v28, %v1662_v18  ;;  %v2289_v12 = vsel %vm2001_vm2, %v2288_v59, %v2284_v58 }
 0x345   :  { %v2293_v40 = vrot.slane %v1790_v8, %v3935_v26  ;;  %v1663_v24 = vadd.f32 %v3889_v44, %v1410_v41  ;;  %v1413_v35 = vpop.xlane.xlu1 %1412 }
 0x346   :  { %v1664_v47 = vadd.f32 %v3889_v44, %v1413_v35  ;;  %v2298_v50 = vrot.slane %v1791_v0, %v3892_v31 }
 0x347   :  { %v2294_v56 = vsel %vm2008_vm4, %v2293_v40, %v2289_v12  ;;  %v1792_v2 = vmul.f32 %v3857_v28, %v1663_v24 }
 0x348   :  { %v2619_v22 = vsel %vm4941_vm7, %v2294_v56, %v2618_v61  ;;  %v1793_v17 = vmul.f32 %v3857_v28, %v1664_v47  ;;  %v1416_v21 = vpop.xlane.xlu0 %1415 }
 0x349   :  { %2640 = vst.msk [vmem:[%s4847_s6 + $0x8] sm:$0xff] %vm4942_vm5, %v2619_v22  ;;  %v2302_v4 = vrot.slane %v1792_v2, %v3932_v29  ;;  %v1665_v25 = vadd.f32 %v3889_v44, %v1416_v21  ;;  %v1419_v46 = vpop.xlane.xlu1 %1418 }
 0x34a   :  { %v2307_v11 = vrot.slane %v1793_v17, %v3901_v30  ;;  %v1666_v39 = vadd.f32 %v3889_v44, %v1419_v46 }
 0x34b   :  { %v2303_v45 = vsel %vm1994_vm1, %v2302_v4, %v2298_v50  ;;  %v1794_v34 = vmul.f32 %v3857_v28, %v1665_v25 }
 0x34c   :  { %v2308_v16 = vsel %vm2001_vm2, %v2307_v11, %v2303_v45  ;;  %v1422_v10 = vpop.xlane.xlu0 %1421  ;;  %v1795_v42 = vmul.f32 %v3857_v28, %v1666_v39 }
 0x34d   :  { %v2312_v38 = vrot.slane %v1794_v34, %v3935_v26  ;;  %v1667_v60 = vadd.f32 %v3889_v44, %v1422_v10  ;;  %v1425_v13 = vpop.xlane.xlu1 %1424 }
 0x34e   :  { %v1668_v48 = vadd.f32 %v3889_v44, %v1425_v13  ;;  %v2317_v54 = vrot.slane %v1795_v42, %v3892_v31 }
 0x34f   :  { %v2313_v5 = vsel %vm2008_vm4, %v2312_v38, %v2308_v16  ;;  %v1796_v7 = vmul.f32 %v3857_v28, %v1667_v60 }
 0x350   :  { %v1797_v20 = vmul.f32 %v3857_v28, %v1668_v48  ;;  %v1428_v57 = vpop.xlane.xlu0 %1427 }
 0x351   :  { %v2321_v51 = vrot.slane %v1796_v7, %v3932_v29  ;;  %v1669_v55 = vadd.f32 %v3889_v44, %v1428_v57  ;;  %v1431_v36 = vpop.xlane.xlu1 %1430 }
 0x352   :  { %v2326_v32 = vrot.slane %v1797_v20, %v3901_v30  ;;  %v1670_v23 = vadd.f32 %v3889_v44, %v1431_v36 }
 0x353   :  { %v2322_v15 = vsel %vm1994_vm1, %v2321_v51, %v2317_v54  ;;  %v1798_v1 = vmul.f32 %v3857_v28, %v1669_v55 }
 0x354   :  { %v2327_v33 = vsel %vm2001_vm2, %v2326_v32, %v2322_v15  ;;  %v1434_v3 = vpop.xlane.xlu0 %1433  ;;  %v1799_v27 = vmul.f32 %v3857_v28, %v1670_v23 }
 0x355   :  { %v2331_v14 = vrot.slane %v1798_v1, %v3935_v26  ;;  %v1671_v6 = vadd.f32 %v3889_v44, %v1434_v3  ;;  %v1437_v9 = vpop.xlane.xlu1 %1436 }
 0x356   :  { %v1672_v49 = vadd.f32 %v3889_v44, %v1437_v9  ;;  %v2336_v58 = vrot.slane %v1799_v27, %v3892_v31 }
 0x357   :  { %v2332_v19 = vsel %vm2008_vm4, %v2331_v14, %v2327_v33  ;;  %v1800_v59 = vmul.f32 %v3857_v28, %v1671_v6 }
 0x358   :  { %v2620_v18 = vsel %vm2599_vm6, %v2332_v19, %v2313_v5  ;;  %v1801_v37 = vmul.f32 %v3857_v28, %v1672_v49  ;;  %v1440_v63 = vpop.xlane.xlu0 %1439 }
 0x359   :  { %v2340_v8 = vrot.slane %v1800_v59, %v3932_v29  ;;  %v1673_v43 = vadd.f32 %v3889_v44, %v1440_v63  ;;  %v1443_v53 = vpop.xlane.xlu1 %1442 }
 0x35a   :  { %v2345_v41 = vrot.slane %v1801_v37, %v3901_v30  ;;  %v1674_v52 = vadd.f32 %v3889_v44, %v1443_v53 }
 0x35b   :  { %v2341_v40 = vsel %vm1994_vm1, %v2340_v8, %v2336_v58  ;;  %v1802_v0 = vmul.f32 %v3857_v28, %v1673_v43 }
 0x35c   :  { %v2346_v24 = vsel %vm2001_vm2, %v2345_v41, %v2341_v40  ;;  %v1446_v35 = vpop.xlane.xlu0 %1445  ;;  %v1803_v12 = vmul.f32 %v3857_v28, %v1674_v52 }
 0x35d   :  { %v2350_v62 = vrot.slane %v1802_v0, %v3935_v26  ;;  %v1675_v47 = vadd.f32 %v3889_v44, %v1446_v35  ;;  %v1449_v61 = vpop.xlane.xlu1 %1448 }
 0x35e   :  { %v1676_v56 = vadd.f32 %v3889_v44, %v1449_v61  ;;  %v2355_v4 = vrot.slane %v1803_v12, %v3892_v31 }
 0x35f   :  { %v2351_v2 = vsel %vm2008_vm4, %v2350_v62, %v2346_v24  ;;  %v1804_v22 = vmul.f32 %v3857_v28, %v1675_v47 }
 0x360   :  { %v2621_v17 = vsel %vm2601_vm11, %v2351_v2, %v2620_v18  ;;  %v1805_v21 = vmul.f32 %v3857_v28, %v1676_v56  ;;  %v1452_v50 = vpop.xlane.xlu0 %1451 }
 0x361   :  { %v2359_v25 = vrot.slane %v1804_v22, %v3932_v29  ;;  %v1677_v46 = vadd.f32 %v3889_v44, %v1452_v50  ;;  %v1455_v11 = vpop.xlane.xlu1 %1454 }
 0x362   :  { %v2364_v39 = vrot.slane %v1805_v21, %v3901_v30  ;;  %v1678_v45 = vadd.f32 %v3889_v44, %v1455_v11 }
 0x363   :  { %v2360_v34 = vsel %vm1994_vm1, %v2359_v25, %v2355_v4  ;;  %v1806_v16 = vmul.f32 %v3857_v28, %v1677_v46 }
 0x364   :  { %v2365_v10 = vsel %vm2001_vm2, %v2364_v39, %v2360_v34  ;;  %v1458_v38 = vpop.xlane.xlu0 %1457  ;;  %v1807_v60 = vmul.f32 %v3857_v28, %v1678_v45 }
 0x365   :  { %v2369_v42 = vrot.slane %v1806_v16, %v3935_v26  ;;  %v1679_v13 = vadd.f32 %v3889_v44, %v1458_v38  ;;  %v1461_v48 = vpop.xlane.xlu1 %1460 }
 0x366   :  { %v1680_v5 = vadd.f32 %v3889_v44, %v1461_v48  ;;  %v2374_v55 = vrot.slane %v1807_v60, %v3892_v31 }
 0x367   :  { %v2370_v7 = vsel %vm2008_vm4, %v2369_v42, %v2365_v10  ;;  %v1808_v20 = vmul.f32 %v3857_v28, %v1679_v13 }
 0x368   :  { %v2622_v57 = vsel %vm2603_vm12, %v2370_v7, %v2621_v17  ;;  %v1809_v54 = vmul.f32 %v3857_v28, %v1680_v5  ;;  %v1464_v51 = vpop.xlane.xlu0 %1463 }
 0x369   :  { %v2378_v36 = vrot.slane %v1808_v20, %v3932_v29  ;;  %v1681_v32 = vadd.f32 %v3889_v44, %v1464_v51  ;;  %v4636_v23 = vpop.xlane.xlu1 %1466 }
 0x36a   :  { %v2383_v15 = vrot.slane %v1809_v54, %v3901_v30 }
 0x36b   :  { %v2379_v1 = vsel %vm1994_vm1, %v2378_v36, %v2374_v55  ;;  %v1810_v33 = vmul.f32 %v3857_v28, %v1681_v32 }
 0x36c   :  { %v2384_v3 = vsel %vm2001_vm2, %v2383_v15, %v2379_v1  ;;  %v1503_v14 = vpop.xlane.xlu0 %1502 }
 0x36d   :  { %v2388_v27 = vrot.slane %v1810_v33, %v3935_v26  ;;  %v1694_v6 = vadd.f32 %v3889_v44, %v1503_v14  ;;  %v1506_v9 = vpop.xlane.xlu1 %1505 }
 0x36e   :  { %v1695_v49 = vadd.f32 %v3889_v44, %v1506_v9 }
 0x36f   :  { %v2389_v19 = vsel %vm2008_vm4, %v2388_v27, %v2384_v3  ;;  %v1823_v59 = vmul.f32 %v3857_v28, %v1694_v6 }
 0x370   :  { %v4648_v18 = vsel %vm2605_vm13, %v2389_v19, %v2622_v57  ;;  %v1824_v37 = vmul.f32 %v3857_v28, %v1695_v49  ;;  %v1515_v63 = vpop.xlane.xlu0 %1514 }
 0x371   :  { %v2450_v58 = vrot.slane %v1823_v59, %v3892_v31  ;;  %v1698_v8 = vadd.f32 %v3889_v44, %v1515_v63  ;;  %v1518_v43 = vpop.xlane.xlu1 %1517 }
 0x372   :  { %v2454_v53 = vrot.slane %v1824_v37, %v3932_v29  ;;  %v1699_v41 = vadd.f32 %v3889_v44, %v1518_v43 }
 0x373   :  { %v1827_v52 = vmul.f32 %v3857_v28, %v1698_v8 }
 0x374   :  { %v2455_v40 = vsel %vm1994_vm1, %v2454_v53, %v2450_v58  ;;  %v1828_v0 = vmul.f32 %v3857_v28, %v1699_v41  ;;  %v1509_v24 = vpop.xlane.xlu0 %1508 }
 0x375   :  { %v2469_v35 = vrot.slane %v1827_v52, %v3892_v31  ;;  %v1696_v62 = vadd.f32 %v3889_v44, %v1509_v24  ;;  %v1521_v12 = vpop.xlane.xlu1 %1520 }
 0x376   :  { %v2473_v47 = vrot.slane %v1828_v0, %v3932_v29  ;;  %v1700_v61 = vadd.f32 %v3889_v44, %v1521_v12 }
 0x377   :  { %v1825_v56 = vmul.f32 %v3857_v28, %v1696_v62 }
 0x378   :  { %v2474_v2 = vsel %vm1994_vm1, %v2473_v47, %v2469_v35  ;;  %v1829_v22 = vmul.f32 %v3857_v28, %v1700_v61  ;;  %v1527_v17 = vpop.xlane.xlu0 %1526  ;;  %v1682_v47 = vadd.f32 %v3889_v44, %v4636_v23 }
 0x379   :  { %v2459_v21 = vrot.slane %v1825_v56, %v3901_v30  ;;  %v1702_v50 = vadd.f32 %v3889_v44, %v1527_v17  ;;  %v1530_v4 = vpop.xlane.xlu1 %1529 }
 0x37a   :  { %v2478_v25 = vrot.slane %v1829_v22, %v3901_v30  ;;  %v1703_v46 = vadd.f32 %v3889_v44, %v1530_v4  ;;  %v1811_v17 = vmul.f32 %v3857_v28, %v1682_v47 }
 0x37b   :  { %v2460_v11 = vsel %vm2001_vm2, %v2459_v21, %v2455_v40  ;;  %v1831_v39 = vmul.f32 %v3857_v28, %v1702_v50 }
 0x37c   :  { %v2479_v45 = vsel %vm2001_vm2, %v2478_v25, %v2474_v2  ;;  %v1832_v34 = vmul.f32 %v3857_v28, %v1703_v46  ;;  %v1512_v16 = vpop.xlane.xlu0 %1511  ;;  %v2393_v23 = vrot.slane %v1811_v17, %v3892_v31 }
 0x37d   :  { %v2488_v10 = vrot.slane %v1831_v39, %v3892_v31  ;;  %v1697_v38 = vadd.f32 %v3889_v44, %v1512_v16  ;;  %v1524_v42 = vpop.xlane.xlu1 %1523 }
 0x37e   :  { %v2492_v60 = vrot.slane %v1832_v34, %v3932_v29  ;;  %v1701_v13 = vadd.f32 %v3889_v44, %v1524_v42 }
 0x37f   :  { %v1826_v48 = vmul.f32 %v3857_v28, %v1697_v38 }
 0x380   :  { %v2493_v5 = vsel %vm1994_vm1, %v2492_v60, %v2488_v10  ;;  %v1830_v7 = vmul.f32 %v3857_v28, %v1701_v13  ;;  %v1533_v20 = vpop.xlane.xlu0 %1532 }
 0x381   :  { %v2464_v57 = vrot.slane %v1826_v48, %v3935_v26  ;;  %v1704_v54 = vadd.f32 %v3889_v44, %v1533_v20  ;;  %v1539_v51 = vpop.xlane.xlu1 %1538 }
 0x382   :  { %v2483_v55 = vrot.slane %v1830_v7, %v3935_v26  ;;  %v1706_v39 = vadd.f32 %v3889_v44, %v1539_v51 }
 0x383   :  { %v2465_v36 = vsel %vm2008_vm4, %v2464_v57, %v2460_v11  ;;  %v1833_v32 = vmul.f32 %v3857_v28, %v1704_v54 }
 0x384   :  { %v2484_v15 = vsel %vm2008_vm4, %v2483_v55, %v2479_v45  ;;  %v1542_v1 = vpop.xlane.xlu0 %1541  ;;  %v1835_v51 = vmul.f32 %v3857_v28, %v1706_v39 }
 0x385   :  { %v2627_v33 = vsel %vm2599_vm6, %v2484_v15, %v2465_v36  ;;  %v1536_v3 = vpop.xlane.xlu1 %1535  ;;  %v2497_v27 = vrot.slane %v1833_v32, %v3901_v30  ;;  %v1707_v4 = vadd.f32 %v3889_v44, %v1542_v1  ;;  %vm4943_vm6 = vmmov %vm4941_vm7 }
 0x386   :  { %v1705_v14 = vadd.f32 %v3889_v44, %v1536_v3 }
 0x387   :  { %v2498_v59 = vsel %vm2001_vm2, %v2497_v27, %v2493_v5  ;;  %v1836_v60 = vmul.f32 %v3857_v28, %v1707_v4 }
 0x388   :  { %v1834_v6 = vmul.f32 %v3857_v28, %v1705_v14  ;;  %v1545_v9 = vpop.xlane.xlu0 %1544 }
 0x389   :  { %v1551_v49 = vpop.xlane.xlu1 %1550  ;;  %v1708_v45 = vadd.f32 %v3889_v44, %v1545_v9 }
 0x38a   :  { %v2502_v19 = vrot.slane %v1834_v6, %v3935_v26  ;;  %v1710_v13 = vadd.f32 %v3889_v44, %v1551_v49  ;;  %v2511_v6 = vrot.slane %v1836_v60, %v3932_v29 }
 0x38b   :  { %v1837_v55 = vmul.f32 %v3857_v28, %v1708_v45 }
 0x38c   :  { %v2503_v37 = vsel %vm2008_vm4, %v2502_v19, %v2498_v59  ;;  %v1554_v63 = vpop.xlane.xlu0 %1553  ;;  %v1839_v9 = vmul.f32 %v3857_v28, %v1710_v13 }
 0x38d   :  { %v4694_v58 = vsel %vm2601_vm11, %v2503_v37, %v2627_v33  ;;  %v1470_v8 = vpop.xlane.xlu1 %1469  ;;  %v1711_v10 = vadd.f32 %v3889_v44, %v1554_v63  ;;  %v2507_v63 = vrot.slane %v1835_v51, %v3892_v31  ;;  %vm4944_vm11 = vmmov %vm4942_vm5 }
 0x38e   :  { %v1683_v62 = vadd.f32 %v3889_v44, %v1470_v8  ;;  %v2516_v8 = vrot.slane %v1837_v55, %v3901_v30 }
 0x38f   :  { %v1840_v1 = vmul.f32 %v3857_v28, %v1711_v10 }
 0x390   :  { %v1548_v43 = vpop.xlane.xlu0 %1547  ;;  %v1812_v2 = vmul.f32 %v3857_v28, %v1683_v62 }
 0x391   :  { %v1557_v53 = vpop.xlane.xlu1 %1556  ;;  %v1709_v38 = vadd.f32 %v3889_v44, %v1548_v43 }
 0x392   :  { %v2397_v25 = vrot.slane %v1812_v2, %v3932_v29  ;;  %v1712_v7 = vadd.f32 %v3889_v44, %v1557_v53  ;;  %v2530_v53 = vrot.slane %v1840_v1, %v3932_v29 }
 0x393   :  { %v1838_v33 = vmul.f32 %v3857_v28, %v1709_v38 }
 0x394   :  { %v1563_v41 = vpop.xlane.xlu0 %1562  ;;  %v2398_v48 = vsel %vm1994_vm1, %v2397_v25, %v2393_v23  ;;  %v1841_v49 = vmul.f32 %v3857_v28, %v1712_v7 }
 0x395   :  { %v1566_v52 = vpop.xlane.xlu1 %1565  ;;  %v1714_v20 = vadd.f32 %v3889_v44, %v1563_v41  ;;  %v2521_v41 = vrot.slane %v1838_v33, %v3935_v26 }
 0x396   :  { %v1715_v57 = vadd.f32 %v3889_v44, %v1566_v52  ;;  %v2535_v62 = vrot.slane %v1841_v49, %v3901_v30 }
 0x397   :  { %v1843_v19 = vmul.f32 %v3857_v28, %v1714_v20 }
 0x398   :  { %v1473_v40 = vpop.xlane.xlu0 %1472  ;;  %v1844_v59 = vmul.f32 %v3857_v28, %v1715_v57 }
 0x399   :  { %v1479_v0 = vpop.xlane.xlu1 %1478  ;;  %v1684_v12 = vadd.f32 %v3889_v44, %v1473_v40 }
 0x39a   :  { %v1686_v3 = vadd.f32 %v3889_v44, %v1479_v0  ;;  %v2512_v0 = vsel %vm1994_vm1, %v2511_v6, %v2507_v63  ;;  %v2549_v47 = vrot.slane %v1844_v59, %v3932_v29 }
 0x39b   :  { %v1813_v22 = vmul.f32 %v3857_v28, %v1684_v12  ;;  %v2545_v12 = vrot.slane %v1843_v19, %v3892_v31 }
 0x39c   :  { %v1482_v24 = vpop.xlane.xlu0 %1481  ;;  %v1815_v52 = vmul.f32 %v3857_v28, %v1686_v3 }
 0x39d   :  { %v1560_v35 = vpop.xlane.xlu1 %1559  ;;  %v2402_v11 = vrot.slane %v1813_v22, %v3901_v30  ;;  %v1687_v36 = vadd.f32 %v3889_v44, %v1482_v24  ;;  %v2526_v24 = vrot.slane %v1839_v9, %v3892_v31  ;;  %v2517_v22 = vsel %vm2001_vm2, %v2516_v8, %v2512_v0 }
 0x39e   :  { %v1713_v37 = vadd.f32 %v3889_v44, %v1560_v35  ;;  %v2550_v38 = vsel %vm1994_vm1, %v2549_v47, %v2545_v12 }
 0x39f   :  { %v2403_v54 = vsel %vm2001_vm2, %v2402_v11, %v2398_v48  ;;  %v2412_v11 = vrot.slane %v1815_v52, %v3892_v31 }
 0x3a0   :  { %v1569_v61 = vpop.xlane.xlu0 %1568  ;;  %v1842_v2 = vmul.f32 %v3857_v28, %v1713_v37 }
 0x3a1   :  { %v1575_v56 = vpop.xlane.xlu1 %1574  ;;  %v1716_v35 = vadd.f32 %v3889_v44, %v1569_v61  ;;  %v4757_v61 = vsel %vm2008_vm4, %v2521_v41, %v2517_v22 }
 0x3a2   :  { %v2540_v60 = vrot.slane %v1842_v2, %v3935_v26 }
 0x3a3   :  { %v1845_v45 = vmul.f32 %v3857_v28, %v1716_v35 }
 0x3a4   :  { %v1578_v21 = vpop.xlane.xlu0 %1577 }
 0x3a5   :  { %v1476_v50 = vpop.xlane.xlu1 %1475  ;;  %v1719_v23 = vadd.f32 %v3889_v44, %v1578_v21 }
 0x3a6   :  { %v1685_v46 = vadd.f32 %v3889_v44, %v1476_v50  ;;  %v1718_v50 = vadd.f32 %v3889_v44, %v1575_v56 }
 0x3a7   :  { %v1848_v57 = vmul.f32 %v3857_v28, %v1719_v23 }
 0x3a8   :  { %v1814_v34 = vmul.f32 %v3857_v28, %v1685_v46  ;;  %v1485_v16 = vpop.xlane.xlu0 %1484  ;;  %v2531_v46 = vsel %vm1994_vm1, %v2530_v53, %v2526_v24  ;;  %v1847_v21 = vmul.f32 %v3857_v28, %v1718_v50 }
 0x3a9   :  { %v1491_v42 = vpop.xlane.xlu1 %1490  ;;  %v1688_v4 = vadd.f32 %v3889_v44, %v1485_v16  ;;  %v2536_v16 = vsel %vm2001_vm2, %v2535_v62, %v2531_v46  ;;  %v2568_v63 = vrot.slane %v1848_v57, %v3932_v29 }
 0x3aa   :  { %v2407_v5 = vrot.slane %v1814_v34, %v3935_v26  ;;  %v1690_v7 = vadd.f32 %v3889_v44, %v1491_v42  ;;  %v2541_v42 = vsel %vm2008_vm4, %v2540_v60, %v2536_v16  ;;  %v2564_v9 = vrot.slane %v1847_v21, %v3892_v31 }
 0x3ac   :  { %v2408_v32 = vsel %vm2008_vm4, %v2407_v5, %v2403_v54  ;;  %v1494_v15 = vpop.xlane.xlu0 %1493  ;;  %v1817_v5 = vmul.f32 %v3857_v28, %v1688_v4  ;;  %v1819_v19 = vmul.f32 %v3857_v28, %v1690_v7  ;;  %v2569_v4 = vsel %vm1994_vm1, %v2568_v63, %v2564_v9 }
 0x3ad   :  { %v4730_v14 = vsel %vm2607_vm14, %v2408_v32, %v4648_v18  ;;  %v1572_v27 = vpop.xlane.xlu1 %1571  ;;  %v1816_v18 = vmul.f32 %v3857_v28, %v1687_v36  ;;  %v1691_v34 = vadd.f32 %v3889_v44, %v1494_v15  ;;  %v2554_v32 = vrot.slane %v1845_v45, %v3901_v30 }
 0x3ae   :  { %v1717_v10 = vadd.f32 %v3889_v44, %v1572_v27  ;;  %v2421_v49 = vrot.slane %v1817_v5, %v3901_v30  ;;  %v2431_v2 = vrot.slane %v1819_v19, %v3892_v31 }
 0x3af   :  { %v2416_v17 = vrot.slane %v1816_v18, %v3932_v29  ;;  %v1820_v15 = vmul.f32 %v3857_v28, %v1691_v34  ;;  %v2555_v41 = vsel %vm2001_vm2, %v2554_v32, %v2550_v38 }
 0x3b0   :  { %v1581_v43 = vpop.xlane.xlu0 %1580  ;;  %v1846_v1 = vmul.f32 %v3857_v28, %v1717_v10 }
 0x3b1   :  { %v1587_v40 = vpop.xlane.xlu1 %1586  ;;  %v1720_v13 = vadd.f32 %v3889_v44, %v1581_v43  ;;  %v2417_v48 = vsel %vm1994_vm1, %v2416_v17, %v2412_v11  ;;  %v2435_v52 = vrot.slane %v1820_v15, %v3932_v29 }
 0x3b2   :  { %v1722_v27 = vadd.f32 %v3889_v44, %v1587_v40  ;;  %v2559_v40 = vrot.slane %v1846_v1, %v3935_v26  ;;  %v2422_v47 = vsel %vm2001_vm2, %v2421_v49, %v2417_v48 }
 0x3b3   :  { %v1849_v3 = vmul.f32 %v3857_v28, %v1720_v13  ;;  %v2436_v23 = vsel %vm1994_vm1, %v2435_v52, %v2431_v2 }
 0x3b4   :  { %v1590_v25 = vpop.xlane.xlu0 %1589  ;;  %v1851_v35 = vmul.f32 %v3857_v28, %v1722_v27 }
 0x3b5   :  { %v1488_v39 = vpop.xlane.xlu1 %1487  ;;  %v1723_v54 = vadd.f32 %v3889_v44, %v1590_v25  ;;  %v2573_v24 = vrot.slane %v1849_v3, %v3901_v30 }
 0x3b6   :  { %v1689_v56 = vadd.f32 %v3889_v44, %v1488_v39  ;;  %v2560_v39 = vsel %vm2008_vm4, %v2559_v40, %v2555_v41 }
 0x3b7   :  { %v1852_v8 = vmul.f32 %v3857_v28, %v1723_v54  ;;  %v2574_v10 = vsel %vm2001_vm2, %v2573_v24, %v2569_v4 }
 0x3b8   :  { %v1497_v20 = vpop.xlane.xlu0 %1496  ;;  %v1818_v51 = vmul.f32 %v3857_v28, %v1689_v56  ;;  %v2583_v56 = vrot.slane %v1851_v35, %v3892_v31 }
 0x3b9   :  { %v1692_v55 = vadd.f32 %v3889_v44, %v1497_v20  ;;  %v1584_v36 = vpop.xlane.xlu1 %1583  ;;  %v2587_v25 = vrot.slane %v1852_v8, %v3932_v29 }
 0x3ba   :  { %v1721_v33 = vadd.f32 %v3889_v44, %v1584_v36  ;;  %v2426_v18 = vrot.slane %v1818_v51, %v3935_v26 }
 0x3bb   :  { %v1821_v6 = vmul.f32 %v3857_v28, %v1692_v55  ;;  %v2588_v48 = vsel %vm1994_vm1, %v2587_v25, %v2583_v56  ;;  %vm4946_vm1 = vmmov %vm4942_vm5 }
 0x3bc   :  { %v1850_v59 = vmul.f32 %v3857_v28, %v1721_v33  ;;  %v1593_v37 = vpop.xlane.xlu0 %1592  ;;  %v2427_v46 = vsel %vm2008_vm4, %v2426_v18, %v2422_v47 }
 0x3bd   :  { %v1724_v43 = vadd.f32 %v3889_v44, %v1593_v37  ;;  %v1500_v53 = vpop.xlane.xlu1 %1499  ;;  %v2440_v62 = vrot.slane %v1821_v6, %v3901_v30  ;;  %v2625_v38 = vsel %vm2609_vm0, %v2427_v46, %v4730_v14 }
 0x3be   :  { %v1693_v0 = vadd.f32 %v3889_v44, %v1500_v53  ;;  %v2578_v22 = vrot.slane %v1850_v59, %v3935_v26 }
 0x3bf   :  { %v1853_v12 = vmul.f32 %v3857_v28, %v1724_v43  ;;  %v2441_v16 = vsel %vm2001_vm2, %v2440_v62, %v2436_v23 }
 0x3c0   :  { %v1822_v17 = vmul.f32 %v3857_v28, %v1693_v0  ;;  %v1596_v50 = vpop.xlane.xlu0 %1595  ;;  %v2579_v60 = vsel %vm2008_vm4, %v2578_v22, %v2574_v10 }
 0x3c1   :  { %v1725_v11 = vadd.f32 %v3889_v44, %v1596_v50  ;;  %v2592_v45 = vrot.slane %v1853_v12, %v3901_v30  ;;  %v2629_v44 = vsel %vm2603_vm12, %v4757_v61, %v4694_v58  ;;  %vm4945_vm12 = vmmov %vm4943_vm6 }
 0x3c2   :  { %v2445_v34 = vrot.slane %v1822_v17, %v3935_v26  ;;  %v2630_v13 = vsel %vm2605_vm13, %v2541_v42, %v2629_v44 }
 0x3c3   :  { %v1854_v29 = vmul.f32 %v3857_v28, %v1725_v11  ;;  %v2631_v28 = vsel %vm2607_vm14, %v2560_v39, %v2630_v13  ;;  %v2593_v5 = vsel %vm2001_vm2, %v2592_v45, %v2588_v48 }
 0x3c4   :  { %v2446_v30 = vsel %vm2008_vm4, %v2445_v34, %v2441_v16  ;;  %v2632_v58 = vsel %vm2609_vm0, %v2579_v60, %v2631_v28 }
 0x3c5   :  { %v2626_v31 = vsel %vm4943_vm6, %v2446_v30, %v2625_v38  ;;  %v2597_v21 = vrot.slane %v1854_v29, %v3935_v26 }
 0x3c6   :  { %2641 = vst.msk [vmem:[%s4847_s6 + $0x10] sm:$0xff] %vm4944_vm11, %v2626_v31 }
 0x3c7   :  { %v2598_v14 = vsel %vm2008_vm4, %v2597_v21, %v2593_v5 }
 0x3c8   :  { %v2633_v61 = vsel %vm4945_vm12, %v2598_v14, %v2632_v58 }
 0x3c9   :  { %2642 = vst.msk [vmem:[%s4847_s6 + $0x18] sm:$0xff] %vm4946_vm1, %v2633_v61 }
 0x3ca   :  { %2647 = vsyncpa [#allocation3], 1 }

</bundles_post_ra>
